<compile_context>
chip_gen: v7x
topology: tpu7x:2x2x1
jax: 0.10.0
libtpu: 0.0.40
codegen_flags: <defaults>
</compile_context>

<pallas_src>
import math
from functools import partial

import jax
import jax.numpy as jnp
from jax.experimental import pallas as pl
from jax.experimental.pallas import tpu as pltpu

# ---------------- static problem configuration -----------------------------
KERNEL_SIZE = 25
PAD = KERNEL_SIZE // 2          # 12
C1, C2 = 16, 32                 # conv channel counts
POOL1_K = 3                     # first maxpool (stride 1)
POOL2_K, POOL2_S = 25, 4        # second maxpool
FC_IN, FC_OUT = 144, 128        # nn.Linear(144, 128)

# The hard-coded Linear(144, ...) forces the input length:
L_IN = (FC_IN - 1) * POOL2_S + POOL2_K + (POOL1_K - 1)   # = 599
L1 = L_IN                        # conv1 output length ("same" padding, odd k)
LP1 = L1 - (POOL1_K - 1)         # 597, after maxpool(3, 1)
L2 = LP1                         # 597, conv2 output length
W25 = L2 - POOL2_K + 1           # 573, number of stride-1 window-25 maxima

S_BLK = 640                      # per-batch-element lane stride (5*128 >= 623)
GL = 128                         # left guard width in the conv2 padded scratch


# ---------------- Pallas kernel ---------------------------------------------
def _cnn_block_kernel(x_ref, mask_ref, w1_ref, b1_ref, w2_ref, b2_ref,
                      fcw_ref, bfc_ref, o_ref,
                      xcols_ref, p1g_ref, pcols_ref, fcin_ref, *, bb):
    nout = bb * S_BLK                   # width of the flat activation slabs
    np_ = nout - 2                      # width after MaxPool1d(3, 1)
    wg = nout + 2 * GL                  # width of the guarded conv2 input

    x2d = x_ref[0]                      # (1, nout + 128) pre-padded flat input

    # --- Conv1d #1 (1 -> 16): im2col rows = 25 lane shifts of x, one matmul --
    for k in range(KERNEL_SIZE):
        xcols_ref[k:k + 1, :] = x2d[:, k:k + nout]
    h1 = jnp.dot(w1_ref[...], xcols_ref[...],
                 preferred_element_type=jnp.float32) + b1_ref[...]   # (16, nout)

    # --- MaxPool1d(k=3, s=1) -------------------------------------------------
    p1 = jnp.maximum(jnp.maximum(h1[:, 0:np_], h1[:, 1:np_ + 1]),
                     h1[:, 2:np_ + 2])                               # (16, np_)

    # zero the inter-batch junk columns so conv2 sees proper zero padding
    p1 = p1 * mask_ref[...]                                          # (1, np_) bcast

    # --- place p1 into a zero-guarded scratch (guards = conv2 zero padding) --
    p1g_ref[:, 0:GL] = jnp.zeros((C1, GL), jnp.float32)
    p1g_ref[:, GL + np_:wg] = jnp.zeros((C1, wg - GL - np_), jnp.float32)
    p1g_ref[:, GL:GL + np_] = p1

    # --- Conv1d #2 (16 -> 32): single im2col matmul, contraction K = 400 -----
    for k in range(KERNEL_SIZE):
        start = GL - PAD + k
        pcols_ref[k * C1:(k + 1) * C1, :] = p1g_ref[:, start:start + nout]
    h2 = jnp.dot(w2_ref[...], pcols_ref[...],
                 preferred_element_type=jnp.float32) + b2_ref[...]   # (32, nout)

    # --- MaxPool1d(k=25): log-tree sliding max (windows 2,4,8,16,25) ---------
    m = jnp.maximum(h2[:, :-1], h2[:, 1:])      # window 2
    m = jnp.maximum(m[:, :-2], m[:, 2:])        # window 4
    m = jnp.maximum(m[:, :-4], m[:, 4:])        # window 8
    m = jnp.maximum(m[:, :-8], m[:, 8:])        # window 16
    m = jnp.maximum(m[:, :-9], m[:, 9:])        # window 25, width nout - 24

    # --- Linear(144 -> 128): stride-4 one-hot subsample pre-folded into fcw --
    # Stack the per-element windows (lane-aligned slabs: 640 = 5*128) so the
    # whole block runs as one (bb*32, 573) @ (573, 128) matmul instead of bb
    # matmuls with M=32 (4x better MXU row utilization).
    for b in range(bb):
        fcin_ref[b * C2:(b + 1) * C2, :] = m[:, b * S_BLK:b * S_BLK + W25]
    fc = jnp.dot(fcin_ref[...], fcw_ref[...],
                 preferred_element_type=jnp.float32) + bfc_ref[...]  # (bb*32, 128)
    for b in range(bb):
        o_ref[b] = fc[b * C2:(b + 1) * C2, :]


# ---------------- wrapper ----------------------------------------------------
@partial(jax.jit, static_argnames=("block_b",))
def cnn_block_forward(x, w1, b1, w2, b2, wfc, bfc, *, block_b=4):
    B, L = x.shape
    assert L == L_IN, f"Linear(144,...) forces input length {L_IN}, got {L}"

    BB = min(block_b, B)                 # batch elements per grid step
    NB = -(-B // BB)                     # grid length
    Bp = NB * BB                         # padded batch
    nout = BB * S_BLK
    np_ = nout - 2
    wx = nout + 128                      # flat input width (right slack >= 24)
    wg = nout + 2 * GL                   # guarded conv2 input width

    # ---- flat input layout: batch b occupies lanes [b*640, b*640+623),
    #      with the conv1 zero padding (12 each side) baked in. ---------------
    xp = jnp.pad(x.astype(jnp.float32), ((0, Bp - B), (0, 0)))
    rows = jnp.zeros((Bp, S_BLK), jnp.float32).at[:, PAD:PAD + L_IN].set(xp)
    x_flat = rows.reshape(NB, BB * S_BLK)
    x_flat = jnp.pad(x_flat, ((0, 0), (0, wx - BB * S_BLK))).reshape(NB, 1, wx)

    # valid-column mask for the pooled conv1 output (zeros the per-block tails)
    col = jnp.arange(np_, dtype=jnp.int32)
    mask = ((col % S_BLK) < LP1).astype(jnp.float32)[None, :]

    # ---- parameter glue (plain JAX, done once under jit) --------------------
    w1_2d = w1.reshape(C1, KERNEL_SIZE).astype(jnp.float32)
    b1_c = b1.reshape(C1, 1).astype(jnp.float32)
    # im2col row order is (tap k major, in-channel i minor):
    w2_pk = jnp.transpose(w2, (0, 2, 1)).reshape(
        C2, KERNEL_SIZE * C1).astype(jnp.float32)
    b2_c = b2.reshape(C2, 1).astype(jnp.float32)
    # Fold the stride-4 one-hot selection into the FC weight (exact):
    # sel_wfc[4*j, :] = wfc[:, j], all other rows zero.
    sel_wfc = jnp.zeros((W25, FC_OUT), jnp.float32).at[
        POOL2_S * jnp.arange(FC_IN)].set(wfc.T.astype(jnp.float32))
    bfc_r = bfc.reshape(1, FC_OUT).astype(jnp.float32)

    kernel = partial(_cnn_block_kernel, bb=BB)

    out = pl.pallas_call(
        kernel,
        out_shape=jax.ShapeDtypeStruct((Bp, C2, FC_OUT), jnp.float32),
        grid_spec=pltpu.PrefetchScalarGridSpec(
            num_scalar_prefetch=0,
            grid=(NB,),
            in_specs=[
                pl.BlockSpec((1, 1, wx), lambda nb: (nb, 0, 0)),
                pl.BlockSpec((1, np_), lambda nb: (0, 0)),
                pl.BlockSpec((C1, KERNEL_SIZE), lambda nb: (0, 0)),
                pl.BlockSpec((C1, 1), lambda nb: (0, 0)),
                pl.BlockSpec((C2, KERNEL_SIZE * C1), lambda nb: (0, 0)),
                pl.BlockSpec((C2, 1), lambda nb: (0, 0)),
                pl.BlockSpec((W25, FC_OUT), lambda nb: (0, 0)),
                pl.BlockSpec((1, FC_OUT), lambda nb: (0, 0)),
            ],
            out_specs=pl.BlockSpec((BB, C2, FC_OUT), lambda nb: (nb, 0, 0)),
            scratch_shapes=[
                pltpu.VMEM((KERNEL_SIZE, nout), jnp.float32),       # conv1 im2col
                pltpu.VMEM((C1, wg), jnp.float32),                  # guarded p1
                pltpu.VMEM((KERNEL_SIZE * C1, nout), jnp.float32),  # conv2 im2col
                pltpu.VMEM((BB * C2, W25), jnp.float32),            # stacked FC in
            ],
        ),
        compiler_params=pltpu.CompilerParams(
            dimension_semantics=("parallel",)),
    )(x_flat, mask, w1_2d, b1_c, w2_pk, b2_c, sel_wfc, bfc_r)

    return out.reshape(Bp, C2 * FC_OUT)[:B]                 # nn.Flatten


# ---------------- pure-JAX reference (for correctness check) ----------------
def reference_forward(x, w1, b1, w2, b2, wfc, bfc):
    B = x.shape[0]
    h = x[:, None, :]                                       # (B,1,L)
    h = jax.lax.conv_general_dilated(
        h, w1, window_strides=(1,), padding=[(PAD, PAD)],
        dimension_numbers=('NCH', 'OIH', 'NCH'),
        precision=jax.lax.Precision.HIGHEST) + b1[None, :, None]
    h = jax.lax.reduce_window(h, -jnp.inf, jax.lax.max,
                              (1, 1, POOL1_K), (1, 1, 1), 'VALID')
    h = jax.lax.conv_general_dilated(
        h, w2, window_strides=(1,), padding=[(PAD, PAD)],
        dimension_numbers=('NCH', 'OIH', 'NCH'),
        precision=jax.lax.Precision.HIGHEST) + b2[None, :, None]
    h = jax.lax.reduce_window(h, -jnp.inf, jax.lax.max,
                              (1, 1, POOL2_K), (1, 1, POOL2_S), 'VALID')
    h = jnp.einsum('bct,ft->bcf', h, wfc,
                   precision=jax.lax.Precision.HIGHEST) + bfc[None, None, :]
    return h.reshape(B, -1)


# ---------------- main -------------------------------------------------------
if __name__ == "__main__":
    B = 2
    key = jax.random.PRNGKey(0)
    ks = jax.random.split(key, 7)

    def uinit(k, shape, fan_in):
        bound = 1.0 / math.sqrt(fan_in)
        return jax.random.uniform(k, shape, jnp.float32, -bound, bound)

    # PyTorch-default-style deterministic initialization (synthetic weights).
    w1 = uinit(ks[0], (C1, 1, KERNEL_SIZE), 1 * KERNEL_SIZE)
    b1 = uinit(ks[1], (C1,), 1 * KERNEL_SIZE)
    w2 = uinit(ks[2], (C2, C1, KERNEL_SIZE), C1 * KERNEL_SIZE)
    b2 = uinit(ks[3], (C2,), C1 * KERNEL_SIZE)
    wfc = uinit(ks[4], (FC_OUT, FC_IN), FC_IN)
    bfc = uinit(ks[5], (FC_OUT,), FC_IN)
    x = jax.random.normal(ks[6], (B, L_IN), jnp.float32)

    y = cnn_block_forward(x, w1, b1, w2, b2, wfc, bfc)
    y = jax.block_until_ready(y)
    assert y.shape == (B, C2 * FC_OUT)

    y_ref = jax.block_until_ready(reference_forward(x, w1, b1, w2, b2, wfc, bfc))
    max_err = float(jnp.max(jnp.abs(y - y_ref)))
    assert max_err < 2e-2, f"mismatch vs reference, max abs err = {max_err}"

    print("KERNEL_OK")
</pallas_src>

<mosaic_0001>
module attributes {stable_mosaic.version = 11 : i64} {
  func.func @_cnn_block_kernel(%arg0: i32, %arg1: memref<1x1x1408xf32, #tpu.memory_space<vmem>>, %arg2: memref<1x1278xf32, #tpu.memory_space<vmem>>, %arg3: memref<16x25xf32, #tpu.memory_space<vmem>>, %arg4: memref<16x1xf32, #tpu.memory_space<vmem>>, %arg5: memref<32x400xf32, #tpu.memory_space<vmem>>, %arg6: memref<32x1xf32, #tpu.memory_space<vmem>>, %arg7: memref<573x128xf32, #tpu.memory_space<vmem>>, %arg8: memref<1x128xf32, #tpu.memory_space<vmem>>, %arg9: memref<2x32x128xf32, #tpu.memory_space<vmem>>, %arg10: memref<25x1280xf32, #tpu.memory_space<vmem>>, %arg11: memref<16x1536xf32, #tpu.memory_space<vmem>>, %arg12: memref<400x1280xf32, #tpu.memory_space<vmem>>, %arg13: memref<64x573xf32, #tpu.memory_space<vmem>>) attributes {dimension_semantics = [#tpu.dimension_semantics<parallel>], iteration_bounds = array<i64: 1>, scalar_prefetch = 0 : i64, scratch_operands = 4 : i64, tpu.core_type = #tpu.core_type<tc>, window_params = [{transform_indices = @transform_0, window_bounds = array<i64: 1, 1, 1408>}, {pipeline_mode = #tpu.pipeline_mode<synchronous>, transform_indices = @transform_1, window_bounds = array<i64: 1, 1278>}, {pipeline_mode = #tpu.pipeline_mode<synchronous>, transform_indices = @transform_2, window_bounds = array<i64: 16, 25>}, {pipeline_mode = #tpu.pipeline_mode<synchronous>, transform_indices = @transform_3, window_bounds = array<i64: 16, 1>}, {pipeline_mode = #tpu.pipeline_mode<synchronous>, transform_indices = @transform_4, window_bounds = array<i64: 32, 400>}, {pipeline_mode = #tpu.pipeline_mode<synchronous>, transform_indices = @transform_5, window_bounds = array<i64: 32, 1>}, {pipeline_mode = #tpu.pipeline_mode<synchronous>, transform_indices = @transform_6, window_bounds = array<i64: 573, 128>}, {pipeline_mode = #tpu.pipeline_mode<synchronous>, transform_indices = @transform_7, window_bounds = array<i64: 1, 128>}, {transform_indices = @transform_8, window_bounds = array<i64: 2, 32, 128>}]} {
    %c0 = arith.constant 0 : index
    %c0_0 = arith.constant 0 : index
    %c0_1 = arith.constant 0 : index
    %0 = vector.load %arg1[%c0, %c0_0, %c0_1] : memref<1x1x1408xf32, #tpu.memory_space<vmem>>, vector<1x1x1408xf32>
    %1 = vector.shape_cast %0 : vector<1x1x1408xf32> to vector<1x1408xf32>
    %2 = vector.extract_strided_slice %1 {offsets = [0, 0], sizes = [1, 1280], strides = [1, 1]} : vector<1x1408xf32> to vector<1x1280xf32>
    %c0_2 = arith.constant 0 : index
    %c0_3 = arith.constant 0 : index
    %3 = vector.load %arg10[%c0_2, %c0_3] : memref<25x1280xf32, #tpu.memory_space<vmem>>, vector<1x1280xf32>
    tpu.vector_store %arg10[%c0_2, %c0_3], %2 {strides = array<i32>} : memref<25x1280xf32, #tpu.memory_space<vmem>>, vector<1x1280xf32>,
    %4 = vector.extract_strided_slice %1 {offsets = [0, 1], sizes = [1, 1280], strides = [1, 1]} : vector<1x1408xf32> to vector<1x1280xf32>
    %c1 = arith.constant 1 : index
    %c0_4 = arith.constant 0 : index
    %5 = vector.load %arg10[%c1, %c0_4] : memref<25x1280xf32, #tpu.memory_space<vmem>>, vector<1x1280xf32>
    tpu.vector_store %arg10[%c1, %c0_4], %4 {strides = array<i32>} : memref<25x1280xf32, #tpu.memory_space<vmem>>, vector<1x1280xf32>,
    %6 = vector.extract_strided_slice %1 {offsets = [0, 2], sizes = [1, 1280], strides = [1, 1]} : vector<1x1408xf32> to vector<1x1280xf32>
    %c2 = arith.constant 2 : index
    %c0_5 = arith.constant 0 : index
    %7 = vector.load %arg10[%c2, %c0_5] : memref<25x1280xf32, #tpu.memory_space<vmem>>, vector<1x1280xf32>
    tpu.vector_store %arg10[%c2, %c0_5], %6 {strides = array<i32>} : memref<25x1280xf32, #tpu.memory_space<vmem>>, vector<1x1280xf32>,
    %8 = vector.extract_strided_slice %1 {offsets = [0, 3], sizes = [1, 1280], strides = [1, 1]} : vector<1x1408xf32> to vector<1x1280xf32>
    %c3 = arith.constant 3 : index
    %c0_6 = arith.constant 0 : index
    %9 = vector.load %arg10[%c3, %c0_6] : memref<25x1280xf32, #tpu.memory_space<vmem>>, vector<1x1280xf32>
    tpu.vector_store %arg10[%c3, %c0_6], %8 {strides = array<i32>} : memref<25x1280xf32, #tpu.memory_space<vmem>>, vector<1x1280xf32>,
    %10 = vector.extract_strided_slice %1 {offsets = [0, 4], sizes = [1, 1280], strides = [1, 1]} : vector<1x1408xf32> to vector<1x1280xf32>
    %c4 = arith.constant 4 : index
    %c0_7 = arith.constant 0 : index
    %11 = vector.load %arg10[%c4, %c0_7] : memref<25x1280xf32, #tpu.memory_space<vmem>>, vector<1x1280xf32>
    tpu.vector_store %arg10[%c4, %c0_7], %10 {strides = array<i32>} : memref<25x1280xf32, #tpu.memory_space<vmem>>, vector<1x1280xf32>,
    %12 = vector.extract_strided_slice %1 {offsets = [0, 5], sizes = [1, 1280], strides = [1, 1]} : vector<1x1408xf32> to vector<1x1280xf32>
    %c5 = arith.constant 5 : index
    %c0_8 = arith.constant 0 : index
    %13 = vector.load %arg10[%c5, %c0_8] : memref<25x1280xf32, #tpu.memory_space<vmem>>, vector<1x1280xf32>
    tpu.vector_store %arg10[%c5, %c0_8], %12 {strides = array<i32>} : memref<25x1280xf32, #tpu.memory_space<vmem>>, vector<1x1280xf32>,
    %14 = vector.extract_strided_slice %1 {offsets = [0, 6], sizes = [1, 1280], strides = [1, 1]} : vector<1x1408xf32> to vector<1x1280xf32>
    %c6 = arith.constant 6 : index
    %c0_9 = arith.constant 0 : index
    %15 = vector.load %arg10[%c6, %c0_9] : memref<25x1280xf32, #tpu.memory_space<vmem>>, vector<1x1280xf32>
    tpu.vector_store %arg10[%c6, %c0_9], %14 {strides = array<i32>} : memref<25x1280xf32, #tpu.memory_space<vmem>>, vector<1x1280xf32>,
    %16 = vector.extract_strided_slice %1 {offsets = [0, 7], sizes = [1, 1280], strides = [1, 1]} : vector<1x1408xf32> to vector<1x1280xf32>
    %c7 = arith.constant 7 : index
    %c0_10 = arith.constant 0 : index
    %17 = vector.load %arg10[%c7, %c0_10] : memref<25x1280xf32, #tpu.memory_space<vmem>>, vector<1x1280xf32>
    tpu.vector_store %arg10[%c7, %c0_10], %16 {strides = array<i32>} : memref<25x1280xf32, #tpu.memory_space<vmem>>, vector<1x1280xf32>,
    %18 = vector.extract_strided_slice %1 {offsets = [0, 8], sizes = [1, 1280], strides = [1, 1]} : vector<1x1408xf32> to vector<1x1280xf32>
    %c8 = arith.constant 8 : index
    %c0_11 = arith.constant 0 : index
    %19 = vector.load %arg10[%c8, %c0_11] : memref<25x1280xf32, #tpu.memory_space<vmem>>, vector<1x1280xf32>
    tpu.vector_store %arg10[%c8, %c0_11], %18 {strides = array<i32>} : memref<25x1280xf32, #tpu.memory_space<vmem>>, vector<1x1280xf32>,
    %20 = vector.extract_strided_slice %1 {offsets = [0, 9], sizes = [1, 1280], strides = [1, 1]} : vector<1x1408xf32> to vector<1x1280xf32>
    %c9 = arith.constant 9 : index
    %c0_12 = arith.constant 0 : index
    %21 = vector.load %arg10[%c9, %c0_12] : memref<25x1280xf32, #tpu.memory_space<vmem>>, vector<1x1280xf32>
    tpu.vector_store %arg10[%c9, %c0_12], %20 {strides = array<i32>} : memref<25x1280xf32, #tpu.memory_space<vmem>>, vector<1x1280xf32>,
    %22 = vector.extract_strided_slice %1 {offsets = [0, 10], sizes = [1, 1280], strides = [1, 1]} : vector<1x1408xf32> to vector<1x1280xf32>
    %c10 = arith.constant 10 : index
    %c0_13 = arith.constant 0 : index
    %23 = vector.load %arg10[%c10, %c0_13] : memref<25x1280xf32, #tpu.memory_space<vmem>>, vector<1x1280xf32>
    tpu.vector_store %arg10[%c10, %c0_13], %22 {strides = array<i32>} : memref<25x1280xf32, #tpu.memory_space<vmem>>, vector<1x1280xf32>,
    %24 = vector.extract_strided_slice %1 {offsets = [0, 11], sizes = [1, 1280], strides = [1, 1]} : vector<1x1408xf32> to vector<1x1280xf32>
    %c11 = arith.constant 11 : index
    %c0_14 = arith.constant 0 : index
    %25 = vector.load %arg10[%c11, %c0_14] : memref<25x1280xf32, #tpu.memory_space<vmem>>, vector<1x1280xf32>
    tpu.vector_store %arg10[%c11, %c0_14], %24 {strides = array<i32>} : memref<25x1280xf32, #tpu.memory_space<vmem>>, vector<1x1280xf32>,
    %26 = vector.extract_strided_slice %1 {offsets = [0, 12], sizes = [1, 1280], strides = [1, 1]} : vector<1x1408xf32> to vector<1x1280xf32>
    %c12 = arith.constant 12 : index
    %c0_15 = arith.constant 0 : index
    %27 = vector.load %arg10[%c12, %c0_15] : memref<25x1280xf32, #tpu.memory_space<vmem>>, vector<1x1280xf32>
    tpu.vector_store %arg10[%c12, %c0_15], %26 {strides = array<i32>} : memref<25x1280xf32, #tpu.memory_space<vmem>>, vector<1x1280xf32>,
    %28 = vector.extract_strided_slice %1 {offsets = [0, 13], sizes = [1, 1280], strides = [1, 1]} : vector<1x1408xf32> to vector<1x1280xf32>
    %c13 = arith.constant 13 : index
    %c0_16 = arith.constant 0 : index
    %29 = vector.load %arg10[%c13, %c0_16] : memref<25x1280xf32, #tpu.memory_space<vmem>>, vector<1x1280xf32>
    tpu.vector_store %arg10[%c13, %c0_16], %28 {strides = array<i32>} : memref<25x1280xf32, #tpu.memory_space<vmem>>, vector<1x1280xf32>,
    %30 = vector.extract_strided_slice %1 {offsets = [0, 14], sizes = [1, 1280], strides = [1, 1]} : vector<1x1408xf32> to vector<1x1280xf32>
    %c14 = arith.constant 14 : index
    %c0_17 = arith.constant 0 : index
    %31 = vector.load %arg10[%c14, %c0_17] : memref<25x1280xf32, #tpu.memory_space<vmem>>, vector<1x1280xf32>
    tpu.vector_store %arg10[%c14, %c0_17], %30 {strides = array<i32>} : memref<25x1280xf32, #tpu.memory_space<vmem>>, vector<1x1280xf32>,
    %32 = vector.extract_strided_slice %1 {offsets = [0, 15], sizes = [1, 1280], strides = [1, 1]} : vector<1x1408xf32> to vector<1x1280xf32>
    %c15 = arith.constant 15 : index
    %c0_18 = arith.constant 0 : index
    %33 = vector.load %arg10[%c15, %c0_18] : memref<25x1280xf32, #tpu.memory_space<vmem>>, vector<1x1280xf32>
    tpu.vector_store %arg10[%c15, %c0_18], %32 {strides = array<i32>} : memref<25x1280xf32, #tpu.memory_space<vmem>>, vector<1x1280xf32>,
    %34 = vector.extract_strided_slice %1 {offsets = [0, 16], sizes = [1, 1280], strides = [1, 1]} : vector<1x1408xf32> to vector<1x1280xf32>
    %c16 = arith.constant 16 : index
    %c0_19 = arith.constant 0 : index
    %35 = vector.load %arg10[%c16, %c0_19] : memref<25x1280xf32, #tpu.memory_space<vmem>>, vector<1x1280xf32>
    tpu.vector_store %arg10[%c16, %c0_19], %34 {strides = array<i32>} : memref<25x1280xf32, #tpu.memory_space<vmem>>, vector<1x1280xf32>,
    %36 = vector.extract_strided_slice %1 {offsets = [0, 17], sizes = [1, 1280], strides = [1, 1]} : vector<1x1408xf32> to vector<1x1280xf32>
    %c17 = arith.constant 17 : index
    %c0_20 = arith.constant 0 : index
    %37 = vector.load %arg10[%c17, %c0_20] : memref<25x1280xf32, #tpu.memory_space<vmem>>, vector<1x1280xf32>
    tpu.vector_store %arg10[%c17, %c0_20], %36 {strides = array<i32>} : memref<25x1280xf32, #tpu.memory_space<vmem>>, vector<1x1280xf32>,
    %38 = vector.extract_strided_slice %1 {offsets = [0, 18], sizes = [1, 1280], strides = [1, 1]} : vector<1x1408xf32> to vector<1x1280xf32>
    %c18 = arith.constant 18 : index
    %c0_21 = arith.constant 0 : index
    %39 = vector.load %arg10[%c18, %c0_21] : memref<25x1280xf32, #tpu.memory_space<vmem>>, vector<1x1280xf32>
    tpu.vector_store %arg10[%c18, %c0_21], %38 {strides = array<i32>} : memref<25x1280xf32, #tpu.memory_space<vmem>>, vector<1x1280xf32>,
    %40 = vector.extract_strided_slice %1 {offsets = [0, 19], sizes = [1, 1280], strides = [1, 1]} : vector<1x1408xf32> to vector<1x1280xf32>
    %c19 = arith.constant 19 : index
    %c0_22 = arith.constant 0 : index
    %41 = vector.load %arg10[%c19, %c0_22] : memref<25x1280xf32, #tpu.memory_space<vmem>>, vector<1x1280xf32>
    tpu.vector_store %arg10[%c19, %c0_22], %40 {strides = array<i32>} : memref<25x1280xf32, #tpu.memory_space<vmem>>, vector<1x1280xf32>,
    %42 = vector.extract_strided_slice %1 {offsets = [0, 20], sizes = [1, 1280], strides = [1, 1]} : vector<1x1408xf32> to vector<1x1280xf32>
    %c20 = arith.constant 20 : index
    %c0_23 = arith.constant 0 : index
    %43 = vector.load %arg10[%c20, %c0_23] : memref<25x1280xf32, #tpu.memory_space<vmem>>, vector<1x1280xf32>
    tpu.vector_store %arg10[%c20, %c0_23], %42 {strides = array<i32>} : memref<25x1280xf32, #tpu.memory_space<vmem>>, vector<1x1280xf32>,
    %44 = vector.extract_strided_slice %1 {offsets = [0, 21], sizes = [1, 1280], strides = [1, 1]} : vector<1x1408xf32> to vector<1x1280xf32>
    %c21 = arith.constant 21 : index
    %c0_24 = arith.constant 0 : index
    %45 = vector.load %arg10[%c21, %c0_24] : memref<25x1280xf32, #tpu.memory_space<vmem>>, vector<1x1280xf32>
    tpu.vector_store %arg10[%c21, %c0_24], %44 {strides = array<i32>} : memref<25x1280xf32, #tpu.memory_space<vmem>>, vector<1x1280xf32>,
    %46 = vector.extract_strided_slice %1 {offsets = [0, 22], sizes = [1, 1280], strides = [1, 1]} : vector<1x1408xf32> to vector<1x1280xf32>
    %c22 = arith.constant 22 : index
    %c0_25 = arith.constant 0 : index
    %47 = vector.load %arg10[%c22, %c0_25] : memref<25x1280xf32, #tpu.memory_space<vmem>>, vector<1x1280xf32>
    tpu.vector_store %arg10[%c22, %c0_25], %46 {strides = array<i32>} : memref<25x1280xf32, #tpu.memory_space<vmem>>, vector<1x1280xf32>,
    %48 = vector.extract_strided_slice %1 {offsets = [0, 23], sizes = [1, 1280], strides = [1, 1]} : vector<1x1408xf32> to vector<1x1280xf32>
    %c23 = arith.constant 23 : index
    %c0_26 = arith.constant 0 : index
    %49 = vector.load %arg10[%c23, %c0_26] : memref<25x1280xf32, #tpu.memory_space<vmem>>, vector<1x1280xf32>
    tpu.vector_store %arg10[%c23, %c0_26], %48 {strides = array<i32>} : memref<25x1280xf32, #tpu.memory_space<vmem>>, vector<1x1280xf32>,
    %50 = vector.extract_strided_slice %1 {offsets = [0, 24], sizes = [1, 1280], strides = [1, 1]} : vector<1x1408xf32> to vector<1x1280xf32>
    %c24 = arith.constant 24 : index
    %c0_27 = arith.constant 0 : index
    %51 = vector.load %arg10[%c24, %c0_27] : memref<25x1280xf32, #tpu.memory_space<vmem>>, vector<1x1280xf32>
    tpu.vector_store %arg10[%c24, %c0_27], %50 {strides = array<i32>} : memref<25x1280xf32, #tpu.memory_space<vmem>>, vector<1x1280xf32>,
    %c0_28 = arith.constant 0 : index
    %c0_29 = arith.constant 0 : index
    %52 = vector.load %arg3[%c0_28, %c0_29] : memref<16x25xf32, #tpu.memory_space<vmem>>, vector<16x25xf32>
    %c0_30 = arith.constant 0 : index
    %c0_31 = arith.constant 0 : index
    %53 = vector.load %arg10[%c0_30, %c0_31] : memref<25x1280xf32, #tpu.memory_space<vmem>>, vector<25x1280xf32>
    %cst = arith.constant dense<0.000000e+00> : vector<16x1280xf32>
    %54 = tpu.matmul %52, %53, %cst {dimension_numbers = #tpu.dot_dimension_numbers<[1], [0], [0], [1], [0, 0, 1, 1], [], []>} : vector<16x25xf32>, vector<25x1280xf32>, vector<16x1280xf32> -> vector<16x1280xf32>
    %c0_32 = arith.constant 0 : index
    %c0_33 = arith.constant 0 : index
    %55 = vector.load %arg4[%c0_32, %c0_33] : memref<16x1xf32, #tpu.memory_space<vmem>>, vector<16x1xf32>
    %56 = vector.broadcast %55 : vector<16x1xf32> to vector<16x1280xf32>
    %57 = arith.addf %54, %56 : vector<16x1280xf32>
    %58 = vector.extract_strided_slice %57 {offsets = [0, 0], sizes = [16, 1278], strides = [1, 1]} : vector<16x1280xf32> to vector<16x1278xf32>
    %59 = vector.extract_strided_slice %57 {offsets = [0, 1], sizes = [16, 1278], strides = [1, 1]} : vector<16x1280xf32> to vector<16x1278xf32>
    %60 = arith.maximumf %58, %59 : vector<16x1278xf32>
    %61 = vector.extract_strided_slice %57 {offsets = [0, 2], sizes = [16, 1278], strides = [1, 1]} : vector<16x1280xf32> to vector<16x1278xf32>
    %62 = arith.maximumf %60, %61 : vector<16x1278xf32>
    %c0_34 = arith.constant 0 : index
    %c0_35 = arith.constant 0 : index
    %63 = vector.load %arg2[%c0_34, %c0_35] : memref<1x1278xf32, #tpu.memory_space<vmem>>, vector<1x1278xf32>
    %64 = vector.broadcast %63 : vector<1x1278xf32> to vector<16x1278xf32>
    %65 = arith.mulf %62, %64 : vector<16x1278xf32>
    %cst_36 = arith.constant 0.000000e+00 : f32
    %66 = vector.broadcast %cst_36 : f32 to vector<16x128xf32>
    %c0_37 = arith.constant 0 : index
    %c0_38 = arith.constant 0 : index
    %67 = vector.load %arg11[%c0_37, %c0_38] : memref<16x1536xf32, #tpu.memory_space<vmem>>, vector<16x128xf32>
    tpu.vector_store %arg11[%c0_37, %c0_38], %66 {strides = array<i32>} : memref<16x1536xf32, #tpu.memory_space<vmem>>, vector<16x128xf32>,
    %cst_39 = arith.constant 0.000000e+00 : f32
    %68 = vector.broadcast %cst_39 : f32 to vector<16x130xf32>
    %c0_40 = arith.constant 0 : index
    %c1406 = arith.constant 1406 : index
    %69 = vector.load %arg11[%c0_40, %c1406] : memref<16x1536xf32, #tpu.memory_space<vmem>>, vector<16x130xf32>
    tpu.vector_store %arg11[%c0_40, %c1406], %68 {strides = array<i32>} : memref<16x1536xf32, #tpu.memory_space<vmem>>, vector<16x130xf32>,
    %c0_41 = arith.constant 0 : index
    %c128 = arith.constant 128 : index
    %70 = vector.load %arg11[%c0_41, %c128] : memref<16x1536xf32, #tpu.memory_space<vmem>>, vector<16x1278xf32>
    tpu.vector_store %arg11[%c0_41, %c128], %65 {strides = array<i32>} : memref<16x1536xf32, #tpu.memory_space<vmem>>, vector<16x1278xf32>,
    %c0_42 = arith.constant 0 : index
    %c116 = arith.constant 116 : index
    %71 = vector.load %arg11[%c0_42, %c116] : memref<16x1536xf32, #tpu.memory_space<vmem>>, vector<16x1280xf32>
    %c0_43 = arith.constant 0 : index
    %c0_44 = arith.constant 0 : index
    %72 = vector.load %arg12[%c0_43, %c0_44] : memref<400x1280xf32, #tpu.memory_space<vmem>>, vector<16x1280xf32>
    tpu.vector_store %arg12[%c0_43, %c0_44], %71 {strides = array<i32>} : memref<400x1280xf32, #tpu.memory_space<vmem>>, vector<16x1280xf32>,
    %c0_45 = arith.constant 0 : index
    %c117 = arith.constant 117 : index
    %73 = vector.load %arg11[%c0_45, %c117] : memref<16x1536xf32, #tpu.memory_space<vmem>>, vector<16x1280xf32>
    %c16_46 = arith.constant 16 : index
    %c0_47 = arith.constant 0 : index
    %74 = vector.load %arg12[%c16_46, %c0_47] : memref<400x1280xf32, #tpu.memory_space<vmem>>, vector<16x1280xf32>
    tpu.vector_store %arg12[%c16_46, %c0_47], %73 {strides = array<i32>} : memref<400x1280xf32, #tpu.memory_space<vmem>>, vector<16x1280xf32>,
    %c0_48 = arith.constant 0 : index
    %c118 = arith.constant 118 : index
    %75 = vector.load %arg11[%c0_48, %c118] : memref<16x1536xf32, #tpu.memory_space<vmem>>, vector<16x1280xf32>
    %c32 = arith.constant 32 : index
    %c0_49 = arith.constant 0 : index
    %76 = vector.load %arg12[%c32, %c0_49] : memref<400x1280xf32, #tpu.memory_space<vmem>>, vector<16x1280xf32>
    tpu.vector_store %arg12[%c32, %c0_49], %75 {strides = array<i32>} : memref<400x1280xf32, #tpu.memory_space<vmem>>, vector<16x1280xf32>,
    %c0_50 = arith.constant 0 : index
    %c119 = arith.constant 119 : index
    %77 = vector.load %arg11[%c0_50, %c119] : memref<16x1536xf32, #tpu.memory_space<vmem>>, vector<16x1280xf32>
    %c48 = arith.constant 48 : index
    %c0_51 = arith.constant 0 : index
    %78 = vector.load %arg12[%c48, %c0_51] : memref<400x1280xf32, #tpu.memory_space<vmem>>, vector<16x1280xf32>
    tpu.vector_store %arg12[%c48, %c0_51], %77 {strides = array<i32>} : memref<400x1280xf32, #tpu.memory_space<vmem>>, vector<16x1280xf32>,
    %c0_52 = arith.constant 0 : index
    %c120 = arith.constant 120 : index
    %79 = vector.load %arg11[%c0_52, %c120] : memref<16x1536xf32, #tpu.memory_space<vmem>>, vector<16x1280xf32>
    %c64 = arith.constant 64 : index
    %c0_53 = arith.constant 0 : index
    %80 = vector.load %arg12[%c64, %c0_53] : memref<400x1280xf32, #tpu.memory_space<vmem>>, vector<16x1280xf32>
    tpu.vector_store %arg12[%c64, %c0_53], %79 {strides = array<i32>} : memref<400x1280xf32, #tpu.memory_space<vmem>>, vector<16x1280xf32>,
    %c0_54 = arith.constant 0 : index
    %c121 = arith.constant 121 : index
    %81 = vector.load %arg11[%c0_54, %c121] : memref<16x1536xf32, #tpu.memory_space<vmem>>, vector<16x1280xf32>
    %c80 = arith.constant 80 : index
    %c0_55 = arith.constant 0 : index
    %82 = vector.load %arg12[%c80, %c0_55] : memref<400x1280xf32, #tpu.memory_space<vmem>>, vector<16x1280xf32>
    tpu.vector_store %arg12[%c80, %c0_55], %81 {strides = array<i32>} : memref<400x1280xf32, #tpu.memory_space<vmem>>, vector<16x1280xf32>,
    %c0_56 = arith.constant 0 : index
    %c122 = arith.constant 122 : index
    %83 = vector.load %arg11[%c0_56, %c122] : memref<16x1536xf32, #tpu.memory_space<vmem>>, vector<16x1280xf32>
    %c96 = arith.constant 96 : index
    %c0_57 = arith.constant 0 : index
    %84 = vector.load %arg12[%c96, %c0_57] : memref<400x1280xf32, #tpu.memory_space<vmem>>, vector<16x1280xf32>
    tpu.vector_store %arg12[%c96, %c0_57], %83 {strides = array<i32>} : memref<400x1280xf32, #tpu.memory_space<vmem>>, vector<16x1280xf32>,
    %c0_58 = arith.constant 0 : index
    %c123 = arith.constant 123 : index
    %85 = vector.load %arg11[%c0_58, %c123] : memref<16x1536xf32, #tpu.memory_space<vmem>>, vector<16x1280xf32>
    %c112 = arith.constant 112 : index
    %c0_59 = arith.constant 0 : index
    %86 = vector.load %arg12[%c112, %c0_59] : memref<400x1280xf32, #tpu.memory_space<vmem>>, vector<16x1280xf32>
    tpu.vector_store %arg12[%c112, %c0_59], %85 {strides = array<i32>} : memref<400x1280xf32, #tpu.memory_space<vmem>>, vector<16x1280xf32>,
    %c0_60 = arith.constant 0 : index
    %c124 = arith.constant 124 : index
    %87 = vector.load %arg11[%c0_60, %c124] : memref<16x1536xf32, #tpu.memory_space<vmem>>, vector<16x1280xf32>
    %c128_61 = arith.constant 128 : index
    %c0_62 = arith.constant 0 : index
    %88 = vector.load %arg12[%c128_61, %c0_62] : memref<400x1280xf32, #tpu.memory_space<vmem>>, vector<16x1280xf32>
    tpu.vector_store %arg12[%c128_61, %c0_62], %87 {strides = array<i32>} : memref<400x1280xf32, #tpu.memory_space<vmem>>, vector<16x1280xf32>,
    %c0_63 = arith.constant 0 : index
    %c125 = arith.constant 125 : index
    %89 = vector.load %arg11[%c0_63, %c125] : memref<16x1536xf32, #tpu.memory_space<vmem>>, vector<16x1280xf32>
    %c144 = arith.constant 144 : index
    %c0_64 = arith.constant 0 : index
    %90 = vector.load %arg12[%c144, %c0_64] : memref<400x1280xf32, #tpu.memory_space<vmem>>, vector<16x1280xf32>
    tpu.vector_store %arg12[%c144, %c0_64], %89 {strides = array<i32>} : memref<400x1280xf32, #tpu.memory_space<vmem>>, vector<16x1280xf32>,
    %c0_65 = arith.constant 0 : index
    %c126 = arith.constant 126 : index
    %91 = vector.load %arg11[%c0_65, %c126] : memref<16x1536xf32, #tpu.memory_space<vmem>>, vector<16x1280xf32>
    %c160 = arith.constant 160 : index
    %c0_66 = arith.constant 0 : index
    %92 = vector.load %arg12[%c160, %c0_66] : memref<400x1280xf32, #tpu.memory_space<vmem>>, vector<16x1280xf32>
    tpu.vector_store %arg12[%c160, %c0_66], %91 {strides = array<i32>} : memref<400x1280xf32, #tpu.memory_space<vmem>>, vector<16x1280xf32>,
    %c0_67 = arith.constant 0 : index
    %c127 = arith.constant 127 : index
    %93 = vector.load %arg11[%c0_67, %c127] : memref<16x1536xf32, #tpu.memory_space<vmem>>, vector<16x1280xf32>
    %c176 = arith.constant 176 : index
    %c0_68 = arith.constant 0 : index
    %94 = vector.load %arg12[%c176, %c0_68] : memref<400x1280xf32, #tpu.memory_space<vmem>>, vector<16x1280xf32>
    tpu.vector_store %arg12[%c176, %c0_68], %93 {strides = array<i32>} : memref<400x1280xf32, #tpu.memory_space<vmem>>, vector<16x1280xf32>,
    %c0_69 = arith.constant 0 : index
    %c128_70 = arith.constant 128 : index
    %95 = vector.load %arg11[%c0_69, %c128_70] : memref<16x1536xf32, #tpu.memory_space<vmem>>, vector<16x1280xf32>
    %c192 = arith.constant 192 : index
    %c0_71 = arith.constant 0 : index
    %96 = vector.load %arg12[%c192, %c0_71] : memref<400x1280xf32, #tpu.memory_space<vmem>>, vector<16x1280xf32>
    tpu.vector_store %arg12[%c192, %c0_71], %95 {strides = array<i32>} : memref<400x1280xf32, #tpu.memory_space<vmem>>, vector<16x1280xf32>,
    %c0_72 = arith.constant 0 : index
    %c129 = arith.constant 129 : index
    %97 = vector.load %arg11[%c0_72, %c129] : memref<16x1536xf32, #tpu.memory_space<vmem>>, vector<16x1280xf32>
    %c208 = arith.constant 208 : index
    %c0_73 = arith.constant 0 : index
    %98 = vector.load %arg12[%c208, %c0_73] : memref<400x1280xf32, #tpu.memory_space<vmem>>, vector<16x1280xf32>
    tpu.vector_store %arg12[%c208, %c0_73], %97 {strides = array<i32>} : memref<400x1280xf32, #tpu.memory_space<vmem>>, vector<16x1280xf32>,
    %c0_74 = arith.constant 0 : index
    %c130 = arith.constant 130 : index
    %99 = vector.load %arg11[%c0_74, %c130] : memref<16x1536xf32, #tpu.memory_space<vmem>>, vector<16x1280xf32>
    %c224 = arith.constant 224 : index
    %c0_75 = arith.constant 0 : index
    %100 = vector.load %arg12[%c224, %c0_75] : memref<400x1280xf32, #tpu.memory_space<vmem>>, vector<16x1280xf32>
    tpu.vector_store %arg12[%c224, %c0_75], %99 {strides = array<i32>} : memref<400x1280xf32, #tpu.memory_space<vmem>>, vector<16x1280xf32>,
    %c0_76 = arith.constant 0 : index
    %c131 = arith.constant 131 : index
    %101 = vector.load %arg11[%c0_76, %c131] : memref<16x1536xf32, #tpu.memory_space<vmem>>, vector<16x1280xf32>
    %c240 = arith.constant 240 : index
    %c0_77 = arith.constant 0 : index
    %102 = vector.load %arg12[%c240, %c0_77] : memref<400x1280xf32, #tpu.memory_space<vmem>>, vector<16x1280xf32>
    tpu.vector_store %arg12[%c240, %c0_77], %101 {strides = array<i32>} : memref<400x1280xf32, #tpu.memory_space<vmem>>, vector<16x1280xf32>,
    %c0_78 = arith.constant 0 : index
    %c132 = arith.constant 132 : index
    %103 = vector.load %arg11[%c0_78, %c132] : memref<16x1536xf32, #tpu.memory_space<vmem>>, vector<16x1280xf32>
    %c256 = arith.constant 256 : index
    %c0_79 = arith.constant 0 : index
    %104 = vector.load %arg12[%c256, %c0_79] : memref<400x1280xf32, #tpu.memory_space<vmem>>, vector<16x1280xf32>
    tpu.vector_store %arg12[%c256, %c0_79], %103 {strides = array<i32>} : memref<400x1280xf32, #tpu.memory_space<vmem>>, vector<16x1280xf32>,
    %c0_80 = arith.constant 0 : index
    %c133 = arith.constant 133 : index
    %105 = vector.load %arg11[%c0_80, %c133] : memref<16x1536xf32, #tpu.memory_space<vmem>>, vector<16x1280xf32>
    %c272 = arith.constant 272 : index
    %c0_81 = arith.constant 0 : index
    %106 = vector.load %arg12[%c272, %c0_81] : memref<400x1280xf32, #tpu.memory_space<vmem>>, vector<16x1280xf32>
    tpu.vector_store %arg12[%c272, %c0_81], %105 {strides = array<i32>} : memref<400x1280xf32, #tpu.memory_space<vmem>>, vector<16x1280xf32>,
    %c0_82 = arith.constant 0 : index
    %c134 = arith.constant 134 : index
    %107 = vector.load %arg11[%c0_82, %c134] : memref<16x1536xf32, #tpu.memory_space<vmem>>, vector<16x1280xf32>
    %c288 = arith.constant 288 : index
    %c0_83 = arith.constant 0 : index
    %108 = vector.load %arg12[%c288, %c0_83] : memref<400x1280xf32, #tpu.memory_space<vmem>>, vector<16x1280xf32>
    tpu.vector_store %arg12[%c288, %c0_83], %107 {strides = array<i32>} : memref<400x1280xf32, #tpu.memory_space<vmem>>, vector<16x1280xf32>,
    %c0_84 = arith.constant 0 : index
    %c135 = arith.constant 135 : index
    %109 = vector.load %arg11[%c0_84, %c135] : memref<16x1536xf32, #tpu.memory_space<vmem>>, vector<16x1280xf32>
    %c304 = arith.constant 304 : index
    %c0_85 = arith.constant 0 : index
    %110 = vector.load %arg12[%c304, %c0_85] : memref<400x1280xf32, #tpu.memory_space<vmem>>, vector<16x1280xf32>
    tpu.vector_store %arg12[%c304, %c0_85], %109 {strides = array<i32>} : memref<400x1280xf32, #tpu.memory_space<vmem>>, vector<16x1280xf32>,
    %c0_86 = arith.constant 0 : index
    %c136 = arith.constant 136 : index
    %111 = vector.load %arg11[%c0_86, %c136] : memref<16x1536xf32, #tpu.memory_space<vmem>>, vector<16x1280xf32>
    %c320 = arith.constant 320 : index
    %c0_87 = arith.constant 0 : index
    %112 = vector.load %arg12[%c320, %c0_87] : memref<400x1280xf32, #tpu.memory_space<vmem>>, vector<16x1280xf32>
    tpu.vector_store %arg12[%c320, %c0_87], %111 {strides = array<i32>} : memref<400x1280xf32, #tpu.memory_space<vmem>>, vector<16x1280xf32>,
    %c0_88 = arith.constant 0 : index
    %c137 = arith.constant 137 : index
    %113 = vector.load %arg11[%c0_88, %c137] : memref<16x1536xf32, #tpu.memory_space<vmem>>, vector<16x1280xf32>
    %c336 = arith.constant 336 : index
    %c0_89 = arith.constant 0 : index
    %114 = vector.load %arg12[%c336, %c0_89] : memref<400x1280xf32, #tpu.memory_space<vmem>>, vector<16x1280xf32>
    tpu.vector_store %arg12[%c336, %c0_89], %113 {strides = array<i32>} : memref<400x1280xf32, #tpu.memory_space<vmem>>, vector<16x1280xf32>,
    %c0_90 = arith.constant 0 : index
    %c138 = arith.constant 138 : index
    %115 = vector.load %arg11[%c0_90, %c138] : memref<16x1536xf32, #tpu.memory_space<vmem>>, vector<16x1280xf32>
    %c352 = arith.constant 352 : index
    %c0_91 = arith.constant 0 : index
    %116 = vector.load %arg12[%c352, %c0_91] : memref<400x1280xf32, #tpu.memory_space<vmem>>, vector<16x1280xf32>
    tpu.vector_store %arg12[%c352, %c0_91], %115 {strides = array<i32>} : memref<400x1280xf32, #tpu.memory_space<vmem>>, vector<16x1280xf32>,
    %c0_92 = arith.constant 0 : index
    %c139 = arith.constant 139 : index
    %117 = vector.load %arg11[%c0_92, %c139] : memref<16x1536xf32, #tpu.memory_space<vmem>>, vector<16x1280xf32>
    %c368 = arith.constant 368 : index
    %c0_93 = arith.constant 0 : index
    %118 = vector.load %arg12[%c368, %c0_93] : memref<400x1280xf32, #tpu.memory_space<vmem>>, vector<16x1280xf32>
    tpu.vector_store %arg12[%c368, %c0_93], %117 {strides = array<i32>} : memref<400x1280xf32, #tpu.memory_space<vmem>>, vector<16x1280xf32>,
    %c0_94 = arith.constant 0 : index
    %c140 = arith.constant 140 : index
    %119 = vector.load %arg11[%c0_94, %c140] : memref<16x1536xf32, #tpu.memory_space<vmem>>, vector<16x1280xf32>
    %c384 = arith.constant 384 : index
    %c0_95 = arith.constant 0 : index
    %120 = vector.load %arg12[%c384, %c0_95] : memref<400x1280xf32, #tpu.memory_space<vmem>>, vector<16x1280xf32>
    tpu.vector_store %arg12[%c384, %c0_95], %119 {strides = array<i32>} : memref<400x1280xf32, #tpu.memory_space<vmem>>, vector<16x1280xf32>,
    %c0_96 = arith.constant 0 : index
    %c0_97 = arith.constant 0 : index
    %121 = vector.load %arg5[%c0_96, %c0_97] : memref<32x400xf32, #tpu.memory_space<vmem>>, vector<32x400xf32>
    %c0_98 = arith.constant 0 : index
    %c0_99 = arith.constant 0 : index
    %122 = vector.load %arg12[%c0_98, %c0_99] : memref<400x1280xf32, #tpu.memory_space<vmem>>, vector<400x1280xf32>
    %cst_100 = arith.constant dense<0.000000e+00> : vector<32x1280xf32>
    %123 = tpu.matmul %121, %122, %cst_100 {dimension_numbers = #tpu.dot_dimension_numbers<[1], [0], [0], [1], [0, 0, 1, 1], [], []>} : vector<32x400xf32>, vector<400x1280xf32>, vector<32x1280xf32> -> vector<32x1280xf32>
    %c0_101 = arith.constant 0 : index
    %c0_102 = arith.constant 0 : index
    %124 = vector.load %arg6[%c0_101, %c0_102] : memref<32x1xf32, #tpu.memory_space<vmem>>, vector<32x1xf32>
    %125 = vector.broadcast %124 : vector<32x1xf32> to vector<32x1280xf32>
    %126 = arith.addf %123, %125 : vector<32x1280xf32>
    %127 = vector.extract_strided_slice %126 {offsets = [0, 0], sizes = [32, 1279], strides = [1, 1]} : vector<32x1280xf32> to vector<32x1279xf32>
    %128 = vector.extract_strided_slice %126 {offsets = [0, 1], sizes = [32, 1279], strides = [1, 1]} : vector<32x1280xf32> to vector<32x1279xf32>
    %129 = arith.maximumf %127, %128 : vector<32x1279xf32>
    %130 = vector.extract_strided_slice %129 {offsets = [0, 0], sizes = [32, 1277], strides = [1, 1]} : vector<32x1279xf32> to vector<32x1277xf32>
    %131 = vector.extract_strided_slice %129 {offsets = [0, 2], sizes = [32, 1277], strides = [1, 1]} : vector<32x1279xf32> to vector<32x1277xf32>
    %132 = arith.maximumf %130, %131 : vector<32x1277xf32>
    %133 = vector.extract_strided_slice %132 {offsets = [0, 0], sizes = [32, 1273], strides = [1, 1]} : vector<32x1277xf32> to vector<32x1273xf32>
    %134 = vector.extract_strided_slice %132 {offsets = [0, 4], sizes = [32, 1273], strides = [1, 1]} : vector<32x1277xf32> to vector<32x1273xf32>
    %135 = arith.maximumf %133, %134 : vector<32x1273xf32>
    %136 = vector.extract_strided_slice %135 {offsets = [0, 0], sizes = [32, 1265], strides = [1, 1]} : vector<32x1273xf32> to vector<32x1265xf32>
    %137 = vector.extract_strided_slice %135 {offsets = [0, 8], sizes = [32, 1265], strides = [1, 1]} : vector<32x1273xf32> to vector<32x1265xf32>
    %138 = arith.maximumf %136, %137 : vector<32x1265xf32>
    %139 = vector.extract_strided_slice %138 {offsets = [0, 0], sizes = [32, 1256], strides = [1, 1]} : vector<32x1265xf32> to vector<32x1256xf32>
    %140 = vector.extract_strided_slice %138 {offsets = [0, 9], sizes = [32, 1256], strides = [1, 1]} : vector<32x1265xf32> to vector<32x1256xf32>
    %141 = arith.maximumf %139, %140 : vector<32x1256xf32>
    %142 = vector.extract_strided_slice %141 {offsets = [0, 0], sizes = [32, 573], strides = [1, 1]} : vector<32x1256xf32> to vector<32x573xf32>
    %c0_103 = arith.constant 0 : index
    %c0_104 = arith.constant 0 : index
    %143 = vector.load %arg13[%c0_103, %c0_104] : memref<64x573xf32, #tpu.memory_space<vmem>>, vector<32x573xf32>
    tpu.vector_store %arg13[%c0_103, %c0_104], %142 {strides = array<i32>} : memref<64x573xf32, #tpu.memory_space<vmem>>, vector<32x573xf32>,
    %144 = vector.extract_strided_slice %141 {offsets = [0, 640], sizes = [32, 573], strides = [1, 1]} : vector<32x1256xf32> to vector<32x573xf32>
    %c32_105 = arith.constant 32 : index
    %c0_106 = arith.constant 0 : index
    %145 = vector.load %arg13[%c32_105, %c0_106] : memref<64x573xf32, #tpu.memory_space<vmem>>, vector<32x573xf32>
    tpu.vector_store %arg13[%c32_105, %c0_106], %144 {strides = array<i32>} : memref<64x573xf32, #tpu.memory_space<vmem>>, vector<32x573xf32>,
    %c0_107 = arith.constant 0 : index
    %c0_108 = arith.constant 0 : index
    %146 = vector.load %arg13[%c0_107, %c0_108] : memref<64x573xf32, #tpu.memory_space<vmem>>, vector<64x573xf32>
    %c0_109 = arith.constant 0 : index
    %c0_110 = arith.constant 0 : index
    %147 = vector.load %arg7[%c0_109, %c0_110] : memref<573x128xf32, #tpu.memory_space<vmem>>, vector<573x128xf32>
    %cst_111 = arith.constant dense<0.000000e+00> : vector<64x128xf32>
    %148 = tpu.matmul %146, %147, %cst_111 {dimension_numbers = #tpu.dot_dimension_numbers<[1], [0], [0], [1], [0, 0, 1, 1], [], []>} : vector<64x573xf32>, vector<573x128xf32>, vector<64x128xf32> -> vector<64x128xf32>
    %c0_112 = arith.constant 0 : index
    %c0_113 = arith.constant 0 : index
    %149 = vector.load %arg8[%c0_112, %c0_113] : memref<1x128xf32, #tpu.memory_space<vmem>>, vector<1x128xf32>
    %150 = vector.broadcast %149 : vector<1x128xf32> to vector<64x128xf32>
    %151 = arith.addf %148, %150 : vector<64x128xf32>
    %152 = vector.extract_strided_slice %151 {offsets = [0, 0], sizes = [32, 128], strides = [1, 1]} : vector<64x128xf32> to vector<32x128xf32>
    %c0_114 = arith.constant 0 : index
    %c0_115 = arith.constant 0 : index
    %c0_116 = arith.constant 0 : index
    %153 = vector.load %arg9[%c0_114, %c0_115, %c0_116] : memref<2x32x128xf32, #tpu.memory_space<vmem>>, vector<1x32x128xf32>
    %154 = vector.shape_cast %153 : vector<1x32x128xf32> to vector<32x128xf32>
    %155 = vector.shape_cast %152 : vector<32x128xf32> to vector<1x32x128xf32>
    tpu.vector_store %arg9[%c0_114, %c0_115, %c0_116], %155 {strides = array<i32>} : memref<2x32x128xf32, #tpu.memory_space<vmem>>, vector<1x32x128xf32>,
    %156 = vector.extract_strided_slice %151 {offsets = [32, 0], sizes = [32, 128], strides = [1, 1]} : vector<64x128xf32> to vector<32x128xf32>
    %c1_117 = arith.constant 1 : index
    %c0_118 = arith.constant 0 : index
    %c0_119 = arith.constant 0 : index
    %157 = vector.load %arg9[%c1_117, %c0_118, %c0_119] : memref<2x32x128xf32, #tpu.memory_space<vmem>>, vector<1x32x128xf32>
    %158 = vector.shape_cast %157 : vector<1x32x128xf32> to vector<32x128xf32>
    %159 = vector.shape_cast %156 : vector<32x128xf32> to vector<1x32x128xf32>
    tpu.vector_store %arg9[%c1_117, %c0_118, %c0_119], %159 {strides = array<i32>} : memref<2x32x128xf32, #tpu.memory_space<vmem>>, vector<1x32x128xf32>,
    return
  }
  func.func @transform_0(%arg0: i32) -> (i32, i32, i32) {
    %c0_i32 = arith.constant 0 : i32
    %c0_i32_0 = arith.constant 0 : i32
    %c0_i32_1 = arith.constant 0 : i32
    return %arg0, %c0_i32, %c0_i32_0 : i32, i32, i32
  }
  func.func @transform_1(%arg0: i32) -> (i32, i32) {
    %c0_i32 = arith.constant 0 : i32
    %c0_i32_0 = arith.constant 0 : i32
    %c0_i32_1 = arith.constant 0 : i32
    return %c0_i32, %c0_i32_0 : i32, i32
  }
  func.func @transform_2(%arg0: i32) -> (i32, i32) {
    %c0_i32 = arith.constant 0 : i32
    %c0_i32_0 = arith.constant 0 : i32
    %c0_i32_1 = arith.constant 0 : i32
    return %c0_i32, %c0_i32_0 : i32, i32
  }
  func.func @transform_3(%arg0: i32) -> (i32, i32) {
    %c0_i32 = arith.constant 0 : i32
    %c0_i32_0 = arith.constant 0 : i32
    %c0_i32_1 = arith.constant 0 : i32
    return %c0_i32, %c0_i32_0 : i32, i32
  }
  func.func @transform_4(%arg0: i32) -> (i32, i32) {
    %c0_i32 = arith.constant 0 : i32
    %c0_i32_0 = arith.constant 0 : i32
    %c0_i32_1 = arith.constant 0 : i32
    return %c0_i32, %c0_i32_0 : i32, i32
  }
  func.func @transform_5(%arg0: i32) -> (i32, i32) {
    %c0_i32 = arith.constant 0 : i32
    %c0_i32_0 = arith.constant 0 : i32
    %c0_i32_1 = arith.constant 0 : i32
    return %c0_i32, %c0_i32_0 : i32, i32
  }
  func.func @transform_6(%arg0: i32) -> (i32, i32) {
    %c0_i32 = arith.constant 0 : i32
    %c0_i32_0 = arith.constant 0 : i32
    %c0_i32_1 = arith.constant 0 : i32
    return %c0_i32, %c0_i32_0 : i32, i32
  }
  func.func @transform_7(%arg0: i32) -> (i32, i32) {
    %c0_i32 = arith.constant 0 : i32
    %c0_i32_0 = arith.constant 0 : i32
    %c0_i32_1 = arith.constant 0 : i32
    return %c0_i32, %c0_i32_0 : i32, i32
  }
  func.func @transform_8(%arg0: i32) -> (i32, i32, i32) {
    %c0_i32 = arith.constant 0 : i32
    %c0_i32_0 = arith.constant 0 : i32
    %c0_i32_1 = arith.constant 0 : i32
    return %arg0, %c0_i32, %c0_i32_0 : i32, i32, i32
  }
}

</mosaic_0001>

<bundles_post_ra>
// kernel: cnn_block_forward.1
= control target key start
LH: loop header
LB: loop body
LE: loop exit
PB: predicated region body
PF: predicated region fallthrough
CT: control target
= control target key end

     0   :  { %v33_v0 = vlaneseq  ;;  %s10314_s29 = smov 126   ;;  %s10315_s30 = smov 127   ;;  %v10338_v4 = vmov 0.0   ;;  %vm48_vm1 = vcmask 1046528   ;;  %vm17216_vm2 = vcmask 1031168   ;;  %s16918_s0 = inlined_call_operand.vmem [shape: f32[1,1,1408], index: 0, kind: input, shape index: {}]   ;;  %s16919_s3 = inlined_call_operand.vmem [shape: f32[16,1], index: 3, kind: input, shape index: {}]   ;;  %s16920_s2 = inlined_call_operand.vmem [shape: f32[16,25], index: 2, kind: input, shape index: {}]   ;;  %s16921_s1 = inlined_call_operand.vmem [shape: f32[1,1278], index: 1, kind: input, shape index: {}]   ;;  %s16922_s4 = inlined_call_operand.vmem [shape: f32[32,400], index: 4, kind: input, shape index: {}]   ;;  %s16923_s5 = inlined_call_operand.vmem [shape: f32[32,1], index: 5, kind: input, shape index: {}]   ;;  %s16924_s6 = inlined_call_operand.vmem [shape: f32[573,128], index: 6, kind: input, shape index: {}]   ;;  %s16925_s7 = inlined_call_operand.vmem [shape: f32[1,128], index: 7, kind: input, shape index: {}]   ;;  %s16926_s8 = inlined_call_operand.vmem [shape: f32[2,32,128], index: 8, kind: output, shape index: {}]  }
   0x1   :  { %v10401_v1 = vld [vmem:[%s16918_s0] sm:$0xff]  ;;  %v10412_v2 = vld [vmem:[%s16918_s0 + $0x8] sm:$0x7]  ;;  %s10316_s11 = smov 125   ;;  %s16929_s0 = smov 124   ;;  %631 = vmatprep.mubr.f32.mxu0 %v10338_v4  ;;  %1242 = vst [vmem:[#allocation3] sm:$0xff] %v10338_v4  ;;  %708 = vmatprep.mubr.f32.mxu1 %v10338_v4 }
   0x2   :  { %61 = vrot.lane.b32.xlu1 %v10401_v1, %s10314_s29  ;;  %31 = vst [vmem:[#allocation2] ss:$8 sm:$0xf] %v10401_v1  ;;  %32 = vst [vmem:[#allocation2] ss:$8 sm:$0xf0] %v10401_v1  ;;  %42 = vrot.lane.b32.xlu0 %v10401_v1, %s10315_s30 }
   0x3   :  { %vm10415_vm0 = vcmp.lt.s32.totalorder %v33_v0, 256  ;;  %s10318_s12 = smov 123   ;;  %s10319_s13 = smov 122   ;;  %vm50_vm3 = vcmask 1039360   ;;  %v10339_v10 = vmov 0   ;;  %v517_v11 = vld [vmem:[%s16919_s3] sm:$0xff] }
   0x4   :  { %38 = vst.msk [vmem:[#allocation2 + $0x40] ss:$8 sm:$0x3] %vm10415_vm0, %v10412_v2  ;;  %s10320_s14 = smov 121   ;;  %s10321_s15 = smov 120   ;;  %8973 = vset.pattern.permute.xlu0 %v10339_v10  ;;  %8974 = vset.pattern.permute.xlu1 %v10339_v10  ;;  %v518_v12 = vld [vmem:[%s16919_s3 + $0x8] sm:$0xff] }
   0x5   :  { %s10322_s16 = smov 119   ;;  %s10323_s17 = smov 118   ;;  %vm17215_vm4 = vcmask 1022976   ;;  %vm17208_vm5 = vcmask 1014784   ;;  %vm17067_vm6 = vcmask 1006592   ;;  %vm17065_vm7 = vcmask 998400  }
   0x6   :  { %63 = vrot.lane.b32.xlu1 %v10412_v2, %s10314_s29  ;;  %44 = vrot.lane.b32.xlu0 %v10412_v2, %s10315_s30  ;;  %s10324_s18 = smov 117   ;;  %s10325_s19 = smov 116   ;;  %vm17053_vm8 = vcmask 990208   ;;  %vm17058_vm9 = vcmask 982016   ;;  %vm17031_vm10 = vcmask 973824   ;;  %vm17028_vm11 = vcmask 965632  }
   0x7   :  { %s10326_s20 = smov 115   ;;  %s10327_s21 = smov 114   ;;  %vm16927_vm12 = vcmask 957440   ;;  %vm16928_vm13 = vcmask 949248   ;;  %vm266_vm14 = vcmask 941056   ;;  %vm284_vm15 = vcmask 932864  }
   0x8   :  { %s10328_s22 = smov 113   ;;  %s10329_s23 = smov 112  }
   0x9   :  { %s10330_s24 = smov 111   ;;  %s10331_s25 = smov 110  }
   0xa   :  { %81 = vrot.lane.b32.xlu1 %v10412_v2, %s10316_s11  ;;  %79 = vrot.lane.b32.xlu0 %v10401_v1, %s10316_s11  ;;  %s10332_s26 = smov 109   ;;  %s10333_s27 = smov 108  }
   0xb   :  { %s10334_s28 = smov 107   ;;  %s10335_s9 = smov 106  }
   0xc   :  { %s10336_s10 = smov 105   ;;  %s10340_s3 = smov 3  }
   0xe   :  { %99 = vrot.lane.b32.xlu1 %v10412_v2, %s16929_s0  ;;  %97 = vrot.lane.b32.xlu0 %v10401_v1, %s16929_s0 }
  0x12   :  { %117 = vrot.lane.b32.xlu1 %v10412_v2, %s10318_s12  ;;  %115 = vrot.lane.b32.xlu0 %v10401_v1, %s10318_s12 }
  0x16   :  { %135 = vrot.lane.b32.xlu1 %v10412_v2, %s10319_s13  ;;  %133 = vrot.lane.b32.xlu0 %v10401_v1, %s10319_s13 }
  0x1a   :  { %153 = vrot.lane.b32.xlu1 %v10412_v2, %s10320_s14  ;;  %151 = vrot.lane.b32.xlu0 %v10401_v1, %s10320_s14 }
  0x1e   :  { %171 = vrot.lane.b32.xlu1 %v10412_v2, %s10321_s15  ;;  %169 = vrot.lane.b32.xlu0 %v10401_v1, %s10321_s15 }
  0x22   :  { %189 = vrot.lane.b32.xlu1 %v10412_v2, %s10322_s16  ;;  %187 = vrot.lane.b32.xlu0 %v10401_v1, %s10322_s16 }
  0x26   :  { %207 = vrot.lane.b32.xlu1 %v10412_v2, %s10323_s17  ;;  %205 = vrot.lane.b32.xlu0 %v10401_v1, %s10323_s17 }
  0x2a   :  { %225 = vrot.lane.b32.xlu1 %v10412_v2, %s10324_s18  ;;  %223 = vrot.lane.b32.xlu0 %v10401_v1, %s10324_s18 }
  0x2e   :  { %243 = vrot.lane.b32.xlu1 %v10412_v2, %s10325_s19  ;;  %241 = vrot.lane.b32.xlu0 %v10401_v1, %s10325_s19 }
  0x32   :  { %261 = vrot.lane.b32.xlu1 %v10412_v2, %s10326_s20  ;;  %259 = vrot.lane.b32.xlu0 %v10401_v1, %s10326_s20  ;;  %s10337_s20 = smov 104  }
  0x36   :  { %279 = vrot.lane.b32.xlu1 %v10412_v2, %s10327_s21  ;;  %277 = vrot.lane.b32.xlu0 %v10401_v1, %s10327_s21 }
  0x3a   :  { %297 = vrot.lane.b32.xlu1 %v10412_v2, %s10328_s22  ;;  %295 = vrot.lane.b32.xlu0 %v10401_v1, %s10328_s22  ;;  %s10345_s22 = smov 12  }
  0x3e   :  { %315 = vrot.lane.b32.xlu1 %v10412_v2, %s10329_s23  ;;  %313 = vrot.lane.b32.xlu0 %v10401_v1, %s10329_s23  ;;  %s10346_s23 = smov 11  }
  0x42   :  { %333 = vrot.lane.b32.xlu1 %v10412_v2, %s10330_s24  ;;  %331 = vrot.lane.b32.xlu0 %v10401_v1, %s10330_s24  ;;  %s10347_s24 = smov 10  }
  0x46   :  { %351 = vrot.lane.b32.xlu1 %v10412_v2, %s10331_s25  ;;  %349 = vrot.lane.b32.xlu0 %v10401_v1, %s10331_s25  ;;  %s10341_s25 = smov 4  }
  0x4a   :  { %369 = vrot.lane.b32.xlu1 %v10412_v2, %s10332_s26  ;;  %367 = vrot.lane.b32.xlu0 %v10401_v1, %s10332_s26  ;;  %s10342_s26 = smov 1  }
  0x4e   :  { %387 = vrot.lane.b32.xlu1 %v10412_v2, %s10333_s27  ;;  %385 = vrot.lane.b32.xlu0 %v10401_v1, %s10333_s27  ;;  %s10343_s27 = smov 2  }
  0x52   :  { %405 = vrot.lane.b32.xlu1 %v10412_v2, %s10334_s28  ;;  %403 = vrot.lane.b32.xlu0 %v10401_v1, %s10334_s28  ;;  %s10348_s28 = smov 9  }
  0x56   :  { %423 = vrot.lane.b32.xlu1 %v10412_v2, %s10335_s9  ;;  %421 = vrot.lane.b32.xlu0 %v10401_v1, %s10335_s9  ;;  %s10349_s9 = smov 8  }
  0x5a   :  { %441 = vrot.lane.b32.xlu1 %v10412_v2, %s10336_s10  ;;  %439 = vrot.lane.b32.xlu0 %v10401_v1, %s10336_s10  ;;  %s10350_s10 = smov 7  }
  0x5e   :  { %459 = vrot.lane.b32.xlu1 %v10412_v2, %s10337_s20  ;;  %457 = vrot.lane.b32.xlu0 %v10401_v1, %s10337_s20  ;;  %s10351_s20 = smov 6  }
  0x62   :  { %521 = vperm.xlu0 %8973, %v517_v11   ;;  %526 = vperm.xlu1 %8974, %v518_v12  }
  0x66   :  { %8981 = vrot.lane.b32.xlu1 %v10338_v4, %s10340_s3  ;;  %8976 = vrot.lane.b32.xlu0 %v10338_v4, %s10341_s25 }
  0x6a   :  { %8991 = vrot.lane.b32.xlu1 %v10338_v4, %s10342_s26  ;;  %8986 = vrot.lane.b32.xlu0 %v10338_v4, %s10343_s27 }
  0x74   :  { %v62_v5 = vpop.permute.xlu1 %61  ;;  %v43_v6 = vpop.permute.xlu0 %42 }
  0x75   :  { %v65_v7 = vrot.slane %v62_v5, 1  ;;  %v46_v13 = vrot.slane %v43_v6, 1 }
  0x78   :  { %v64_v8 = vpop.permute.xlu1 %63  ;;  %v45_v9 = vpop.permute.xlu0 %44 }
  0x79   :  { %v66_v14 = vrot.slane %v64_v8, 1  ;;  %v47_v15 = vrot.slane %v45_v9, 1 }
  0x7b   :  { %v67_v16 = vsel %vm48_vm1, %v65_v7, %v66_v14  ;;  %v70_v17 = vsel %vm17216_vm2, %v64_v8, %v66_v14  ;;  %v49_v18 = vsel %vm48_vm1, %v46_v13, %v47_v15  ;;  %v52_v19 = vsel %vm50_vm3, %v45_v9, %v47_v15 }
  0x7c   :  { %v69_v20 = vsel %vm17216_vm2, %v62_v5, %v67_v16  ;;  %77 = vst.msk [vmem:[#allocation2 + $0x42] ss:$8 sm:$0x3] %vm10415_vm0, %v70_v17  ;;  %v51_v21 = vsel %vm50_vm3, %v43_v6, %v49_v18  ;;  %59 = vst.msk [vmem:[#allocation2 + $0x41] ss:$8 sm:$0x3] %vm10415_vm0, %v52_v19  ;;  %v82_v22 = vpop.permute.xlu1 %81  ;;  %v80_v23 = vpop.permute.xlu0 %79 }
  0x7d   :  { %74 = vst [vmem:[#allocation2 + $0x2] ss:$8 sm:$0xf] %v69_v20  ;;  %75 = vst [vmem:[#allocation2 + $0x2] ss:$8 sm:$0xf0] %v69_v20 }
  0x7e   :  { %56 = vst [vmem:[#allocation2 + $0x1] ss:$8 sm:$0xf] %v51_v21  ;;  %57 = vst [vmem:[#allocation2 + $0x1] ss:$8 sm:$0xf0] %v51_v21 }
  0x7f   :  { %v84_v24 = vrot.slane %v82_v22, 1  ;;  %v83_v25 = vrot.slane %v80_v23, 1 }
  0x80   :  { %v100_v29 = vpop.permute.xlu1 %99  ;;  %v98_v30 = vpop.permute.xlu0 %97 }
  0x81   :  { %v88_v26 = vsel %vm17215_vm4, %v82_v22, %v84_v24  ;;  %v85_v27 = vsel %vm48_vm1, %v83_v25, %v84_v24  ;;  %v102_v31 = vrot.slane %v100_v29, 1  ;;  %v101_v32 = vrot.slane %v98_v30, 1 }
  0x82   :  { %95 = vst.msk [vmem:[#allocation2 + $0x43] ss:$8 sm:$0x3] %vm10415_vm0, %v88_v26  ;;  %v87_v28 = vsel %vm17215_vm4, %v80_v23, %v85_v27 }
  0x83   :  { %92 = vst [vmem:[#allocation2 + $0x3] ss:$8 sm:$0xf] %v87_v28  ;;  %93 = vst [vmem:[#allocation2 + $0x3] ss:$8 sm:$0xf0] %v87_v28  ;;  %v106_v33 = vsel %vm17208_vm5, %v100_v29, %v102_v31  ;;  %v103_v34 = vsel %vm48_vm1, %v101_v32, %v102_v31 }
  0x84   :  { %113 = vst.msk [vmem:[#allocation2 + $0x44] ss:$8 sm:$0x3] %vm10415_vm0, %v106_v33  ;;  %v105_v35 = vsel %vm17208_vm5, %v98_v30, %v103_v34  ;;  %v118_v36 = vpop.permute.xlu1 %117  ;;  %v116_v37 = vpop.permute.xlu0 %115 }
  0x85   :  { %110 = vst [vmem:[#allocation2 + $0x4] ss:$8 sm:$0xf] %v105_v35  ;;  %111 = vst [vmem:[#allocation2 + $0x4] ss:$8 sm:$0xf0] %v105_v35 }
  0x86   :  { %v120_v38 = vrot.slane %v118_v36, 1  ;;  %v119_v39 = vrot.slane %v116_v37, 1 }
  0x88   :  { %v124_v40 = vsel %vm17067_vm6, %v118_v36, %v120_v38  ;;  %v121_v41 = vsel %vm48_vm1, %v119_v39, %v120_v38  ;;  %v136_v43 = vpop.permute.xlu1 %135  ;;  %v134_v44 = vpop.permute.xlu0 %133 }
  0x89   :  { %131 = vst.msk [vmem:[#allocation2 + $0x45] ss:$8 sm:$0x3] %vm10415_vm0, %v124_v40  ;;  %v123_v42 = vsel %vm17067_vm6, %v116_v37, %v121_v41  ;;  %v138_v45 = vrot.slane %v136_v43, 1  ;;  %v137_v46 = vrot.slane %v134_v44, 1  ;;  %vm2996_vm6 = vcmask 7168  }
  0x8a   :  { %128 = vst [vmem:[#allocation2 + $0x5] ss:$8 sm:$0xf] %v123_v42  ;;  %129 = vst [vmem:[#allocation2 + $0x5] ss:$8 sm:$0xf0] %v123_v42 }
  0x8b   :  { %v142_v47 = vsel %vm17065_vm7, %v136_v43, %v138_v45  ;;  %v139_v48 = vsel %vm48_vm1, %v137_v46, %v138_v45 }
  0x8c   :  { %149 = vst.msk [vmem:[#allocation2 + $0x46] ss:$8 sm:$0x3] %vm10415_vm0, %v142_v47  ;;  %v141_v49 = vsel %vm17065_vm7, %v134_v44, %v139_v48  ;;  %v154_v50 = vpop.permute.xlu1 %153  ;;  %v152_v51 = vpop.permute.xlu0 %151  ;;  %vm17169_vm7 = vcmask 15360  }
  0x8d   :  { %146 = vst [vmem:[#allocation2 + $0x6] ss:$8 sm:$0xf] %v141_v49  ;;  %147 = vst [vmem:[#allocation2 + $0x6] ss:$8 sm:$0xf0] %v141_v49 }
  0x8e   :  { %v156_v52 = vrot.slane %v154_v50, 1  ;;  %v155_v53 = vrot.slane %v152_v51, 1 }
  0x90   :  { %v160_v54 = vsel %vm17053_vm8, %v154_v50, %v156_v52  ;;  %v157_v55 = vsel %vm48_vm1, %v155_v53, %v156_v52  ;;  %v172_v57 = vpop.permute.xlu1 %171  ;;  %v170_v58 = vpop.permute.xlu0 %169 }
  0x91   :  { %167 = vst.msk [vmem:[#allocation2 + $0x47] ss:$8 sm:$0x3] %vm10415_vm0, %v160_v54  ;;  %v159_v56 = vsel %vm17053_vm8, %v152_v51, %v157_v55  ;;  %v174_v59 = vrot.slane %v172_v57, 1  ;;  %v173_v60 = vrot.slane %v170_v58, 1  ;;  %vm2549_vm8 = vcmask 31744  }
  0x92   :  { %164 = vst [vmem:[#allocation2 + $0x7] ss:$8 sm:$0xf] %v159_v56  ;;  %165 = vst [vmem:[#allocation2 + $0x7] ss:$8 sm:$0xf0] %v159_v56 }
  0x93   :  { %v178_v61 = vsel %vm17058_vm9, %v172_v57, %v174_v59  ;;  %v175_v62 = vsel %vm48_vm1, %v173_v60, %v174_v59 }
  0x94   :  { %185 = vst.msk [vmem:[#allocation2 + $0x90] ss:$8 sm:$0x3] %vm10415_vm0, %v178_v61  ;;  %v177_v63 = vsel %vm17058_vm9, %v170_v58, %v175_v62  ;;  %v190_v1 = vpop.permute.xlu1 %189  ;;  %v188_v2 = vpop.permute.xlu0 %187  ;;  %vm17168_vm9 = vcmask 23552  }
  0x95   :  { %182 = vst [vmem:[#allocation2 + $0x50] ss:$8 sm:$0xf] %v177_v63  ;;  %183 = vst [vmem:[#allocation2 + $0x50] ss:$8 sm:$0xf0] %v177_v63 }
  0x96   :  { %v192_v5 = vrot.slane %v190_v1, 1  ;;  %v191_v6 = vrot.slane %v188_v2, 1 }
  0x98   :  { %v196_v7 = vsel %vm17031_vm10, %v190_v1, %v192_v5  ;;  %v193_v8 = vsel %vm48_vm1, %v191_v6, %v192_v5  ;;  %v208_v10 = vpop.permute.xlu1 %207  ;;  %v206_v11 = vpop.permute.xlu0 %205 }
  0x99   :  { %203 = vst.msk [vmem:[#allocation2 + $0x91] ss:$8 sm:$0x3] %vm10415_vm0, %v196_v7  ;;  %v195_v9 = vsel %vm17031_vm10, %v188_v2, %v193_v8  ;;  %v210_v12 = vrot.slane %v208_v10, 1  ;;  %v209_v13 = vrot.slane %v206_v11, 1  ;;  %v478_v2 = vld [vmem:[#allocation2 + $0x8] sm:$0xff] }
  0x9a   :  { %200 = vst [vmem:[#allocation2 + $0x51] ss:$8 sm:$0xf] %v195_v9  ;;  %201 = vst [vmem:[#allocation2 + $0x51] ss:$8 sm:$0xf0] %v195_v9 }
  0x9b   :  { %v214_v14 = vsel %vm17028_vm11, %v208_v10, %v210_v12  ;;  %v211_v15 = vsel %vm48_vm1, %v209_v13, %v210_v12  ;;  %v480_v5 = vld [vmem:[#allocation2 + $0x18] sm:$0xff]  ;;  %vm2400_vm10 = vcmask 39936  }
  0x9c   :  { %221 = vst.msk [vmem:[#allocation2 + $0x92] ss:$8 sm:$0x3] %vm10415_vm0, %v214_v14  ;;  %v213_v16 = vsel %vm17028_vm11, %v206_v11, %v211_v15  ;;  %v226_v17 = vpop.permute.xlu1 %225  ;;  %v224_v18 = vpop.permute.xlu0 %223  ;;  %vm2251_vm11 = vcmask 48128  }
  0x9d   :  { %218 = vst [vmem:[#allocation2 + $0x52] ss:$8 sm:$0xf] %v213_v16  ;;  %219 = vst [vmem:[#allocation2 + $0x52] ss:$8 sm:$0xf0] %v213_v16 }
  0x9e   :  { %v228_v19 = vrot.slane %v226_v17, 1  ;;  %v227_v20 = vrot.slane %v224_v18, 1  ;;  %v477_v16 = vld [vmem:[#allocation2] sm:$0xff] }
  0xa0   :  { %v232_v21 = vsel %vm16927_vm12, %v226_v17, %v228_v19  ;;  %v229_v22 = vsel %vm48_vm1, %v227_v20, %v228_v19  ;;  %v244_v24 = vpop.permute.xlu1 %243  ;;  %v242_v25 = vpop.permute.xlu0 %241  ;;  %v479_v17 = vld [vmem:[#allocation2 + $0x10] sm:$0xff] }
  0xa1   :  { %239 = vst.msk [vmem:[#allocation2 + $0x93] ss:$8 sm:$0x3] %vm10415_vm0, %v232_v21  ;;  %v231_v23 = vsel %vm16927_vm12, %v224_v18, %v229_v22  ;;  %v246_v26 = vrot.slane %v244_v24, 1  ;;  %v245_v27 = vrot.slane %v242_v25, 1  ;;  %vm302_vm12 = vcmask 924672  }
  0xa2   :  { %236 = vst [vmem:[#allocation2 + $0x53] ss:$8 sm:$0xf] %v231_v23  ;;  %237 = vst [vmem:[#allocation2 + $0x53] ss:$8 sm:$0xf0] %v231_v23 }
  0xa3   :  { %v250_v28 = vsel %vm16928_vm13, %v244_v24, %v246_v26  ;;  %v247_v29 = vsel %vm48_vm1, %v245_v27, %v246_v26 }
  0xa4   :  { %257 = vst.msk [vmem:[#allocation2 + $0x94] ss:$8 sm:$0x3] %vm10415_vm0, %v250_v28  ;;  %v249_v30 = vsel %vm16928_vm13, %v242_v25, %v247_v29  ;;  %v262_v31 = vpop.permute.xlu1 %261  ;;  %v260_v32 = vpop.permute.xlu0 %259  ;;  %vm17027_vm13 = vmmov 1  }
  0xa5   :  { %254 = vst [vmem:[#allocation2 + $0x54] ss:$8 sm:$0xf] %v249_v30  ;;  %255 = vst [vmem:[#allocation2 + $0x54] ss:$8 sm:$0xf0] %v249_v30 }
  0xa6   :  { %v264_v33 = vrot.slane %v262_v31, 1  ;;  %v263_v34 = vrot.slane %v260_v32, 1 }
  0xa8   :  { %v268_v35 = vsel %vm266_vm14, %v262_v31, %v264_v33  ;;  %v265_v36 = vsel %vm48_vm1, %v263_v34, %v264_v33  ;;  %v280_v38 = vpop.permute.xlu1 %279  ;;  %v278_v39 = vpop.permute.xlu0 %277 }
  0xa9   :  { %275 = vst.msk [vmem:[#allocation2 + $0x95] ss:$8 sm:$0x3] %vm10415_vm0, %v268_v35  ;;  %v267_v37 = vsel %vm266_vm14, %v260_v32, %v265_v36  ;;  %v282_v40 = vrot.slane %v280_v38, 1  ;;  %v281_v41 = vrot.slane %v278_v39, 1  ;;  %vm320_vm14 = vcmask 916480  }
  0xaa   :  { %272 = vst [vmem:[#allocation2 + $0x55] ss:$8 sm:$0xf] %v267_v37  ;;  %273 = vst [vmem:[#allocation2 + $0x55] ss:$8 sm:$0xf0] %v267_v37 }
  0xab   :  { %v286_v42 = vsel %vm284_vm15, %v280_v38, %v282_v40  ;;  %v283_v43 = vsel %vm48_vm1, %v281_v41, %v282_v40 }
  0xac   :  { %293 = vst.msk [vmem:[#allocation2 + $0x96] ss:$8 sm:$0x3] %vm10415_vm0, %v286_v42  ;;  %v285_v44 = vsel %vm284_vm15, %v278_v39, %v283_v43  ;;  %v298_v45 = vpop.permute.xlu1 %297  ;;  %v296_v46 = vpop.permute.xlu0 %295  ;;  %vm338_vm15 = vcmask 908288  }
  0xad   :  { %290 = vst [vmem:[#allocation2 + $0x56] ss:$8 sm:$0xf] %v285_v44  ;;  %291 = vst [vmem:[#allocation2 + $0x56] ss:$8 sm:$0xf0] %v285_v44 }
  0xae   :  { %v300_v47 = vrot.slane %v298_v45, 1  ;;  %v299_v48 = vrot.slane %v296_v46, 1 }
  0xb0   :  { %v304_v49 = vsel %vm302_vm12, %v298_v45, %v300_v47  ;;  %v301_v50 = vsel %vm48_vm1, %v299_v48, %v300_v47  ;;  %v316_v52 = vpop.permute.xlu1 %315  ;;  %v314_v53 = vpop.permute.xlu0 %313 }
  0xb1   :  { %311 = vst.msk [vmem:[#allocation2 + $0x97] ss:$8 sm:$0x3] %vm10415_vm0, %v304_v49  ;;  %v303_v51 = vsel %vm302_vm12, %v296_v46, %v301_v50  ;;  %v318_v54 = vrot.slane %v316_v52, 1  ;;  %v317_v55 = vrot.slane %v314_v53, 1  ;;  %vm356_vm12 = vcmask 900096  }
  0xb2   :  { %308 = vst [vmem:[#allocation2 + $0x57] ss:$8 sm:$0xf] %v303_v51  ;;  %309 = vst [vmem:[#allocation2 + $0x57] ss:$8 sm:$0xf0] %v303_v51 }
  0xb3   :  { %v322_v56 = vsel %vm320_vm14, %v316_v52, %v318_v54  ;;  %v319_v57 = vsel %vm48_vm1, %v317_v55, %v318_v54 }
  0xb4   :  { %329 = vst.msk [vmem:[#allocation2 + $0xe0] ss:$8 sm:$0x3] %vm10415_vm0, %v322_v56  ;;  %v321_v58 = vsel %vm320_vm14, %v314_v53, %v319_v57  ;;  %v334_v59 = vpop.permute.xlu1 %333  ;;  %v332_v60 = vpop.permute.xlu0 %331  ;;  %vm374_vm14 = vcmask 891904  }
  0xb5   :  { %326 = vst [vmem:[#allocation2 + $0xa0] ss:$8 sm:$0xf] %v321_v58  ;;  %327 = vst [vmem:[#allocation2 + $0xa0] ss:$8 sm:$0xf0] %v321_v58 }
  0xb6   :  { %v336_v61 = vrot.slane %v334_v59, 1  ;;  %v335_v62 = vrot.slane %v332_v60, 1 }
  0xb8   :  { %v340_v63 = vsel %vm338_vm15, %v334_v59, %v336_v61  ;;  %v337_v1 = vsel %vm48_vm1, %v335_v62, %v336_v61  ;;  %v352_v7 = vpop.permute.xlu1 %351  ;;  %v350_v8 = vpop.permute.xlu0 %349 }
  0xb9   :  { %347 = vst.msk [vmem:[#allocation2 + $0xe1] ss:$8 sm:$0x3] %vm10415_vm0, %v340_v63  ;;  %v339_v6 = vsel %vm338_vm15, %v332_v60, %v337_v1  ;;  %v488_v9 = vld [vmem:[#allocation2 + $0x58] sm:$0xff]  ;;  %v490_v10 = vld [vmem:[#allocation2 + $0x68] sm:$0xff]  ;;  %v487_v11 = vld [vmem:[#allocation2 + $0x50] sm:$0xff] }
  0xba   :  { %344 = vst [vmem:[#allocation2 + $0xa1] ss:$8 sm:$0xf] %v339_v6  ;;  %345 = vst [vmem:[#allocation2 + $0xa1] ss:$8 sm:$0xf0] %v339_v6  ;;  %v8222_v14 = vpack.c.bf16 %v488_v9, %v478_v2  ;;  %v8232_v15 = vpack.c.bf16 %v490_v10, %v480_v5  ;;  %v8224_v19 = vpack.c.bf16 %v487_v11, %v477_v16 }
  0xbb   :  { %v354_v12 = vrot.slane %v352_v7, 1  ;;  %v353_v13 = vrot.slane %v350_v8, 1  ;;  %v489_v18 = vld [vmem:[#allocation2 + $0x60] sm:$0xff]  ;;  %vm392_vm15 = vcmask 883712   ;;  %v492_v6 = vld [vmem:[#allocation2 + $0x78] sm:$0xff] }
  0xbc   :  { %v8234_v20 = vpack.c.bf16 %v489_v18, %v479_v17  ;;  %8223 = vmatprep.subr.bf16.mxu0 %v8222_v14  ;;  %8233 = vmatprep.subr.bf16.mxu1 %v8232_v15  ;;  %v370_v24 = vpop.permute.xlu1 %369  ;;  %v368_v25 = vpop.permute.xlu0 %367 }
  0xbd   :  { %v358_v21 = vsel %vm356_vm12, %v352_v7, %v354_v12  ;;  %v355_v22 = vsel %vm48_vm1, %v353_v13, %v354_v12  ;;  %8225 = vmatpush1.bf16.msra.mxu0 %v8224_v19  ;;  %v372_v26 = vrot.slane %v370_v24, 1  ;;  %v371_v27 = vrot.slane %v368_v25, 1  ;;  %v494_v7 = vld [vmem:[#allocation2 + $0x88] sm:$0xff] }
  0xbe   :  { %365 = vst.msk [vmem:[#allocation2 + $0xe2] ss:$8 sm:$0x3] %vm10415_vm0, %v358_v21  ;;  %v357_v23 = vsel %vm356_vm12, %v350_v8, %v355_v22  ;;  %8235 = vmatpush1.bf16.msra.mxu1 %v8234_v20  ;;  %vm410_vm12 = vcmask 875520   ;;  %v482_v19 = vld [vmem:[#allocation2 + $0x28] sm:$0xff]  ;;  %v484_v20 = vld [vmem:[#allocation2 + $0x38] sm:$0xff] }
  0xbf   :  { %362 = vst [vmem:[#allocation2 + $0xa2] ss:$8 sm:$0xf] %v357_v23  ;;  %363 = vst [vmem:[#allocation2 + $0xa2] ss:$8 sm:$0xf0] %v357_v23  ;;  %v376_v28 = vsel %vm374_vm14, %v370_v24, %v372_v26  ;;  %v373_v29 = vsel %vm48_vm1, %v371_v27, %v372_v26  ;;  %v8242_v21 = vpack.c.bf16 %v492_v6, %v482_v19 }
  0xc0   :  { %383 = vst.msk [vmem:[#allocation2 + $0xe3] ss:$8 sm:$0x3] %vm10415_vm0, %v376_v28  ;;  %v375_v30 = vsel %vm374_vm14, %v368_v25, %v373_v29  ;;  %v388_v31 = vpop.permute.xlu1 %387  ;;  %v386_v32 = vpop.permute.xlu0 %385  ;;  %vm428_vm14 = vcmask 867328   ;;  %v8252_v22 = vpack.c.bf16 %v494_v7, %v484_v20  ;;  %v491_v23 = vld [vmem:[#allocation2 + $0x70] sm:$0xff]  ;;  %v493_v24 = vld [vmem:[#allocation2 + $0x80] sm:$0xff] }
  0xc1   :  { %380 = vst [vmem:[#allocation2 + $0xa3] ss:$8 sm:$0xf] %v375_v30  ;;  %381 = vst [vmem:[#allocation2 + $0xa3] ss:$8 sm:$0xf0] %v375_v30 }
  0xc2   :  { %v390_v33 = vrot.slane %v388_v31, 1  ;;  %v389_v34 = vrot.slane %v386_v32, 1  ;;  %v475_v25 = vld [vmem:[%s16920_s2] sm:$0xff]  ;;  %v483_v29 = vld [vmem:[#allocation2 + $0x30] sm:$0xff] }
  0xc3   :  { %v481_v28 = vld [vmem:[#allocation2 + $0x20] sm:$0xff] }
  0xc4   :  { %v394_v35 = vsel %vm392_vm15, %v388_v31, %v390_v33  ;;  %v391_v36 = vsel %vm48_vm1, %v389_v34, %v390_v33  ;;  %v406_v38 = vpop.permute.xlu1 %405  ;;  %v404_v39 = vpop.permute.xlu0 %403  ;;  %v8244_v30 = vpack.c.bf16 %v491_v23, %v481_v28  ;;  %v8254_v31 = vpack.c.bf16 %v493_v24, %v483_v29 }
  0xc5   :  { %401 = vst.msk [vmem:[#allocation2 + $0xe4] ss:$8 sm:$0x3] %vm10415_vm0, %v394_v35  ;;  %v393_v37 = vsel %vm392_vm15, %v386_v32, %v391_v36  ;;  %v408_v40 = vrot.slane %v406_v38, 1  ;;  %v407_v41 = vrot.slane %v404_v39, 1  ;;  %vm446_vm15 = vcmask 859136  }
  0xc6   :  { %398 = vst [vmem:[#allocation2 + $0xa4] ss:$8 sm:$0xf] %v393_v37  ;;  %399 = vst [vmem:[#allocation2 + $0xa4] ss:$8 sm:$0xf0] %v393_v37 }
  0xc7   :  { %v412_v42 = vsel %vm410_vm12, %v406_v38, %v408_v40  ;;  %v409_v43 = vsel %vm48_vm1, %v407_v41, %v408_v40  ;;  %v476_v38 = vld [vmem:[%s16920_s2 + $0x8] sm:$0xff]  ;;  %s10352_s2 = smov 5  }
  0xc8   :  { %419 = vst.msk [vmem:[#allocation2 + $0xe5] ss:$8 sm:$0x3] %vm10415_vm0, %v412_v42  ;;  %v411_v44 = vsel %vm410_vm12, %v404_v39, %v409_v43  ;;  %v424_v45 = vpop.permute.xlu1 %423  ;;  %v422_v46 = vpop.permute.xlu0 %421  ;;  %vm464_vm12 = vcmask 850944   ;;  %v496_v39 = vld [vmem:[#allocation2 + $0x98] sm:$0xff] }
  0xc9   :  { %416 = vst [vmem:[#allocation2 + $0xa5] ss:$8 sm:$0xf] %v411_v44  ;;  %417 = vst [vmem:[#allocation2 + $0xa5] ss:$8 sm:$0xf0] %v411_v44 }
  0xca   :  { %v426_v47 = vrot.slane %v424_v45, 1  ;;  %v425_v48 = vrot.slane %v422_v46, 1  ;;  %v486_v44 = vld [vmem:[#allocation2 + $0x48] sm:$0xff] }
  0xcc   :  { %v430_v49 = vsel %vm428_vm14, %v424_v45, %v426_v47  ;;  %v427_v50 = vsel %vm48_vm1, %v425_v48, %v426_v47  ;;  %v442_v52 = vpop.permute.xlu1 %441  ;;  %v440_v53 = vpop.permute.xlu0 %439  ;;  %v8262_v45 = vpack.c.bf16 %v496_v39, %v486_v44  ;;  %v485_v48 = vld [vmem:[#allocation2 + $0x40] sm:$0xff] }
  0xcd   :  { %437 = vst.msk [vmem:[#allocation2 + $0xe6] ss:$8 sm:$0x3] %vm10415_vm0, %v430_v49  ;;  %v429_v51 = vsel %vm428_vm14, %v422_v46, %v427_v50  ;;  %v444_v54 = vrot.slane %v442_v52, 1  ;;  %v443_v55 = vrot.slane %v440_v53, 1  ;;  %vm536_vm14 = vcmask 1040384  }
  0xce   :  { %434 = vst [vmem:[#allocation2 + $0xa6] ss:$8 sm:$0xf] %v429_v51  ;;  %435 = vst [vmem:[#allocation2 + $0xa6] ss:$8 sm:$0xf0] %v429_v51 }
  0xcf   :  { %v448_v56 = vsel %vm446_vm15, %v442_v52, %v444_v54  ;;  %v445_v57 = vsel %vm48_vm1, %v443_v55, %v444_v54  ;;  %v495_v46 = vld [vmem:[#allocation2 + $0x90] sm:$0xff] }
  0xd0   :  { %455 = vst.msk [vmem:[#allocation2 + $0xe7] ss:$8 sm:$0x3] %vm10415_vm0, %v448_v56  ;;  %v447_v58 = vsel %vm446_vm15, %v440_v53, %v445_v57  ;;  %v460_v59 = vpop.permute.xlu1 %459  ;;  %v458_v60 = vpop.permute.xlu0 %457  ;;  %vm10606_vm15 = vmpackc.low %vm536_vm14, %vm17027_vm13  ;;  %v8264_v49 = vpack.c.bf16 %v495_v46, %v485_v48  ;;  %vm1506_vm14 = vcmask 89088   ;;  %vm2102_vm13 = vcmask 56320  }
  0xd1   :  { %452 = vst [vmem:[#allocation2 + $0xa7] ss:$8 sm:$0xf] %v447_v58  ;;  %453 = vst [vmem:[#allocation2 + $0xa7] ss:$8 sm:$0xf0] %v447_v58 }
  0xd2   :  { %v462_v61 = vrot.slane %v460_v59, 1  ;;  %v461_v62 = vrot.slane %v458_v60, 1 }
  0xd4   :  { %v466_v63 = vsel %vm464_vm12, %v460_v59, %v462_v61  ;;  %v463_v1 = vsel %vm48_vm1, %v461_v62, %v462_v61  ;;  %vm1244_vm1 = vcmask 1048560  }
  0xd5   :  { %473 = vst.msk [vmem:[#allocation2 + $0x130] ss:$8 sm:$0x3] %vm10415_vm0, %v466_v63  ;;  %v465_v2 = vsel %vm464_vm12, %v458_v60, %v463_v1  ;;  %vm529_vm0 = vcmask 203776   ;;  %vm1357_vm12 = vcmask 97280  }
  0xd6   :  { %470 = vst [vmem:[#allocation2 + $0xf0] ss:$8 sm:$0xf] %v465_v2  ;;  %471 = vst [vmem:[#allocation2 + $0xf0] ss:$8 sm:$0xf0] %v465_v2 }
  0xd7   :  { %v506_v50 = vld [vmem:[#allocation2 + $0xe8] sm:$0xff]  ;;  %v505_v53 = vld [vmem:[#allocation2 + $0xe0] sm:$0xff]  ;;  %1245 = vst.msk [vmem:[#allocation3 + $0x50] sm:$0xff] %vm1244_vm1, %v10338_v4  ;;  %1247 = vst.msk [vmem:[#allocation3 + $0xb0] sm:$0xff] %vm1244_vm1, %v10338_v4  ;;  %vm17139_vm1 = vcmask 64512  }
  0xd8   :  { %v498_v8 = vld [vmem:[#allocation2 + $0xa8] sm:$0xff]  ;;  %v500_v9 = vld [vmem:[#allocation2 + $0xb8] sm:$0xff]  ;;  %v497_v10 = vld [vmem:[#allocation2 + $0xa0] sm:$0xff] }
  0xd9   :  { %v499_v16 = vld [vmem:[#allocation2 + $0xb0] sm:$0xff]  ;;  %v502_v32 = vld [vmem:[#allocation2 + $0xc8] sm:$0xff]  ;;  %v504_v33 = vld [vmem:[#allocation2 + $0xd8] sm:$0xff] }
  0xda   :  { %v501_v40 = vld [vmem:[#allocation2 + $0xc0] sm:$0xff]  ;;  %v503_v41 = vld [vmem:[#allocation2 + $0xd0] sm:$0xff] }
  0xdc   :  { %v516_v47 = vld [vmem:[#allocation2 + $0x138] sm:$0x1]  ;;  %v515_v52 = vld [vmem:[#allocation2 + $0x130] sm:$0x1] }
  0xdd   :  { %v508_v11 = vld [vmem:[#allocation2 + $0xf8] sm:$0x1]  ;;  %v510_v12 = vld [vmem:[#allocation2 + $0x108] sm:$0x1]  ;;  %v507_v13 = vld [vmem:[#allocation2 + $0xf0] sm:$0x1]  ;;  %v8266_v51 = vpack.c.bf16 %v516_v47, %v506_v50  ;;  %v8269_v54 = vpack.c.bf16 %v515_v52, %v505_v53 }
  0xde   :  { %v8226_v3 = vpack.c.bf16 %v508_v11, %v498_v8  ;;  %v8236_v14 = vpack.c.bf16 %v510_v12, %v500_v9  ;;  %v8229_v15 = vpack.c.bf16 %v507_v13, %v497_v10  ;;  %v509_v17 = vld [vmem:[#allocation2 + $0x100] sm:$0x1]  ;;  %v512_v26 = vld [vmem:[#allocation2 + $0x118] sm:$0x1]  ;;  %v514_v27 = vld [vmem:[#allocation2 + $0x128] sm:$0x1] }
  0xdf   :  { %v8239_v18 = vpack.c.bf16 %v509_v17, %v499_v16  ;;  %v8246_v34 = vpack.c.bf16 %v512_v26, %v502_v32  ;;  %v8256_v35 = vpack.c.bf16 %v514_v27, %v504_v33  ;;  %v511_v36 = vld [vmem:[#allocation2 + $0x110] sm:$0x1]  ;;  %v513_v37 = vld [vmem:[#allocation2 + $0x120] sm:$0x1] }
  0xe0   :  { %8228 = vmatprep.subr.msk.bf16.mxu0 %vm10606_vm15, %v8226_v3  ;;  %8238 = vmatprep.subr.msk.bf16.mxu1 %vm10606_vm15, %v8236_v14  ;;  %v8249_v42 = vpack.c.bf16 %v511_v36, %v501_v40  ;;  %v8259_v43 = vpack.c.bf16 %v513_v37, %v503_v41  ;;  %v10797_v40 = vshrl.u32 %v33_v0, 7 }
  0xe1   :  { %8231 = vmatpush1.bf16.msk.msra.mxu0 %vm10606_vm15, %v8229_v15  ;;  %8241 = vmatpush1.bf16.msk.msra.mxu1 %vm10606_vm15, %v8239_v18  ;;  %v10654_v55 = vpop.permute.xlu0 %521  ;;  %v527_v11 = vpop.permute.xlu1 %526 }
  0xe2   :  { %8243 = vmatprep.subr.bf16.mxu0 %v8242_v21  ;;  %8253 = vmatprep.subr.bf16.mxu1 %v8252_v22  ;;  %v1178_v47 = vsub.s32 1, %v10797_v40 }
  0xe4   :  { %8014 = vmatmul.mubr.msk.f32.vlgmr.msra.gmra.mrb[0].mxu0 %vm529_vm0, %v475_v25  ;;  %8018 = vmatmul.mubr.msk.f32.vlgmr.msra.gmra.mrb[0].mxu1 %vm529_vm0, %v475_v25 }
  0xe5   :  { %8245 = vmatpush1.bf16.msra.mxu0 %v8244_v30  ;;  %8255 = vmatpush1.bf16.msra.mxu1 %v8254_v31 }
  0xe6   :  { %8248 = vmatprep.subr.msk.bf16.mxu0 %vm10606_vm15, %v8246_v34  ;;  %8258 = vmatprep.subr.msk.bf16.mxu1 %vm10606_vm15, %v8256_v35  ;;  %v10788_v34 = vpop.permute.xlu1 %8981  ;;  %v10790_v35 = vpop.permute.xlu0 %8976 }
  0xe7   :  { %637 = vmatprep.mubr.f32.mxu0 %v10338_v4  ;;  %714 = vmatprep.mubr.f32.mxu1 %v10338_v4  ;;  %17364 = vst [vmem:[#allocation6_spill] sm:$0xff] %v10788_v34  ;;  %17365 = vst [vmem:[#allocation7_spill] sm:$0xff] %v10790_v35 }
  0xe8   :  { %8015 = vmatmul.mubr.msk.f32.gmra.mrb[2].mxu0 %vm529_vm0, %v476_v38  ;;  %8019 = vmatmul.mubr.msk.f32.gmra.mrb[2].mxu1 %vm529_vm0, %v476_v38 }
  0xe9   :  { %8251 = vmatpush1.bf16.msk.msra.mxu0 %vm10606_vm15, %v8249_v42  ;;  %8261 = vmatpush1.bf16.msk.msra.mxu1 %vm10606_vm15, %v8259_v43  ;;  %v1174_v43 = vsub.s32 0, %v10797_v40 }
  0xea   :  { %8263 = vmatprep.subr.bf16.mxu0 %v8262_v45  ;;  %785 = vmatprep.mubr.f32.mxu0 %v10338_v4  ;;  %v10792_v36 = vpop.permute.xlu1 %8991  ;;  %v10794_v37 = vpop.permute.xlu0 %8986  ;;  %v10806_v45 = vld [vmem:[%s16921_s1] sm:$0xff] }
  0xeb   :  { %862 = vmatprep.mubr.f32.mxu1 %v10338_v4  ;;  %17366 = vst [vmem:[#allocation8_spill] sm:$0xff] %v10792_v36  ;;  %17367 = vst [vmem:[#allocation9_spill] sm:$0xff] %v10794_v37 }
  0xec   :  { %8022 = vmatmul.mubr.msk.f32.vlgmr.msra.gmra.mrb[4].mxu0 %vm529_vm0, %v475_v25  ;;  %8026 = vmatmul.mubr.msk.f32.vlgmr.msra.gmra.mrb[4].mxu1 %vm529_vm0, %v475_v25 }
  0xed   :  { %8265 = vmatpush1.bf16.msra.mxu0 %v8264_v49  ;;  %791 = vmatprep.mubr.f32.mxu0 %v10338_v4  ;;  %v1175_v49 = vrot.slane %v10806_v45, %v1174_v43 }
  0xee   :  { %8268 = vmatprep.subr.msk.bf16.mxu0 %vm10606_vm15, %v8266_v51  ;;  %868 = vmatprep.mubr.f32.mxu1 %v10338_v4  ;;  %v1182_v51 = vsub.s32 2, %v10797_v40 }
  0xf0   :  { %8023 = vmatmul.mubr.msk.f32.gmra.mrb[6].mxu0 %vm529_vm0, %v476_v38  ;;  %8027 = vmatmul.mubr.msk.f32.gmra.mrb[6].mxu1 %vm529_vm0, %v476_v38 }
  0xf1   :  { %8271 = vmatpush1.bf16.msk.msra.mxu0 %vm10606_vm15, %v8269_v54  ;;  %939 = vmatprep.mubr.f32.mxu0 %v10338_v4  ;;  %vm1655_vm15 = vcmask 80896  }
  0xf4   :  { %8030 = vmatmul.mubr.msk.f32.vlgmr.msra.gmra.mrb[8].mxu0 %vm529_vm0, %v475_v25 }
  0xf5   :  { %945 = vmatprep.mubr.f32.mxu0 %v10338_v4 }
  0xf8   :  { %8031 = vmatmul.mubr.msk.f32.gmra.mrb[10].mxu0 %vm529_vm0, %v476_v38  ;;  %vm17144_vm0 = vcmask 72704  }
 0x1b7   :  { %v633_v56 = vpop.f32.mrb[0].mxu0  ;;  %v710_v57 = vpop.f32.mrb[0].mxu1 }
 0x1b8   :  { %v10657_v58 = vadd.f32 %v633_v56, %v10654_v55  ;;  %v635_v59 = vpop.f32.mrb[1].mxu0  ;;  %v712_v60 = vpop.f32.mrb[1].mxu1  ;;  %v10667_v1 = vadd.f32 %v710_v57, %v10654_v55  ;;  %v1179_v56 = vrot.slane %v10806_v45, %v1178_v47 }
 0x1b9   :  { %v10660_v61 = vadd.f32 %v635_v59, %v10654_v55  ;;  %v10670_v6 = vadd.f32 %v712_v60, %v10654_v55 }
 0x1ba   :  { %972 = vrot.lane.b32.xlu1 %v10657_v58, %s10315_s30 }
 0x1bb   :  { %974 = vrot.lane.b32.xlu0 %v10660_v61, %s10315_s30  ;;  %v639_v62 = vpop.f32.mrb[2].mxu0  ;;  %v716_v63 = vpop.f32.mrb[2].mxu1 }
 0x1bc   :  { %v641_v2 = vpop.f32.mrb[3].mxu0  ;;  %v718_v5 = vpop.f32.mrb[3].mxu1  ;;  %v10682_v15 = vadd.f32 %v639_v62, %v527_v11  ;;  %v10690_v19 = vadd.f32 %v716_v63, %v527_v11  ;;  %v1183_v62 = vrot.slane %v10806_v45, %v1182_v51 }
 0x1bd   :  { %v10686_v17 = vadd.f32 %v641_v2, %v527_v11  ;;  %v10694_v20 = vadd.f32 %v718_v5, %v527_v11 }
 0x1be   :  { %976 = vrot.lane.b32.xlu1 %v10667_v1, %s10315_s30 }
 0x1bf   :  { %v787_v7 = vpop.f32.mrb[4].mxu0  ;;  %v864_v8 = vpop.f32.mrb[4].mxu1  ;;  %978 = vrot.lane.b32.xlu0 %v10670_v6, %s10315_s30 }
 0x1c0   :  { %v789_v9 = vpop.f32.mrb[5].mxu0  ;;  %v866_v10 = vpop.f32.mrb[5].mxu1  ;;  %v10709_v23 = vadd.f32 %v787_v7, %v10654_v55  ;;  %v10719_v25 = vadd.f32 %v864_v8, %v10654_v55  ;;  %v10832_v7 = vld [vmem:[#allocation3] sm:$0xff] }
 0x1c1   :  { %v10712_v24 = vadd.f32 %v789_v9, %v10654_v55  ;;  %v10722_v26 = vadd.f32 %v866_v10, %v10654_v55 }
 0x1c2   :  { %1070 = vrot.lane.b32.xlu1 %v10657_v58, %s10314_s29 }
 0x1c3   :  { %1072 = vrot.lane.b32.xlu0 %v10660_v61, %s10314_s29  ;;  %v793_v12 = vpop.f32.mrb[6].mxu0  ;;  %v870_v13 = vpop.f32.mrb[6].mxu1 }
 0x1c4   :  { %v795_v3 = vpop.f32.mrb[7].mxu0  ;;  %v872_v14 = vpop.f32.mrb[7].mxu1  ;;  %v10734_v27 = vadd.f32 %v793_v12, %v527_v11  ;;  %v10742_v29 = vadd.f32 %v870_v13, %v527_v11 }
 0x1c5   :  { %v10738_v28 = vadd.f32 %v795_v3, %v527_v11  ;;  %v10746_v30 = vadd.f32 %v872_v14, %v527_v11 }
 0x1c6   :  { %1074 = vrot.lane.b32.xlu1 %v10667_v1, %s10314_s29 }
 0x1c7   :  { %v941_v16 = vpop.f32.mrb[8].mxu0  ;;  %1076 = vrot.lane.b32.xlu0 %v10670_v6, %s10314_s29 }
 0x1c8   :  { %v943_v18 = vpop.f32.mrb[9].mxu0  ;;  %v10763_v31 = vadd.f32 %v941_v16, %v10654_v55 }
 0x1c9   :  { %v10766_v32 = vadd.f32 %v943_v18, %v10654_v55 }
 0x1ca   :  { %992 = vrot.lane.b32.xlu1 %v10682_v15, %s10315_s30 }
 0x1cb   :  { %994 = vrot.lane.b32.xlu0 %v10686_v17, %s10315_s30  ;;  %v947_v21 = vpop.f32.mrb[10].mxu0 }
 0x1cc   :  { %v949_v22 = vpop.f32.mrb[11].mxu0  ;;  %v10776_v33 = vadd.f32 %v947_v21, %v527_v11 }
 0x1cd   :  { %v10778_v4 = vadd.f32 %v949_v22, %v527_v11 }
 0x1ce   :  { %996 = vrot.lane.b32.xlu1 %v10690_v19, %s10315_s30 }
 0x1cf   :  { %998 = vrot.lane.b32.xlu0 %v10694_v20, %s10315_s30 }
 0x1d2   :  { %1090 = vrot.lane.b32.xlu1 %v10682_v15, %s10314_s29 }
 0x1d3   :  { %1092 = vrot.lane.b32.xlu0 %v10686_v17, %s10314_s29 }
 0x1d6   :  { %1094 = vrot.lane.b32.xlu1 %v10690_v19, %s10314_s29 }
 0x1d7   :  { %1096 = vrot.lane.b32.xlu0 %v10694_v20, %s10314_s29 }
 0x1da   :  { %980 = vrot.lane.b32.xlu1 %v10709_v23, %s10315_s30 }
 0x1db   :  { %982 = vrot.lane.b32.xlu0 %v10712_v24, %s10315_s30 }
 0x1de   :  { %984 = vrot.lane.b32.xlu1 %v10719_v25, %s10315_s30 }
 0x1df   :  { %986 = vrot.lane.b32.xlu0 %v10722_v26, %s10315_s30 }
 0x1e2   :  { %1078 = vrot.lane.b32.xlu1 %v10709_v23, %s10314_s29 }
 0x1e3   :  { %1080 = vrot.lane.b32.xlu0 %v10712_v24, %s10314_s29 }
 0x1e6   :  { %1082 = vrot.lane.b32.xlu1 %v10719_v25, %s10314_s29 }
 0x1e7   :  { %1084 = vrot.lane.b32.xlu0 %v10722_v26, %s10314_s29 }
 0x1ea   :  { %1000 = vrot.lane.b32.xlu1 %v10734_v27, %s10315_s30 }
 0x1eb   :  { %1002 = vrot.lane.b32.xlu0 %v10738_v28, %s10315_s30 }
 0x1ee   :  { %1004 = vrot.lane.b32.xlu1 %v10742_v29, %s10315_s30 }
 0x1ef   :  { %1006 = vrot.lane.b32.xlu0 %v10746_v30, %s10315_s30 }
 0x1f2   :  { %1098 = vrot.lane.b32.xlu1 %v10734_v27, %s10314_s29 }
 0x1f3   :  { %1100 = vrot.lane.b32.xlu0 %v10738_v28, %s10314_s29 }
 0x1f6   :  { %1102 = vrot.lane.b32.xlu1 %v10742_v29, %s10314_s29 }
 0x1f7   :  { %1104 = vrot.lane.b32.xlu0 %v10746_v30, %s10314_s29 }
 0x1fa   :  { %988 = vrot.lane.b32.xlu1 %v10763_v31, %s10315_s30 }
 0x1fb   :  { %990 = vrot.lane.b32.xlu0 %v10766_v32, %s10315_s30 }
 0x1fe   :  { %1086 = vrot.lane.b32.xlu1 %v10763_v31, %s10314_s29 }
 0x1ff   :  { %1088 = vrot.lane.b32.xlu0 %v10766_v32, %s10314_s29 }
 0x202   :  { %1008 = vrot.lane.b32.xlu1 %v10776_v33, %s10315_s30 }
 0x203   :  { %1010 = vrot.lane.b32.xlu0 %v10778_v4, %s10315_s30 }
 0x206   :  { %1106 = vrot.lane.b32.xlu1 %v10776_v33, %s10314_s29 }
 0x207   :  { %1108 = vrot.lane.b32.xlu0 %v10778_v4, %s10314_s29 }
 0x22c   :  { %v973_v38 = vpop.permute.xlu1 %972 }
 0x22d   :  { %v975_v39 = vpop.permute.xlu0 %974 }
 0x22e   :  { %v1012_v44 = vsel %vm50_vm3, %v973_v38, %v975_v39 }
 0x22f   :  { %v1050_v48 = vmax.f32 %v10657_v58, %v1012_v44 }
 0x230   :  { %v977_v41 = vpop.permute.xlu1 %976 }
 0x231   :  { %v10799_v42 = vpop.permute.xlu0 %978  ;;  %v1013_v0 = vsel %vm50_vm3, %v975_v39, %v977_v41 }
 0x232   :  { %v1014_v52 = vsel %vm50_vm3, %v977_v41, %v10799_v42  ;;  %v1051_v55 = vmax.f32 %v10660_v61, %v1013_v0 }
 0x233   :  { %v1052_v58 = vmax.f32 %v10667_v1, %v1014_v52 }
 0x234   :  { %v1071_v46 = vpop.permute.xlu1 %1070 }
 0x235   :  { %v1073_v50 = vpop.permute.xlu0 %1072 }
 0x236   :  { %v1110_v53 = vsel %vm17216_vm2, %v1071_v46, %v1073_v50 }
 0x237   :  { %v1148_v54 = vmax.f32 %v1050_v48, %v1110_v53 }
 0x238   :  { %v1075_v57 = vpop.permute.xlu1 %1074 }
 0x239   :  { %v10823_v59 = vmul.f32 %v1175_v49, %v1148_v54  ;;  %v1111_v60 = vsel %vm17216_vm2, %v1073_v50, %v1075_v57  ;;  %v10827_v63 = vpop.permute.xlu0 %1076 }
 0x23a   :  { %v1149_v2 = vmax.f32 %v1051_v55, %v1111_v60  ;;  %v1112_v5 = vsel %vm17216_vm2, %v1075_v57, %v10827_v63  ;;  %v1186_v57 = vsub.s32 3, %v10797_v40  ;;  %v1190_v60 = vsub.s32 4, %v10797_v40 }
 0x23b   :  { %1249 = vst [vmem:[#allocation3 + $0x8] sm:$0xff] %v10823_v59  ;;  %v1150_v61 = vmax.f32 %v1052_v58, %v1112_v5  ;;  %v10836_v1 = vpack.i.bf16 %v10823_v59, %v10832_v7 }
 0x23c   :  { %v10838_v8 = vmul.f32 %v1179_v56, %v1149_v2  ;;  %v993_v9 = vpop.permute.xlu1 %992 }
 0x23d   :  { %v10840_v10 = vmul.f32 %v1183_v62, %v1150_v61  ;;  %v995_v11 = vpop.permute.xlu0 %994  ;;  %8996 = vrot.lane.b32.xlu1 %v10836_v1, %s10345_s22  ;;  %v10906_v61 = vrot.slane %v10806_v45, %v1186_v57 }
 0x23e   :  { %1250 = vst [vmem:[#allocation3 + $0x10] sm:$0xff] %v10838_v8  ;;  %v1021_v14 = vsel %vm50_vm3, %v993_v9, %v995_v11 }
 0x23f   :  { %1251 = vst [vmem:[#allocation3 + $0x18] sm:$0xff] %v10840_v10  ;;  %v10848_v12 = vpack.i.bf16 %v10840_v10, %v10838_v8  ;;  %v1060_v18 = vmax.f32 %v10682_v15, %v1021_v14  ;;  %v1198_v14 = vsub.s32 6, %v10797_v40 }
 0x240   :  { %v997_v13 = vpop.permute.xlu1 %996 }
 0x241   :  { %v10850_v3 = vpop.permute.xlu0 %998  ;;  %9011 = vrot.lane.b32.xlu1 %v10848_v12, %s10346_s23  ;;  %9001 = vrot.lane.b32.xlu0 %v10848_v12, %s10345_s22  ;;  %v1022_v21 = vsel %vm50_vm3, %v995_v11, %v997_v13 }
 0x242   :  { %v1023_v38 = vsel %vm50_vm3, %v997_v13, %v10850_v3  ;;  %v1061_v44 = vmax.f32 %v10686_v17, %v1022_v21  ;;  %v10910_v13 = vrot.slane %v10806_v45, %v1190_v60 }
 0x243   :  { %v1062_v15 = vmax.f32 %v10690_v19, %v1023_v38 }
 0x244   :  { %v1091_v16 = vpop.permute.xlu1 %1090 }
 0x245   :  { %v1093_v22 = vpop.permute.xlu0 %1092  ;;  %9016 = vrot.lane.b32.xlu1 %v10836_v1, %s10347_s24  ;;  %9006 = vrot.lane.b32.xlu0 %v10836_v1, %s10346_s23 }
 0x246   :  { %v1119_v39 = vsel %vm17216_vm2, %v1091_v16, %v1093_v22 }
 0x247   :  { %v1158_v41 = vmax.f32 %v1060_v18, %v1119_v39 }
 0x248   :  { %v1095_v46 = vpop.permute.xlu1 %1094 }
 0x249   :  { %v10868_v48 = vmul.f32 %v1175_v49, %v1158_v41  ;;  %v1120_v0 = vsel %vm17216_vm2, %v1093_v22, %v1095_v46  ;;  %v10871_v50 = vpop.permute.xlu0 %1096  ;;  %9031 = vrot.lane.b32.xlu1 %v10848_v12, %s10348_s28  ;;  %9021 = vrot.lane.b32.xlu0 %v10848_v12, %s10347_s24 }
 0x24a   :  { %v1159_v51 = vmax.f32 %v1061_v44, %v1120_v0  ;;  %v1121_v17 = vsel %vm17216_vm2, %v1095_v46, %v10871_v50 }
 0x24b   :  { %1259 = vst [vmem:[#allocation3 + $0x68] sm:$0xff] %v10868_v48  ;;  %v1160_v19 = vmax.f32 %v1062_v15, %v1121_v17  ;;  %v10882_v49 = vpack.i.bf16 %v10868_v48, %v10823_v59  ;;  %v1199_v15 = vrot.slane %v10806_v45, %v1198_v14 }
 0x24c   :  { %v10884_v52 = vmul.f32 %v1179_v56, %v1159_v51  ;;  %v981_v53 = vpop.permute.xlu1 %980 }
 0x24d   :  { %v1234_v54 = vmul.f32 %v1183_v62, %v1160_v19  ;;  %v983_v55 = vpop.permute.xlu0 %982  ;;  %9036 = vrot.lane.b32.xlu1 %v10836_v1, %s10349_s9  ;;  %9026 = vrot.lane.b32.xlu0 %v10836_v1, %s10348_s28  ;;  %v1015_v62 = vsel %vm50_vm3, %v10799_v42, %v981_v53  ;;  %v1194_v42 = vsub.s32 5, %v10797_v40 }
 0x24e   :  { %1260 = vst [vmem:[#allocation3 + $0x70] sm:$0xff] %v10884_v52  ;;  %v1016_v5 = vsel %vm50_vm3, %v981_v53, %v983_v55  ;;  %v1053_v9 = vmax.f32 %v10670_v6, %v1015_v62 }
 0x24f   :  { %1261 = vst [vmem:[#allocation3 + $0x78] sm:$0xff] %v1234_v54  ;;  %v10893_v58 = vpack.i.bf16 %v1234_v54, %v10884_v52  ;;  %v1054_v16 = vmax.f32 %v10709_v23, %v1016_v5 }
 0x250   :  { %v985_v56 = vpop.permute.xlu1 %984 }
 0x251   :  { %v10898_v2 = vpop.permute.xlu0 %986  ;;  %9051 = vrot.lane.b32.xlu1 %v10848_v12, %s10350_s10  ;;  %9041 = vrot.lane.b32.xlu0 %v10848_v12, %s10349_s9  ;;  %v1017_v18 = vsel %vm50_vm3, %v983_v55, %v985_v56  ;;  %v9080_v55 = vpack.i.bf16 %v10838_v8, %v10823_v59 }
 0x252   :  { %v1018_v6 = vsel %vm50_vm3, %v985_v56, %v10898_v2  ;;  %v1055_v41 = vmax.f32 %v10712_v24, %v1017_v18 }
 0x253   :  { %v1056_v0 = vmax.f32 %v10719_v25, %v1018_v6 }
 0x254   :  { %v1079_v11 = vpop.permute.xlu1 %1078 }
 0x255   :  { %v1113_v21 = vsel %vm17216_vm2, %v10827_v63, %v1079_v11  ;;  %v1081_v22 = vpop.permute.xlu0 %1080  ;;  %9056 = vrot.lane.b32.xlu1 %v10836_v1, %s10351_s20  ;;  %9046 = vrot.lane.b32.xlu0 %v10836_v1, %s10350_s10  ;;  %v1195_v63 = vrot.slane %v10806_v45, %v1194_v42 }
 0x256   :  { %v1151_v38 = vmax.f32 %v1053_v9, %v1113_v21  ;;  %v1114_v39 = vsel %vm17216_vm2, %v1079_v11, %v1081_v22 }
 0x257   :  { %v1152_v23 = vmax.f32 %v1054_v16, %v1114_v39 }
 0x258   :  { %v10927_v44 = vmul.f32 %v10906_v61, %v1151_v38  ;;  %v1083_v46 = vpop.permute.xlu1 %1082 }
 0x259   :  { %v10933_v51 = vmul.f32 %v10910_v13, %v1152_v23  ;;  %v1115_v17 = vsel %vm17216_vm2, %v1081_v22, %v1083_v46  ;;  %v10936_v19 = vpop.permute.xlu0 %1084  ;;  %9071 = vrot.lane.b32.xlu1 %v10848_v12, %s10352_s2  ;;  %9061 = vrot.lane.b32.xlu0 %v10848_v12, %s10351_s20 }
 0x25a   :  { %1252 = vst [vmem:[#allocation3 + $0x20] sm:$0xff] %v10927_v44  ;;  %v1153_v24 = vmax.f32 %v1055_v41, %v1115_v17  ;;  %v1116_v25 = vsel %vm17216_vm2, %v1083_v46, %v10936_v19  ;;  %v10947_v53 = vpack.i.bf16 %v10927_v44, %v10840_v10 }
 0x25b   :  { %1253 = vst [vmem:[#allocation3 + $0x28] sm:$0xff] %v10933_v51  ;;  %v1154_v54 = vmax.f32 %v1056_v0, %v1116_v25  ;;  %v10954_v57 = vpack.i.bf16 %v10933_v51, %v10927_v44 }
 0x25c   :  { %v1227_v56 = vmul.f32 %v1195_v63, %v1153_v24  ;;  %v1001_v60 = vpop.permute.xlu1 %1000 }
 0x25d   :  { %v1228_v62 = vmul.f32 %v1199_v15, %v1154_v54  ;;  %v1003_v5 = vpop.permute.xlu0 %1002  ;;  %9081 = vrot.lane.b32.xlu1 %v9080_v55, %s10340_s3  ;;  %9066 = vrot.lane.b32.xlu0 %v10836_v1, %s10352_s2  ;;  %v1024_v59 = vsel %vm50_vm3, %v10850_v3, %v1001_v60 }
 0x25e   :  { %1254 = vst [vmem:[#allocation3 + $0x30] sm:$0xff] %v1227_v56  ;;  %v1025_v11 = vsel %vm50_vm3, %v1001_v60, %v1003_v5  ;;  %v1063_v42 = vmax.f32 %v10694_v20, %v1024_v59 }
 0x25f   :  { %1255 = vst [vmem:[#allocation3 + $0x38] sm:$0xff] %v1228_v62  ;;  %v10959_v10 = vpack.i.bf16 %v1228_v62, %v1227_v56  ;;  %v1064_v1 = vmax.f32 %v10734_v27, %v1025_v11 }
 0x260   :  { %v1005_v9 = vpop.permute.xlu1 %1004 }
 0x261   :  { %v1007_v8 = vpop.permute.xlu0 %1006  ;;  %9091 = vrot.lane.b32.xlu1 %v9080_v55, %s10342_s26  ;;  %9076 = vrot.lane.b32.xlu0 %v9080_v55, %s10341_s25  ;;  %v1026_v16 = vsel %vm50_vm3, %v1003_v5, %v1005_v9 }
 0x262   :  { %v1027_v3 = vsel %vm50_vm3, %v1005_v9, %v1007_v8  ;;  %v1065_v38 = vmax.f32 %v10738_v28, %v1026_v16  ;;  %v11472_v34 = vld [vmem:[#allocation3 + $0x28] sm:$0xff] }
 0x263   :  { %17454 = vst [vmem:[#allocation91_spill] sm:$0xff] %v11472_v34  ;;  %v10296_v34 = vld [vmem:[#allocation3] sm:$0xff] }
 0x264   :  { %v1099_v14 = vpop.permute.xlu1 %1098 }
 0x265   :  { %v1122_v18 = vsel %vm17216_vm2, %v10871_v50, %v1099_v14  ;;  %v1101_v21 = vpop.permute.xlu0 %1100  ;;  %9101 = vrot.lane.b32.xlu1 %v10848_v12, %s10314_s29  ;;  %9086 = vrot.lane.b32.xlu0 %v9080_v55, %s10343_s27  ;;  %v1066_v50 = vmax.f32 %v10742_v29, %v1027_v3  ;;  %v1169_v55 = vld [vmem:[%s16921_s1 + $0x8] sm:$0x3]  ;;  %s17368_s1 = smov 124  }
 0x266   :  { %v1161_v22 = vmax.f32 %v1063_v42, %v1122_v18  ;;  %v1123_v6 = vsel %vm17216_vm2, %v1099_v14, %v1101_v21  ;;  %v1211_v62 = vrot.slane %v1169_v55, %v1178_v47  ;;  %v1207_v59 = vrot.slane %v1169_v55, %v1174_v43 }
 0x267   :  { %v1162_v20 = vmax.f32 %v1064_v1, %v1123_v6 }
 0x268   :  { %v10978_v27 = vmul.f32 %v10906_v61, %v1161_v22  ;;  %v1103_v39 = vpop.permute.xlu1 %1102 }
 0x269   :  { %v1236_v23 = vmul.f32 %v10910_v13, %v1162_v20  ;;  %v1124_v41 = vsel %vm17216_vm2, %v1101_v21, %v1103_v39  ;;  %v1105_v46 = vpop.permute.xlu0 %1104  ;;  %9111 = vrot.lane.b32.xlu1 %v10848_v12, %s16929_s0  ;;  %9096 = vrot.lane.b32.xlu0 %v10848_v12, %s10315_s30  ;;  %v1202_v13 = vsub.s32 7, %v10797_v40 }
 0x26a   :  { %1262 = vst [vmem:[#allocation3 + $0x80] sm:$0xff] %v10978_v27  ;;  %v1163_v28 = vmax.f32 %v1065_v38, %v1124_v41  ;;  %v1125_v61 = vsel %vm17216_vm2, %v1103_v39, %v1105_v46 }
 0x26b   :  { %1263 = vst [vmem:[#allocation3 + $0x88] sm:$0xff] %v1236_v23  ;;  %v1164_v0 = vmax.f32 %v1066_v50, %v1125_v61 }
 0x26c   :  { %v1237_v17 = vmul.f32 %v1195_v63, %v1163_v28  ;;  %v989_v29 = vpop.permute.xlu1 %988 }
 0x26d   :  { %v1238_v24 = vmul.f32 %v1199_v15, %v1164_v0  ;;  %v1019_v25 = vsel %vm50_vm3, %v10898_v2, %v989_v29  ;;  %v991_v54 = vpop.permute.xlu0 %990  ;;  %9121 = vrot.lane.b32.xlu1 %v10848_v12, %s10319_s13  ;;  %9106 = vrot.lane.b32.xlu0 %v10848_v12, %s10316_s11  ;;  %v1203_v2 = vrot.slane %v10806_v45, %v1202_v13 }
 0x26e   :  { %1264 = vst [vmem:[#allocation3 + $0x90] sm:$0xff] %v1237_v17  ;;  %v1020_v63 = vsel %vm50_vm3, %v989_v29, %v991_v54  ;;  %v1057_v15 = vmax.f32 %v10722_v26, %v1019_v25  ;;  %v1059_v56 = vmax.f32 %v10766_v32, %v991_v54 }
 0x26f   :  { %1265 = vst [vmem:[#allocation3 + $0x98] sm:$0xff] %v1238_v24  ;;  %v1058_v5 = vmax.f32 %v10763_v31, %v1020_v63 }
 0x270   :  { %v1087_v60 = vpop.permute.xlu1 %1086 }
 0x271   :  { %v1117_v9 = vsel %vm17216_vm2, %v10936_v19, %v1087_v60  ;;  %v1089_v11 = vpop.permute.xlu0 %1088  ;;  %9131 = vrot.lane.b32.xlu1 %v10848_v12, %s10321_s15  ;;  %9116 = vrot.lane.b32.xlu0 %v10848_v12, %s10318_s12 }
 0x272   :  { %v1155_v26 = vmax.f32 %v1057_v15, %v1117_v9  ;;  %v1118_v32 = vsel %vm17216_vm2, %v1087_v60, %v1089_v11  ;;  %v1157_v45 = vmax.f32 %v1059_v56, %v1089_v11 }
 0x273   :  { %v1156_v47 = vmax.f32 %v1058_v5, %v1118_v32  ;;  %v2019_v32 = vld [vmem:[#allocation3 + $0x28] sm:$0xff] }
 0x274   :  { %v1229_v42 = vmul.f32 %v1203_v2, %v1155_v26  ;;  %v1231_v31 = vmul.f32 %v1211_v62, %v1157_v45  ;;  %v1009_v14 = vpop.permute.xlu1 %1008  ;;  %v2467_v45 = vld [vmem:[#allocation3 + $0x30] sm:$0xff] }
 0x275   :  { %v1230_v1 = vmul.f32 %v1207_v59, %v1156_v47  ;;  %v1028_v19 = vsel %vm50_vm3, %v1007_v8, %v1009_v14  ;;  %v1011_v40 = vpop.permute.xlu0 %1010  ;;  %9141 = vrot.lane.b32.xlu1 %v10848_v12, %s10323_s17  ;;  %9126 = vrot.lane.b32.xlu0 %v10848_v12, %s10320_s14  ;;  %v11482_v36 = vld [vmem:[#allocation3 + $0x90] sm:$0xff] }
 0x276   :  { %1256 = vst [vmem:[#allocation3 + $0x40] sm:$0xff] %v1229_v42  ;;  %1258 = vst.msk [vmem:[#allocation3 + $0x50] sm:$0xff] %vm17216_vm2, %v1231_v31  ;;  %v1029_v43 = vsel %vm50_vm3, %v1009_v14, %v1011_v40  ;;  %v1067_v16 = vmax.f32 %v10746_v30, %v1028_v19  ;;  %v1069_v18 = vmax.f32 %v10778_v4, %v1011_v40  ;;  %v2170_v31 = vld [vmem:[#allocation3 + $0x38] sm:$0xff] }
 0x277   :  { %1257 = vst [vmem:[#allocation3 + $0x48] sm:$0xff] %v1230_v1  ;;  %v1068_v8 = vmax.f32 %v10776_v33, %v1029_v43  ;;  %v9155_v30 = vpack.i.bf16 %v10884_v52, %v10868_v48  ;;  %v9420_v19 = vpack.i.bf16 %v2170_v31, %v2467_v45  ;;  %v11247_v31 = vld [vmem:[#allocation3 + $0x88] sm:$0xff]  ;;  %17456 = vst [vmem:[#allocation93_spill] sm:$0xff] %v11482_v36  ;;  %v11484_v35 = vld [vmem:[#allocation3 + $0x98] sm:$0xff] }
 0x278   :  { %v1107_v21 = vpop.permute.xlu1 %1106  ;;  %17457 = vst [vmem:[#allocation94_spill] sm:$0xff] %v11484_v35 }
 0x279   :  { %v1126_v3 = vsel %vm17216_vm2, %v1105_v46, %v1107_v21  ;;  %v1109_v22 = vpop.permute.xlu0 %1108  ;;  %9151 = vrot.lane.b32.xlu1 %v10848_v12, %s10325_s19  ;;  %9136 = vrot.lane.b32.xlu0 %v10848_v12, %s10322_s16 }
 0x27a   :  { %v1165_v6 = vmax.f32 %v1067_v16, %v1126_v3  ;;  %v1127_v20 = vsel %vm17216_vm2, %v1107_v21, %v1109_v22  ;;  %v1167_v38 = vmax.f32 %v1069_v18, %v1109_v22 }
 0x27b   :  { %v1166_v39 = vmax.f32 %v1068_v8, %v1127_v20  ;;  %v1283_v8 = vld [vmem:[#allocation3 + $0x78] sm:$0xff] }
 0x27c   :  { %v1239_v4 = vmul.f32 %v1203_v2, %v1165_v6  ;;  %v1241_v50 = vmul.f32 %v1211_v62, %v1167_v38  ;;  %v2167_v62 = vld [vmem:[#allocation3 + $0x20] sm:$0xff]  ;;  %v9490_v38 = vpack.i.bf16 %v10978_v27, %v1283_v8 }
 0x27d   :  { %v1240_v33 = vmul.f32 %v1207_v59, %v1166_v39  ;;  %9146 = vrot.lane.b32.xlu0 %v10848_v12, %s10324_s18  ;;  %9156 = vrot.lane.b32.xlu1 %v9155_v30, %s10345_s22  ;;  %v9415_v59 = vpack.i.bf16 %v10933_v51, %v2167_v62  ;;  %v9405_v42 = vpack.i.bf16 %v2019_v32, %v2167_v62 }
 0x27e   :  { %1266 = vst [vmem:[#allocation3 + $0xa0] sm:$0xff] %v1239_v4  ;;  %1268 = vst.msk [vmem:[#allocation3 + $0xb0] sm:$0xff] %vm17216_vm2, %v1241_v50 }
 0x27f   :  { %1267 = vst [vmem:[#allocation3 + $0xa8] sm:$0xff] %v1240_v33 }
 0x281   :  { %9161 = vrot.lane.b32.xlu0 %v9155_v30, %s10346_s23  ;;  %9166 = vrot.lane.b32.xlu1 %v9155_v30, %s10347_s24 }
 0x285   :  { %9171 = vrot.lane.b32.xlu0 %v9155_v30, %s10348_s28  ;;  %9176 = vrot.lane.b32.xlu1 %v9155_v30, %s10349_s9 }
 0x286   :  { %v11542_v35 = vld [vmem:[#allocation3 + $0xa8] sm:$0xff] }
 0x287   :  { %17471 = vst [vmem:[#allocation108_spill] sm:$0xff] %v11542_v35 }
 0x289   :  { %9181 = vrot.lane.b32.xlu0 %v9155_v30, %s10350_s10  ;;  %9186 = vrot.lane.b32.xlu1 %v9155_v30, %s10351_s20 }
 0x28d   :  { %9191 = vrot.lane.b32.xlu0 %v9155_v30, %s10352_s2  ;;  %9196 = vrot.lane.b32.xlu1 %v9155_v30, %s10341_s25 }
 0x291   :  { %9201 = vrot.lane.b32.xlu0 %v9155_v30, %s10340_s3  ;;  %9206 = vrot.lane.b32.xlu1 %v9155_v30, %s10343_s27 }
 0x295   :  { %9211 = vrot.lane.b32.xlu0 %v9155_v30, %s10342_s26  ;;  %9216 = vrot.lane.b32.xlu1 %v10893_v58, %s10315_s30  ;;  %v1582_v30 = vld [vmem:[#allocation3 + $0x80] sm:$0xff] }
 0x296   :  { %v9500_v33 = vpack.i.bf16 %v1582_v30, %v1283_v8 }
 0x299   :  { %9221 = vrot.lane.b32.xlu0 %v10882_v49, %s10315_s30  ;;  %9231 = vrot.lane.b32.xlu1 %v10882_v49, %s10314_s29 }
 0x29d   :  { %9226 = vrot.lane.b32.xlu0 %v10893_v58, %s10314_s29  ;;  %9236 = vrot.lane.b32.xlu1 %v10893_v58, %s10316_s11 }
 0x2a1   :  { %9241 = vrot.lane.b32.xlu0 %v10882_v49, %s10316_s11  ;;  %9251 = vrot.lane.b32.xlu1 %v10882_v49, %s17368_s1 }
 0x2a5   :  { %9246 = vrot.lane.b32.xlu0 %v10893_v58, %s17368_s1  ;;  %9256 = vrot.lane.b32.xlu1 %v10893_v58, %s10318_s12 }
 0x2a9   :  { %9261 = vrot.lane.b32.xlu0 %v10882_v49, %s10318_s12  ;;  %9271 = vrot.lane.b32.xlu1 %v10882_v49, %s10319_s13 }
 0x2ad   :  { %9266 = vrot.lane.b32.xlu0 %v10893_v58, %s10319_s13  ;;  %9276 = vrot.lane.b32.xlu1 %v10893_v58, %s10320_s14 }
 0x2af   :  { %v11074_v12 = vpop.permute.xlu1 %8996 }
 0x2b0   :  { %v16932_v16 = vunpack.i.h.bf16 %v11074_v12 }
 0x2b1   :  { %9281 = vrot.lane.b32.xlu0 %v10882_v49, %s10320_s14  ;;  %9291 = vrot.lane.b32.xlu1 %v10882_v49, %s10321_s15 }
 0x2b3   :  { %v11080_v48 = vpop.permute.xlu0 %9001  ;;  %v11082_v52 = vpop.permute.xlu1 %9011 }
 0x2b5   :  { %9286 = vrot.lane.b32.xlu0 %v10893_v58, %s10321_s15  ;;  %9296 = vrot.lane.b32.xlu1 %v10893_v58, %s10322_s16 }
 0x2b7   :  { %v11088_v23 = vpop.permute.xlu0 %9006  ;;  %v11090_v41 = vpop.permute.xlu1 %9016 }
 0x2b8   :  { %v9008_v36 = vunpack.i.l.bf16 %v11088_v23 }
 0x2b9   :  { %9301 = vrot.lane.b32.xlu0 %v10882_v49, %s10322_s16  ;;  %9311 = vrot.lane.b32.xlu1 %v10882_v49, %s10323_s17 }
 0x2bb   :  { %v11096_v46 = vpop.permute.xlu0 %9021  ;;  %v11098_v28 = vpop.permute.xlu1 %9031 }
 0x2bd   :  { %9306 = vrot.lane.b32.xlu0 %v10893_v58, %s10323_s17  ;;  %9316 = vrot.lane.b32.xlu1 %v10893_v58, %s10324_s18 }
 0x2bf   :  { %v11104_v61 = vpop.permute.xlu0 %9026  ;;  %v11106_v0 = vpop.permute.xlu1 %9036 }
 0x2c1   :  { %9321 = vrot.lane.b32.xlu0 %v10882_v49, %s10324_s18  ;;  %9331 = vrot.lane.b32.xlu1 %v10882_v49, %s10325_s19 }
 0x2c3   :  { %v11112_v17 = vpop.permute.xlu0 %9041  ;;  %v11114_v29 = vpop.permute.xlu1 %9051 }
 0x2c5   :  { %9326 = vrot.lane.b32.xlu0 %v10893_v58, %s10325_s19  ;;  %9351 = vrot.lane.b32.xlu1 %v10947_v53, %s10342_s26  ;;  %v2762_v58 = vld [vmem:[#allocation3 + $0x18] sm:$0xff] }
 0x2c6   :  { %v9345_v63 = vpack.i.bf16 %v10927_v44, %v2762_v58 }
 0x2c7   :  { %v11120_v13 = vpop.permute.xlu0 %9046  ;;  %v11122_v24 = vpop.permute.xlu1 %9056 }
 0x2c9   :  { %9336 = vrot.lane.b32.xlu0 %v10947_v53, %s10341_s25  ;;  %9356 = vrot.lane.b32.xlu1 %v10954_v57, %s10345_s22 }
 0x2cb   :  { %v11128_v49 = vpop.permute.xlu0 %9061  ;;  %v11130_v25 = vpop.permute.xlu1 %9071 }
 0x2cd   :  { %9341 = vrot.lane.b32.xlu0 %v10947_v53, %s10340_s3  ;;  %9371 = vrot.lane.b32.xlu1 %v10959_v10, %s10346_s23 }
 0x2cf   :  { %v11136_v54 = vpop.permute.xlu0 %9066  ;;  %v11138_v55 = vpop.permute.xlu1 %9081 }
 0x2d1   :  { %9346 = vrot.lane.b32.xlu0 %v9345_v63, %s10343_s27  ;;  %9376 = vrot.lane.b32.xlu1 %v10954_v57, %s10347_s24 }
 0x2d3   :  { %v11144_v15 = vpop.permute.xlu0 %9076  ;;  %v11146_v56 = vpop.permute.xlu1 %9091 }
 0x2d4   :  { %17369 = vst [vmem:[#allocation10_spill] sm:$0xff] %v11146_v56 }
 0x2d5   :  { %9391 = vrot.lane.b32.xlu1 %v10959_v10, %s10348_s28  ;;  %9361 = vrot.lane.b32.xlu0 %v10959_v10, %s10345_s22 }
 0x2d7   :  { %v11152_v53 = vpop.permute.xlu0 %9086  ;;  %v11154_v2 = vpop.permute.xlu1 %9101 }
 0x2d8   :  { %17370 = vst [vmem:[#allocation11_spill] sm:$0xff] %v11154_v2  ;;  %v17440_v2 = vunpack.i.l.bf16 %v11080_v48 }
 0x2d9   :  { %9396 = vrot.lane.b32.xlu1 %v10954_v57, %s10349_s9  ;;  %9366 = vrot.lane.b32.xlu0 %v10954_v57, %s10346_s23 }
 0x2db   :  { %v11160_v44 = vpop.permute.xlu0 %9096  ;;  %v11162_v60 = vpop.permute.xlu1 %9111 }
 0x2dc   :  { %17371 = vst [vmem:[#allocation12_spill] sm:$0xff] %v11160_v44  ;;  %17372 = vst [vmem:[#allocation13_spill] sm:$0xff] %v11162_v60  ;;  %v1290_v44 = vld [vmem:[#allocation3 + $0xb0] sm:$0xff] }
 0x2dd   :  { %9411 = vrot.lane.b32.xlu1 %v10959_v10, %s10350_s10  ;;  %9381 = vrot.lane.b32.xlu0 %v10959_v10, %s10347_s24 }
 0x2df   :  { %v11168_v5 = vpop.permute.xlu0 %9106  ;;  %v11170_v9 = vpop.permute.xlu1 %9121 }
 0x2e0   :  { %17373 = vst [vmem:[#allocation14_spill] sm:$0xff] %v11168_v5  ;;  %17374 = vst [vmem:[#allocation15_spill] sm:$0xff] %v11170_v9  ;;  %v1289_v5 = vld [vmem:[#allocation3 + $0xa8] sm:$0xff] }
 0x2e1   :  { %9386 = vrot.lane.b32.xlu0 %v10954_v57, %s10348_s28  ;;  %9416 = vrot.lane.b32.xlu1 %v9415_v59, %s10351_s20  ;;  %v9435_v57 = vpack.i.bf16 %v2467_v45, %v2019_v32  ;;  %v1435_v45 = vld [vmem:[#allocation3 + $0x90] sm:$0xff] }
 0x2e3   :  { %v11176_v11 = vpop.permute.xlu0 %9116  ;;  %v11178_v26 = vpop.permute.xlu1 %9131 }
 0x2e4   :  { %17375 = vst [vmem:[#allocation16_spill] sm:$0xff] %v11176_v11  ;;  %17376 = vst [vmem:[#allocation17_spill] sm:$0xff] %v11178_v26  ;;  %v1427_v26 = vld [vmem:[#allocation3 + $0x48] sm:$0xff] }
 0x2e5   :  { %9401 = vrot.lane.b32.xlu0 %v10959_v10, %s10349_s9  ;;  %9431 = vrot.lane.b32.xlu1 %v10959_v10, %s10352_s2  ;;  %v16934_v10 = vunpack.i.l.bf16 %v11080_v48 }
 0x2e7   :  { %v11184_v47 = vpop.permute.xlu0 %9126  ;;  %v11186_v51 = vpop.permute.xlu1 %9141  ;;  %v1359_v3 = vsel %vm1357_vm12, %v16932_v16, %v16934_v10 }
 0x2e8   :  { %17377 = vst [vmem:[#allocation18_spill] sm:$0xff] %v11184_v47  ;;  %17378 = vst [vmem:[#allocation19_spill] sm:$0xff] %v11186_v51  ;;  %v1426_v47 = vld [vmem:[#allocation3 + $0x40] sm:$0xff] }
 0x2e9   :  { %9406 = vrot.lane.b32.xlu0 %v9405_v42, %s10350_s10  ;;  %9436 = vrot.lane.b32.xlu1 %v9435_v57, %s10341_s25  ;;  %v9685_v9 = vpack.i.bf16 %v1427_v26, %v1426_v47 }
 0x2eb   :  { %v11190_v14 = vpop.permute.xlu0 %9136  ;;  %v11192_v1 = vpop.permute.xlu1 %9151 }
 0x2ec   :  { %17379 = vst [vmem:[#allocation20_spill] sm:$0xff] %v11190_v14  ;;  %17380 = vst [vmem:[#allocation21_spill] sm:$0xff] %v11192_v1 }
 0x2ed   :  { %9421 = vrot.lane.b32.xlu0 %v9420_v19, %s10351_s20  ;;  %9441 = vrot.lane.b32.xlu1 %v9435_v57, %s10340_s3 }
 0x2ef   :  { %v11197_v40 = vpop.permute.xlu0 %9146  ;;  %v11199_v43 = vpop.permute.xlu1 %9156 }
 0x2f0   :  { %17381 = vst [vmem:[#allocation22_spill] sm:$0xff] %v11197_v40  ;;  %17382 = vst [vmem:[#allocation23_spill] sm:$0xff] %v11199_v43  ;;  %v16933_v18 = vunpack.i.h.bf16 %v11199_v43  ;;  %v16931_v21 = vunpack.i.l.bf16 %v11199_v43 }
 0x2f1   :  { %9426 = vrot.lane.b32.xlu0 %v9405_v42, %s10352_s2  ;;  %9446 = vrot.lane.b32.xlu1 %v9405_v42, %s10315_s30 }
 0x2f2   :  { %v1369_v22 = vsel %vm1357_vm12, %v16931_v21, %v16933_v18 }
 0x2f3   :  { %v11216_v6 = vpop.permute.xlu0 %9161  ;;  %v11218_v20 = vpop.permute.xlu1 %9166  ;;  %v8272_v39 = vpack.c.bf16 %v1369_v22, %v1359_v3  ;;  %v9555_v3 = vpack.i.bf16 %v1435_v45, %v11247_v31 }
 0x2f5   :  { %9491 = vrot.lane.b32.xlu0 %v9490_v38, %s10345_s22  ;;  %9451 = vrot.lane.b32.xlu1 %v9435_v57, %s10343_s27 }
 0x2f6   :  { %8273 = vmatprep.subr.bf16.mxu1 %v8272_v39 }
 0x2f7   :  { %v11223_v4 = vpop.permute.xlu0 %9171  ;;  %v11225_v50 = vpop.permute.xlu1 %9176 }
 0x2f9   :  { %9501 = vrot.lane.b32.xlu0 %v9500_v33, %s10347_s24  ;;  %9456 = vrot.lane.b32.xlu1 %v9405_v42, %s10314_s29 }
 0x2fb   :  { %v11229_v58 = vpop.permute.xlu0 %9181  ;;  %v11231_v63 = vpop.permute.xlu1 %9186 }
 0x2fc   :  { %17383 = vst [vmem:[#allocation24_spill] sm:$0xff] %v11229_v58  ;;  %17384 = vst [vmem:[#allocation25_spill] sm:$0xff] %v11231_v63 }
 0x2fd   :  { %9511 = vrot.lane.b32.xlu0 %v9500_v33, %s10349_s9  ;;  %9461 = vrot.lane.b32.xlu1 %v9435_v57, %s10342_s26 }
 0x2ff   :  { %v11235_v27 = vpop.permute.xlu0 %9191  ;;  %v11237_v62 = vpop.permute.xlu1 %9196 }
 0x300   :  { %17385 = vst [vmem:[#allocation26_spill] sm:$0xff] %v11235_v27  ;;  %17386 = vst [vmem:[#allocation27_spill] sm:$0xff] %v11237_v62 }
 0x301   :  { %9521 = vrot.lane.b32.xlu0 %v9500_v33, %s10351_s20  ;;  %9466 = vrot.lane.b32.xlu1 %v9405_v42, %s10316_s11 }
 0x303   :  { %v11241_v59 = vpop.permute.xlu0 %9201  ;;  %v11243_v32 = vpop.permute.xlu1 %9206 }
 0x304   :  { %17387 = vst [vmem:[#allocation28_spill] sm:$0xff] %v11241_v59  ;;  %17388 = vst [vmem:[#allocation29_spill] sm:$0xff] %v11243_v32 }
 0x305   :  { %9546 = vrot.lane.b32.xlu0 %v9500_v33, %s10342_s26  ;;  %9471 = vrot.lane.b32.xlu1 %v9405_v42, %s17368_s1 }
 0x307   :  { %v11249_v57 = vpop.permute.xlu0 %9211  ;;  %v11251_v8 = vpop.permute.xlu1 %9216 }
 0x308   :  { %17389 = vst [vmem:[#allocation30_spill] sm:$0xff] %v11249_v57  ;;  %17390 = vst [vmem:[#allocation31_spill] sm:$0xff] %v11251_v8 }
 0x309   :  { %9556 = vrot.lane.b32.xlu0 %v9555_v3, %s10346_s23  ;;  %9476 = vrot.lane.b32.xlu1 %v9420_v19, %s10315_s30 }
 0x30b   :  { %v11256_v22 = vpop.permute.xlu0 %9221  ;;  %v11258_v38 = vpop.permute.xlu1 %9231 }
 0x30c   :  { %17391 = vst [vmem:[#allocation32_spill] sm:$0xff] %v11256_v22  ;;  %17392 = vst [vmem:[#allocation33_spill] sm:$0xff] %v11258_v38 }
 0x30d   :  { %9566 = vrot.lane.b32.xlu0 %v9555_v3, %s10348_s28  ;;  %9481 = vrot.lane.b32.xlu1 %v9405_v42, %s10318_s12 }
 0x30f   :  { %v11262_v39 = vpop.permute.xlu0 %9226  ;;  %v11264_v21 = vpop.permute.xlu1 %9236 }
 0x310   :  { %17393 = vst [vmem:[#allocation34_spill] sm:$0xff] %v11262_v39  ;;  %17394 = vst [vmem:[#allocation35_spill] sm:$0xff] %v11264_v21 }
 0x311   :  { %9576 = vrot.lane.b32.xlu0 %v9555_v3, %s10350_s10  ;;  %9486 = vrot.lane.b32.xlu1 %v9420_v19, %s10314_s29 }
 0x313   :  { %v11268_v16 = vpop.permute.xlu0 %9241  ;;  %v11270_v18 = vpop.permute.xlu1 %9251 }
 0x314   :  { %17395 = vst [vmem:[#allocation36_spill] sm:$0xff] %v11268_v16  ;;  %17396 = vst [vmem:[#allocation37_spill] sm:$0xff] %v11270_v18  ;;  %v9600_v16 = vpack.i.bf16 %v11247_v31, %v1582_v30 }
 0x315   :  { %9586 = vrot.lane.b32.xlu0 %v9555_v3, %s10352_s2  ;;  %9496 = vrot.lane.b32.xlu1 %v9500_v33, %s10346_s23 }
 0x317   :  { %v11274_v10 = vpop.permute.xlu0 %9246  ;;  %v11276_v38 = vpop.permute.xlu1 %9256 }
 0x318   :  { %17397 = vst [vmem:[#allocation38_spill] sm:$0xff] %v11274_v10  ;;  %17398 = vst [vmem:[#allocation39_spill] sm:$0xff] %v11276_v38 }
 0x319   :  { %9591 = vrot.lane.b32.xlu0 %v9555_v3, %s10341_s25  ;;  %9506 = vrot.lane.b32.xlu1 %v9500_v33, %s10348_s28 }
 0x31b   :  { %v11280_v42 = vpop.permute.xlu0 %9261  ;;  %v11282_v22 = vpop.permute.xlu1 %9271 }
 0x31c   :  { %17399 = vst [vmem:[#allocation40_spill] sm:$0xff] %v11280_v42  ;;  %17400 = vst [vmem:[#allocation41_spill] sm:$0xff] %v11282_v22 }
 0x31d   :  { %9596 = vrot.lane.b32.xlu0 %v9555_v3, %s10340_s3  ;;  %9516 = vrot.lane.b32.xlu1 %v9500_v33, %s10350_s10 }
 0x31f   :  { %v11286_v19 = vpop.permute.xlu0 %9266  ;;  %v11288_v18 = vpop.permute.xlu1 %9276 }
 0x320   :  { %17401 = vst [vmem:[#allocation42_spill] sm:$0xff] %v11286_v19  ;;  %17402 = vst [vmem:[#allocation43_spill] sm:$0xff] %v11288_v18  ;;  %v11321_v19 = vld [vmem:[#allocation3 + $0x98] sm:$0xff] }
 0x321   :  { %9601 = vrot.lane.b32.xlu0 %v9600_v16, %s10315_s30  ;;  %9526 = vrot.lane.b32.xlu1 %v9500_v33, %s10352_s2 }
 0x323   :  { %v11293_v40 = vpop.permute.xlu0 %9281  ;;  %v11295_v1 = vpop.permute.xlu1 %9291 }
 0x324   :  { %17403 = vst [vmem:[#allocation44_spill] sm:$0xff] %v11293_v40  ;;  %17404 = vst [vmem:[#allocation45_spill] sm:$0xff] %v11295_v1 }
 0x325   :  { %9606 = vrot.lane.b32.xlu0 %v9555_v3, %s10343_s27  ;;  %9531 = vrot.lane.b32.xlu1 %v9500_v33, %s10341_s25 }
 0x327   :  { %v11299_v22 = vpop.permute.xlu0 %9286  ;;  %v11301_v42 = vpop.permute.xlu1 %9296 }
 0x328   :  { %17405 = vst [vmem:[#allocation46_spill] sm:$0xff] %v11299_v22  ;;  %17406 = vst [vmem:[#allocation47_spill] sm:$0xff] %v11301_v42 }
 0x329   :  { %9611 = vrot.lane.b32.xlu0 %v9600_v16, %s10314_s29  ;;  %9536 = vrot.lane.b32.xlu1 %v9500_v33, %s10340_s3 }
 0x32b   :  { %v11305_v30 = vpop.permute.xlu0 %9301  ;;  %v11307_v18 = vpop.permute.xlu1 %9311 }
 0x32c   :  { %17407 = vst [vmem:[#allocation48_spill] sm:$0xff] %v11305_v30  ;;  %17408 = vst [vmem:[#allocation49_spill] sm:$0xff] %v11307_v18 }
 0x32d   :  { %9616 = vrot.lane.b32.xlu0 %v9555_v3, %s10342_s26  ;;  %9541 = vrot.lane.b32.xlu1 %v9500_v33, %s10343_s27 }
 0x32f   :  { %v11311_v1 = vpop.permute.xlu0 %9306  ;;  %v11313_v40 = vpop.permute.xlu1 %9316 }
 0x330   :  { %17409 = vst [vmem:[#allocation50_spill] sm:$0xff] %v11311_v1  ;;  %17410 = vst [vmem:[#allocation51_spill] sm:$0xff] %v11313_v40  ;;  %v11330_v40 = vpack.i.bf16 %v11321_v19, %v1435_v45  ;;  %v1279_v1 = vld [vmem:[#allocation3 + $0x50] sm:$0xff] }
 0x331   :  { %9621 = vrot.lane.b32.xlu0 %v9600_v16, %s10316_s11  ;;  %9551 = vrot.lane.b32.xlu1 %v9555_v3, %s10345_s22  ;;  %v9640_v45 = vpack.i.bf16 %v10832_v7, %v1279_v1 }
 0x333   :  { %v11317_v42 = vpop.permute.xlu0 %9321  ;;  %v11319_v22 = vpop.permute.xlu1 %9331 }
 0x334   :  { %17411 = vst [vmem:[#allocation52_spill] sm:$0xff] %v11317_v42  ;;  %17412 = vst [vmem:[#allocation53_spill] sm:$0xff] %v11319_v22 }
 0x335   :  { %9626 = vrot.lane.b32.xlu0 %v9600_v16, %s17368_s1  ;;  %9561 = vrot.lane.b32.xlu1 %v9555_v3, %s10347_s24 }
 0x337   :  { %v11325_v18 = vpop.permute.xlu0 %9326  ;;  %v11327_v33 = vpop.permute.xlu1 %9351 }
 0x338   :  { %17413 = vst [vmem:[#allocation54_spill] sm:$0xff] %v11325_v18  ;;  %17414 = vst [vmem:[#allocation55_spill] sm:$0xff] %v11327_v33 }
 0x339   :  { %9631 = vrot.lane.b32.xlu0 %v11330_v40, %s10315_s30  ;;  %9571 = vrot.lane.b32.xlu1 %v9555_v3, %s10349_s9 }
 0x33b   :  { %v11335_v42 = vpop.permute.xlu0 %9336  ;;  %v11337_v22 = vpop.permute.xlu1 %9356 }
 0x33c   :  { %17415 = vst [vmem:[#allocation56_spill] sm:$0xff] %v11335_v42  ;;  %17416 = vst [vmem:[#allocation57_spill] sm:$0xff] %v11337_v22 }
 0x33d   :  { %9636 = vrot.lane.b32.xlu0 %v9600_v16, %s10318_s12  ;;  %9581 = vrot.lane.b32.xlu1 %v9555_v3, %s10351_s20 }
 0x33f   :  { %v11341_v18 = vpop.permute.xlu0 %9341  ;;  %v11343_v30 = vpop.permute.xlu1 %9371 }
 0x340   :  { %17417 = vst [vmem:[#allocation58_spill] sm:$0xff] %v11341_v18  ;;  %17418 = vst [vmem:[#allocation59_spill] sm:$0xff] %v11343_v30  ;;  %v4874_v30 = vld [vmem:[%s16922_s4 + $0x8] sm:$0xff]  ;;  %v11435_v18 = vpack.i.bf16 %v1290_v44, %v1289_v5  ;;  %v11450_v44 = vld [vmem:[#allocation3 + $0x20] sm:$0xff] }
 0x341   :  { %9641 = vrot.lane.b32.xlu0 %v9640_v45, %s10345_s22  ;;  %9646 = vrot.lane.b32.xlu1 %v9640_v45, %s10346_s23  ;;  %17449 = vst [vmem:[#allocation86_spill] sm:$0xff] %v11450_v44  ;;  %v3398_v5 = vld [vmem:[#allocation3 + $0x30] sm:$0xff] }
 0x342   :  { %5668 = vmatprep.mubr.f32.mxu0 %v4874_v30  ;;  %5490 = vmatprep.mubr.f32.mxu1 %v4874_v30 }
 0x343   :  { %v11348_v14 = vpop.permute.xlu0 %9346  ;;  %v11350_v51 = vpop.permute.xlu1 %9376 }
 0x344   :  { %17419 = vst [vmem:[#allocation60_spill] sm:$0xff] %v11348_v14  ;;  %17420 = vst [vmem:[#allocation61_spill] sm:$0xff] %v11350_v51 }
 0x345   :  { %9651 = vrot.lane.b32.xlu0 %v9640_v45, %s10347_s24  ;;  %9656 = vrot.lane.b32.xlu1 %v9640_v45, %s10348_s28 }
 0x347   :  { %v11354_v16 = vpop.permute.xlu0 %9361  ;;  %v11356_v3 = vpop.permute.xlu1 %9391 }
 0x348   :  { %17421 = vst [vmem:[#allocation62_spill] sm:$0xff] %v11354_v16  ;;  %17422 = vst [vmem:[#allocation63_spill] sm:$0xff] %v11356_v3 }
 0x349   :  { %9661 = vrot.lane.b32.xlu0 %v9640_v45, %s10349_s9  ;;  %9666 = vrot.lane.b32.xlu1 %v9640_v45, %s10350_s10 }
 0x34b   :  { %v11360_v7 = vpop.permute.xlu0 %9366  ;;  %v11362_v1 = vpop.permute.xlu1 %9396 }
 0x34c   :  { %17423 = vst [vmem:[#allocation64_spill] sm:$0xff] %v11360_v7  ;;  %17424 = vst [vmem:[#allocation65_spill] sm:$0xff] %v11362_v1 }
 0x34d   :  { %9671 = vrot.lane.b32.xlu0 %v9640_v45, %s10351_s20  ;;  %9676 = vrot.lane.b32.xlu1 %v9640_v45, %s10352_s2 }
 0x34f   :  { %v11369_v3 = vpop.permute.xlu0 %9381  ;;  %v11371_v16 = vpop.permute.xlu1 %9411 }
 0x350   :  { %17425 = vst [vmem:[#allocation66_spill] sm:$0xff] %v11369_v3  ;;  %17426 = vst [vmem:[#allocation67_spill] sm:$0xff] %v11371_v16  ;;  %v11391_v16 = vld [vmem:[#allocation3 + $0xa0] sm:$0xff] }
 0x351   :  { %9686 = vrot.lane.b32.xlu0 %v9685_v9, %s10346_s23  ;;  %9681 = vrot.lane.b32.xlu1 %v9685_v9, %s10345_s22  ;;  %17433 = vst [vmem:[#allocation74_spill] sm:$0xff] %v11391_v16 }
 0x353   :  { %v11375_v37 = vpop.permute.xlu0 %9386  ;;  %v11377_v38 = vpop.permute.xlu1 %9416 }
 0x354   :  { %17427 = vst [vmem:[#allocation68_spill] sm:$0xff] %v11375_v37  ;;  %17428 = vst [vmem:[#allocation69_spill] sm:$0xff] %v11377_v38 }
 0x355   :  { %9696 = vrot.lane.b32.xlu0 %v9685_v9, %s10348_s28  ;;  %9691 = vrot.lane.b32.xlu1 %v9685_v9, %s10347_s24 }
 0x357   :  { %v11381_v30 = vpop.permute.xlu0 %9401  ;;  %v11383_v45 = vpop.permute.xlu1 %9431 }
 0x358   :  { %17429 = vst [vmem:[#allocation70_spill] sm:$0xff] %v11381_v30  ;;  %17430 = vst [vmem:[#allocation71_spill] sm:$0xff] %v11383_v45  ;;  %v9720_v45 = vpack.i.bf16 %v11391_v16, %v11321_v19  ;;  %v17493_v16 = vunpack.i.h.bf16 %v11112_v17 }
 0x359   :  { %9706 = vrot.lane.b32.xlu0 %v9685_v9, %s10350_s10  ;;  %9701 = vrot.lane.b32.xlu1 %v9685_v9, %s10349_s9 }
 0x35b   :  { %v11387_v26 = vpop.permute.xlu0 %9406  ;;  %v11389_v47 = vpop.permute.xlu1 %9436 }
 0x35c   :  { %17431 = vst [vmem:[#allocation72_spill] sm:$0xff] %v11387_v26  ;;  %17432 = vst [vmem:[#allocation73_spill] sm:$0xff] %v11389_v47 }
 0x35d   :  { %9716 = vrot.lane.b32.xlu0 %v9685_v9, %s10352_s2  ;;  %9711 = vrot.lane.b32.xlu1 %v9685_v9, %s10351_s20  ;;  %v9004_v9 = vunpack.i.h.bf16 %v11080_v48 }
 0x35f   :  { %v11395_v3 = vpop.permute.xlu0 %9421  ;;  %v11397_v11 = vpop.permute.xlu1 %9441  ;;  %v1360_v57 = vsel %vm1357_vm12, %v17440_v2, %v9004_v9 }
 0x360   :  { %17434 = vst [vmem:[#allocation75_spill] sm:$0xff] %v11395_v3  ;;  %17435 = vst [vmem:[#allocation76_spill] sm:$0xff] %v11397_v11  ;;  %v17441_v3 = vunpack.i.h.bf16 %v11199_v43  ;;  %v4000_v43 = vld [vmem:[#allocation3 + $0x88] sm:$0xff] }
 0x361   :  { %9721 = vrot.lane.b32.xlu0 %v9720_v45, %s10345_s22  ;;  %9726 = vrot.lane.b32.xlu1 %v9720_v45, %s10346_s23  ;;  %v11474_v11 = vld [vmem:[#allocation3 + $0x88] sm:$0xff] }
 0x362   :  { %17455 = vst [vmem:[#allocation92_spill] sm:$0xff] %v11474_v11 }
 0x363   :  { %v11403_v30 = vpop.permute.xlu0 %9426  ;;  %v11405_v60 = vpop.permute.xlu1 %9446 }
 0x364   :  { %17436 = vst [vmem:[#allocation77_spill] sm:$0xff] %v11403_v30  ;;  %17437 = vst [vmem:[#allocation78_spill] sm:$0xff] %v11405_v60  ;;  %v17442_v60 = vunpack.i.l.bf16 %v11337_v22  ;;  %v2469_v22 = vld [vmem:[#allocation3 + $0x40] sm:$0xff] }
 0x365   :  { %9731 = vrot.lane.b32.xlu0 %v9720_v45, %s10347_s24  ;;  %9736 = vrot.lane.b32.xlu1 %v9720_v45, %s10348_s28 }
 0x366   :  { %v1361_v39 = vsel %vm1357_vm12, %v9004_v9, %v17442_v60  ;;  %v11442_v60 = vld [vmem:[#allocation3 + $0x70] sm:$0xff]  ;;  %v11444_v9 = vld [vmem:[#allocation3 + $0x68] sm:$0xff] }
 0x367   :  { %v11411_v10 = vpop.permute.xlu0 %9491  ;;  %v11413_v21 = vpop.permute.xlu1 %9451  ;;  %17446 = vst [vmem:[#allocation83_spill] sm:$0xff] %v11442_v60  ;;  %17447 = vst [vmem:[#allocation84_spill] sm:$0xff] %v11444_v9  ;;  %v11500_v9 = vld [vmem:[#allocation3 + $0x40] sm:$0xff] }
 0x368   :  { %17438 = vst [vmem:[#allocation79_spill] sm:$0xff] %v11411_v10  ;;  %17439 = vst [vmem:[#allocation80_spill] sm:$0xff] %v11413_v21  ;;  %v9493_v8 = vunpack.i.l.bf16 %v11411_v10  ;;  %v17443_v32 = vunpack.i.h.bf16 %v11411_v10  ;;  %v11510_v10 = vld [vmem:[#allocation3 + $0x30] sm:$0xff] }
 0x369   :  { %9741 = vrot.lane.b32.xlu0 %v9720_v45, %s10349_s9  ;;  %9746 = vrot.lane.b32.xlu1 %v9720_v45, %s10350_s10  ;;  %17460 = vst [vmem:[#allocation97_spill] sm:$0xff] %v11500_v9  ;;  %17462 = vst [vmem:[#allocation99_spill] sm:$0xff] %v11510_v10 }
 0x36a   :  { %v1370_v56 = vsel %vm1357_vm12, %v17441_v3, %v9493_v8  ;;  %v1371_v59 = vsel %vm1357_vm12, %v9493_v8, %v17443_v32  ;;  %v11440_v3 = vld [vmem:[#allocation3 + $0x78] sm:$0xff] }
 0x36b   :  { %v11431_v21 = vpop.permute.xlu0 %9501  ;;  %v11433_v14 = vpop.permute.xlu1 %9456  ;;  %v8372_v48 = vpack.c.bf16 %v1371_v59, %v1361_v39  ;;  %v8374_v2 = vpack.c.bf16 %v1370_v56, %v1360_v57  ;;  %17445 = vst [vmem:[#allocation82_spill] sm:$0xff] %v11440_v3  ;;  %v3841_v56 = vld [vmem:[#allocation3 + $0x28] sm:$0xff]  ;;  %v11452_v59 = vld [vmem:[#allocation3 + $0x18] sm:$0xff]  ;;  %v11454_v57 = vld [vmem:[#allocation3 + $0x10] sm:$0xff] }
 0x36c   :  { %17444 = vst [vmem:[#allocation81_spill] sm:$0xff] %v11433_v14  ;;  %17450 = vst [vmem:[#allocation87_spill] sm:$0xff] %v11452_v59  ;;  %v11456_v39 = vld [vmem:[#allocation3 + $0x8] sm:$0xff]  ;;  %v11460_v14 = vld [vmem:[#allocation3 + $0x80] sm:$0xff]  ;;  %v11491_v42 = vpack.i.bf16 %v3841_v56, %v11450_v44 }
 0x36d   :  { %9751 = vrot.lane.b32.xlu0 %v9720_v45, %s10351_s20  ;;  %9756 = vrot.lane.b32.xlu1 %v11435_v18, %s10345_s22  ;;  %17451 = vst [vmem:[#allocation88_spill] sm:$0xff] %v11454_v57  ;;  %17452 = vst [vmem:[#allocation89_spill] sm:$0xff] %v11456_v39  ;;  %v3557_v45 = vld [vmem:[#allocation3 + $0x90] sm:$0xff]  ;;  %v11498_v33 = vpack.i.bf16 %v4000_v43, %v11460_v14 }
 0x36e   :  { %8373 = vmatprep.subr.bf16.mxu0 %v8372_v48  ;;  %v11470_v48 = vld [vmem:[#allocation3 + $0x98] sm:$0xff]  ;;  %v2471_v39 = vld [vmem:[#allocation3 + $0x50] sm:$0xff]  ;;  %v11503_v57 = vpack.i.bf16 %v11321_v19, %v3557_v45 }
 0x36f   :  { %8375 = vmatpush1.bf16.msra.mxu0 %v8374_v2  ;;  %v11446_v32 = vpop.permute.xlu0 %9511  ;;  %v11448_v8 = vpop.permute.xlu1 %9461  ;;  %v3399_v2 = vld [vmem:[#allocation3 + $0x38] sm:$0xff]  ;;  %17453 = vst [vmem:[#allocation90_spill] sm:$0xff] %v11470_v48  ;;  %v11506_v60 = vpack.i.bf16 %v11470_v48, %v3557_v45  ;;  %v11530_v11 = vpack.i.bf16 %v10296_v34, %v2471_v39  ;;  %v9013_v45 = vunpack.i.l.bf16 %v11082_v52 }
 0x370   :  { %17448 = vst [vmem:[#allocation85_spill] sm:$0xff] %v11448_v8  ;;  %v11495_v59 = vpack.i.bf16 %v3399_v2, %v3398_v5  ;;  %v2470_v8 = vld [vmem:[#allocation3 + $0x48] sm:$0xff]  ;;  %v11514_v5 = vld [vmem:[#allocation3 + $0x38] sm:$0xff]  ;;  %v11520_v19 = vpack.i.bf16 %v2469_v22, %v3399_v2  ;;  %v8998_v2 = vunpack.i.l.bf16 %v11074_v12 }
 0x371   :  { %9761 = vrot.lane.b32.xlu0 %v11435_v18, %s10346_s23  ;;  %9766 = vrot.lane.b32.xlu1 %v11435_v18, %s10347_s24  ;;  %17461 = vst [vmem:[#allocation98_spill] sm:$0xff] %v11506_v60  ;;  %17463 = vst [vmem:[#allocation100_spill] sm:$0xff] %v11514_v5  ;;  %v11526_v3 = vpack.i.bf16 %v2471_v39, %v2470_v8  ;;  %v11528_v43 = vpack.i.bf16 %v2470_v8, %v2469_v22  ;;  %v4142_v60 = vld [vmem:[#allocation3 + $0x50] sm:$0xff]  ;;  %v2480_v22 = vld [vmem:[#allocation3 + $0xa0] sm:$0xff] }
 0x372   :  { %17464 = vst [vmem:[#allocation101_spill] sm:$0xff] %v11520_v19  ;;  %17467 = vst [vmem:[#allocation104_spill] sm:$0xff] %v11530_v11  ;;  %v11533_v44 = vpack.i.bf16 %v2470_v8, %v11500_v9  ;;  %v2333_v39 = vld [vmem:[#allocation3 + $0xb0] sm:$0xff]  ;;  %v9009_v8 = vunpack.i.h.bf16 %v11088_v23  ;;  %v9019_v19 = vunpack.i.h.bf16 %v11090_v41  ;;  %v11551_v11 = vld [vmem:[#allocation3 + $0xa0] sm:$0xff] }
 0x373   :  { %v11486_v38 = vpop.permute.xlu0 %9521  ;;  %v11488_v62 = vpop.permute.xlu1 %9466  ;;  %17465 = vst [vmem:[#allocation102_spill] sm:$0xff] %v11526_v3  ;;  %17466 = vst [vmem:[#allocation103_spill] sm:$0xff] %v11528_v43  ;;  %v4448_v43 = vld [vmem:[#allocation3 + $0xa8] sm:$0xff]  ;;  %v4005_v3 = vld [vmem:[#allocation3 + $0xb0] sm:$0xff] }
 0x374   :  { %17458 = vst [vmem:[#allocation95_spill] sm:$0xff] %v11486_v38  ;;  %17459 = vst [vmem:[#allocation96_spill] sm:$0xff] %v11488_v62  ;;  %v4585_v62 = vld [vmem:[#allocation3 + $0x48] sm:$0xff]  ;;  %v11572_v38 = vpack.i.bf16 %v10296_v34, %v2333_v39  ;;  %v11581_v23 = vpack.i.bf16 %v4448_v43, %v11551_v11 }
 0x375   :  { %9771 = vrot.lane.b32.xlu0 %v11435_v18, %s10348_s28  ;;  %9776 = vrot.lane.b32.xlu1 %v11435_v18, %s10349_s9  ;;  %17468 = vst [vmem:[#allocation105_spill] sm:$0xff] %v11533_v44  ;;  %v11545_v10 = vpack.i.bf16 %v4585_v62, %v11500_v9  ;;  %v9018_v44 = vunpack.i.l.bf16 %v11090_v41  ;;  %17473 = vst [vmem:[#allocation110_spill] sm:$0xff] %v11551_v11  ;;  %v11561_v41 = vpack.i.bf16 %v10296_v34, %v4142_v60 }
 0x376   :  { %v11564_v62 = vpack.i.bf16 %v2480_v22, %v11470_v48  ;;  %17478 = vst [vmem:[#allocation115_spill] sm:$0xff] %v11572_v38  ;;  %17481 = vst [vmem:[#allocation118_spill] sm:$0xff] %v11581_v23  ;;  %v17484_v38 = vunpack.i.h.bf16 %v11082_v52  ;;  %v11598_v60 = vsel %vm1506_vm14, %v9008_v36, %v9009_v8  ;;  %v11615_v36 = vsel %vm1506_vm14, %v9009_v8, %v9013_v45 }
 0x377   :  { %v11538_v56 = vpop.permute.xlu0 %9546  ;;  %v11540_v5 = vpop.permute.xlu1 %9471  ;;  %17472 = vst [vmem:[#allocation109_spill] sm:$0xff] %v11545_v10  ;;  %17474 = vst [vmem:[#allocation111_spill] sm:$0xff] %v11561_v41  ;;  %v11570_v10 = vpack.i.bf16 %v11542_v35, %v2480_v22  ;;  %v11583_v41 = vpack.i.bf16 %v10296_v34, %v4005_v3  ;;  %v17483_v22 = vunpack.i.h.bf16 %v11074_v12  ;;  %v11601_v43 = vsel %vm1655_vm15, %v9018_v44, %v9019_v19 }
 0x378   :  { %17469 = vst [vmem:[#allocation106_spill] sm:$0xff] %v11538_v56  ;;  %17470 = vst [vmem:[#allocation107_spill] sm:$0xff] %v11540_v5  ;;  %v9023_v56 = vunpack.i.l.bf16 %v11096_v46  ;;  %v11567_v5 = vpack.i.bf16 %v2333_v39, %v11542_v35  ;;  %v17486_v34 = vunpack.i.h.bf16 %v11096_v46  ;;  %v9028_v44 = vunpack.i.l.bf16 %v11104_v61 }
 0x379   :  { %9781 = vrot.lane.b32.xlu0 %v11435_v18, %s10350_s10  ;;  %9791 = vrot.lane.b32.xlu1 %v11435_v18, %s10351_s20  ;;  %17475 = vst [vmem:[#allocation112_spill] sm:$0xff] %v11564_v62  ;;  %17477 = vst [vmem:[#allocation114_spill] sm:$0xff] %v11570_v10  ;;  %v11590_v39 = vsel %vm1357_vm12, %v8998_v2, %v17483_v22  ;;  %v11595_v10 = vsel %vm1506_vm14, %v9013_v45, %v17484_v38  ;;  %v9033_v2 = vunpack.i.l.bf16 %v11098_v28 }
 0x37a   :  { %17476 = vst [vmem:[#allocation113_spill] sm:$0xff] %v11567_v5  ;;  %17482 = vst [vmem:[#allocation119_spill] sm:$0xff] %v11583_v41  ;;  %v11606_v3 = vsel %vm1655_vm15, %v9023_v56, %v17486_v34  ;;  %v9029_v38 = vunpack.i.h.bf16 %v11104_v61  ;;  %v9039_v22 = vunpack.i.h.bf16 %v11106_v0  ;;  %v9038_v34 = vunpack.i.l.bf16 %v11106_v0 }
 0x37b   :  { %v11574_v27 = vpop.permute.xlu0 %9556  ;;  %v11576_v18 = vpop.permute.xlu1 %9476  ;;  %17485 = vst [vmem:[#allocation120_spill] sm:$0xff] %v11601_v43  ;;  %v9043_v12 = vunpack.i.l.bf16 %v11112_v17  ;;  %v9053_v41 = vunpack.i.l.bf16 %v11114_v29  ;;  %v9049_v8 = vunpack.i.h.bf16 %v11120_v13  ;;  %v9048_v61 = vunpack.i.l.bf16 %v11120_v13 }
 0x37c   :  { %17479 = vst [vmem:[#allocation116_spill] sm:$0xff] %v11574_v27  ;;  %17480 = vst [vmem:[#allocation117_spill] sm:$0xff] %v11576_v18  ;;  %v9059_v11 = vunpack.i.h.bf16 %v11122_v24  ;;  %v9058_v0 = vunpack.i.l.bf16 %v11122_v24  ;;  %v17489_v5 = vunpack.i.h.bf16 %v11098_v28  ;;  %v9063_v62 = vunpack.i.l.bf16 %v11128_v49 }
 0x37d   :  { %9786 = vrot.lane.b32.xlu0 %v11330_v40, %s10314_s29  ;;  %9796 = vrot.lane.b32.xlu1 %v11491_v42, %s10319_s13  ;;  %v11647_v13 = vsel %vm1655_vm15, %v9019_v19, %v9023_v56  ;;  %v11650_v24 = vsel %vm17144_vm0, %v9028_v44, %v9029_v38  ;;  %v9068_v56 = vunpack.i.l.bf16 %v11136_v54  ;;  %v17497_v9 = vunpack.i.h.bf16 %v11114_v29 }
 0x37e   :  { %v11636_v35 = vsel %vm17144_vm0, %v9033_v2, %v17489_v5  ;;  %17491 = vst [vmem:[#allocation123_spill] sm:$0xff] %v11650_v24  ;;  %v11653_v5 = vsel %vm17139_vm1, %v9038_v34, %v9039_v22  ;;  %v11669_v34 = vsel %vm17144_vm0, %v9029_v38, %v9033_v2  ;;  %v17501_v24 = vunpack.i.h.bf16 %v11128_v49 }
 0x37f   :  { %v11625_v23 = vpop.permute.xlu0 %9566  ;;  %v11627_v45 = vpop.permute.xlu1 %9481  ;;  %17492 = vst [vmem:[#allocation124_spill] sm:$0xff] %v11653_v5  ;;  %17496 = vst [vmem:[#allocation127_spill] sm:$0xff] %v11669_v34  ;;  %v11674_v48 = vsel %vm2102_vm13, %v9053_v41, %v17497_v9  ;;  %v11677_v5 = vsel %vm2102_vm13, %v9048_v61, %v9049_v8  ;;  %v9368_v38 = vunpack.i.l.bf16 %v11360_v7  ;;  %v11697_v9 = vsel %vm2102_vm13, %v9049_v8, %v9053_v41 }
 0x380   :  { %17487 = vst [vmem:[#allocation121_spill] sm:$0xff] %v11625_v23  ;;  %17488 = vst [vmem:[#allocation122_spill] sm:$0xff] %v11627_v45  ;;  %v17490_v45 = vpack.i.bf16 %v11247_v31, %v11460_v14  ;;  %v11660_v31 = vsel %vm17139_vm1, %v9043_v12, %v17493_v16  ;;  %v11680_v16 = vsel %vm2251_vm11, %v9058_v0, %v9059_v11  ;;  %v17052_v0 = vunpack.i.h.bf16 %v11216_v6 }
 0x381   :  { %9806 = vrot.lane.b32.xlu1 %v11495_v59, %s10316_s11  ;;  %17498 = vst [vmem:[#allocation128_spill] sm:$0xff] %v11677_v5  ;;  %17499 = vst [vmem:[#allocation129_spill] sm:$0xff] %v11680_v16  ;;  %v11709_v2 = vsel %vm2251_vm11, %v9059_v11, %v9063_v62  ;;  %v9503_v5 = vunpack.i.l.bf16 %v11431_v21  ;;  %v9388_v8 = vunpack.i.l.bf16 %v11375_v37 }
 0x382   :  { %9801 = vrot.lane.b32.xlu0 %v17490_v45, %s10319_s13  ;;  %v11683_v45 = vsel %vm17139_vm1, %v9039_v22, %v9043_v12  ;;  %17502 = vst [vmem:[#allocation131_spill] sm:$0xff] %v11697_v9  ;;  %v17503_v12 = vunpack.i.h.bf16 %v11130_v25  ;;  %v17504_v22 = vunpack.i.l.bf16 %v11130_v25  ;;  %17505 = vst [vmem:[#allocation132_spill] sm:$0xff] %v11709_v2  ;;  %v17512_v2 = vunpack.i.h.bf16 %v11082_v52 }
 0x383   :  { %v11664_v19 = vpop.permute.xlu0 %9576  ;;  %v11666_v44 = vpop.permute.xlu1 %9486  ;;  %17500 = vst [vmem:[#allocation130_spill] sm:$0xff] %v11683_v45  ;;  %v17054_v52 = vunpack.i.l.bf16 %v11625_v23 }
 0x384   :  { %17494 = vst [vmem:[#allocation125_spill] sm:$0xff] %v11664_v19  ;;  %17495 = vst [vmem:[#allocation126_spill] sm:$0xff] %v11666_v44  ;;  %v11688_v44 = vsel %vm2251_vm11, %v9063_v62, %v17501_v24  ;;  %v11704_v61 = vsel %vm2400_vm10, %v17504_v22, %v17503_v12  ;;  %v17051_v24 = vunpack.i.l.bf16 %v11574_v27  ;;  %v1510_v41 = vsel %vm1506_vm14, %v17512_v2, %v9368_v38 }
 0x385   :  { %9816 = vrot.lane.b32.xlu1 %v11491_v42, %s10320_s14  ;;  %v17514_v27 = vunpack.i.h.bf16 %v11431_v21 }
 0x386   :  { %9811 = vrot.lane.b32.xlu0 %v11330_v40, %s10316_s11  ;;  %v17506_v40 = vunpack.i.h.bf16 %v11136_v54 }
 0x387   :  { %v11719_v12 = vpop.permute.xlu0 %9586  ;;  %v9497_v22 = vpop.permute.xlu1 %9496 }
 0x388   :  { %v11714_v16 = vsel %vm2400_vm10, %v9068_v56, %v17506_v40  ;;  %17508 = vst [vmem:[#allocation134_spill] sm:$0xff] %v11719_v12  ;;  %v9499_v11 = vunpack.i.h.bf16 %v9497_v22  ;;  %v9498_v62 = vunpack.i.l.bf16 %v9497_v22  ;;  %v17509_v56 = vunpack.i.h.bf16 %v11360_v7 }
 0x389   :  { %17507 = vst [vmem:[#allocation133_spill] sm:$0xff] %v11714_v16  ;;  %9826 = vrot.lane.b32.xlu1 %v11495_v59, %s17368_s1 }
 0x38a   :  { %v11727_v40 = vsel %vm1506_vm14, %v9368_v38, %v17509_v56  ;;  %9821 = vrot.lane.b32.xlu0 %v11498_v33, %s10320_s14  ;;  %v11738_v22 = vsel %vm1506_vm14, %v9499_v11, %v17051_v24  ;;  %v1519_v56 = vsel %vm1506_vm14, %v17052_v0, %v9498_v62  ;;  %v1520_v7 = vsel %vm1506_vm14, %v9498_v62, %v9499_v11 }
 0x38b   :  { %17510 = vst [vmem:[#allocation135_spill] sm:$0xff] %v11727_v40  ;;  %17511 = vst [vmem:[#allocation136_spill] sm:$0xff] %v11738_v22  ;;  %v11747_v16 = vpop.permute.xlu0 %9591  ;;  %v9507_v9 = vpop.permute.xlu1 %9506  ;;  %v8376_v45 = vpack.c.bf16 %v1520_v7, %v1510_v41  ;;  %v8378_v43 = vpack.c.bf16 %v1519_v56, %v11595_v10  ;;  %v1669_v24 = vsel %vm1655_vm15, %v9503_v5, %v17514_v27  ;;  %v17055_v0 = vunpack.i.h.bf16 %v11218_v20 }
 0x38c   :  { %17513 = vst [vmem:[#allocation137_spill] sm:$0xff] %v11747_v16  ;;  %v9509_v2 = vunpack.i.h.bf16 %v9507_v9  ;;  %v9508_v38 = vunpack.i.l.bf16 %v9507_v9  ;;  %v17515_v62 = vunpack.i.h.bf16 %v11375_v37  ;;  %v17517_v27 = vunpack.i.l.bf16 %v11350_v51 }
 0x38d   :  { %9836 = vrot.lane.b32.xlu1 %v11491_v42, %s10321_s15  ;;  %v17518_v41 = vunpack.i.h.bf16 %v11096_v46  ;;  %8377 = vmatprep.subr.bf16.mxu0 %v8376_v45  ;;  %v9513_v46 = vunpack.i.l.bf16 %v11446_v32  ;;  %v17522_v10 = vunpack.i.h.bf16 %v11387_v26  ;;  %v17548_v22 = vunpack.i.l.bf16 %v11747_v16  ;;  %v17557_v16 = vld [vmem:[#allocation80_spill] sm:$0xff] }
 0x38e   :  { %v11761_v7 = vsel %vm17144_vm0, %v9388_v8, %v17515_v62  ;;  %9831 = vrot.lane.b32.xlu0 %v11503_v57, %s17368_s1  ;;  %v1668_v62 = vsel %vm1655_vm15, %v17055_v0, %v9503_v5  ;;  %v11780_v34 = vsel %vm17144_vm0, %v9509_v2, %v17054_v52  ;;  %8379 = vmatpush1.bf16.msra.mxu0 %v8378_v43  ;;  %v17059_v52 = vunpack.i.h.bf16 %v11223_v4 }
 0x38f   :  { %17516 = vst [vmem:[#allocation138_spill] sm:$0xff] %v11761_v7  ;;  %v1659_v9 = vsel %vm1655_vm15, %v17518_v41, %v17517_v27  ;;  %17519 = vst [vmem:[#allocation139_spill] sm:$0xff] %v11780_v34  ;;  %v11784_v27 = vpop.permute.xlu0 %9596  ;;  %v11786_v41 = vpop.permute.xlu1 %9516  ;;  %v1818_v56 = vsel %vm17144_vm0, %v9508_v38, %v9509_v2  ;;  %v8382_v2 = vpack.c.bf16 %v1668_v62, %v11606_v3  ;;  %v17521_v5 = vunpack.i.h.bf16 %v11098_v28 }
 0x390   :  { %v8380_v11 = vpack.c.bf16 %v1669_v24, %v1659_v9  ;;  %17520 = vst [vmem:[#allocation140_spill] sm:$0xff] %v11784_v27  ;;  %v17057_v24 = vunpack.i.l.bf16 %v11664_v19  ;;  %v9519_v9 = vunpack.i.h.bf16 %v11786_v41  ;;  %v1817_v0 = vsel %vm17144_vm0, %v17059_v52, %v9508_v38  ;;  %v17527_v52 = vld [vmem:[#allocation26_spill] sm:$0xff]  ;;  %v17535_v19 = vld [vmem:[#allocation95_spill] sm:$0xff] }
 0x391   :  { %9846 = vrot.lane.b32.xlu1 %v11495_v59, %s10318_s12  ;;  %v1808_v45 = vsel %vm17144_vm0, %v17521_v5, %v9388_v8  ;;  %v9518_v8 = vunpack.i.l.bf16 %v11786_v41  ;;  %v17528_v38 = vunpack.i.l.bf16 %v11362_v1  ;;  %v17553_v34 = vunpack.i.h.bf16 %v17535_v19 }
 0x392   :  { %8381 = vmatprep.subr.bf16.mxu0 %v8380_v11  ;;  %9841 = vrot.lane.b32.xlu0 %v11498_v33, %s10321_s15  ;;  %v17523_v11 = vunpack.i.l.bf16 %v11387_v26  ;;  %v11818_v7 = vsel %vm2102_vm13, %v9519_v9, %v17057_v24  ;;  %v8384_v3 = vpack.c.bf16 %v1818_v56, %v1808_v45  ;;  %v17066_v45 = vunpack.i.l.bf16 %v11719_v12 }
 0x393   :  { %17525 = vst [vmem:[#allocation142_spill] sm:$0xff] %v11818_v7  ;;  %8383 = vmatpush1.bf16.msra.mxu0 %v8382_v2  ;;  %v11822_v62 = vpop.permute.xlu0 %9601  ;;  %v11824_v5 = vpop.permute.xlu1 %9526  ;;  %v17529_v56 = vunpack.i.h.bf16 %v11112_v17  ;;  %v17531_v2 = vunpack.i.h.bf16 %v11225_v50  ;;  %v17546_v17 = vld [vmem:[#allocation76_spill] sm:$0xff]  ;;  %v17547_v12 = vunpack.i.h.bf16 %v11229_v58  ;;  %v17562_v37 = vunpack.i.h.bf16 %v11231_v63 }
 0x394   :  { %v11810_v43 = vsel %vm2102_vm13, %v17523_v11, %v17522_v10  ;;  %v17526_v10 = vunpack.i.h.bf16 %v11446_v32  ;;  %8385 = vmatprep.subr.bf16.mxu0 %v8384_v3  ;;  %v17530_v3 = vld [vmem:[#allocation56_spill] sm:$0xff] }
 0x395   :  { %17524 = vst [vmem:[#allocation141_spill] sm:$0xff] %v11810_v43  ;;  %9856 = vrot.lane.b32.xlu1 %v11491_v42, %s10322_s16  ;;  %v1957_v24 = vsel %vm17139_vm1, %v17529_v56, %v17528_v38  ;;  %v1966_v28 = vsel %vm17139_vm1, %v17531_v2, %v9513_v46  ;;  %v17532_v43 = vunpack.i.h.bf16 %v11824_v5  ;;  %v9523_v38 = vunpack.i.l.bf16 %v17535_v19 }
 0x396   :  { %v1967_v11 = vsel %vm17139_vm1, %v9513_v46, %v17526_v10  ;;  %9851 = vrot.lane.b32.xlu0 %v11503_v57, %s10318_s12  ;;  %v8386_v10 = vpack.c.bf16 %v1817_v0, %v11636_v35  ;;  %v17534_v0 = vld [vmem:[#allocation27_spill] sm:$0xff]  ;;  %v2116_v46 = vsel %vm2102_vm13, %v9518_v8, %v9519_v9  ;;  %v17537_v2 = vunpack.i.l.bf16 %v11389_v47  ;;  %v17543_v9 = vld [vmem:[#allocation69_spill] sm:$0xff] }
 0x397   :  { %v11856_v7 = vsel %vm2400_vm10, %v17532_v43, %v17066_v45  ;;  %v8388_v35 = vpack.c.bf16 %v1967_v11, %v1957_v24  ;;  %v11861_v56 = vpop.permute.xlu0 %9606  ;;  %v11863_v41 = vpop.permute.xlu1 %9531  ;;  %v17538_v43 = vunpack.i.h.bf16 %v17530_v3  ;;  %v17540_v11 = vunpack.i.h.bf16 %v11403_v30 }
 0x398   :  { %17533 = vst [vmem:[#allocation26_spill] sm:$0xff] %v11856_v7  ;;  %8387 = vmatpush1.bf16.msra.mxu0 %v8386_v10  ;;  %17536 = vst [vmem:[#allocation56_spill] sm:$0xff] %v11861_v56  ;;  %v17541_v45 = vunpack.i.l.bf16 %v11403_v30  ;;  %v2115_v40 = vsel %vm2102_vm13, %v17547_v12, %v9518_v8  ;;  %v17549_v23 = vunpack.i.h.bf16 %v11863_v41  ;;  %v2265_v12 = vsel %vm2251_vm11, %v9523_v38, %v17553_v34 }
 0x399   :  { %v11871_v24 = vsel %vm2549_vm8, %v17538_v43, %v17537_v2  ;;  %8389 = vmatprep.subr.bf16.mxu0 %v8388_v35  ;;  %9866 = vrot.lane.b32.xlu1 %v11495_v59, %s10319_s13  ;;  %v8390_v2 = vpack.c.bf16 %v1966_v28, %v11660_v31  ;;  %v17544_v43 = vunpack.i.l.bf16 %v11387_v26  ;;  %v8394_v34 = vpack.c.bf16 %v2115_v40, %v11674_v48 }
 0x39a   :  { %17539 = vst [vmem:[#allocation27_spill] sm:$0xff] %v11871_v24  ;;  %v11878_v10 = vsel %vm2400_vm10, %v17541_v45, %v17540_v11  ;;  %9861 = vrot.lane.b32.xlu0 %v11498_v33, %s10322_s16  ;;  %v17545_v45 = vunpack.i.h.bf16 %v11114_v29  ;;  %v11904_v31 = vsel %vm2549_vm8, %v17549_v23, %v17548_v22  ;;  %v17551_v29 = vld [vmem:[#allocation55_spill] sm:$0xff]  ;;  %v17555_v22 = vld [vmem:[#allocation58_spill] sm:$0xff]  ;;  %v17558_v8 = vunpack.i.l.bf16 %v17543_v9 }
 0x39b   :  { %17542 = vst [vmem:[#allocation95_spill] sm:$0xff] %v11878_v10  ;;  %17550 = vst [vmem:[#allocation143_spill] sm:$0xff] %v11904_v31  ;;  %v11910_v35 = vpop.permute.xlu1 %9536  ;;  %v17554_v10 = vld [vmem:[#allocation57_spill] sm:$0xff]  ;;  %v17559_v23 = vunpack.i.h.bf16 %v11128_v49  ;;  %v2264_v24 = vsel %vm2251_vm11, %v17562_v37, %v9523_v38  ;;  %v17563_v31 = vunpack.i.l.bf16 %v11784_v27  ;;  %v17569_v38 = vunpack.i.h.bf16 %v11824_v5 }
 0x39c   :  { %v2106_v11 = vsel %vm2102_vm13, %v17545_v45, %v17544_v43  ;;  %v9528_v43 = vunpack.i.l.bf16 %v11824_v5  ;;  %8391 = vmatpush1.bf16.msra.mxu0 %v8390_v2  ;;  %v11908_v45 = vpop.permute.xlu0 %9611  ;;  %v9539_v26 = vunpack.i.h.bf16 %v11910_v35  ;;  %v17556_v2 = vld [vmem:[#allocation60_spill] sm:$0xff]  ;;  %v17565_v49 = vld [vmem:[#allocation85_spill] sm:$0xff]  ;;  %v17097_v47 = vunpack.i.l.bf16 %v11861_v56 }
 0x39d   :  { %v8392_v28 = vpack.c.bf16 %v2116_v46, %v2106_v11  ;;  %17552 = vst [vmem:[#allocation55_spill] sm:$0xff] %v11908_v45  ;;  %v17085_v46 = vunpack.i.h.bf16 %v17555_v22  ;;  %9876 = vrot.lane.b32.xlu1 %v11491_v42, %s10323_s17  ;;  %v2255_v11 = vsel %vm2251_vm11, %v17559_v23, %v17558_v8  ;;  %v9533_v8 = vunpack.i.l.bf16 %v11863_v41 }
 0x39e   :  { %9871 = vrot.lane.b32.xlu0 %v11503_v57, %s10319_s13  ;;  %v11946_v48 = vsel %vm17168_vm9, %v9539_v26, %v17563_v31  ;;  %v8396_v40 = vpack.c.bf16 %v2265_v12, %v2255_v11  ;;  %v2414_v31 = vsel %vm2400_vm10, %v9528_v43, %v17569_v38  ;;  %v17570_v12 = vld [vmem:[#allocation106_spill] sm:$0xff]  ;;  %v9338_v63 = vunpack.i.l.bf16 %v17530_v3 }
 0x39f   :  { %8393 = vmatprep.subr.bf16.mxu0 %v8392_v28  ;;  %v17560_v28 = vunpack.i.l.bf16 %v17546_v17  ;;  %17564 = vst [vmem:[#allocation60_spill] sm:$0xff] %v11946_v48  ;;  %v11952_v17 = vpop.permute.xlu1 %9541  ;;  %v17096_v11 = vunpack.i.h.bf16 %v17570_v12  ;;  %v17572_v58 = vunpack.i.h.bf16 %v17556_v2  ;;  %v8398_v5 = vpack.c.bf16 %v2264_v24, %v11688_v44  ;;  %v17577_v24 = vld [vmem:[#allocation28_spill] sm:$0xff] }
 0x3a0   :  { %8395 = vmatpush1.bf16.msra.mxu0 %v8394_v34  ;;  %v11950_v23 = vpop.permute.xlu0 %9616  ;;  %v9544_v27 = vunpack.i.h.bf16 %v11952_v17 }
 0x3a1   :  { %v11938_v7 = vsel %vm17168_vm9, %v17085_v46, %v17560_v28  ;;  %17566 = vst [vmem:[#allocation144_spill] sm:$0xff] %v11950_v23  ;;  %v17567_v28 = vunpack.i.l.bf16 %v11403_v30  ;;  %v17568_v46 = vunpack.i.h.bf16 %v11130_v25  ;;  %v17095_v34 = vunpack.i.l.bf16 %v11950_v23  ;;  %8397 = vmatprep.subr.bf16.mxu0 %v8396_v40  ;;  %9886 = vrot.lane.b32.xlu1 %v11495_v59, %s10320_s14 }
 0x3a2   :  { %17561 = vst [vmem:[#allocation58_spill] sm:$0xff] %v11938_v7  ;;  %v17571_v30 = vunpack.i.l.bf16 %v17557_v16  ;;  %9881 = vrot.lane.b32.xlu0 %v11498_v33, %s10323_s17  ;;  %v9538_v40 = vunpack.i.l.bf16 %v11910_v35  ;;  %v9343_v35 = vunpack.i.l.bf16 %v17555_v22  ;;  %v17585_v16 = vunpack.i.h.bf16 %v17551_v29 }
 0x3a3   :  { %v2404_v37 = vsel %vm2400_vm10, %v17568_v46, %v17567_v28  ;;  %v17574_v28 = vunpack.i.h.bf16 %v17527_v52 }
 0x3a4   :  { %v11972_v46 = vsel %vm17169_vm7, %v17572_v58, %v17571_v30  ;;  %v11989_v58 = vsel %vm2996_vm6, %v17096_v11, %v17095_v34  ;;  %v11994_v30 = vsel %vm17169_vm7, %v9544_v27, %v17097_v47  ;;  %v8400_v44 = vpack.c.bf16 %v2414_v31, %v2404_v37  ;;  %8399 = vmatpush1.bf16.msra.mxu0 %v8398_v5  ;;  %v11998_v7 = vpop.permute.xlu0 %9621  ;;  %v17587_v11 = vld [vmem:[#allocation29_spill] sm:$0xff] }
 0x3a5   :  { %17573 = vst [vmem:[#allocation106_spill] sm:$0xff] %v11972_v46  ;;  %v2413_v38 = vsel %vm2400_vm10, %v17574_v28, %v9528_v43  ;;  %17575 = vst [vmem:[#allocation145_spill] sm:$0xff] %v11989_v58  ;;  %v12000_v43 = vpop.permute.xlu1 %9551  ;;  %v17580_v28 = vunpack.i.h.bf16 %v11863_v41  ;;  %v17581_v47 = vunpack.i.h.bf16 %v17554_v10  ;;  %v17582_v37 = vunpack.i.l.bf16 %v17554_v10  ;;  %9896 = vrot.lane.b32.xlu1 %v11491_v42, %s10324_s18 }
 0x3a6   :  { %17576 = vst [vmem:[#allocation146_spill] sm:$0xff] %v11994_v30  ;;  %17578 = vst [vmem:[#allocation28_spill] sm:$0xff] %v11998_v7  ;;  %v17584_v5 = vunpack.i.l.bf16 %v17565_v49  ;;  %8401 = vmatprep.subr.bf16.mxu0 %v8400_v44  ;;  %9891 = vrot.lane.b32.xlu0 %v11503_v57, %s10320_s14  ;;  %v17589_v44 = vunpack.i.h.bf16 %v17534_v0  ;;  %v17590_v57 = vld [vmem:[#allocation79_spill] sm:$0xff] }
 0x3a7   :  { %17579 = vst [vmem:[#allocation147_spill] sm:$0xff] %v12000_v43  ;;  %v2563_v34 = vsel %vm2549_vm8, %v9533_v8, %v17580_v28  ;;  %v12012_v31 = vsel %vm1357_vm12, %v17582_v37, %v17581_v47  ;;  %v17103_v28 = vunpack.i.l.bf16 %v12000_v43  ;;  %v8402_v47 = vpack.c.bf16 %v2413_v38, %v11704_v61 }
 0x3a8   :  { %17583 = vst [vmem:[#allocation148_spill] sm:$0xff] %v12012_v31  ;;  %v12020_v41 = vsel %vm2996_vm6, %v17585_v16, %v17584_v5  ;;  %v17588_v37 = vunpack.i.h.bf16 %v17530_v3  ;;  %v2562_v46 = vsel %vm2549_vm8, %v17589_v44, %v9533_v8  ;;  %v17591_v48 = vunpack.i.h.bf16 %v17590_v57 }
 0x3a9   :  { %17586 = vst [vmem:[#allocation149_spill] sm:$0xff] %v12020_v41  ;;  %v9543_v38 = vunpack.i.l.bf16 %v11952_v17  ;;  %8403 = vmatpush1.bf16.msra.mxu0 %v8402_v47  ;;  %v12049_v16 = vpop.permute.xlu1 %9561  ;;  %v2712_v5 = vsel %vm17168_vm9, %v9538_v40, %v9539_v26  ;;  %v17595_v44 = vunpack.i.h.bf16 %v11144_v15  ;;  %v9348_v17 = vunpack.i.l.bf16 %v17556_v2  ;;  %9906 = vrot.lane.b32.xlu1 %v11495_v59, %s10321_s15 }
 0x3aa   :  { %v2553_v30 = vsel %vm2549_vm8, %v9338_v63, %v17588_v37  ;;  %v12043_v23 = vsel %vm1357_vm12, %v17591_v48, %v17103_v28  ;;  %v12047_v37 = vpop.permute.xlu0 %9626  ;;  %17594 = vst [vmem:[#allocation150_spill] sm:$0xff] %v12049_v16  ;;  %v17105_v47 = vunpack.i.l.bf16 %v12049_v16  ;;  %9901 = vrot.lane.b32.xlu0 %v11498_v33, %s10324_s18  ;;  %v17598_v8 = vunpack.i.h.bf16 %v11350_v51 }
 0x3ab   :  { %17592 = vst [vmem:[#allocation29_spill] sm:$0xff] %v12043_v23  ;;  %v8404_v61 = vpack.c.bf16 %v2563_v34, %v2553_v30  ;;  %17593 = vst [vmem:[#allocation79_spill] sm:$0xff] %v12047_v37  ;;  %v2552_v48 = vsel %vm2549_vm8, %v17595_v44, %v9338_v63  ;;  %v17596_v34 = vunpack.i.h.bf16 %v11138_v55  ;;  %v17597_v44 = vunpack.i.h.bf16 %v17555_v22 }
 0x3ac   :  { %v8406_v63 = vpack.c.bf16 %v2562_v46, %v2552_v48  ;;  %v17599_v28 = vunpack.i.l.bf16 %v11350_v51  ;;  %v17601_v3 = vunpack.i.h.bf16 %v17577_v24  ;;  %v17602_v57 = vunpack.i.h.bf16 %v11431_v21 }
 0x3ad   :  { %v2701_v30 = vsel %vm17168_vm9, %v17596_v34, %v9343_v35  ;;  %8405 = vmatprep.subr.bf16.mxu0 %v8404_v61  ;;  %v2702_v34 = vsel %vm17168_vm9, %v9343_v35, %v17597_v44  ;;  %v17604_v35 = vld [vmem:[#allocation78_spill] sm:$0xff]  ;;  %v9548_v44 = vunpack.i.l.bf16 %v17570_v12  ;;  %v17611_v21 = vunpack.i.l.bf16 %v11576_v18  ;;  %9916 = vrot.lane.b32.xlu1 %v11491_v42, %s10325_s19 }
 0x3ae   :  { %v12076_v61 = vsel %vm1655_vm15, %v17599_v28, %v17598_v8  ;;  %v2711_v26 = vsel %vm17168_vm9, %v17601_v3, %v9538_v40  ;;  %v12086_v46 = vsel %vm1655_vm15, %v17602_v57, %v17105_v47  ;;  %v8408_v22 = vpack.c.bf16 %v2712_v5, %v2702_v34  ;;  %8407 = vmatpush1.bf16.msra.mxu0 %v8406_v63  ;;  %v12090_v41 = vpop.permute.xlu0 %9631  ;;  %v12092_v28 = vpop.permute.xlu1 %9571 }
 0x3af   :  { %17600 = vst [vmem:[#allocation151_spill] sm:$0xff] %v12076_v61  ;;  %17603 = vst [vmem:[#allocation152_spill] sm:$0xff] %v12086_v46  ;;  %v17106_v48 = vunpack.i.h.bf16 %v17604_v35  ;;  %v2861_v8 = vsel %vm17169_vm7, %v9543_v38, %v9544_v27  ;;  %v17110_v3 = vunpack.i.l.bf16 %v12090_v41  ;;  %v17607_v57 = vunpack.i.h.bf16 %v17556_v2  ;;  %v17613_v2 = vld [vmem:[#allocation98_spill] sm:$0xff] }
 0x3b0   :  { %17605 = vst [vmem:[#allocation78_spill] sm:$0xff] %v12090_v41  ;;  %17606 = vst [vmem:[#allocation153_spill] sm:$0xff] %v12092_v28  ;;  %8409 = vmatprep.subr.bf16.mxu0 %v8408_v22  ;;  %v17608_v34 = vunpack.i.h.bf16 %v11362_v1  ;;  %v17609_v47 = vunpack.i.l.bf16 %v11362_v1  ;;  %9911 = vrot.lane.b32.xlu0 %v17613_v2, %s10321_s15  ;;  %v8410_v22 = vpack.c.bf16 %v2711_v26, %v2701_v30  ;;  %v17620_v30 = vunpack.i.l.bf16 %v11138_v55  ;;  %v17621_v26 = vld [vmem:[#allocation6_spill] sm:$0xff]  ;;  %v17761_v1 = vld [vmem:[#allocation133_spill] sm:$0xff] }
 0x3b1   :  { %v2851_v63 = vsel %vm17169_vm7, %v9348_v17, %v17607_v57  ;;  %v12116_v5 = vsel %vm50_vm3, %v17106_v48, %v17611_v21  ;;  %v17614_v57 = vunpack.i.h.bf16 %v17587_v11  ;;  %v17617_v21 = vunpack.i.l.bf16 %v12092_v28  ;;  %v17627_v41 = vld [vmem:[#allocation30_spill] sm:$0xff]  ;;  %9926 = vrot.lane.b32.xlu1 %v11495_v59, %s10322_s16 }
 0x3b2   :  { %v12108_v27 = vsel %vm17139_vm1, %v17609_v47, %v17608_v34  ;;  %17612 = vst [vmem:[#allocation155_spill] sm:$0xff] %v12116_v5  ;;  %v17615_v34 = vunpack.i.h.bf16 %v11822_v62  ;;  %v17618_v48 = vunpack.i.h.bf16 %v11446_v32  ;;  %v8412_v42 = vpack.c.bf16 %v2861_v8, %v2851_v63  ;;  %8411 = vmatpush1.bf16.msra.mxu0 %v8410_v22  ;;  %v17626_v63 = vld [vmem:[#allocation10_spill] sm:$0xff] }
 0x3b3   :  { %17610 = vst [vmem:[#allocation154_spill] sm:$0xff] %v12108_v27  ;;  %v2860_v47 = vsel %vm17169_vm7, %v17614_v57, %v9543_v38  ;;  %v17622_v56 = vunpack.i.l.bf16 %v17621_v26  ;;  %v12146_v57 = vpop.permute.xlu0 %9636  ;;  %v17628_v22 = vunpack.i.h.bf16 %v11152_v53  ;;  %v17773_v10 = vunpack.i.h.bf16 %v17621_v26 }
 0x3b4   :  { %v12130_v40 = vsel %vm50_vm3, %v17615_v34, %v17110_v3  ;;  %v12137_v58 = vsel %vm17139_vm1, %v17618_v48, %v17617_v21  ;;  %17623 = vst [vmem:[#allocation6_spill] sm:$0xff] %v12146_v57  ;;  %v12148_v34 = vpop.permute.xlu1 %9581  ;;  %v17625_v3 = vunpack.i.h.bf16 %v17570_v12  ;;  %8413 = vmatprep.subr.bf16.mxu0 %v8412_v42  ;;  %v9163_v12 = vunpack.i.l.bf16 %v11216_v6  ;;  %9921 = vrot.lane.b32.xlu0 %v11498_v33, %s10325_s19 }
 0x3b5   :  { %17616 = vst [vmem:[#allocation98_spill] sm:$0xff] %v12130_v40  ;;  %17619 = vst [vmem:[#allocation156_spill] sm:$0xff] %v12137_v58  ;;  %v12144_v38 = vsel %vm17168_vm9, %v17622_v56, %v17620_v30  ;;  %v17117_v56 = vunpack.i.h.bf16 %v17627_v41  ;;  %v2850_v30 = vsel %vm17169_vm7, %v17628_v22, %v9348_v17  ;;  %v17629_v48 = vunpack.i.h.bf16 %v17551_v29  ;;  %9936 = vrot.lane.b32.xlu1 %v11495_v59, %s10323_s17 }
 0x3b6   :  { %17624 = vst [vmem:[#allocation157_spill] sm:$0xff] %v12148_v34  ;;  %v3010_v32 = vsel %vm2996_vm6, %v9548_v44, %v17625_v3  ;;  %v8414_v8 = vpack.c.bf16 %v2860_v47, %v2850_v30  ;;  %v17630_v21 = vunpack.i.l.bf16 %v17551_v29  ;;  %v17631_v22 = vunpack.i.h.bf16 %v17543_v9 }
 0x3b7   :  { %v17632_v42 = vunpack.i.l.bf16 %v17543_v9  ;;  %v3009_v33 = vsel %vm2996_vm6, %v17117_v56, %v9548_v44  ;;  %v17634_v3 = vunpack.i.l.bf16 %v12148_v34  ;;  %v17635_v47 = vunpack.i.h.bf16 %v17535_v19  ;;  %v12193_v27 = vpop.permute.xlu0 %9641 }
 0x3b8   :  { %v3000_v17 = vsel %vm2996_vm6, %v17630_v21, %v17629_v48  ;;  %v17637_v48 = vld [vmem:[#allocation11_spill] sm:$0xff]  ;;  %v9603_v40 = vunpack.i.l.bf16 %v11822_v62  ;;  %8415 = vmatpush1.bf16.msra.mxu0 %v8414_v8  ;;  %v17641_v44 = vunpack.i.h.bf16 %v11136_v54  ;;  %v17644_v8 = vmov %v17630_v21  ;;  %9931 = vrot.lane.b32.xlu0 %v17613_v2, %s10322_s16 }
 0x3b9   :  { %v12179_v61 = vsel %vm2251_vm11, %v17632_v42, %v17631_v22  ;;  %v12189_v30 = vsel %vm2251_vm11, %v17635_v47, %v17634_v3  ;;  %v8416_v5 = vpack.c.bf16 %v3010_v32, %v3000_v17  ;;  %17638 = vst [vmem:[#allocation11_spill] sm:$0xff] %v12193_v27  ;;  %v12195_v22 = vpop.permute.xlu1 %9646  ;;  %v17640_v42 = vunpack.i.l.bf16 %v11130_v25  ;;  %v17642_v32 = vld [vmem:[#allocation12_spill] sm:$0xff]  ;;  %v17643_v17 = vld [vmem:[#allocation14_spill] sm:$0xff]  ;;  %9946 = vrot.lane.b32.xlu1 %v11495_v59, %s10324_s18 }
 0x3ba   :  { %17633 = vst [vmem:[#allocation10_spill] sm:$0xff] %v12179_v61  ;;  %17636 = vst [vmem:[#allocation30_spill] sm:$0xff] %v12189_v30  ;;  %v17645_v21 = vunpack.i.h.bf16 %v17626_v63  ;;  %v9644_v25 = vunpack.i.h.bf16 %v12193_v27  ;;  %v9448_v54 = vunpack.i.l.bf16 %v17604_v35  ;;  %v17646_v29 = vunpack.i.h.bf16 %v11216_v6  ;;  %v17655_v30 = vld [vmem:[#allocation81_spill] sm:$0xff] }
 0x3bb   :  { %17639 = vst [vmem:[#allocation158_spill] sm:$0xff] %v12195_v22  ;;  %v12202_v56 = vsel %vm2400_vm10, %v17641_v44, %v17640_v42  ;;  %8417 = vmatprep.subr.bf16.mxu0 %v8416_v5  ;;  %v9649_v42 = vunpack.i.h.bf16 %v12195_v22  ;;  %v17647_v5 = vld [vmem:[#allocation23_spill] sm:$0xff]  ;;  %v17649_v22 = vunpack.i.h.bf16 %v11218_v20  ;;  %v17650_v27 = vunpack.i.l.bf16 %v11218_v20 }
 0x3bc   :  { %v2999_v58 = vsel %vm2996_vm6, %v17645_v21, %v17644_v8  ;;  %v1518_v19 = vsel %vm1506_vm14, %v9163_v12, %v17646_v29  ;;  %v17648_v47 = vunpack.i.l.bf16 %v17647_v5  ;;  %v9613_v6 = vunpack.i.l.bf16 %v11908_v45  ;;  %9941 = vrot.lane.b32.xlu0 %v17613_v2, %s10323_s17 }
 0x3bd   :  { %v8418_v44 = vpack.c.bf16 %v3009_v33, %v2999_v58  ;;  %v1667_v61 = vsel %vm1655_vm15, %v17650_v27, %v17649_v22  ;;  %v12235_v33 = vpop.permute.xlu0 %9651  ;;  %v12237_v29 = vpop.permute.xlu1 %9656  ;;  %v17653_v5 = vunpack.i.h.bf16 %v11822_v62  ;;  %v9458_v27 = vunpack.i.l.bf16 %v17655_v30  ;;  %v17656_v22 = vld [vmem:[#allocation86_spill] sm:$0xff]  ;;  %9956 = vrot.lane.b32.xlu1 %v11495_v59, %s10325_s19 }
 0x3be   :  { %v1368_v3 = vsel %vm1357_vm12, %v9644_v25, %v17648_v47  ;;  %17651 = vst [vmem:[#allocation12_spill] sm:$0xff] %v12235_v33  ;;  %17652 = vst [vmem:[#allocation14_spill] sm:$0xff] %v12237_v29  ;;  %v17654_v25 = vld [vmem:[#allocation31_spill] sm:$0xff]  ;;  %v17657_v58 = vpack.c.bf16 %v11460_v14, %v17656_v22  ;;  %v1517_v46 = vsel %vm1506_vm14, %v9649_v42, %v9163_v12  ;;  %v17658_v62 = vunpack.i.h.bf16 %v17604_v35 }
 0x3bf   :  { %8419 = vmatpush1.bf16.msra.mxu0 %v8418_v44  ;;  %v8274_v8 = vpack.c.bf16 %v1368_v3, %v11590_v39  ;;  %v3198_v47 = vsel %vm50_vm3, %v9603_v40, %v17653_v5  ;;  %v17126_v21 = vunpack.i.h.bf16 %v17654_v25  ;;  %v8276_v44 = vpack.c.bf16 %v1518_v19, %v11615_v36 }
 0x3c0   :  { %8421 = vmatprep.subr.bf16.mxu0 %v17657_v58  ;;  %v9654_v39 = vunpack.i.h.bf16 %v12235_v33  ;;  %v3188_v3 = vsel %vm50_vm3, %v9448_v54, %v17658_v62  ;;  %v8280_v5 = vpack.c.bf16 %v1667_v61, %v11647_v13  ;;  %v17659_v12 = vunpack.i.h.bf16 %v11223_v4  ;;  %v17663_v13 = vld [vmem:[#allocation34_spill] sm:$0xff]  ;;  %v17671_v62 = vld [vmem:[#allocation96_spill] sm:$0xff]  ;;  %9951 = vrot.lane.b32.xlu0 %v17613_v2, %s10324_s18 }
 0x3c1   :  { %v3197_v14 = vsel %vm50_vm3, %v17126_v21, %v9603_v40  ;;  %8275 = vmatpush1.bf16.msra.mxu1 %v8274_v8  ;;  %v8424_v36 = vpack.c.bf16 %v3198_v47, %v3188_v3  ;;  %v17660_v19 = vunpack.i.l.bf16 %v11223_v4  ;;  %v17661_v58 = vunpack.i.h.bf16 %v11225_v50  ;;  %v17664_v8 = vld [vmem:[#allocation82_spill] sm:$0xff]  ;;  %v17665_v47 = vld [vmem:[#allocation87_spill] sm:$0xff]  ;;  %v12281_v21 = vpop.permute.xlu0 %9661 }
 0x3c2   :  { %v17662_v35 = vunpack.i.l.bf16 %v11225_v50  ;;  %v9623_v40 = vunpack.i.l.bf16 %v11998_v7  ;;  %8277 = vmatprep.subr.bf16.mxu1 %v8276_v44  ;;  %v17666_v3 = vpack.c.bf16 %v17664_v8, %v17665_v47  ;;  %17667 = vst [vmem:[#allocation23_spill] sm:$0xff] %v12281_v21  ;;  %v8278_v44 = vpack.c.bf16 %v1517_v46, %v11598_v60  ;;  %v17674_v60 = vld [vmem:[#allocation24_spill] sm:$0xff] }
 0x3c3   :  { %v1816_v42 = vsel %vm17144_vm0, %v17660_v19, %v17659_v12  ;;  %v12283_v12 = vpop.permute.xlu1 %9666  ;;  %v17669_v19 = vunpack.i.h.bf16 %v11908_v45  ;;  %v17672_v8 = vunpack.i.h.bf16 %v17655_v30  ;;  %v17673_v33 = vunpack.i.l.bf16 %v11218_v20  ;;  %v17676_v20 = vld [vmem:[#allocation127_spill] sm:$0xff] }
 0x3c4   :  { %v12273_v22 = vsel %vm17139_vm1, %v17662_v35, %v17661_v58  ;;  %8423 = vmatpush1.bf16.msra.mxu0 %v17666_v3  ;;  %17668 = vst [vmem:[#allocation31_spill] sm:$0xff] %v12283_v12  ;;  %v17670_v35 = vunpack.i.h.bf16 %v17642_v32  ;;  %v9468_v3 = vunpack.i.l.bf16 %v17671_v62  ;;  %v8284_v34 = vpack.c.bf16 %v1816_v42, %v17676_v20  ;;  %v17683_v20 = vld [vmem:[#allocation120_spill] sm:$0xff]  ;;  %9961 = vrot.lane.b32.xlu0 %v17613_v2, %s10325_s19 }
 0x3c5   :  { %v3346_v58 = vsel %vm17216_vm2, %v9613_v6, %v17669_v19  ;;  %8425 = vmatprep.subr.bf16.mxu0 %v8424_v36  ;;  %v3336_v47 = vsel %vm17216_vm2, %v9458_v27, %v17672_v8  ;;  %v1666_v45 = vsel %vm1655_vm15, %v9654_v39, %v17673_v33  ;;  %v9659_v19 = vunpack.i.h.bf16 %v12237_v29  ;;  %8279 = vmatpush1.bf16.msra.mxu1 %v8278_v44  ;;  %v17677_v33 = vld [vmem:[#allocation35_spill] sm:$0xff]  ;;  %v12313_v59 = vpop.permute.xlu0 %9671  ;;  %v17686_v39 = vld [vmem:[#allocation90_spill] sm:$0xff] }
 0x3c6   :  { %v3187_v61 = vsel %vm50_vm3, %v17670_v35, %v9448_v54  ;;  %v17675_v36 = vunpack.i.h.bf16 %v17663_v13  ;;  %v8428_v8 = vpack.c.bf16 %v3346_v58, %v3336_v47  ;;  %v9628_v30 = vunpack.i.l.bf16 %v12047_v37  ;;  %8281 = vmatprep.subr.bf16.mxu1 %v8280_v5  ;;  %17678 = vst [vmem:[#allocation86_spill] sm:$0xff] %v12313_v59  ;;  %v17682_v44 = vld [vmem:[#allocation107_spill] sm:$0xff] }
 0x3c7   :  { %v8426_v54 = vpack.c.bf16 %v3197_v14, %v3187_v61  ;;  %v12315_v14 = vpop.permute.xlu1 %9676  ;;  %v17680_v61 = vunpack.i.h.bf16 %v11998_v7  ;;  %v17681_v58 = vunpack.i.h.bf16 %v17637_v48  ;;  %v8282_v5 = vpack.c.bf16 %v1666_v45, %v17683_v20  ;;  %v17690_v20 = vld [vmem:[#allocation130_spill] sm:$0xff]  ;;  %v17702_v7 = vld [vmem:[#allocation101_spill] sm:$0xff] }
 0x3c8   :  { %v3345_v35 = vsel %vm17216_vm2, %v17675_v36, %v9613_v6  ;;  %17679 = vst [vmem:[#allocation34_spill] sm:$0xff] %v12315_v14  ;;  %v9473_v36 = vunpack.i.l.bf16 %v17682_v44  ;;  %v9664_v46 = vunpack.i.h.bf16 %v12281_v21  ;;  %v17688_v47 = vunpack.i.h.bf16 %v17671_v62  ;;  %9971 = vrot.lane.b32.xlu0 %v17702_v7, %s10341_s25  ;;  %v17714_v62 = vld [vmem:[#allocation131_spill] sm:$0xff] }
 0x3c9   :  { %8427 = vmatpush1.bf16.msra.mxu0 %v8426_v54  ;;  %v3494_v6 = vsel %vm17215_vm4, %v9623_v40, %v17680_v61  ;;  %v3335_v42 = vsel %vm17216_vm2, %v17681_v58, %v9458_v27  ;;  %v17684_v54 = vunpack.i.l.bf16 %v11223_v4  ;;  %v17685_v61 = vld [vmem:[#allocation74_spill] sm:$0xff]  ;;  %v17689_v45 = vunpack.i.h.bf16 %v17677_v33  ;;  %8283 = vmatpush1.bf16.msra.mxu1 %v8282_v5 }
 0x3ca   :  { %8429 = vmatprep.subr.bf16.mxu0 %v8428_v8  ;;  %v17687_v27 = vpack.i.bf16 %v17685_v61, %v17686_v39  ;;  %v8430_v58 = vpack.c.bf16 %v3345_v35, %v3335_v42  ;;  %v3484_v8 = vsel %vm17215_vm4, %v9468_v3, %v17688_v47  ;;  %v17691_v2 = vunpack.i.h.bf16 %v17674_v60  ;;  %v17693_v35 = vld [vmem:[#allocation38_spill] sm:$0xff]  ;;  %8285 = vmatprep.subr.bf16.mxu1 %v8284_v34 }
 0x3cb   :  { %v1815_v29 = vsel %vm17144_vm0, %v9659_v19, %v17684_v54  ;;  %v3493_v4 = vsel %vm17215_vm4, %v17689_v45, %v9623_v40  ;;  %v8432_v19 = vpack.c.bf16 %v3494_v6, %v3484_v8  ;;  %v8288_v54 = vpack.c.bf16 %v12273_v22, %v17690_v20  ;;  %v12352_v40 = vpop.permute.xlu0 %9686  ;;  %v12354_v6 = vpop.permute.xlu1 %9681  ;;  %v17698_v8 = vld [vmem:[#allocation122_spill] sm:$0xff]  ;;  %v17699_v20 = vld [vmem:[#allocation123_spill] sm:$0xff] }
 0x3cc   :  { %9966 = vrot.lane.b32.xlu1 %v17687_v27, %s10352_s2  ;;  %v17692_v21 = vunpack.i.l.bf16 %v17674_v60  ;;  %v9638_v47 = vunpack.i.l.bf16 %v12146_v57  ;;  %17694 = vst [vmem:[#allocation82_spill] sm:$0xff] %v12352_v40  ;;  %17695 = vst [vmem:[#allocation87_spill] sm:$0xff] %v12354_v6  ;;  %v17696_v22 = vunpack.i.h.bf16 %v12047_v37  ;;  %v17697_v27 = vunpack.i.h.bf16 %v17643_v17  ;;  %9981 = vrot.lane.b32.xlu0 %v17702_v7, %s10340_s3 }
 0x3cd   :  { %8431 = vmatpush1.bf16.msra.mxu0 %v8430_v58  ;;  %v17700_v34 = vunpack.i.h.bf16 %v17682_v44  ;;  %v9483_v61 = vunpack.i.l.bf16 %v17698_v8  ;;  %v17701_v42 = vunpack.i.l.bf16 %v11225_v50  ;;  %v17715_v28 = vunpack.i.l.bf16 %v17674_v60 }
 0x3ce   :  { %v2114_v39 = vsel %vm2102_vm13, %v17692_v21, %v17691_v2  ;;  %v3642_v5 = vsel %vm17208_vm5, %v9628_v30, %v17696_v22  ;;  %v3483_v21 = vsel %vm17215_vm4, %v17697_v27, %v9468_v3  ;;  %8433 = vmatprep.subr.bf16.mxu0 %v8432_v19  ;;  %v8286_v2 = vpack.c.bf16 %v1815_v29, %v17699_v20  ;;  %v17703_v3 = vld [vmem:[#allocation112_spill] sm:$0xff]  ;;  %v17704_v29 = vld [vmem:[#allocation13_spill] sm:$0xff] }
 0x3cf   :  { %v3632_v58 = vsel %vm17208_vm5, %v9473_v36, %v17700_v34  ;;  %v1964_v37 = vsel %vm17139_vm1, %v9664_v46, %v17701_v42  ;;  %v9669_v22 = vunpack.i.h.bf16 %v12283_v12  ;;  %v8434_v19 = vpack.c.bf16 %v3493_v4, %v3483_v21  ;;  %v17705_v20 = vld [vmem:[#allocation25_spill] sm:$0xff]  ;;  %v17707_v12 = vld [vmem:[#allocation16_spill] sm:$0xff]  ;;  %v12384_v18 = vpop.permute.xlu0 %9696  ;;  %v12386_v4 = vpop.permute.xlu1 %9691  ;;  %v12391_v21 = vld [vmem:[%s16922_s4] sm:$0xff] }
 0x3d0   :  { %9976 = vrot.lane.b32.xlu1 %v17703_v3, %s10341_s25  ;;  %v17145_v27 = vunpack.i.h.bf16 %v17704_v29  ;;  %v9188_v45 = vunpack.i.l.bf16 %v17705_v20  ;;  %v17706_v34 = vunpack.i.h.bf16 %v17693_v35  ;;  %8287 = vmatpush1.bf16.msra.mxu1 %v8286_v2  ;;  %v8436_v50 = vpack.c.bf16 %v3642_v5, %v3632_v58  ;;  %17708 = vst [vmem:[#allocation24_spill] sm:$0xff] %v12384_v18  ;;  %17709 = vst [vmem:[#allocation127_spill] sm:$0xff] %v12386_v4  ;;  %v17712_v2 = vld [vmem:[#allocation39_spill] sm:$0xff] }
 0x3d1   :  { %v9078_v46 = vunpack.i.l.bf16 %v11144_v15  ;;  %8289 = vmatprep.subr.bf16.mxu1 %v8288_v54  ;;  %8435 = vmatpush1.bf16.msra.mxu0 %v8434_v19  ;;  %vm17711_vm1 = vcmask 1006592   ;;  %v17148_v58 = vunpack.i.h.bf16 %v17712_v2  ;;  %v17713_v19 = vld [vmem:[#allocation124_spill] sm:$0xff]  ;;  %v8292_v42 = vpack.c.bf16 %v2114_v39, %v17714_v62 }
 0x3d2   :  { %v3641_v44 = vsel %vm17208_vm5, %v17706_v34, %v9628_v30  ;;  %v17710_v30 = vunpack.i.h.bf16 %v12146_v57  ;;  %v3631_v54 = vsel %vm17208_vm5, %v17145_v27, %v9473_v36  ;;  %8437 = vmatprep.subr.bf16.mxu0 %v8436_v50  ;;  %v8290_v34 = vpack.c.bf16 %v1964_v37, %v17713_v19  ;;  %vm17717_vm0 = vmmov %vm17711_vm1  ;;  %9991 = vrot.lane.b32.xlu0 %v17702_v7, %s10343_s27 }
 0x3d3   :  { %v2113_v9 = vsel %vm2102_vm13, %v9669_v22, %v17715_v28  ;;  %v9674_v31 = vunpack.i.h.bf16 %v12313_v59  ;;  %v17716_v36 = vunpack.i.h.bf16 %v17698_v8  ;;  %v9193_v37 = vunpack.i.l.bf16 %v17527_v52  ;;  %v17719_v22 = vld [vmem:[#allocation9_spill] sm:$0xff]  ;;  %v17723_v59 = vld [vmem:[#allocation8_spill] sm:$0xff] }
 0x3d4   :  { %v3790_v5 = vsel %vm17711_vm1, %v9638_v47, %v17710_v30  ;;  %9986 = vrot.lane.b32.xlu1 %v17703_v3, %s10340_s3  ;;  %v8438_v30 = vpack.c.bf16 %v3641_v44, %v3631_v54  ;;  %v3789_v62 = vsel %vm17717_vm0, %v17148_v58, %v9638_v47  ;;  %8291 = vmatpush1.bf16.msra.mxu1 %v8290_v34  ;;  %v17718_v60 = vunpack.i.h.bf16 %v17705_v20  ;;  %v17720_v54 = vld [vmem:[#allocation7_spill] sm:$0xff]  ;;  %v12436_v20 = vpop.permute.xlu1 %9701 }
 0x3d5   :  { %v3780_v50 = vsel %vm17711_vm1, %v9483_v61, %v17716_v36  ;;  %5669 = vmatmul.mubr.f32.vlgmr.msra.gmra.mrb[12].mxu0 %v12391_v21  ;;  %v8988_v44 = vunpack.i.l.bf16 %v17719_v22  ;;  %v17721_v19 = vunpack.i.l.bf16 %v17720_v54  ;;  %v17722_v27 = vunpack.i.l.bf16 %v17626_v63  ;;  %8293 = vmatprep.subr.bf16.mxu1 %v8292_v42  ;;  %17726 = vst [vmem:[#allocation120_spill] sm:$0xff] %v12436_v20 }
 0x3d6   :  { %v8440_v28 = vpack.c.bf16 %v3790_v5, %v3780_v50  ;;  %v2263_v39 = vsel %vm2251_vm11, %v9188_v45, %v17718_v60  ;;  %v17724_v57 = vunpack.i.l.bf16 %v17723_v59  ;;  %8439 = vmatpush1.bf16.msra.mxu0 %v8438_v30  ;;  %v12434_v5 = vpop.permute.xlu0 %9706  ;;  %v17727_v34 = vunpack.i.h.bf16 %v11138_v55  ;;  %v17731_v30 = vld [vmem:[#allocation128_spill] sm:$0xff] }
 0x3d7   :  { %v12425_v36 = vsel %vm2549_vm8, %v17721_v19, %v9078_v46  ;;  %17725 = vst [vmem:[#allocation35_spill] sm:$0xff] %v12434_v5  ;;  %v17728_v50 = vunpack.i.l.bf16 %v11138_v55  ;;  %v12448_v19 = vld [vmem:[%s16922_s4 + $0x28] sm:$0xff]  ;;  %v8294_v58 = vpack.c.bf16 %v2113_v9, %v17731_v30  ;;  %v17732_v8 = vunpack.i.h.bf16 %v11144_v15  ;;  %v12471_v15 = vld [vmem:[%s16922_s4 + $0x20] sm:$0xff] }
 0x3d8   :  { %v12432_v47 = vsel %vm2996_vm6, %v17724_v57, %v17722_v27  ;;  %17729 = vst [vmem:[#allocation74_spill] sm:$0xff] %v12448_v19  ;;  %v9088_v57 = vunpack.i.l.bf16 %v11152_v53  ;;  %v17730_v27 = vunpack.i.h.bf16 %v17707_v12  ;;  %8441 = vmatprep.subr.bf16.mxu0 %v8440_v28  ;;  %5674 = vmatprep.mubr.f32.mxu0 %v12448_v19  ;;  %17734 = vst [vmem:[#allocation90_spill] sm:$0xff] %v12471_v15  ;;  %vm17759_vm1 = vcmask 998400  }
 0x3d9   :  { %v12443_v60 = vsel %vm17168_vm9, %v17728_v50, %v17727_v34  ;;  %v12458_v55 = vsel %vm2549_vm8, %v9078_v46, %v17732_v8  ;;  %v2262_v34 = vsel %vm2251_vm11, %v9674_v31, %v9188_v45  ;;  %v9679_v50 = vunpack.i.h.bf16 %v12315_v14  ;;  %9996 = vrot.lane.b32.xlu1 %v17703_v3, %s10343_s27  ;;  %8295 = vmatpush1.bf16.msra.mxu1 %v8294_v58  ;;  %v12486_v31 = vpop.permute.xlu1 %9711 }
 0x3da   :  { %v3779_v42 = vsel %vm17717_vm0, %v17730_v27, %v9483_v61  ;;  %v17733_v61 = vld [vmem:[#allocation132_spill] sm:$0xff]  ;;  %v9198_v45 = vunpack.i.l.bf16 %v17534_v0  ;;  %v17735_v46 = vunpack.i.h.bf16 %v17527_v52  ;;  %5675 = vmatmul.mubr.f32.gmra.mrb[14].mxu0 %v12471_v15  ;;  %v12484_v8 = vpop.permute.xlu0 %9716  ;;  %17738 = vst [vmem:[#allocation38_spill] sm:$0xff] %v12486_v31  ;;  %v12491_v52 = vld [vmem:[%s16922_s4 + $0x48] sm:$0xff]  ;;  %v12494_v58 = vsel %vm17169_vm7, %v8988_v44, %v9088_v57  ;;  %v17743_v44 = vld [vmem:[#allocation113_spill] sm:$0xff] }
 0x3db   :  { %v8296_v28 = vpack.c.bf16 %v2263_v39, %v17733_v61  ;;  %v8442_v9 = vpack.c.bf16 %v3789_v62, %v3779_v42  ;;  %v17736_v42 = vld [vmem:[#allocation15_spill] sm:$0xff]  ;;  %17737 = vst [vmem:[#allocation130_spill] sm:$0xff] %v12484_v8  ;;  %17739 = vst [vmem:[#allocation123_spill] sm:$0xff] %v12491_v52  ;;  %v17740_v62 = vld [vmem:[#allocation129_spill] sm:$0xff]  ;;  %v17741_v61 = vunpack.i.h.bf16 %v17626_v63  ;;  %5680 = vmatprep.mubr.f32.mxu0 %v12491_v52  ;;  %v8989_v39 = vunpack.i.h.bf16 %v17719_v22 }
 0x3dc   :  { %v2412_v27 = vsel %vm2400_vm10, %v9193_v37, %v17735_v46  ;;  %v8298_v30 = vpack.c.bf16 %v2262_v34, %v17740_v62  ;;  %v2411_v14 = vsel %vm2400_vm10, %v9679_v50, %v9193_v37  ;;  %10001 = vrot.lane.b32.xlu0 %v17743_v44, %s10352_s2  ;;  %v17744_v62 = vunpack.i.h.bf16 %v11152_v53 }
 0x3dd   :  { %8297 = vmatprep.subr.bf16.mxu1 %v8296_v28  ;;  %8443 = vmatpush1.bf16.msra.mxu0 %v8442_v9  ;;  %v17742_v28 = vunpack.i.l.bf16 %v17626_v63  ;;  %v8300_v34 = vpack.c.bf16 %v2412_v27, %v12202_v56  ;;  %v9203_v37 = vunpack.i.l.bf16 %v17577_v24  ;;  %v17746_v22 = vunpack.i.h.bf16 %v17534_v0  ;;  %v12544_v0 = vld [vmem:[%s16922_s4 + $0x68] sm:$0xff] }
 0x3de   :  { %10006 = vrot.lane.b32.xlu1 %v17702_v7, %s10342_s26  ;;  %v12516_v63 = vsel %vm17169_vm7, %v9088_v57, %v17744_v62  ;;  %8299 = vmatpush1.bf16.msra.mxu1 %v8298_v30  ;;  %v17747_v7 = vunpack.i.h.bf16 %v17642_v32  ;;  %v17748_v56 = vunpack.i.l.bf16 %v17642_v32  ;;  %v17749_v57 = vunpack.i.h.bf16 %v17637_v48  ;;  %17751 = vst [vmem:[#allocation112_spill] sm:$0xff] %v12544_v0  ;;  %v17752_v30 = vld [vmem:[#allocation17_spill] sm:$0xff] }
 0x3df   :  { %v12503_v9 = vsel %vm2996_vm6, %v17742_v28, %v17741_v61  ;;  %v12521_v61 = vld [vmem:[%s16922_s4 + $0x40] sm:$0xff]  ;;  %v2561_v50 = vsel %vm2549_vm8, %v9198_v45, %v17746_v22  ;;  %v17750_v27 = vunpack.i.l.bf16 %v17637_v48  ;;  %8301 = vmatprep.subr.bf16.mxu1 %v8300_v34  ;;  %v12548_v22 = vpop.permute.xlu0 %9721  ;;  %v17754_v46 = vunpack.i.l.bf16 %v17643_v17 }
 0x3e0   :  { %17745 = vst [vmem:[#allocation101_spill] sm:$0xff] %v12521_v61  ;;  %v12532_v53 = vsel %vm50_vm3, %v17748_v56, %v17747_v7  ;;  %5681 = vmatmul.mubr.f32.gmra.mrb[16].mxu0 %v12521_v61  ;;  %v12550_v7 = vpop.permute.xlu1 %9726  ;;  %v17753_v56 = vunpack.i.h.bf16 %v17643_v17  ;;  %v17756_v8 = vunpack.i.l.bf16 %v17704_v29  ;;  %v17757_v34 = vunpack.i.h.bf16 %v17736_v42  ;;  %v17764_v61 = vld [vmem:[#allocation19_spill] sm:$0xff]  ;;  %10011 = vrot.lane.b32.xlu0 %v17703_v3, %s10342_s26  ;;  %v12607_v3 = vld [vmem:[%s16922_s4 + $0x18] sm:$0xff] }
 0x3e1   :  { %v12539_v28 = vsel %vm17216_vm2, %v17750_v27, %v17749_v57  ;;  %v17755_v27 = vunpack.i.h.bf16 %v17704_v29  ;;  %v17758_v62 = vunpack.i.l.bf16 %v17736_v42  ;;  %5686 = vmatprep.mubr.f32.mxu0 %v12544_v0  ;;  %v8302_v51 = vpack.c.bf16 %v2411_v14, %v17761_v1  ;;  %v17766_v1 = vld [vmem:[#allocation102_spill] sm:$0xff]  ;;  %17769 = vst [vmem:[#allocation25_spill] sm:$0xff] %v12607_v3 }
 0x3e2   :  { %v12557_v57 = vsel %vm17215_vm4, %v17754_v46, %v17753_v56  ;;  %v17760_v46 = vld [vmem:[#allocation18_spill] sm:$0xff]  ;;  %v17762_v43 = vunpack.i.h.bf16 %v17707_v12  ;;  %10016 = vrot.lane.b32.xlu1 %v17766_v1, %s10341_s25  ;;  %v8304_v14 = vpack.c.bf16 %v2561_v50, %v12458_v55  ;;  %v17770_v55 = vld [vmem:[#allocation20_spill] sm:$0xff]  ;;  %v9213_v50 = vunpack.i.l.bf16 %v17627_v41 }
 0x3e3   :  { %v12564_v23 = vsel %vm17208_vm5, %v17756_v8, %v17755_v27  ;;  %v12571_v49 = vsel %vm17759_vm1, %v17758_v62, %v17757_v34  ;;  %v17763_v8 = vunpack.i.l.bf16 %v17707_v12  ;;  %v17765_v34 = vunpack.i.h.bf16 %v17720_v54  ;;  %8303 = vmatpush1.bf16.msra.mxu1 %v8302_v51  ;;  %v17772_v56 = vld [vmem:[#allocation22_spill] sm:$0xff] }
 0x3e4   :  { %v9208_v62 = vunpack.i.l.bf16 %v17587_v11  ;;  %v17768_v54 = vunpack.i.h.bf16 %v17577_v24  ;;  %vm5413_vm1 = vcmask 130048   ;;  %8305 = vmatprep.subr.bf16.mxu1 %v8304_v14  ;;  %v12614_v24 = vpop.permute.xlu0 %9731  ;;  %v2709_v51 = vsel %vm17168_vm9, %v17773_v10, %v9203_v37  ;;  %10021 = vrot.lane.b32.xlu0 %v17743_v44, %s10341_s25  ;;  %v17778_v10 = vld [vmem:[#allocation32_spill] sm:$0xff] }
 0x3e5   :  { %v12582_v27 = vsel %vm17717_vm0, %v17763_v8, %v17762_v43  ;;  %v2560_v0 = vsel %vm2549_vm8, %v17765_v34, %v9198_v45  ;;  %v12597_v43 = vld [vmem:[%s16922_s4 + $0x60] sm:$0xff]  ;;  %v17771_v8 = vld [vmem:[#allocation21_spill] sm:$0xff]  ;;  %v9218_v14 = vunpack.i.l.bf16 %v17654_v25  ;;  %vm17776_vm0 = vcmask 982016  }
 0x3e6   :  { %17767 = vst [vmem:[#allocation13_spill] sm:$0xff] %v12597_v43  ;;  %v2710_v45 = vsel %vm17168_vm9, %v9203_v37, %v17768_v54  ;;  %5687 = vmatmul.mubr.f32.gmra.mrb[18].mxu0 %v12597_v43  ;;  %v12616_v54 = vpop.permute.xlu1 %9736  ;;  %v8306_v34 = vpack.c.bf16 %v2560_v0, %v12425_v36  ;;  %10026 = vrot.lane.b32.xlu1 %v17766_v1, %s10340_s3  ;;  %v17774_v43 = vunpack.i.h.bf16 %v17752_v30  ;;  %v9224_v37 = vunpack.i.h.bf16 %v17778_v10 }
 0x3e7   :  { %8036 = vmatprep.mubr.msk.f32.mxu0 %vm5413_vm1, %v12607_v3  ;;  %v8308_v16 = vpack.c.bf16 %v2710_v45, %v12443_v60  ;;  %v17775_v3 = vunpack.i.l.bf16 %v17752_v30  ;;  %v2858_v26 = vsel %vm17169_vm7, %v8989_v39, %v9208_v62  ;;  %v9223_v0 = vunpack.i.l.bf16 %v17778_v10 }
 0x3e8   :  { %8307 = vmatpush1.bf16.msra.mxu1 %v8306_v34  ;;  %v17779_v52 = vunpack.i.h.bf16 %v17587_v11  ;;  %v12646_v60 = vpop.permute.xlu0 %9741  ;;  %v17781_v19 = vunpack.i.h.bf16 %v17760_v46  ;;  %v17785_v34 = vunpack.i.l.bf16 %v17770_v55  ;;  %vm17786_vm9 = vcmask 973824   ;;  %10031 = vrot.lane.b32.xlu0 %v17743_v44, %s10340_s3 }
 0x3e9   :  { %v12638_v36 = vsel %vm17776_vm0, %v17775_v3, %v17774_v43  ;;  %8309 = vmatprep.subr.bf16.mxu1 %v8308_v16  ;;  %v17782_v43 = vunpack.i.l.bf16 %v17760_v46  ;;  %vm17783_vm0 = vcmask 990208   ;;  %v17784_v3 = vunpack.i.h.bf16 %v17770_v55 }
 0x3ea   :  { %17777 = vst [vmem:[#allocation16_spill] sm:$0xff] %v12638_v36  ;;  %v2859_v15 = vsel %vm17169_vm7, %v9208_v62, %v17779_v52  ;;  %v12648_v45 = vpop.permute.xlu1 %9746  ;;  %v17787_v16 = vunpack.i.h.bf16 %v17764_v61  ;;  %v17788_v52 = vunpack.i.l.bf16 %v17764_v61  ;;  %vm17789_vm7 = vcmask 965632  }
 0x3eb   :  { %17780 = vst [vmem:[#allocation39_spill] sm:$0xff] %v12648_v45  ;;  %v12655_v39 = vsel %vm17783_vm0, %v17782_v43, %v17781_v19  ;;  %v12662_v11 = vsel %vm17786_vm9, %v17785_v34, %v17784_v3  ;;  %v17791_v10 = vunpack.i.h.bf16 %v17771_v8  ;;  %v17792_v36 = vunpack.i.l.bf16 %v17771_v8  ;;  %v17799_v8 = vld [vmem:[#allocation33_spill] sm:$0xff] }
 0x3ec   :  { %v12669_v62 = vsel %vm17789_vm7, %v17788_v52, %v17787_v16  ;;  %vm17793_vm0 = vcmask 949248   ;;  %v17794_v43 = vunpack.i.h.bf16 %v17723_v59  ;;  %v8310_v3 = vpack.c.bf16 %v2709_v51, %v12144_v38  ;;  %v17800_v59 = vld [vmem:[#allocation103_spill] sm:$0xff] }
 0x3ed   :  { %17790 = vst [vmem:[#allocation124_spill] sm:$0xff] %v12669_v62  ;;  %v12676_v19 = vsel %vm17793_vm0, %v17792_v36, %v17791_v10  ;;  %v17795_v34 = vunpack.i.h.bf16 %v17627_v41  ;;  %v17796_v16 = vunpack.i.h.bf16 %v17772_v56  ;;  %v17797_v52 = vunpack.i.l.bf16 %v17772_v56  ;;  %10036 = vrot.lane.b32.xlu1 %v17800_v59, %s10315_s30 }
 0x3ee   :  { %v3007_v55 = vsel %vm2996_vm6, %v17794_v43, %v9213_v50  ;;  %vm17798_vm7 = vcmask 957440   ;;  %v9233_v36 = vunpack.i.l.bf16 %v17799_v8  ;;  %v8312_v38 = vpack.c.bf16 %v2859_v15, %v12516_v63  ;;  %8311 = vmatpush1.bf16.msra.mxu1 %v8310_v3  ;;  %v12718_v63 = vpop.permute.xlu1 %9756 }
 0x3ef   :  { %v3008_v61 = vsel %vm2996_vm6, %v9213_v50, %v17795_v34  ;;  %v12690_v62 = vsel %vm17798_vm7, %v17797_v52, %v17796_v16  ;;  %v8314_v41 = vpack.c.bf16 %v2858_v26, %v12494_v58  ;;  %v17801_v50 = vunpack.i.h.bf16 %v17654_v25  ;;  %v12716_v58 = vpop.permute.xlu0 %9751  ;;  %17804 = vst [vmem:[#allocation9_spill] sm:$0xff] %v12718_v63 }
 0x3f0   :  { %v17802_v10 = vunpack.i.l.bf16 %v17642_v32  ;;  %v12710_v34 = vsel %vm50_vm3, %v9224_v37, %v9218_v14  ;;  %v17173_v16 = vunpack.i.h.bf16 %v12354_v6  ;;  %v17174_v52 = vunpack.i.l.bf16 %v12354_v6  ;;  %8313 = vmatprep.subr.bf16.mxu1 %v8312_v38  ;;  %17803 = vst [vmem:[#allocation131_spill] sm:$0xff] %v12716_v58 }
 0x3f1   :  { %v12702_v51 = vsel %vm50_vm3, %v9218_v14, %v17801_v50  ;;  %v9228_v15 = vunpack.i.l.bf16 %v17663_v13  ;;  %v17177_v25 = vunpack.i.l.bf16 %v17677_v33  ;;  %v8316_v32 = vpack.c.bf16 %v3008_v61, %v12503_v9  ;;  %10046 = vrot.lane.b32.xlu1 %v17766_v1, %s10343_s27 }
 0x3f2   :  { %v12707_v43 = vsel %vm50_vm3, %v9223_v0, %v17802_v10  ;;  %v8318_v26 = vpack.c.bf16 %v3007_v55, %v12432_v47  ;;  %v9234_v14 = vunpack.i.h.bf16 %v17799_v8  ;;  %v17176_v37 = vunpack.i.h.bf16 %v12548_v22  ;;  %v17806_v47 = vld [vmem:[#allocation114_spill] sm:$0xff]  ;;  %8315 = vmatpush1.bf16.msra.mxu1 %v8314_v41 }
 0x3f3   :  { %v17175_v0 = vunpack.i.l.bf16 %v12718_v63  ;;  %v8324_v3 = vpack.c.bf16 %v12702_v51, %v12532_v53  ;;  %v17805_v50 = vunpack.i.l.bf16 %v17637_v48  ;;  %v17178_v10 = vunpack.i.h.bf16 %v12352_v40  ;;  %10041 = vrot.lane.b32.xlu0 %v17806_v47, %s10315_s30  ;;  %8317 = vmatprep.subr.bf16.mxu1 %v8316_v32  ;;  %v12759_v51 = vpop.permute.xlu0 %9761 }
 0x3f4   :  { %v17179_v9 = vunpack.i.l.bf16 %v12352_v40  ;;  %v12745_v48 = vsel %vm1357_vm12, %v17174_v52, %v17173_v16  ;;  %v17180_v53 = vunpack.i.h.bf16 %v12386_v4  ;;  %17809 = vst [vmem:[#allocation128_spill] sm:$0xff] %v12759_v51  ;;  %v17811_v16 = vunpack.i.h.bf16 %v17663_v13 }
 0x3f5   :  { %v12730_v38 = vsel %vm17216_vm2, %v9233_v36, %v17805_v50  ;;  %17807 = vst [vmem:[#allocation7_spill] sm:$0xff] %v12745_v48  ;;  %v12754_v55 = vsel %vm1357_vm12, %v17176_v37, %v17175_v0  ;;  %v12757_v36 = vsel %vm17216_vm2, %v9234_v14, %v9228_v15  ;;  %v12761_v50 = vpop.permute.xlu1 %9766  ;;  %v17812_v61 = vunpack.i.h.bf16 %v17677_v33  ;;  %10056 = vrot.lane.b32.xlu1 %v17800_v59, %s10314_s29 }
 0x3f6   :  { %17808 = vst [vmem:[#allocation8_spill] sm:$0xff] %v12754_v55  ;;  %17810 = vst [vmem:[#allocation132_spill] sm:$0xff] %v12761_v50  ;;  %v12766_v52 = vsel %vm17216_vm2, %v9228_v15, %v17811_v16  ;;  %v17184_v32 = vunpack.i.h.bf16 %v12550_v7  ;;  %v17186_v14 = vunpack.i.h.bf16 %v12614_v24  ;;  %v17183_v37 = vunpack.i.l.bf16 %v12759_v51  ;;  %8319 = vmatpush1.bf16.msra.mxu1 %v8318_v26  ;;  %v17820_v16 = vld [vmem:[#allocation88_spill] sm:$0xff] }
 0x3f7   :  { %v12773_v0 = vsel %vm17215_vm4, %v17177_v25, %v17812_v61  ;;  %v17185_v13 = vunpack.i.l.bf16 %v12761_v50  ;;  %10051 = vrot.lane.b32.xlu0 %v17743_v44, %s10343_s27  ;;  %v12794_v41 = vsel %vm1506_vm14, %v17179_v9, %v17178_v10  ;;  %v17814_v25 = vunpack.i.l.bf16 %v12386_v4  ;;  %v17818_v9 = vld [vmem:[#allocation36_spill] sm:$0xff]  ;;  %v12822_v55 = vpop.permute.xlu0 %9771 }
 0x3f8   :  { %17813 = vst [vmem:[#allocation15_spill] sm:$0xff] %v12794_v41  ;;  %v12808_v61 = vsel %vm1506_vm14, %v17184_v32, %v17183_v37  ;;  %v9244_v15 = vunpack.i.h.bf16 %v17818_v9  ;;  %17822 = vst [vmem:[#allocation18_spill] sm:$0xff] %v12822_v55  ;;  %vm17826_vm9 = vcmask 72704   ;;  %v17829_v26 = vunpack.i.l.bf16 %v12436_v20 }
 0x3f9   :  { %v12801_v8 = vsel %vm1655_vm15, %v17814_v25, %v17180_v53  ;;  %17816 = vst [vmem:[#allocation113_spill] sm:$0xff] %v12808_v61  ;;  %v12815_v10 = vsel %vm1655_vm15, %v17186_v14, %v17185_v13  ;;  %v9243_v25 = vunpack.i.l.bf16 %v17818_v9  ;;  %v17819_v53 = vld [vmem:[#allocation83_spill] sm:$0xff]  ;;  %v12824_v37 = vpop.permute.xlu1 %9776  ;;  %v17193_v9 = vunpack.i.l.bf16 %v12822_v55  ;;  %10066 = vrot.lane.b32.xlu1 %v17766_v1, %s10342_s26  ;;  %vm17833_vm7 = vmmov %vm17826_vm9  ;;  %v17839_v1 = vld [vmem:[#allocation89_spill] sm:$0xff] }
 0x3fa   :  { %17815 = vst [vmem:[#allocation129_spill] sm:$0xff] %v12801_v8  ;;  %17817 = vst [vmem:[#allocation17_spill] sm:$0xff] %v12815_v10  ;;  %v17821_v48 = vpack.c.bf16 %v17819_v53, %v17820_v16  ;;  %v17194_v50 = vunpack.i.l.bf16 %v12824_v37  ;;  %v17825_v53 = vunpack.i.l.bf16 %v12384_v18  ;;  %v17828_v13 = vunpack.i.h.bf16 %v12436_v20  ;;  %v17838_v8 = vld [vmem:[#allocation84_spill] sm:$0xff]  ;;  %v17844_v55 = vld [vmem:[#allocation37_spill] sm:$0xff] }
 0x3fb   :  { %17823 = vst [vmem:[#allocation133_spill] sm:$0xff] %v12824_v37  ;;  %vm17830_vm0 = vcmask 64512   ;;  %10061 = vrot.lane.b32.xlu0 %v17806_v47, %s10314_s29  ;;  %v17832_v41 = vunpack.i.h.bf16 %v12616_v54  ;;  %v17840_v10 = vpack.c.bf16 %v17838_v8, %v17839_v1  ;;  %v12875_v61 = vpop.permute.xlu0 %9781  ;;  %v9254_v51 = vunpack.i.h.bf16 %v17844_v55 }
 0x3fc   :  { %8321 = vmatprep.subr.bf16.mxu1 %v17821_v48  ;;  %v17824_v48 = vunpack.i.h.bf16 %v12384_v18  ;;  %v12848_v14 = vsel %vm17830_vm0, %v17829_v26, %v17828_v13  ;;  %v17835_v13 = vunpack.i.h.bf16 %v12646_v60  ;;  %17841 = vst [vmem:[#allocation103_spill] sm:$0xff] %v12875_v61  ;;  %v9253_v63 = vunpack.i.l.bf16 %v17844_v55 }
 0x3fd   :  { %17831 = vst [vmem:[#allocation22_spill] sm:$0xff] %v12848_v14  ;;  %v12861_v32 = vsel %vm17833_vm7, %v17832_v41, %v17193_v9  ;;  %8323 = vmatpush1.bf16.msra.mxu1 %v17840_v10  ;;  %v12877_v41 = vpop.permute.xlu1 %9791  ;;  %v17203_v10 = vunpack.i.l.bf16 %v12875_v61  ;;  %10076 = vrot.lane.b32.xlu1 %v17800_v59, %s10316_s11  ;;  %v17845_v9 = vunpack.i.h.bf16 %v12434_v5  ;;  %v17846_v8 = vunpack.i.l.bf16 %v12434_v5  ;;  %v17914_v61 = vld [vmem:[#allocation20_spill] sm:$0xff] }
 0x3fe   :  { %v12839_v16 = vsel %vm17826_vm9, %v17825_v53, %v17824_v48  ;;  %17834 = vst [vmem:[#allocation32_spill] sm:$0xff] %v12861_v32  ;;  %vm17836_vm9 = vmmov %vm17830_vm0  ;;  %v9248_v53 = vunpack.i.l.bf16 %v17693_v35  ;;  %v9258_v48 = vunpack.i.l.bf16 %v17712_v2  ;;  %8325 = vmatprep.subr.bf16.mxu1 %v8324_v3  ;;  %v17206_v1 = vunpack.i.l.bf16 %v12877_v41 }
 0x3ff   :  { %17827 = vst [vmem:[#allocation102_spill] sm:$0xff] %v12839_v16  ;;  %v12868_v26 = vsel %vm17836_vm9, %v17835_v13, %v17194_v50  ;;  %17842 = vst [vmem:[#allocation114_spill] sm:$0xff] %v12877_v41  ;;  %v17204_v50 = vunpack.i.h.bf16 %v12648_v45  ;;  %v17843_v3 = vunpack.i.l.bf16 %v17643_v17  ;;  %10071 = vrot.lane.b32.xlu0 %v17743_v44, %s10342_s26  ;;  %v8328_v13 = vpack.c.bf16 %v12766_v52, %v12539_v28  ;;  %v17908_v41 = vld [vmem:[#allocation123_spill] sm:$0xff] }
 0x400   :  { %17837 = vst [vmem:[#allocation33_spill] sm:$0xff] %v12868_v26  ;;  %v12903_v17 = vsel %vm2102_vm13, %v17846_v8, %v17845_v9  ;;  %v17849_v55 = vunpack.i.l.bf16 %v12486_v31  ;;  %v17852_v28 = vunpack.i.h.bf16 %v12716_v58  ;;  %v17854_v9 = vpack.c.bf16 %v12710_v34, %v12707_v43  ;;  %v17884_v26 = vld [vmem:[#allocation47_spill] sm:$0xff] }
 0x401   :  { %v3481_v37 = vsel %vm17215_vm4, %v9243_v25, %v17843_v3  ;;  %17847 = vst [vmem:[#allocation36_spill] sm:$0xff] %v12903_v17  ;;  %v17848_v25 = vunpack.i.h.bf16 %v12486_v31  ;;  %v12917_v44 = vsel %vm2102_vm13, %v17204_v50, %v17203_v10  ;;  %v17855_v8 = vunpack.i.l.bf16 %v17677_v33  ;;  %v12934_v10 = vpop.permute.xlu1 %9796  ;;  %10086 = vrot.lane.b32.xlu1 %v17800_v59, %s17368_s1 }
 0x402   :  { %17851 = vst [vmem:[#allocation88_spill] sm:$0xff] %v12917_v44  ;;  %v12924_v52 = vsel %vm2251_vm11, %v17852_v28, %v17206_v1  ;;  %8327 = vmatpush1.bf16.msra.mxu1 %v17854_v9  ;;  %v17857_v50 = vunpack.i.h.bf16 %v17693_v35  ;;  %v3639_v34 = vsel %vm17208_vm5, %v9254_v51, %v9248_v53  ;;  %v8330_v33 = vpack.c.bf16 %v12757_v36, %v12730_v38  ;;  %v17862_v51 = vld [vmem:[#allocation41_spill] sm:$0xff] }
 0x403   :  { %v12910_v3 = vsel %vm2251_vm11, %v17849_v55, %v17848_v25  ;;  %17853 = vst [vmem:[#allocation84_spill] sm:$0xff] %v12924_v52  ;;  %v3491_v25 = vsel %vm17215_vm4, %v9244_v15, %v17855_v8  ;;  %8329 = vmatprep.subr.bf16.mxu1 %v8328_v13  ;;  %v12932_v55 = vpop.permute.xlu0 %9786  ;;  %v8332_v15 = vpack.c.bf16 %v12773_v0, %v12557_v57  ;;  %v17858_v13 = vunpack.i.h.bf16 %v17712_v2  ;;  %v17861_v8 = vld [vmem:[#allocation40_spill] sm:$0xff]  ;;  %v17863_v0 = vld [vmem:[#allocation42_spill] sm:$0xff]  ;;  %v17865_v2 = vld [vmem:[#allocation43_spill] sm:$0xff] }
 0x404   :  { %17850 = vst [vmem:[#allocation83_spill] sm:$0xff] %v12910_v3  ;;  %17856 = vst [vmem:[#allocation89_spill] sm:$0xff] %v12932_v55  ;;  %v3640_v14 = vsel %vm17208_vm5, %v9248_v53, %v17857_v50  ;;  %vm17859_vm0 = vcmask 1006592   ;;  %v17860_v50 = vunpack.i.l.bf16 %v17704_v29  ;;  %v9264_v28 = vunpack.i.h.bf16 %v17861_v8  ;;  %10081 = vrot.lane.b32.xlu0 %v17806_v47, %s10316_s11 }
 0x405   :  { %v12951_v35 = vsel %vm17859_vm0, %v9258_v48, %v17858_v13  ;;  %v9263_v43 = vunpack.i.l.bf16 %v17861_v8  ;;  %v9273_v53 = vunpack.i.l.bf16 %v17862_v51  ;;  %v9798_v57 = vunpack.i.l.bf16 %v12934_v10  ;;  %vm17867_vm7 = vmmov %vm17859_vm0 }
 0x406   :  { %v3629_v9 = vsel %vm17208_vm5, %v9253_v63, %v17860_v50  ;;  %8331 = vmatpush1.bf16.msra.mxu1 %v8330_v33  ;;  %v8334_v29 = vpack.c.bf16 %v3491_v25, %v3481_v37  ;;  %v8336_v63 = vpack.c.bf16 %v3640_v14, %v12564_v23  ;;  %v9269_v38 = vunpack.i.h.bf16 %v17863_v0  ;;  %v12970_v50 = vpop.permute.xlu1 %9806  ;;  %vm17868_vm9 = vmmov %vm17859_vm0 }
 0x407   :  { %v9268_v36 = vunpack.i.l.bf16 %v17863_v0  ;;  %8333 = vmatprep.subr.bf16.mxu1 %v8332_v15  ;;  %v12968_v13 = vpop.permute.xlu0 %9801  ;;  %17864 = vst [vmem:[#allocation37_spill] sm:$0xff] %v12970_v50  ;;  %v8338_v8 = vpack.c.bf16 %v3639_v34, %v3629_v9  ;;  %v8340_v1 = vpack.c.bf16 %v12951_v35, %v12582_v27  ;;  %v9279_v3 = vunpack.i.h.bf16 %v17865_v2  ;;  %v17871_v35 = vld [vmem:[#allocation104_spill] sm:$0xff]  ;;  %v17938_v50 = vld [vmem:[#allocation25_spill] sm:$0xff] }
 0x408   :  { %v9278_v33 = vunpack.i.l.bf16 %v17865_v2  ;;  %v17211_v37 = vunpack.i.h.bf16 %v12968_v13  ;;  %v9803_v23 = vunpack.i.l.bf16 %v12968_v13  ;;  %v17866_v14 = vunpack.i.l.bf16 %v17707_v12  ;;  %10091 = vrot.lane.b32.xlu0 %v17806_v47, %s17368_s1  ;;  %10096 = vrot.lane.b32.xlu1 %v17871_v35, %s10315_s30 }
 0x409   :  { %v3787_v15 = vsel %vm17868_vm9, %v9264_v28, %v9258_v48  ;;  %v9274_v0 = vunpack.i.h.bf16 %v17862_v51  ;;  %v17869_v34 = vunpack.i.l.bf16 %v17736_v42  ;;  %vm17870_vm0 = vcmask 998400  }
 0x40a   :  { %v3777_v25 = vsel %vm17867_vm7, %v9263_v43, %v17866_v14  ;;  %v17872_v9 = vunpack.i.h.bf16 %v17736_v42  ;;  %vm17873_vm5 = vmmov %vm17870_vm0  ;;  %8335 = vmatpush1.bf16.msra.mxu1 %v8334_v29  ;;  %v17875_v48 = vunpack.i.h.bf16 %v12934_v10  ;;  %v3938_v51 = vsel %vm17870_vm0, %v9803_v23, %v17211_v37  ;;  %v17883_v37 = vld [vmem:[#allocation46_spill] sm:$0xff] }
 0x40b   :  { %v12986_v27 = vsel %vm17870_vm0, %v9273_v53, %v17869_v34  ;;  %vm17874_vm7 = vmmov %vm17870_vm0  ;;  %v17877_v53 = vld [vmem:[#allocation44_spill] sm:$0xff]  ;;  %8337 = vmatprep.subr.bf16.mxu1 %v8336_v63  ;;  %v13003_v14 = vpop.permute.xlu0 %9811  ;;  %v13005_v34 = vpop.permute.xlu1 %9816  ;;  %v9288_v44 = vunpack.i.l.bf16 %v17883_v37 }
 0x40c   :  { %v3927_v12 = vsel %vm17873_vm5, %v17872_v9, %v9798_v57  ;;  %v3937_v43 = vsel %vm17874_vm7, %v9269_v38, %v9803_v23  ;;  %vm17876_vm9 = vmmov %vm17870_vm0  ;;  %v9283_v2 = vunpack.i.l.bf16 %v17877_v53  ;;  %17878 = vst [vmem:[#allocation40_spill] sm:$0xff] %v13003_v14  ;;  %10106 = vrot.lane.b32.xlu1 %v17800_v59, %s10318_s12 }
 0x40d   :  { %v3928_v28 = vsel %vm17876_vm9, %v9798_v57, %v17875_v48  ;;  %v8446_v9 = vpack.c.bf16 %v3937_v43, %v3927_v12  ;;  %vm17879_vm5 = vmmov %vm17870_vm0  ;;  %v9284_v57 = vunpack.i.h.bf16 %v17877_v53  ;;  %v17881_v48 = vld [vmem:[#allocation45_spill] sm:$0xff]  ;;  %vm17882_vm9 = vcmask 990208   ;;  %5491 = vmatmul.mubr.f32.vlgmr.msra.gmra.mrb[8].mxu1 %v12391_v21 }
 0x40e   :  { %v8444_v42 = vpack.c.bf16 %v3938_v51, %v3928_v28  ;;  %v3936_v52 = vsel %vm17879_vm5, %v9268_v36, %v9269_v38  ;;  %vm17880_vm7 = vmmov %vm17870_vm0  ;;  %v9293_v17 = vunpack.i.l.bf16 %v17881_v48  ;;  %v13014_v23 = vsel %vm17882_vm9, %v9278_v33, %v9279_v3  ;;  %v17885_v38 = vld [vmem:[#allocation115_spill] sm:$0xff]  ;;  %8339 = vmatpush1.bf16.msra.mxu1 %v8338_v8 }
 0x40f   :  { %v13009_v29 = vsel %vm17880_vm7, %v9274_v0, %v9268_v36  ;;  %v9298_v12 = vunpack.i.l.bf16 %v17884_v26  ;;  %10101 = vrot.lane.b32.xlu0 %v17885_v38, %s10315_s30  ;;  %v9818_v0 = vunpack.i.l.bf16 %v13005_v34  ;;  %v8342_v43 = vpack.c.bf16 %v3787_v15, %v3777_v25  ;;  %vm17887_vm0 = vmmov %vm17882_vm9  ;;  %v13034_v63 = vpop.permute.xlu0 %9821  ;;  %v13036_v36 = vpop.permute.xlu1 %9826  ;;  %8341 = vmatprep.subr.bf16.mxu1 %v8340_v1 }
 0x410   :  { %8445 = vmatprep.subr.bf16.mxu0 %v8444_v42  ;;  %v8344_v28 = vpack.c.bf16 %v3936_v52, %v12571_v49  ;;  %v17886_v51 = vunpack.i.l.bf16 %v17760_v46  ;;  %v9294_v16 = vunpack.i.h.bf16 %v17881_v48  ;;  %17888 = vst [vmem:[#allocation41_spill] sm:$0xff] %v13036_v36  ;;  %v8346_v21 = vpack.c.bf16 %v13009_v29, %v12986_v27  ;;  %vm17889_vm5 = vmmov %vm17887_vm0  ;;  %v17892_v42 = vld [vmem:[#allocation74_spill] sm:$0xff]  ;;  %10116 = vrot.lane.b32.xlu1 %v17871_v35, %s10314_s29 }
 0x411   :  { %8447 = vmatpush1.bf16.msra.mxu0 %v8446_v9  ;;  %v8348_v25 = vpack.c.bf16 %v13014_v23, %v12655_v39  ;;  %v13043_v49 = vsel %vm17889_vm5, %v9284_v57, %v9278_v33  ;;  %v17890_v52 = vunpack.i.l.bf16 %v17752_v30  ;;  %vm17891_vm7 = vcmask 982016   ;;  %5496 = vmatprep.mubr.f32.mxu1 %v17892_v42  ;;  %v17894_v9 = vld [vmem:[#allocation48_spill] sm:$0xff] }
 0x412   :  { %v13031_v53 = vsel %vm17887_vm0, %v9283_v2, %v17886_v51  ;;  %v17222_v8 = vunpack.i.h.bf16 %v13034_v63  ;;  %v9823_v2 = vunpack.i.l.bf16 %v13034_v63  ;;  %vm17893_vm9 = vmmov %vm17891_vm7  ;;  %v9304_v39 = vunpack.i.h.bf16 %v17894_v9  ;;  %8343 = vmatpush1.bf16.msra.mxu1 %v8342_v43 }
 0x413   :  { %v13048_v15 = vsel %vm17891_vm7, %v9293_v17, %v17890_v52  ;;  %v13054_v27 = vsel %vm17893_vm9, %v9294_v16, %v9288_v44  ;;  %10111 = vrot.lane.b32.xlu0 %v17806_v47, %s10318_s12  ;;  %v17895_v17 = vunpack.i.h.bf16 %v17883_v37  ;;  %vm17896_vm0 = vmmov %vm17891_vm7  ;;  %v17897_v33 = vunpack.i.h.bf16 %v17884_v26  ;;  %v17905_v52 = vld [vmem:[#allocation90_spill] sm:$0xff]  ;;  %8345 = vmatprep.subr.bf16.mxu1 %v8344_v28 }
 0x414   :  { %vm17898_vm5 = vcmask 973824   ;;  %v17899_v16 = vunpack.i.h.bf16 %v17760_v46  ;;  %vm17900_vm7 = vcmask 990208   ;;  %v17902_v23 = vunpack.i.h.bf16 %v13005_v34  ;;  %5497 = vmatmul.mubr.f32.gmra.mrb[10].mxu1 %v17905_v52  ;;  %v13084_v46 = vpop.permute.xlu0 %9831  ;;  %v17910_v52 = vld [vmem:[#allocation49_spill] sm:$0xff]  ;;  %10126 = vrot.lane.b32.xlu1 %v17800_v59, %s10319_s13 }
 0x415   :  { %v13064_v1 = vsel %vm17896_vm0, %v9288_v44, %v17895_v17  ;;  %v13069_v29 = vsel %vm17898_vm5, %v9298_v12, %v17897_v33  ;;  %vm17901_vm9 = vmmov %vm17900_vm7  ;;  %v9303_v42 = vunpack.i.l.bf16 %v17894_v9  ;;  %v17906_v17 = vld [vmem:[#allocation50_spill] sm:$0xff]  ;;  %17907 = vst [vmem:[#allocation42_spill] sm:$0xff] %v13084_v46  ;;  %5502 = vmatprep.mubr.f32.mxu1 %v17908_v41  ;;  %v8350_v9 = vpack.c.bf16 %v13043_v49, %v13031_v53  ;;  %v17912_v41 = vld [vmem:[#allocation16_spill] sm:$0xff] }
 0x416   :  { %v4075_v57 = vsel %vm17900_vm7, %v17899_v16, %v9818_v0  ;;  %v4085_v48 = vsel %vm17901_vm9, %v9279_v3, %v9823_v2  ;;  %vm17903_vm4 = vmmov %vm17900_vm7  ;;  %v9308_v33 = vunpack.i.l.bf16 %v17906_v17  ;;  %v13086_v16 = vpop.permute.xlu1 %9836  ;;  %v9314_v43 = vunpack.i.h.bf16 %v17910_v52  ;;  %8347 = vmatpush1.bf16.msra.mxu1 %v8346_v21 }
 0x417   :  { %v4076_v51 = vsel %vm17903_vm4, %v9818_v0, %v17902_v23  ;;  %vm17904_vm2 = vmmov %vm17903_vm4  ;;  %v8450_v32 = vpack.c.bf16 %v4085_v48, %v4075_v57  ;;  %v17909_v23 = vld [vmem:[#allocation51_spill] sm:$0xff]  ;;  %10121 = vrot.lane.b32.xlu0 %v17885_v38, %s10314_s29  ;;  %v8352_v57 = vpack.c.bf16 %v13064_v1, %v17912_v41  ;;  %v8354_v48 = vpack.c.bf16 %v13054_v27, %v13048_v15  ;;  %v17928_v41 = vld [vmem:[#allocation54_spill] sm:$0xff] }
 0x418   :  { %v4086_v44 = vsel %vm17904_vm2, %v9823_v2, %v17222_v8  ;;  %v9318_v2 = vunpack.i.l.bf16 %v17909_v23  ;;  %v17911_v8 = vld [vmem:[#allocation52_spill] sm:$0xff]  ;;  %v9313_v28 = vunpack.i.l.bf16 %v17910_v52  ;;  %v17228_v53 = vunpack.i.h.bf16 %v13086_v16  ;;  %vm17916_vm2 = vmmov %vm17898_vm5  ;;  %8349 = vmatprep.subr.bf16.mxu1 %v8348_v25  ;;  %v17927_v52 = vld [vmem:[#allocation53_spill] sm:$0xff]  ;;  %10136 = vrot.lane.b32.xlu1 %v17871_v35, %s10316_s11 }
 0x419   :  { %v8448_v3 = vpack.c.bf16 %v4086_v44, %v4076_v51  ;;  %v9323_v46 = vunpack.i.l.bf16 %v17911_v8  ;;  %v9838_v49 = vunpack.i.l.bf16 %v13086_v16  ;;  %v8356_v51 = vpack.c.bf16 %v13069_v29, %v12662_v11  ;;  %v17913_v44 = vld [vmem:[#allocation101_spill] sm:$0xff]  ;;  %vm17917_vm4 = vmmov %vm17916_vm2 }
 0x41a   :  { %5503 = vmatmul.mubr.f32.gmra.mrb[12].mxu1 %v17913_v44  ;;  %v17915_v0 = vunpack.i.l.bf16 %v17914_v61  ;;  %v13116_v1 = vsel %vm17917_vm4, %v9304_v39, %v9298_v12  ;;  %vm17918_vm0 = vcmask 965632   ;;  %v9324_v27 = vunpack.i.h.bf16 %v17911_v8  ;;  %v13124_v11 = vpop.permute.xlu1 %9846 }
 0x41b   :  { %8449 = vmatprep.subr.bf16.mxu0 %v8448_v3  ;;  %v13119_v15 = vsel %vm17918_vm0, %v9314_v43, %v9308_v33  ;;  %v13122_v3 = vpop.permute.xlu0 %9841  ;;  %17919 = vst [vmem:[#allocation43_spill] sm:$0xff] %v13124_v11  ;;  %vm17921_vm5 = vmmov %vm17918_vm0  ;;  %v17922_v39 = vunpack.i.h.bf16 %v17909_v23  ;;  %vm17923_vm7 = vcmask 957440   ;;  %v17925_v21 = vunpack.i.l.bf16 %v17772_v56  ;;  %10131 = vrot.lane.b32.xlu0 %v17806_v47, %s10319_s13  ;;  %v17936_v11 = vld [vmem:[#allocation13_spill] sm:$0xff] }
 0x41c   :  { %v13113_v36 = vsel %vm17916_vm2, %v9303_v42, %v17915_v0  ;;  %8451 = vmatpush1.bf16.msra.mxu0 %v8450_v32  ;;  %v9843_v42 = vunpack.i.l.bf16 %v13122_v3  ;;  %v17920_v0 = vunpack.i.h.bf16 %v17906_v17  ;;  %v17924_v32 = vld [vmem:[#allocation112_spill] sm:$0xff]  ;;  %vm17926_vm9 = vmmov %vm17923_vm7  ;;  %v9333_v43 = vunpack.i.l.bf16 %v17927_v52  ;;  %8351 = vmatpush1.bf16.msra.mxu1 %v8350_v9 }
 0x41d   :  { %v13136_v8 = vsel %vm17923_vm7, %v9318_v2, %v17922_v39  ;;  %5508 = vmatprep.mubr.f32.mxu1 %v17924_v32  ;;  %v13142_v25 = vsel %vm17926_vm9, %v9323_v46, %v17925_v21  ;;  %v9328_v29 = vunpack.i.l.bf16 %v17928_v41  ;;  %vm17930_vm2 = vcmask 982016   ;;  %8353 = vmatprep.subr.bf16.mxu1 %v8352_v57  ;;  %v17942_v9 = vld [vmem:[#allocation124_spill] sm:$0xff] }
 0x41e   :  { %v13131_v12 = vsel %vm17921_vm5, %v9308_v33, %v17920_v0  ;;  %v17929_v33 = vunpack.i.h.bf16 %v17752_v30  ;;  %v17931_v39 = vunpack.i.h.bf16 %v17883_v37  ;;  %vm17932_vm4 = vmmov %vm17930_vm2  ;;  %v17934_v21 = vunpack.i.h.bf16 %v13122_v3  ;;  %5509 = vmatmul.mubr.f32.gmra.mrb[14].mxu1 %v17936_v11  ;;  %10146 = vrot.lane.b32.xlu1 %v17800_v59, %s10320_s14 }
 0x41f   :  { %vm17933_vm0 = vmmov %vm17930_vm2  ;;  %v13165_v14 = vsel %vm17923_vm7, %v9324_v27, %v9318_v2  ;;  %v13167_v30 = vpop.permute.xlu0 %9851  ;;  %8032 = vmatprep.mubr.msk.f32.mxu1 %vm5413_vm1, %v17938_v50  ;;  %vm17941_vm9 = vcmask 965632   ;;  %v9334_v11 = vunpack.i.h.bf16 %v17927_v52  ;;  %v8358_v2 = vpack.c.bf16 %v13116_v1, %v13113_v36  ;;  %10141 = vrot.lane.b32.xlu0 %v17885_v38, %s10316_s11 }
 0x420   :  { %v4223_v0 = vsel %vm17930_vm2, %v17929_v33, %v9838_v49  ;;  %v4233_v46 = vsel %vm17932_vm4, %v17931_v39, %v9843_v42  ;;  %v4224_v32 = vsel %vm17933_vm0, %v9838_v49, %v17228_v53  ;;  %vm17935_vm5 = vmmov %vm17933_vm0  ;;  %17937 = vst [vmem:[#allocation104_spill] sm:$0xff] %v13167_v30  ;;  %v13169_v33 = vpop.permute.xlu1 %9856  ;;  %v17939_v49 = vld [vmem:[#allocation19_spill] sm:$0xff]  ;;  %v8360_v27 = vpack.c.bf16 %v13131_v12, %v17942_v9 }
 0x421   :  { %v4234_v44 = vsel %vm17935_vm5, %v9843_v42, %v17934_v21  ;;  %v8454_v39 = vpack.c.bf16 %v4233_v46, %v4223_v0  ;;  %v17940_v53 = vunpack.i.l.bf16 %v17939_v49  ;;  %v17943_v42 = vld [vmem:[#allocation21_spill] sm:$0xff]  ;;  %vm17945_vm2 = vcmask 949248   ;;  %8355 = vmatpush1.bf16.msra.mxu1 %v8354_v48 }
 0x422   :  { %v8452_v37 = vpack.c.bf16 %v4234_v44, %v4224_v32  ;;  %v17944_v44 = vunpack.i.l.bf16 %v17943_v42  ;;  %v9858_v50 = vunpack.i.l.bf16 %v13169_v33  ;;  %v8364_v36 = vpack.c.bf16 %v13136_v8, %v12690_v62  ;;  %vm17946_vm4 = vmmov %vm17945_vm2  ;;  %8357 = vmatprep.subr.bf16.mxu1 %v8356_v51  ;;  %10156 = vrot.lane.b32.xlu1 %v17871_v35, %s17368_s1 }
 0x423   :  { %v13176_v31 = vsel %vm17941_vm9, %v9313_v28, %v17940_v53  ;;  %v13198_v28 = vsel %vm17946_vm4, %v9334_v11, %v9328_v29  ;;  %v17232_v53 = vunpack.i.h.bf16 %v13169_v33  ;;  %v17947_v12 = vunpack.i.h.bf16 %v17928_v41  ;;  %vm17948_vm0 = vmmov %vm17945_vm2  ;;  %v13212_v32 = vpop.permute.xlu0 %9861  ;;  %10151 = vrot.lane.b32.xlu0 %v17806_v47, %s10320_s14 }
 0x424   :  { %v13186_v0 = vsel %vm17945_vm2, %v9333_v43, %v17944_v44  ;;  %v8362_v57 = vpack.c.bf16 %v13119_v15, %v13176_v31  ;;  %8453 = vmatprep.subr.bf16.mxu0 %v8452_v37  ;;  %v17949_v43 = vld [vmem:[#allocation59_spill] sm:$0xff]  ;;  %v17950_v15 = vld [vmem:[#allocation62_spill] sm:$0xff]  ;;  %v13214_v21 = vpop.permute.xlu1 %9866  ;;  %v9863_v44 = vunpack.i.l.bf16 %v13212_v32  ;;  %v17954_v48 = vunpack.i.h.bf16 %v17914_v61 }
 0x425   :  { %v13206_v52 = vsel %vm17948_vm0, %v9328_v29, %v17947_v12  ;;  %v17233_v46 = vunpack.i.h.bf16 %v17949_v43  ;;  %v9373_v31 = vunpack.i.l.bf16 %v17949_v43  ;;  %v9363_v8 = vunpack.i.l.bf16 %v17950_v15  ;;  %8455 = vmatpush1.bf16.msra.mxu0 %v8454_v39  ;;  %17951 = vst [vmem:[#allocation44_spill] sm:$0xff] %v13214_v21  ;;  %v17952_v37 = vld [vmem:[#allocation63_spill] sm:$0xff]  ;;  %v17953_v12 = vld [vmem:[#allocation66_spill] sm:$0xff]  ;;  %8359 = vmatpush1.bf16.msra.mxu1 %v8358_v2 }
 0x426   :  { %v17234_v29 = vunpack.i.h.bf16 %v13212_v32  ;;  %v9383_v62 = vunpack.i.l.bf16 %v17953_v12  ;;  %vm17955_vm5 = vcmask 973824   ;;  %v8368_v51 = vpack.c.bf16 %v13206_v52, %v12676_v19  ;;  %8361 = vmatprep.subr.bf16.mxu1 %v8360_v27  ;;  %10166 = vrot.lane.b32.xlu1 %v17800_v59, %s10321_s15  ;;  %v17969_v27 = vld [vmem:[#allocation64_spill] sm:$0xff] }
 0x427   :  { %v4371_v39 = vsel %vm17955_vm5, %v17954_v48, %v9858_v50  ;;  %v17956_v9 = vunpack.i.h.bf16 %v17884_v26  ;;  %vm17957_vm7 = vmmov %vm17955_vm5  ;;  %v13244_v30 = vsel %vm1506_vm14, %v9373_v31, %v17233_v46  ;;  %v13246_v19 = vpop.permute.xlu0 %9871  ;;  %v17963_v46 = vunpack.i.l.bf16 %v17952_v37  ;;  %10161 = vrot.lane.b32.xlu0 %v17885_v38, %s17368_s1 }
 0x428   :  { %vm17958_vm9 = vmmov %vm17955_vm5  ;;  %17960 = vst [vmem:[#allocation45_spill] sm:$0xff] %v13246_v19  ;;  %v13248_v26 = vpop.permute.xlu1 %9876  ;;  %vm17964_vm4 = vcmask 72704   ;;  %v17973_v1 = vunpack.i.h.bf16 %v12934_v10  ;;  %vm17974_vm0 = vcmask 998400   ;;  %v17976_v55 = vunpack.i.l.bf16 %v13246_v19 }
 0x429   :  { %v4381_v11 = vsel %vm17957_vm7, %v17956_v9, %v9863_v44  ;;  %v4372_v61 = vsel %vm17958_vm9, %v9858_v50, %v17232_v53  ;;  %vm17959_vm2 = vmmov %vm17955_vm5  ;;  %v17961_v50 = vunpack.i.h.bf16 %v17950_v15  ;;  %v9878_v5 = vunpack.i.l.bf16 %v13248_v26  ;;  %8363 = vmatpush1.bf16.msra.mxu1 %v8362_v57 }
 0x42a   :  { %v4382_v48 = vsel %vm17959_vm2, %v9863_v44, %v17234_v29  ;;  %v8458_v9 = vpack.c.bf16 %v4381_v11, %v4371_v39  ;;  %v17962_v44 = vunpack.i.h.bf16 %v17952_v37  ;;  %v17977_v59 = vunpack.i.h.bf16 %v12968_v13  ;;  %vm17978_vm5 = vmmov %vm17974_vm0  ;;  %8365 = vmatprep.subr.bf16.mxu1 %v8364_v36  ;;  %10176 = vrot.lane.b32.xlu1 %v17871_v35, %s10318_s12  ;;  %v17989_v36 = vld [vmem:[#allocation61_spill] sm:$0xff] }
 0x42b   :  { %v8456_v52 = vpack.c.bf16 %v4382_v48, %v4372_v61  ;;  %v13255_v53 = vsel %vm1357_vm12, %v9363_v8, %v17961_v50  ;;  %v17966_v61 = vld [vmem:[#allocation57_spill] sm:$0xff]  ;;  %v17968_v48 = vld [vmem:[#allocation67_spill] sm:$0xff]  ;;  %v13305_v10 = vpop.permute.xlu0 %9881  ;;  %v17987_v19 = vunpack.i.h.bf16 %v17939_v49  ;;  %vm17988_vm7 = vcmask 965632   ;;  %10171 = vrot.lane.b32.xlu0 %v17806_v47, %s10321_s15 }
 0x42c   :  { %v13262_v2 = vsel %vm17964_vm4, %v17963_v46, %v17962_v44  ;;  %v17967_v11 = vunpack.i.h.bf16 %v17966_v61  ;;  %v9413_v50 = vunpack.i.l.bf16 %v17968_v48  ;;  %v17970_v46 = vunpack.i.h.bf16 %v17969_v27  ;;  %vm17992_vm9 = vmmov %vm17988_vm7 }
 0x42d   :  { %17965 = vst [vmem:[#allocation46_spill] sm:$0xff] %v13262_v2  ;;  %v13299_v27 = vsel %vm17978_vm5, %v17977_v59, %v17976_v55  ;;  %8457 = vmatprep.subr.bf16.mxu0 %v8456_v52  ;;  %v17983_v55 = vld [vmem:[#allocation71_spill] sm:$0xff]  ;;  %v17984_v20 = vunpack.i.h.bf16 %v17968_v48  ;;  %v4519_v13 = vsel %vm17988_vm7, %v17987_v19, %v9878_v5  ;;  %v17990_v59 = vunpack.i.h.bf16 %v17989_v36  ;;  %vm17994_vm2 = vmmov %vm17988_vm7 }
 0x42e   :  { %v13268_v39 = vsel %vm1357_vm12, %v17967_v11, %v9363_v8  ;;  %v13280_v44 = vsel %vm1506_vm14, %v17970_v46, %v9373_v31  ;;  %v17971_v8 = vunpack.i.h.bf16 %v17953_v12  ;;  %v17972_v11 = vunpack.i.l.bf16 %v13214_v21  ;;  %17979 = vst [vmem:[#allocation115_spill] sm:$0xff] %v13299_v27  ;;  %v17980_v46 = vld [vmem:[#allocation70_spill] sm:$0xff]  ;;  %v17981_v21 = vld [vmem:[#allocation147_spill] sm:$0xff]  ;;  %8459 = vmatpush1.bf16.msra.mxu0 %v8458_v9  ;;  %v17986_v9 = vld [vmem:[#allocation116_spill] sm:$0xff] }
 0x42f   :  { %v9403_v58 = vunpack.i.l.bf16 %v17980_v46  ;;  %v13318_v57 = vsel %vm2102_vm13, %v9413_v50, %v17984_v20  ;;  %v17991_v20 = vunpack.i.h.bf16 %v17906_v17  ;;  %v17993_v49 = vunpack.i.h.bf16 %v13248_v26  ;;  %vm17996_vm4 = vmmov %vm17994_vm2  ;;  %v17997_v27 = vld [vmem:[#allocation73_spill] sm:$0xff]  ;;  %10181 = vrot.lane.b32.xlu0 %v17885_v38, %s10318_s12 }
 0x430   :  { %v13285_v61 = vsel %vm1655_vm15, %v9383_v62, %v17971_v8  ;;  %v13292_v29 = vsel %vm17974_vm0, %v17973_v1, %v17972_v11  ;;  %v13307_v1 = vpop.permute.xlu1 %9886  ;;  %v9883_v8 = vunpack.i.l.bf16 %v13305_v10  ;;  %17985 = vst [vmem:[#allocation48_spill] sm:$0xff] %v13318_v57  ;;  %v13331_v11 = vsel %vm1655_vm15, %v17990_v59, %v9383_v62  ;;  %v13347_v59 = vpop.permute.xlu0 %9891  ;;  %v18015_v57 = vld [vmem:[#allocation65_spill] sm:$0xff] }
 0x431   :  { %17975 = vst [vmem:[#allocation47_spill] sm:$0xff] %v13292_v29  ;;  %17982 = vst [vmem:[#allocation74_spill] sm:$0xff] %v13307_v1  ;;  %v4520_v19 = vsel %vm17994_vm2, %v9878_v5, %v17993_v49  ;;  %v17995_v47 = vunpack.i.h.bf16 %v13305_v10  ;;  %v17998_v62 = vpack.c.bf16 %v13165_v14, %v13142_v25  ;;  %v18000_v31 = vunpack.i.h.bf16 %v17981_v21 }
 0x432   :  { %v4529_v52 = vsel %vm17992_vm9, %v17991_v20, %v9883_v8  ;;  %17999 = vst [vmem:[#allocation90_spill] sm:$0xff] %v13347_v59  ;;  %v18001_v5 = vunpack.i.l.bf16 %v17981_v21  ;;  %vm18003_vm0 = vcmask 64512   ;;  %v18005_v14 = vunpack.i.h.bf16 %v17983_v55 }
 0x433   :  { %v4530_v29 = vsel %vm17996_vm4, %v9883_v8, %v17995_v47  ;;  %8367 = vmatpush1.bf16.msra.mxu1 %v17998_v62  ;;  %v8462_v20 = vpack.c.bf16 %v4529_v52, %v4519_v13  ;;  %v18002_v8 = vunpack.i.h.bf16 %v17980_v46  ;;  %v18006_v25 = vunpack.i.l.bf16 %v17983_v55  ;;  %v18009_v52 = vld [vmem:[#allocation68_spill] sm:$0xff]  ;;  %vm18017_vm7 = vmmov %vm18003_vm0 }
 0x434   :  { %v13349_v17 = vpop.permute.xlu1 %9896  ;;  %v8460_v36 = vpack.c.bf16 %v4530_v29, %v4520_v19  ;;  %v1373_v49 = vsel %vm1357_vm12, %v18001_v5, %v18000_v31  ;;  %8369 = vmatprep.subr.bf16.mxu1 %v8368_v51  ;;  %v18008_v13 = vunpack.i.l.bf16 %v17952_v37  ;;  %v18010_v19 = vunpack.i.h.bf16 %v18009_v52 }
 0x435   :  { %v13359_v47 = vsel %vm18003_vm0, %v9403_v58, %v18002_v8  ;;  %v13366_v62 = vsel %vm2400_vm10, %v18006_v25, %v18005_v14  ;;  %vm18011_vm5 = vcmask 72704   ;;  %v9898_v5 = vunpack.i.l.bf16 %v13349_v17  ;;  %v18012_v8 = vld [vmem:[#allocation105_spill] sm:$0xff] }
 0x436   :  { %18004 = vst [vmem:[#allocation50_spill] sm:$0xff] %v13359_v47  ;;  %18007 = vst [vmem:[#allocation123_spill] sm:$0xff] %v13366_v62  ;;  %v13374_v31 = vsel %vm18011_vm5, %v18010_v19, %v18008_v13  ;;  %10186 = vrot.lane.b32.xlu1 %v18012_v8, %s10322_s16  ;;  %v18013_v14 = vunpack.i.h.bf16 %v17986_v9  ;;  %v18014_v51 = vunpack.i.l.bf16 %v17986_v9  ;;  %v18016_v29 = vunpack.i.h.bf16 %v18015_v57  ;;  %v18018_v13 = vld [vmem:[#allocation72_spill] sm:$0xff]  ;;  %8461 = vmatprep.subr.bf16.mxu0 %v8460_v36 }
 0x437   :  { %v18019_v19 = vunpack.i.h.bf16 %v18018_v13  ;;  %v18020_v48 = vunpack.i.l.bf16 %v13307_v1  ;;  %v18021_v47 = vunpack.i.h.bf16 %v13005_v34  ;;  %vm18022_vm9 = vcmask 990208   ;;  %v18029_v13 = vld [vmem:[#allocation150_spill] sm:$0xff]  ;;  %8463 = vmatpush1.bf16.msra.mxu0 %v8462_v20  ;;  %v18035_v20 = vld [vmem:[#allocation76_spill] sm:$0xff] }
 0x438   :  { %v1522_v25 = vsel %vm1506_vm14, %v18014_v51, %v18013_v14  ;;  %v13389_v52 = vsel %vm18017_vm7, %v18016_v29, %v9403_v58  ;;  %v18024_v2 = vunpack.i.l.bf16 %v13347_v59  ;;  %v18025_v14 = vunpack.i.h.bf16 %v13034_v63  ;;  %vm18026_vm2 = vmmov %vm18022_vm9  ;;  %v18028_v29 = vld [vmem:[#allocation75_spill] sm:$0xff]  ;;  %v13419_v63 = vpop.permute.xlu1 %9906  ;;  %v13442_v51 = vld [vmem:[%s16922_s4 + $0x38] sm:$0xff] }
 0x439   :  { %v13394_v62 = vsel %vm2102_vm13, %v18019_v19, %v9413_v50  ;;  %v13401_v46 = vsel %vm18022_vm9, %v18021_v47, %v18020_v48  ;;  %v8472_v50 = vpack.c.bf16 %v1373_v49, %v13268_v39  ;;  %v18030_v34 = vpack.c.bf16 %v13198_v28, %v13186_v0  ;;  %v13417_v48 = vpop.permute.xlu0 %9901  ;;  %18031 = vst [vmem:[#allocation52_spill] sm:$0xff] %v13419_v63  ;;  %v18036_v19 = vld [vmem:[#allocation80_spill] sm:$0xff] }
 0x43a   :  { %18023 = vst [vmem:[#allocation51_spill] sm:$0xff] %v13401_v46  ;;  %v13408_v57 = vsel %vm18026_vm2, %v18025_v14, %v18024_v2  ;;  %v13424_v2 = vld [vmem:[%s16922_s4 + $0x10] sm:$0xff]  ;;  %v18032_v39 = vunpack.i.h.bf16 %v17997_v27  ;;  %v18033_v36 = vunpack.i.l.bf16 %v17997_v27  ;;  %v9423_v28 = vunpack.i.l.bf16 %v18028_v29  ;;  %10196 = vrot.lane.b32.xlu1 %v17871_v35, %s10319_s13  ;;  %v18050_v27 = vld [vmem:[#allocation29_spill] sm:$0xff] }
 0x43b   :  { %18027 = vst [vmem:[#allocation49_spill] sm:$0xff] %v13408_v57  ;;  %8371 = vmatpush1.bf16.msra.mxu1 %v18030_v34  ;;  %v9903_v34 = vunpack.i.l.bf16 %v13417_v48  ;;  %v18038_v0 = vunpack.i.h.bf16 %v17772_v56  ;;  %vm18039_vm4 = vcmask 957440   ;;  %v18040_v47 = vld [vmem:[#allocation108_spill] sm:$0xff]  ;;  %v8476_v14 = vpack.c.bf16 %v1522_v25, %v13280_v44 }
 0x43c   :  { %v13431_v49 = vsel %vm2549_vm8, %v18033_v36, %v18032_v39  ;;  %8473 = vmatprep.subr.bf16.mxu1 %v8472_v50  ;;  %v18037_v36 = vld [vmem:[#allocation121_spill] sm:$0xff]  ;;  %v18041_v50 = vld [vmem:[#allocation110_spill] sm:$0xff]  ;;  %v18043_v59 = vunpack.i.h.bf16 %v17909_v23  ;;  %vm18044_vm0 = vmmov %vm18039_vm4  ;;  %v18045_v56 = vunpack.i.h.bf16 %v13349_v17  ;;  %v18055_v1 = vunpack.i.l.bf16 %v18029_v13 }
 0x43d   :  { %18034 = vst [vmem:[#allocation16_spill] sm:$0xff] %v13431_v49  ;;  %v4667_v46 = vsel %vm18039_vm4, %v18038_v0, %v9898_v5  ;;  %v18042_v57 = vpack.i.bf16 %v18040_v47, %v18041_v50  ;;  %vm18046_vm5 = vmmov %vm18044_vm0  ;;  %v18047_v47 = vunpack.i.h.bf16 %v13417_v48  ;;  %v18049_v50 = vld [vmem:[#allocation85_spill] sm:$0xff]  ;;  %v18051_v44 = vld [vmem:[#allocation148_spill] sm:$0xff]  ;;  %v13471_v23 = vpop.permute.xlu0 %9911  ;;  %vm18062_vm9 = vcmask 23552  }
 0x43e   :  { %v4677_v39 = vsel %vm18044_vm0, %v18043_v59, %v9903_v34  ;;  %5580 = vmatmul.mubr.f32.vlgmr.msra.gmra.mrb[8].mxu1 %v13424_v2  ;;  %v4668_v0 = vsel %vm18046_vm5, %v9898_v5, %v18045_v56  ;;  %vm18048_vm7 = vmmov %vm18044_vm0  ;;  %v18052_v25 = vpack.c.bf16 %v18050_v27, %v18051_v44  ;;  %18053 = vst [vmem:[#allocation101_spill] sm:$0xff] %v13471_v23  ;;  %v13473_v59 = vpop.permute.xlu1 %9916  ;;  %v13480_v5 = vld [vmem:[%s16922_s4 + $0x30] sm:$0xff]  ;;  %v18056_v44 = vunpack.i.h.bf16 %v18028_v29  ;;  %v18058_v49 = vld [vmem:[#allocation69_spill] sm:$0xff] }
 0x43f   :  { %10191 = vrot.lane.b32.xlu0 %v18042_v57, %s10322_s16  ;;  %v4678_v57 = vsel %vm18048_vm7, %v9903_v34, %v18047_v47  ;;  %8033 = vmatprep.mubr.msk.f32.mxu1 %vm5413_vm1, %v13442_v51  ;;  %v8466_v34 = vpack.c.bf16 %v4677_v39, %v4667_v46  ;;  %v18054_v47 = vunpack.i.h.bf16 %v18029_v13  ;;  %v18059_v45 = vunpack.i.h.bf16 %v18058_v49 }
 0x440   :  { %8475 = vmatpush1.bf16.msra.mxu1 %v18052_v25  ;;  %v8464_v56 = vpack.c.bf16 %v4678_v57, %v4668_v0  ;;  %v13490_v25 = vsel %vm2251_vm11, %v9423_v28, %v18056_v44  ;;  %v18060_v46 = vunpack.i.h.bf16 %v18035_v20  ;;  %v18061_v39 = vunpack.i.l.bf16 %v18035_v20  ;;  %10206 = vrot.lane.b32.xlu1 %v18012_v8, %s10323_s17 }
 0x441   :  { %v1671_v27 = vsel %vm1655_vm15, %v18055_v1, %v18054_v47  ;;  %18057 = vst [vmem:[#allocation20_spill] sm:$0xff] %v13490_v25  ;;  %8477 = vmatprep.subr.bf16.mxu1 %v8476_v14  ;;  %v13496_v37 = vsel %vm2251_vm11, %v18059_v45, %v9423_v28  ;;  %v18063_v1 = vld [vmem:[#allocation153_spill] sm:$0xff]  ;;  %v9918_v47 = vunpack.i.l.bf16 %v13473_v59  ;;  %v18064_v49 = vunpack.i.h.bf16 %v18037_v36 }
 0x442   :  { %v13503_v0 = vsel %vm18062_vm9, %v18061_v39, %v18060_v46  ;;  %v13514_v45 = vld [vmem:[%s16922_s4 + $0x58] sm:$0xff]  ;;  %v18065_v28 = vunpack.i.l.bf16 %v18037_v36  ;;  %vm18066_vm2 = vcmask 72704   ;;  %v18067_v44 = vunpack.i.l.bf16 %v17983_v55  ;;  %5586 = vmatmul.mubr.f32.gmra.mrb[10].mxu1 %v13480_v5  ;;  %8465 = vmatprep.subr.bf16.mxu0 %v8464_v56  ;;  %v18102_v55 = vld [vmem:[#allocation152_spill] sm:$0xff] }
 0x443   :  { %10201 = vrot.lane.b32.xlu0 %v17885_v38, %s10319_s13  ;;  %v18068_v46 = vld [vmem:[#allocation77_spill] sm:$0xff]  ;;  %v18070_v8 = vunpack.i.l.bf16 %v13419_v63  ;;  %v18071_v57 = vunpack.i.h.bf16 %v13086_v16  ;;  %vm18072_vm4 = vcmask 982016   ;;  %v18074_v20 = vunpack.i.l.bf16 %v13471_v23  ;;  %v18078_v16 = vld [vmem:[#allocation136_spill] sm:$0xff]  ;;  %8467 = vmatpush1.bf16.msra.mxu0 %v8466_v34 }
 0x444   :  { %v1820_v14 = vsel %vm18066_vm2, %v18065_v28, %v18064_v49  ;;  %v18069_v39 = vunpack.i.h.bf16 %v18068_v46  ;;  %v18075_v25 = vunpack.i.h.bf16 %v13122_v3  ;;  %vm18076_vm0 = vmmov %vm18072_vm4  ;;  %v9723_v46 = vunpack.i.l.bf16 %v12548_v22  ;;  %v13551_v3 = vpop.permute.xlu1 %9926  ;;  %v18089_v63 = vld [vmem:[#allocation125_spill] sm:$0xff]  ;;  %8034 = vmatprep.mubr.msk.f32.mxu1 %vm5413_vm1, %v13514_v45  ;;  %10216 = vrot.lane.b32.xlu1 %v17871_v35, %s10320_s14 }
 0x445   :  { %v13533_v58 = vsel %vm18072_vm4, %v18071_v57, %v18070_v8  ;;  %v13549_v8 = vpop.permute.xlu0 %9921  ;;  %v18081_v56 = vunpack.i.h.bf16 %v18036_v19  ;;  %vm18083_vm5 = vcmask 15360   ;;  %v18086_v34 = vunpack.i.l.bf16 %v18049_v50 }
 0x446   :  { %v13526_v38 = vsel %vm2400_vm10, %v18069_v39, %v18067_v44  ;;  %18073 = vst [vmem:[#allocation112_spill] sm:$0xff] %v13533_v58  ;;  %v13540_v49 = vsel %vm18076_vm0, %v18075_v25, %v18074_v20  ;;  %v8480_v44 = vpack.c.bf16 %v1671_v27, %v13331_v11  ;;  %v18079_v39 = vld [vmem:[#allocation135_spill] sm:$0xff]  ;;  %v13556_v20 = vld [vmem:[%s16922_s4 + $0x50] sm:$0xff]  ;;  %v18082_v11 = vunpack.i.l.bf16 %v18036_v19 }
 0x447   :  { %18077 = vst [vmem:[#allocation53_spill] sm:$0xff] %v13540_v49  ;;  %v18080_v57 = vpack.c.bf16 %v18078_v16, %v18079_v39  ;;  %v18085_v25 = vunpack.i.h.bf16 %v18049_v50  ;;  %vm18091_vm7 = vcmask 949248   ;;  %v18092_v39 = vld [vmem:[#allocation118_spill] sm:$0xff]  ;;  %v18093_v28 = vunpack.i.h.bf16 %v18063_v1  ;;  %5592 = vmatmul.mubr.f32.gmra.mrb[12].mxu1 %v13556_v20 }
 0x448   :  { %v13563_v27 = vsel %vm18083_vm5, %v18082_v11, %v18081_v56  ;;  %v9923_v56 = vunpack.i.l.bf16 %v13549_v8  ;;  %v13583_v11 = vld [vmem:[%s16922_s4 + $0x78] sm:$0xff]  ;;  %10211 = vrot.lane.b32.xlu0 %v18092_v39, %s10323_s17  ;;  %v18094_v23 = vunpack.i.l.bf16 %v18063_v1  ;;  %vm18095_vm9 = vcmask 64512   ;;  %vm18097_vm2 = vmmov %vm18091_vm7 }
 0x449   :  { %8479 = vmatpush1.bf16.msra.mxu1 %v18080_v57  ;;  %18084 = vst [vmem:[#allocation54_spill] sm:$0xff] %v13563_v27  ;;  %v13570_v16 = vsel %vm2996_vm6, %v18086_v34, %v18085_v25  ;;  %v18088_v57 = vld [vmem:[#allocation117_spill] sm:$0xff]  ;;  %v18090_v25 = vunpack.i.h.bf16 %v17943_v42  ;;  %v18096_v58 = vunpack.i.h.bf16 %v17928_v41  ;;  %v18098_v49 = vunpack.i.h.bf16 %v13473_v59  ;;  %vm18099_vm4 = vmmov %vm18097_vm2  ;;  %v13613_v41 = vpop.permute.xlu0 %9931  ;;  %8035 = vmatprep.mubr.msk.f32.mxu1 %vm5413_vm1, %v13583_v11 }
 0x44a   :  { %18087 = vst [vmem:[#allocation13_spill] sm:$0xff] %v13570_v16  ;;  %8481 = vmatprep.subr.bf16.mxu1 %v8480_v44  ;;  %v8484_v44 = vpack.c.bf16 %v1820_v14, %v13374_v31  ;;  %v1969_v19 = vsel %vm18095_vm9, %v18094_v23, %v18093_v28  ;;  %v18100_v31 = vunpack.i.h.bf16 %v13549_v8  ;;  %vm18101_vm0 = vmmov %vm18097_vm2  ;;  %v9728_v50 = vunpack.i.l.bf16 %v12550_v7  ;;  %v18103_v23 = vld [vmem:[#allocation151_spill] sm:$0xff] }
 0x44b   :  { %v4815_v34 = vsel %vm18091_vm7, %v18090_v25, %v9918_v47  ;;  %v4825_v42 = vsel %vm18097_vm2, %v18096_v58, %v9923_v56  ;;  %v4816_v35 = vsel %vm18099_vm4, %v9918_v47, %v18098_v49  ;;  %v18104_v28 = vpack.c.bf16 %v18102_v55, %v18103_v23  ;;  %v13615_v58 = vpop.permute.xlu1 %9936  ;;  %v13622_v47 = vld [vmem:[%s16922_s4 + $0x70] sm:$0xff]  ;;  %v18106_v55 = vld [vmem:[#allocation157_spill] sm:$0xff] }
 0x44c   :  { %v4826_v14 = vsel %vm18101_vm0, %v9923_v56, %v18100_v31  ;;  %v8470_v56 = vpack.c.bf16 %v4825_v42, %v4815_v34  ;;  %v18105_v31 = vunpack.i.h.bf16 %v12548_v22  ;;  %v18107_v29 = vunpack.i.h.bf16 %v18089_v63  ;;  %5598 = vmatmul.mubr.f32.gmra.mrb[14].mxu1 %v13622_v47 }
 0x44d   :  { %8483 = vmatpush1.bf16.msra.mxu1 %v18104_v28  ;;  %v8468_v49 = vpack.c.bf16 %v4826_v14, %v4816_v35  ;;  %v17274_v28 = vunpack.i.l.bf16 %v13613_v41  ;;  %v18108_v16 = vunpack.i.l.bf16 %v18089_v63  ;;  %v18109_v1 = vunpack.i.h.bf16 %v18088_v57  ;;  %v18113_v14 = vld [vmem:[#allocation109_spill] sm:$0xff] }
 0x44e   :  { %v1375_v25 = vsel %vm1357_vm12, %v9723_v46, %v18105_v31  ;;  %8485 = vmatprep.subr.bf16.mxu1 %v8484_v44  ;;  %v18110_v35 = vunpack.i.l.bf16 %v18088_v57  ;;  %v18111_v22 = vunpack.i.h.bf16 %v17981_v21  ;;  %v18112_v44 = vld [vmem:[#allocation119_spill] sm:$0xff]  ;;  %10226 = vrot.lane.b32.xlu1 %v18113_v14, %s10324_s18  ;;  %v8488_v31 = vpack.c.bf16 %v1969_v19, %v13389_v52  ;;  %v18121_v19 = vld [vmem:[#allocation126_spill] sm:$0xff] }
 0x44f   :  { %v2118_v27 = vsel %vm2102_vm13, %v18108_v16, %v18107_v29  ;;  %10221 = vrot.lane.b32.xlu0 %v18112_v44, %s10320_s14  ;;  %v18114_v29 = vunpack.i.l.bf16 %v12354_v6  ;;  %v18115_v16 = vunpack.i.h.bf16 %v17950_v15  ;;  %v18117_v21 = vunpack.i.h.bf16 %v13169_v33  ;;  %8469 = vmatprep.subr.bf16.mxu0 %v8468_v49  ;;  %v13675_v6 = vpop.permute.xlu0 %9941  ;;  %v18126_v49 = vld [vmem:[#allocation134_spill] sm:$0xff] }
 0x450   :  { %v13639_v34 = vsel %vm50_vm3, %v18110_v35, %v18109_v1  ;;  %v1374_v42 = vsel %vm1357_vm12, %v18111_v22, %v9723_v46  ;;  %v18116_v1 = vunpack.i.l.bf16 %v13551_v3  ;;  %vm18118_vm5 = vcmask 973824   ;;  %8471 = vmatpush1.bf16.msra.mxu0 %v8470_v56 }
 0x451   :  { %v1365_v23 = vsel %vm1357_vm12, %v18115_v16, %v18114_v29  ;;  %v18119_v35 = vunpack.i.h.bf16 %v13212_v32  ;;  %vm18120_vm7 = vmmov %vm18118_vm5  ;;  %v17275_v52 = vunpack.i.l.bf16 %v13615_v58  ;;  %v9733_v33 = vunpack.i.l.bf16 %v12614_v24  ;;  %v18122_v16 = vld [vmem:[#allocation139_spill] sm:$0xff]  ;;  %v13677_v32 = vpop.permute.xlu1 %9946 }
 0x452   :  { %v13659_v46 = vsel %vm18118_vm5, %v18117_v21, %v18116_v1  ;;  %v8572_v15 = vpack.c.bf16 %v1375_v25, %v1365_v23  ;;  %v18123_v1 = vld [vmem:[#allocation138_spill] sm:$0xff]  ;;  %v17285_v23 = vunpack.i.h.bf16 %v18126_v49  ;;  %v17276_v29 = vunpack.i.l.bf16 %v13675_v6 }
 0x453   :  { %v13666_v22 = vsel %vm18120_vm7, %v18119_v35, %v17274_v28  ;;  %v18124_v21 = vpack.c.bf16 %v18122_v16, %v18123_v1  ;;  %v18125_v35 = vunpack.i.h.bf16 %v12550_v7  ;;  %v8492_v16 = vpack.c.bf16 %v2118_v27, %v13394_v62  ;;  %10231 = vrot.lane.b32.xlu0 %v18092_v39, %s10324_s18  ;;  %5758 = vmatmul.mubr.f32.vlgmr.msra.gmra.mrb[12].mxu0 %v13424_v2 }
 0x454   :  { %8573 = vmatprep.subr.bf16.mxu0 %v8572_v15  ;;  %v18127_v56 = vunpack.i.h.bf16 %v18106_v55  ;;  %v18128_v1 = vunpack.i.l.bf16 %v18106_v55  ;;  %v18129_v7 = vunpack.i.h.bf16 %v17986_v9  ;;  %v8574_v15 = vpack.c.bf16 %v1374_v42, %v13255_v53  ;;  %v13724_v42 = vld [vmem:[%s16922_s4 + $0x8] sm:$0xff]  ;;  %8037 = vmatprep.mubr.msk.f32.mxu0 %vm5413_vm1, %v13442_v51 }
 0x455   :  { %8487 = vmatpush1.bf16.msra.mxu1 %v18124_v21  ;;  %v1524_v28 = vsel %vm1506_vm14, %v9728_v50, %v18125_v35  ;;  %v18131_v62 = vunpack.i.l.bf16 %v12352_v40  ;;  %v18132_v27 = vunpack.i.h.bf16 %v17949_v43  ;;  %v18133_v9 = vunpack.i.h.bf16 %v13248_v26  ;;  %5846 = vmatprep.mubr.f32.mxu1 %v13724_v42 }
 0x456   :  { %8489 = vmatprep.subr.bf16.mxu1 %v8488_v31  ;;  %v2267_v21 = vsel %vm2251_vm11, %v18128_v1, %v18127_v56  ;;  %v1523_v35 = vsel %vm1506_vm14, %v18129_v7, %v9728_v50  ;;  %v18130_v31 = vld [vmem:[#allocation111_spill] sm:$0xff]  ;;  %vm18134_vm9 = vcmask 965632   ;;  %v18136_v56 = vunpack.i.h.bf16 %v13305_v10  ;;  %v18140_v7 = vld [vmem:[#allocation81_spill] sm:$0xff]  ;;  %8575 = vmatpush1.bf16.msra.mxu0 %v8574_v15 }
 0x457   :  { %10236 = vrot.lane.b32.xlu1 %v18130_v31, %s10321_s15  ;;  %v1514_v25 = vsel %vm1506_vm14, %v18132_v27, %v18131_v62  ;;  %v13710_v50 = vsel %vm18134_vm9, %v18133_v9, %v17275_v52  ;;  %vm18137_vm2 = vmmov %vm18134_vm9  ;;  %v18139_v26 = vunpack.i.l.bf16 %v18121_v19  ;;  %v18141_v62 = vunpack.i.h.bf16 %v18140_v7  ;;  %v18143_v9 = vld [vmem:[#allocation156_spill] sm:$0xff]  ;;  %10241 = vrot.lane.b32.xlu0 %v18112_v44, %s10321_s15 }
 0x458   :  { %18135 = vst [vmem:[#allocation25_spill] sm:$0xff] %v13710_v50  ;;  %v13717_v1 = vsel %vm18137_vm2, %v18136_v56, %v17276_v29  ;;  %v8576_v43 = vpack.c.bf16 %v1524_v28, %v1514_v25  ;;  %vm18142_vm4 = vcmask 1031168   ;;  %v9738_v27 = vunpack.i.l.bf16 %v12616_v54  ;;  %v18144_v56 = vld [vmem:[#allocation154_spill] sm:$0xff]  ;;  %v13738_v28 = vpop.permute.xlu0 %9951  ;;  %v13740_v25 = vpop.permute.xlu1 %9956  ;;  %5764 = vmatmul.mubr.f32.gmra.mrb[14].mxu0 %v13480_v5 }
 0x459   :  { %18138 = vst [vmem:[#allocation19_spill] sm:$0xff] %v13717_v1  ;;  %v13732_v10 = vsel %vm18142_vm4, %v18141_v62, %v18139_v26  ;;  %v18145_v2 = vpack.c.bf16 %v18143_v9, %v18144_v56  ;;  %18146 = vst [vmem:[#allocation124_spill] sm:$0xff] %v13740_v25  ;;  %v18147_v52 = vunpack.i.h.bf16 %v12614_v24  ;;  %v18148_v26 = vld [vmem:[#allocation137_spill] sm:$0xff]  ;;  %v17277_v53 = vunpack.i.l.bf16 %v13738_v28  ;;  %v18150_v24 = vld [vmem:[#allocation140_spill] sm:$0xff]  ;;  %8038 = vmatprep.mubr.msk.f32.mxu0 %vm5413_vm1, %v13514_v45 }
 0x45a   :  { %v17280_v62 = vunpack.i.h.bf16 %v18148_v26  ;;  %8577 = vmatprep.subr.bf16.mxu0 %v8576_v43  ;;  %v8496_v9 = vpack.c.bf16 %v2267_v21, %v13496_v37  ;;  %v18149_v15 = vunpack.i.l.bf16 %v18126_v49  ;;  %v8578_v37 = vpack.c.bf16 %v1523_v35, %v13244_v30 }
 0x45b   :  { %8491 = vmatpush1.bf16.msra.mxu1 %v18145_v2  ;;  %v1673_v29 = vsel %vm1655_vm15, %v9733_v33, %v18147_v52  ;;  %v17278_v2 = vunpack.i.h.bf16 %v18150_v24  ;;  %v18151_v52 = vunpack.i.h.bf16 %v18029_v13  ;;  %v18153_v21 = vunpack.i.h.bf16 %v17953_v12  ;;  %10246 = vrot.lane.b32.xlu1 %v18113_v14, %s10325_s19 }
 0x45c   :  { %8493 = vmatprep.subr.bf16.mxu1 %v8492_v16  ;;  %v2416_v56 = vsel %vm2400_vm10, %v18149_v15, %v17285_v23  ;;  %v18152_v16 = vunpack.i.l.bf16 %v12386_v4  ;;  %v17282_v15 = vunpack.i.h.bf16 %v18121_v19  ;;  %v18154_v13 = vunpack.i.l.bf16 %v13677_v32  ;;  %8579 = vmatpush1.bf16.msra.mxu0 %v8578_v37 }
 0x45d   :  { %v1672_v7 = vsel %vm1655_vm15, %v18151_v52, %v9733_v33  ;;  %v18155_v33 = vunpack.i.h.bf16 %v13349_v17  ;;  %vm18156_vm0 = vcmask 957440   ;;  %v18158_v51 = vunpack.i.h.bf16 %v13417_v48  ;;  %v18162_v17 = vld [vmem:[#allocation141_spill] sm:$0xff]  ;;  %10251 = vrot.lane.b32.xlu0 %v18092_v39, %s10325_s19  ;;  %5770 = vmatmul.mubr.f32.gmra.mrb[16].mxu0 %v13556_v20 }
 0x45e   :  { %v1663_v43 = vsel %vm1655_vm15, %v18153_v21, %v18152_v16  ;;  %vm18159_vm5 = vmmov %vm18156_vm0  ;;  %v9743_v35 = vunpack.i.l.bf16 %v12646_v60  ;;  %v18161_v16 = vld [vmem:[#allocation142_spill] sm:$0xff]  ;;  %v8500_v48 = vpack.c.bf16 %v2416_v56, %v13526_v38  ;;  %vm18165_vm7 = vcmask 72704   ;;  %8039 = vmatprep.mubr.msk.f32.mxu0 %vm5413_vm1, %v13583_v11 }
 0x45f   :  { %v13775_v52 = vsel %vm18156_vm0, %v18155_v33, %v18154_v13  ;;  %v13782_v30 = vsel %vm18159_vm5, %v18158_v51, %v17277_v53  ;;  %v8580_v12 = vpack.c.bf16 %v1673_v29, %v1663_v43  ;;  %v18163_v21 = vpack.c.bf16 %v18161_v16, %v18162_v17  ;;  %v13791_v13 = vpop.permute.xlu0 %9961  ;;  %v13793_v33 = vpop.permute.xlu1 %9966  ;;  %v18166_v29 = vld [vmem:[#allocation56_spill] sm:$0xff]  ;;  %vm18171_vm9 = vmmov %vm18165_vm7  ;;  %10256 = vrot.lane.b32.xlu1 %v18130_v31, %s10322_s16 }
 0x460   :  { %18157 = vst [vmem:[#allocation21_spill] sm:$0xff] %v13775_v52  ;;  %18160 = vst [vmem:[#allocation59_spill] sm:$0xff] %v13782_v30  ;;  %v18164_v51 = vunpack.i.h.bf16 %v12616_v54  ;;  %v17284_v43 = vunpack.i.h.bf16 %v18166_v29  ;;  %v17281_v53 = vunpack.i.l.bf16 %v13740_v25  ;;  %v17279_v37 = vunpack.i.l.bf16 %v13791_v13  ;;  %v18262_v52 = vld [vmem:[#allocation123_spill] sm:$0xff]  ;;  %v18263_v30 = vld [vmem:[#allocation73_spill] sm:$0xff] }
 0x461   :  { %8495 = vmatpush1.bf16.msra.mxu1 %v18163_v21  ;;  %8581 = vmatprep.subr.bf16.mxu0 %v8580_v12  ;;  %v18167_v16 = vunpack.i.l.bf16 %v18148_v26  ;;  %v8582_v54 = vpack.c.bf16 %v1672_v7, %v13285_v61  ;;  %v18168_v56 = vunpack.i.l.bf16 %v12384_v18  ;;  %v18172_v21 = vunpack.i.l.bf16 %v18150_v24  ;;  %vm18176_vm4 = vmmov %vm18165_vm7  ;;  %v18220_v18 = vld [vmem:[#allocation13_spill] sm:$0xff] }
 0x462   :  { %v1822_v14 = vsel %vm18165_vm7, %v9738_v27, %v18164_v51  ;;  %8497 = vmatprep.subr.bf16.mxu1 %v8496_v9  ;;  %v18169_v9 = vld [vmem:[#allocation63_spill] sm:$0xff]  ;;  %vm18173_vm2 = vcmask 23552   ;;  %v18175_v5 = vunpack.i.h.bf16 %v18037_v36  ;;  %v18177_v61 = vunpack.i.h.bf16 %v13549_v8  ;;  %v18184_v8 = vld [vmem:[#allocation16_spill] sm:$0xff]  ;;  %10261 = vrot.lane.b32.xlu0 %v18112_v44, %s10322_s16 }
 0x463   :  { %v2565_v38 = vsel %vm2549_vm8, %v18167_v16, %v17280_v62  ;;  %v18170_v17 = vunpack.i.h.bf16 %v18169_v9  ;;  %v13824_v51 = vsel %vm18173_vm2, %v18172_v21, %v17278_v2  ;;  %v18174_v16 = vld [vmem:[#allocation144_spill] sm:$0xff]  ;;  %vm18178_vm0 = vcmask 949248   ;;  %v18180_v9 = vld [vmem:[#allocation39_spill] sm:$0xff]  ;;  %v18181_v21 = vld [vmem:[#allocation30_spill] sm:$0xff]  ;;  %8583 = vmatpush1.bf16.msra.mxu0 %v8582_v54  ;;  %10266 = vrot.lane.b32.xlu1 %v18130_v31, %s10323_s17 }
 0x464   :  { %v17283_v45 = vunpack.i.h.bf16 %v18174_v16  ;;  %v1821_v39 = vsel %vm18176_vm4, %v18175_v5, %v9738_v27  ;;  %v13835_v7 = vsel %vm18178_vm0, %v18177_v61, %v17279_v37  ;;  %v18182_v2 = vld [vmem:[#allocation10_spill] sm:$0xff]  ;;  %v13844_v27 = vpop.permute.xlu0 %9971  ;;  %v13846_v5 = vpop.permute.xlu1 %9976  ;;  %v8504_v61 = vpack.c.bf16 %v2565_v38, %v18184_v8  ;;  %5776 = vmatmul.mubr.f32.gmra.mrb[18].mxu0 %v13622_v47 }
 0x465   :  { %v1812_v12 = vsel %vm18171_vm9, %v18170_v17, %v18168_v56  ;;  %18179 = vst [vmem:[#allocation62_spill] sm:$0xff] %v13835_v7  ;;  %v9748_v17 = vunpack.i.l.bf16 %v18180_v9  ;;  %v18183_v36 = vpack.c.bf16 %v18181_v21, %v18182_v2  ;;  %v18185_v37 = vunpack.i.h.bf16 %v12646_v60  ;;  %v18189_v2 = vld [vmem:[#allocation78_spill] sm:$0xff]  ;;  %vm18191_vm9 = vmmov %vm18178_vm0  ;;  %6024 = vmatprep.mubr.f32.mxu0 %v13724_v42 }
 0x466   :  { %v8584_v56 = vpack.c.bf16 %v1822_v14, %v1812_v12  ;;  %vm18186_vm5 = vcmask 64512   ;;  %v18187_v20 = vunpack.i.l.bf16 %v18121_v19  ;;  %vm18188_vm7 = vcmask 1031168   ;;  %v18198_v8 = vld [vmem:[#allocation70_spill] sm:$0xff]  ;;  %10271 = vrot.lane.b32.xlu0 %v18112_v44, %s10323_s17 }
 0x467   :  { %8499 = vmatpush1.bf16.msra.mxu1 %v18183_v36  ;;  %v1971_v62 = vsel %vm18186_vm5, %v9743_v35, %v18185_v37  ;;  %v18190_v54 = vunpack.i.h.bf16 %v13473_v59  ;;  %v8508_v60 = vpack.c.bf16 %v13824_v51, %v13503_v0  ;;  %v18193_v37 = vunpack.i.l.bf16 %v18166_v29  ;;  %v18195_v59 = vld [vmem:[#allocation46_spill] sm:$0xff]  ;;  %vm18200_vm4 = vmmov %vm18186_vm5  ;;  %10276 = vrot.lane.b32.xlu1 %v18130_v31, %s10324_s18 }
 0x468   :  { %v13857_v14 = vsel %vm18188_vm7, %v18187_v20, %v17282_v15  ;;  %8501 = vmatprep.subr.bf16.mxu1 %v8500_v48  ;;  %8585 = vmatprep.subr.bf16.mxu0 %v8584_v56  ;;  %vm18194_vm2 = vcmask 15360   ;;  %v8586_v36 = vpack.c.bf16 %v1821_v39, %v18195_v59  ;;  %v18196_v48 = vld [vmem:[#allocation120_spill] sm:$0xff]  ;;  %v18199_v20 = vunpack.i.h.bf16 %v18198_v8  ;;  %vm18203_vm0 = vmmov %vm18200_vm4  ;;  %v13907_v47 = vpop.permute.xlu0 %9981  ;;  %v18212_v8 = vld [vmem:[#allocation54_spill] sm:$0xff] }
 0x469   :  { %v13865_v21 = vsel %vm18191_vm9, %v18190_v54, %v17281_v53  ;;  %v13874_v38 = vsel %vm18194_vm2, %v18193_v37, %v17284_v43  ;;  %v18197_v56 = vunpack.i.l.bf16 %v18196_v48  ;;  %v18201_v54 = vld [vmem:[#allocation153_spill] sm:$0xff]  ;;  %v18204_v39 = vunpack.i.l.bf16 %v18174_v16  ;;  %v18218_v48 = vld [vmem:[#allocation67_spill] sm:$0xff]  ;;  %vm18234_vm5 = vmmov %vm18188_vm7 }
 0x46a   :  { %18192 = vst [vmem:[#allocation66_spill] sm:$0xff] %v13865_v21  ;;  %v18202_v37 = vunpack.i.h.bf16 %v18201_v54  ;;  %v18206_v54 = vld [vmem:[#allocation131_spill] sm:$0xff]  ;;  %8587 = vmatpush1.bf16.msra.mxu0 %v8586_v36  ;;  %v8512_v12 = vpack.c.bf16 %v13874_v38, %v18212_v8  ;;  %v18214_v36 = vunpack.i.l.bf16 %v18189_v2  ;;  %v18221_v8 = vunpack.i.h.bf16 %v18089_v63  ;;  %10281 = vrot.lane.b32.xlu0 %v18112_v44, %s10324_s18  ;;  %vm18240_vm7 = vmmov %vm18234_vm5 }
 0x46b   :  { %v1961_v0 = vsel %vm18200_vm4, %v18199_v20, %v18197_v56  ;;  %v13899_v59 = vsel %vm2996_vm6, %v18204_v39, %v17283_v45  ;;  %v18205_v56 = vld [vmem:[#allocation130_spill] sm:$0xff]  ;;  %v9753_v51 = vunpack.i.l.bf16 %v18206_v54  ;;  %v18211_v45 = vld [vmem:[#allocation89_spill] sm:$0xff]  ;;  %v9968_v4 = vunpack.i.l.bf16 %v13793_v33  ;;  %10286 = vrot.lane.b32.xlu1 %v18130_v31, %s10325_s19 }
 0x46c   :  { %v1970_v53 = vsel %vm18203_vm0, %v18202_v37, %v9743_v35  ;;  %v8588_v11 = vpack.c.bf16 %v1971_v62, %v1961_v0  ;;  %v9718_v20 = vunpack.i.l.bf16 %v18205_v56  ;;  %v18207_v35 = vld [vmem:[#allocation26_spill] sm:$0xff]  ;;  %v18208_v37 = vld [vmem:[#allocation95_spill] sm:$0xff]  ;;  %v13909_v62 = vpop.permute.xlu1 %9986  ;;  %v18210_v0 = vunpack.i.h.bf16 %v18180_v9  ;;  %v13951_v63 = vpop.permute.xlu0 %9991 }
 0x46d   :  { %v18209_v15 = vpack.c.bf16 %v18207_v35, %v18208_v37  ;;  %v9788_v23 = vunpack.i.l.bf16 %v18211_v45  ;;  %v18215_v9 = vld [vmem:[#allocation50_spill] sm:$0xff]  ;;  %v9983_v21 = vunpack.i.l.bf16 %v13907_v47  ;;  %vm18257_vm9 = vcmask 1022976  }
 0x46e   :  { %v2120_v39 = vsel %vm2102_vm13, %v9748_v17, %v18210_v0  ;;  %8589 = vmatprep.subr.bf16.mxu0 %v8588_v11  ;;  %v8590_v37 = vpack.c.bf16 %v1970_v53, %v18215_v9  ;;  %v18216_v0 = vld [vmem:[#allocation35_spill] sm:$0xff]  ;;  %v5389_v31 = vld [vmem:[%s16923_s5] sm:$0xff]  ;;  %10291 = vrot.lane.b32.xlu0 %v18112_v44, %s10325_s19  ;;  %v18251_v44 = vunpack.i.h.bf16 %v13846_v5  ;;  %vm18260_vm2 = vmmov %vm18257_vm9  ;;  %v18261_v7 = vpack.c.bf16 %v13899_v59, %v18220_v18 }
 0x46f   :  { %8503 = vmatpush1.bf16.msra.mxu1 %v18209_v15  ;;  %v18213_v15 = vunpack.i.h.bf16 %v18189_v2  ;;  %v18217_v43 = vunpack.i.l.bf16 %v18216_v0  ;;  %v18224_v9 = vld [vmem:[#allocation143_spill] sm:$0xff]  ;;  %5395 = vperm.xlu1 %8974, %v5389_v31   ;;  %v18264_v50 = vunpack.i.h.bf16 %v18263_v30  ;;  %vm18267_vm4 = vcmask 23552   ;;  %v18278_v18 = vld [vmem:[#allocation42_spill] sm:$0xff] }
 0x470   :  { %8505 = vmatprep.subr.bf16.mxu1 %v8504_v61  ;;  %v18219_v61 = vunpack.i.h.bf16 %v18218_v48  ;;  %v18222_v48 = vunpack.i.h.bf16 %v18205_v56  ;;  %8591 = vmatpush1.bf16.msra.mxu0 %v8590_v37  ;;  %v18231_v37 = vld [vmem:[#allocation75_spill] sm:$0xff]  ;;  %v18233_v56 = vunpack.i.h.bf16 %v18211_v45  ;;  %vm18269_vm0 = vmmov %vm18267_vm4 }
 0x471   :  { %v13923_v35 = vsel %vm50_vm3, %v18214_v36, %v18213_v15  ;;  %v2119_v15 = vsel %vm2102_vm13, %v18221_v8, %v9748_v17  ;;  %v9969_v36 = vunpack.i.h.bf16 %v13793_v33  ;;  %v13953_v17 = vpop.permute.xlu1 %9996  ;;  %v18227_v33 = vunpack.i.h.bf16 %v18206_v54 }
 0x472   :  { %v2110_v11 = vsel %vm2102_vm13, %v18219_v61, %v18217_v43  ;;  %v13946_v43 = vsel %vm2400_vm10, %v9718_v20, %v18222_v48  ;;  %v18225_v61 = vld [vmem:[#allocation27_spill] sm:$0xff]  ;;  %v13971_v54 = vsel %vm18234_vm5, %v9788_v23, %v18233_v56  ;;  %vm18274_vm5 = vmmov %vm18260_vm2 }
 0x473   :  { %v8592_v53 = vpack.c.bf16 %v2120_v39, %v2110_v11  ;;  %18223 = vst [vmem:[#allocation57_spill] sm:$0xff] %v13946_v43  ;;  %v18226_v42 = vpack.c.bf16 %v18224_v9, %v18225_v61  ;;  %v2269_v8 = vsel %vm2251_vm11, %v9753_v51, %v18227_v33  ;;  %v18228_v11 = vunpack.i.h.bf16 %v18106_v55  ;;  %v18229_v9 = vld [vmem:[#allocation38_spill] sm:$0xff]  ;;  %v18235_v55 = vld [vmem:[#allocation48_spill] sm:$0xff]  ;;  %v18238_v33 = vld [vmem:[#allocation55_spill] sm:$0xff] }
 0x474   :  { %v18230_v61 = vunpack.i.l.bf16 %v18229_v9  ;;  %v9973_v39 = vunpack.i.l.bf16 %v13844_v27  ;;  %v18239_v9 = vunpack.i.h.bf16 %v18238_v33 }
 0x475   :  { %8507 = vmatpush1.bf16.msra.mxu1 %v18226_v42  ;;  %v2268_v48 = vsel %vm2251_vm11, %v18228_v11, %v9753_v51  ;;  %8593 = vmatprep.subr.bf16.mxu0 %v8592_v53  ;;  %v18232_v42 = vunpack.i.h.bf16 %v18231_v37  ;;  %v18236_v51 = vld [vmem:[#allocation71_spill] sm:$0xff]  ;;  %v9978_v37 = vunpack.i.l.bf16 %v13846_v5 }
 0x476   :  { %8509 = vmatprep.subr.bf16.mxu1 %v8508_v60  ;;  %v8594_v60 = vpack.c.bf16 %v2119_v15, %v18235_v55  ;;  %v18237_v53 = vunpack.i.h.bf16 %v18236_v51  ;;  %v13989_v0 = vsel %vm18240_vm7, %v18239_v9, %v9788_v23  ;;  %v18241_v15 = vld [vmem:[#allocation60_spill] sm:$0xff]  ;;  %v18242_v55 = vld [vmem:[#allocation58_spill] sm:$0xff]  ;;  %v18246_v23 = vld [vmem:[#allocation37_spill] sm:$0xff] }
 0x477   :  { %v2259_v38 = vsel %vm2251_vm11, %v18232_v42, %v18230_v61  ;;  %v2418_v42 = vsel %vm2400_vm10, %v9968_v4, %v9969_v36  ;;  %v18243_v51 = vpack.c.bf16 %v18241_v15, %v18242_v55  ;;  %v9808_v9 = vunpack.i.l.bf16 %v18246_v23  ;;  %v18247_v61 = vld [vmem:[#allocation40_spill] sm:$0xff]  ;;  %vm18276_vm7 = vmmov %vm18260_vm2 }
 0x478   :  { %v2408_v11 = vsel %vm2400_vm10, %v18237_v53, %v9718_v20  ;;  %v8596_v56 = vpack.c.bf16 %v2269_v8, %v2259_v38  ;;  %8595 = vmatpush1.bf16.msra.mxu0 %v8594_v60  ;;  %v13994_v20 = vpop.permute.xlu0 %10001  ;;  %v13996_v53 = vpop.permute.xlu1 %10006  ;;  %v18245_v38 = vld [vmem:[#allocation20_spill] sm:$0xff]  ;;  %v9813_v40 = vunpack.i.l.bf16 %v18247_v61  ;;  %v18248_v15 = vunpack.i.h.bf16 %v18126_v49  ;;  %v18253_v49 = vld [vmem:[#allocation106_spill] sm:$0xff] }
 0x479   :  { %8511 = vmatpush1.bf16.msra.mxu1 %v18243_v51  ;;  %18244 = vst [vmem:[#allocation64_spill] sm:$0xff] %v13994_v20  ;;  %v8598_v8 = vpack.c.bf16 %v2268_v48, %v18245_v38  ;;  %v17291_v55 = vunpack.i.l.bf16 %v13994_v20  ;;  %v8600_v48 = vpack.c.bf16 %v2418_v42, %v2408_v11  ;;  %v18249_v38 = vunpack.i.h.bf16 %v13844_v27 }
 0x47a   :  { %v2417_v60 = vsel %vm2400_vm10, %v18248_v15, %v9968_v4  ;;  %8513 = vmatprep.subr.bf16.mxu1 %v8512_v12  ;;  %8597 = vmatprep.subr.bf16.mxu0 %v8596_v56  ;;  %v9988_v4 = vunpack.i.l.bf16 %v13909_v62  ;;  %v5390_v56 = vld [vmem:[%s16923_s5 + $0x8] sm:$0xff]  ;;  %v2567_v11 = vsel %vm2549_vm8, %v9978_v37, %v18251_v44  ;;  %v18255_v15 = vld [vmem:[#allocation96_spill] sm:$0xff]  ;;  %v2556_v42 = vsel %vm2549_vm8, %v18264_v50, %v9973_v39  ;;  %v5392_v50 = vld [vmem:[%s16923_s5 + $0x18] sm:$0xff] }
 0x47b   :  { %v2557_v33 = vsel %vm2549_vm8, %v9973_v39, %v18249_v38  ;;  %v14022_v12 = vsel %vm2400_vm10, %v9969_v36, %v17291_v55  ;;  %v18252_v38 = vld [vmem:[#allocation146_spill] sm:$0xff]  ;;  %v5391_v55 = vld [vmem:[%s16923_s5 + $0x10] sm:$0xff]  ;;  %v18256_v20 = vunpack.i.h.bf16 %v18255_v15  ;;  %v8602_v44 = vpack.c.bf16 %v2417_v60, %v18262_v52  ;;  %5400 = vperm.xlu0 %8973, %v5390_v56  }
 0x47c   :  { %18250 = vst [vmem:[#allocation147_spill] sm:$0xff] %v14022_v12  ;;  %v18254_v51 = vpack.c.bf16 %v18252_v38, %v18253_v49  ;;  %8599 = vmatpush1.bf16.msra.mxu0 %v8598_v8  ;;  %v14035_v36 = vpop.permute.xlu0 %10011  ;;  %v14037_v31 = vpop.permute.xlu1 %10016  ;;  %v18258_v8 = vld [vmem:[#allocation28_spill] sm:$0xff]  ;;  %v18265_v15 = vunpack.i.h.bf16 %v18148_v26  ;;  %5405 = vperm.xlu1 %8974, %v5391_v55   ;;  %v18268_v26 = vunpack.i.h.bf16 %v13909_v62  ;;  %v9998_v39 = vunpack.i.l.bf16 %v13953_v17 }
 0x47d   :  { %v14049_v49 = vsel %vm18257_vm9, %v18256_v20, %v9808_v9  ;;  %8601 = vmatprep.subr.bf16.mxu0 %v8600_v48  ;;  %v18273_v56 = vunpack.i.h.bf16 %v18246_v23  ;;  %vm18284_vm9 = vmmov %vm18269_vm0 }
 0x47e   :  { %8515 = vmatpush1.bf16.msra.mxu1 %v18254_v51  ;;  %v18259_v51 = vunpack.i.h.bf16 %v18258_v8  ;;  %v2566_v20 = vsel %vm2549_vm8, %v18265_v15, %v9978_v37  ;;  %v8604_v8 = vpack.c.bf16 %v2567_v11, %v2557_v33  ;;  %v2716_v30 = vsel %vm18269_vm0, %v9988_v4, %v18268_v26  ;;  %v18270_v37 = vld [vmem:[#allocation145_spill] sm:$0xff] }
 0x47f   :  { %8517 = vmatprep.subr.bf16.mxu1 %v18261_v7  ;;  %v9993_v7 = vunpack.i.l.bf16 %v13951_v63  ;;  %v18271_v33 = vld [vmem:[#allocation149_spill] sm:$0xff]  ;;  %v14090_v11 = vsel %vm18274_vm5, %v9808_v9, %v18273_v56  ;;  %v18275_v15 = vunpack.i.h.bf16 %v18247_v61  ;;  %v18282_v56 = vld [vmem:[#allocation76_spill] sm:$0xff]  ;;  %5410 = vperm.xlu0 %8973, %v5392_v50   ;;  %v8606_v59 = vpack.c.bf16 %v2566_v20, %v2556_v42  ;;  %v18293_v20 = vld [vmem:[#allocation91_spill] sm:$0xff] }
 0x480   :  { %v14054_v38 = vsel %vm18260_vm2, %v18259_v51, %v9813_v40  ;;  %v18266_v51 = vunpack.i.h.bf16 %v13907_v47  ;;  %v18272_v60 = vpack.c.bf16 %v18270_v37, %v18271_v33  ;;  %8603 = vmatpush1.bf16.msra.mxu0 %v8602_v44  ;;  %v14083_v48 = vpop.permute.xlu0 %10021  ;;  %v14085_v55 = vpop.permute.xlu1 %10026  ;;  %v18277_v26 = vld [vmem:[#allocation41_spill] sm:$0xff]  ;;  %v9833_v37 = vunpack.i.l.bf16 %v18278_v18  ;;  %v18280_v44 = vld [vmem:[#allocation99_spill] sm:$0xff]  ;;  %vm18286_vm2 = vmmov %vm18269_vm0 }
 0x481   :  { %v18279_v33 = vld [vmem:[#allocation93_spill] sm:$0xff]  ;;  %v17303_v52 = vunpack.i.l.bf16 %v14083_v48  ;;  %8605 = vmatprep.subr.bf16.mxu0 %v8604_v8  ;;  %v18283_v12 = vunpack.i.h.bf16 %v18282_v56  ;;  %v18292_v42 = vld [vmem:[#allocation92_spill] sm:$0xff]  ;;  %v18295_v56 = vunpack.i.h.bf16 %v13953_v17 }
 0x482   :  { %v2706_v43 = vsel %vm18267_vm4, %v9983_v21, %v18266_v51  ;;  %8519 = vmatpush1.bf16.msra.mxu1 %v18272_v60  ;;  %v14095_v51 = vsel %vm18276_vm7, %v9813_v40, %v18275_v15  ;;  %v18281_v60 = vpack.c.bf16 %v18279_v33, %v18280_v44  ;;  %v18285_v40 = vunpack.i.h.bf16 %v18150_v24 }
 0x483   :  { %v2705_v1 = vsel %vm18284_vm9, %v18283_v12, %v9983_v21  ;;  %v8608_v25 = vpack.c.bf16 %v2716_v30, %v2706_v43  ;;  %v18287_v33 = vunpack.i.l.bf16 %v14037_v31  ;;  %v18288_v44 = vunpack.i.h.bf16 %v13844_v27  ;;  %vm18304_vm9 = vmmov %vm18286_vm2 }
 0x484   :  { %8521 = vmatprep.subr.bf16.mxu1 %v18281_v60  ;;  %v2715_v15 = vsel %vm18286_vm2, %v18285_v40, %v9988_v4  ;;  %v18289_v60 = vunpack.i.h.bf16 %v13846_v5  ;;  %v17304_v24 = vunpack.i.l.bf16 %v14085_v55  ;;  %v18290_v4 = vunpack.i.h.bf16 %v13951_v63  ;;  %8607 = vmatpush1.bf16.msra.mxu0 %v8606_v59  ;;  %v14134_v30 = vpop.permute.xlu0 %10031  ;;  %v14136_v5 = vpop.permute.xlu1 %10036 }
 0x485   :  { %v14116_v8 = vsel %vm2549_vm8, %v18288_v44, %v18287_v33  ;;  %vm18291_vm4 = vcmask 15360   ;;  %v17306_v12 = vunpack.i.h.bf16 %v14035_v36  ;;  %v10013_v27 = vunpack.i.l.bf16 %v14035_v36  ;;  %8609 = vmatprep.subr.bf16.mxu0 %v8608_v25 }
 0x486   :  { %v14123_v21 = vsel %vm2549_vm8, %v18289_v60, %v17303_v52  ;;  %v2855_v43 = vsel %vm18291_vm4, %v9993_v7, %v18290_v4  ;;  %v18294_v50 = vpack.c.bf16 %v18292_v42, %v18293_v20  ;;  %vm18296_vm0 = vmmov %vm18291_vm4  ;;  %v9828_v44 = vunpack.i.l.bf16 %v18277_v26  ;;  %v18298_v20 = vld [vmem:[#allocation80_spill] sm:$0xff] }
 0x487   :  { %v2865_v40 = vsel %vm18296_vm0, %v9998_v39, %v18295_v56  ;;  %v18297_v4 = vpack.c.bf16 %v13923_v35, %v13639_v34  ;;  %v17305_v59 = vunpack.i.l.bf16 %v14134_v30  ;;  %v8532_v42 = vpack.c.bf16 %v14095_v51, %v14090_v11  ;;  %vm18300_vm5 = vmmov %vm18296_vm0 }
 0x488   :  { %8523 = vmatpush1.bf16.msra.mxu1 %v18294_v50  ;;  %v18299_v50 = vunpack.i.h.bf16 %v18298_v20  ;;  %v17307_v33 = vunpack.i.h.bf16 %v13996_v53  ;;  %v10008_v52 = vunpack.i.l.bf16 %v13996_v53  ;;  %v8610_v9 = vpack.c.bf16 %v2715_v15, %v2705_v1  ;;  %vm18302_vm7 = vmmov %vm18296_vm0  ;;  %v18306_v1 = vld [vmem:[#allocation79_spill] sm:$0xff] }
 0x489   :  { %8525 = vmatprep.subr.bf16.mxu1 %v18297_v4  ;;  %v18301_v60 = vunpack.i.h.bf16 %v18166_v29  ;;  %v18303_v25 = vunpack.i.h.bf16 %v13907_v47  ;;  %v8612_v51 = vpack.c.bf16 %v2865_v40, %v2855_v43  ;;  %v18307_v15 = vunpack.i.h.bf16 %v18306_v1  ;;  %v18310_v4 = vld [vmem:[#allocation98_spill] sm:$0xff]  ;;  %v18311_v47 = vld [vmem:[#allocation155_spill] sm:$0xff] }
 0x48a   :  { %v2854_v56 = vsel %vm18300_vm5, %v18299_v50, %v9993_v7  ;;  %v18305_v7 = vunpack.i.h.bf16 %v13909_v62  ;;  %vm18308_vm4 = vcmask 1014784   ;;  %v18312_v20 = vpack.c.bf16 %v18310_v4, %v18311_v47  ;;  %8611 = vmatpush1.bf16.msra.mxu0 %v8610_v9  ;;  %v14182_v50 = vpop.permute.xlu0 %10041  ;;  %v18313_v40 = vld [vmem:[#allocation107_spill] sm:$0xff] }
 0x48b   :  { %v2864_v34 = vsel %vm18302_vm7, %v18301_v60, %v9998_v39  ;;  %v14164_v35 = vsel %vm18304_vm9, %v18303_v25, %v17304_v24  ;;  %v14176_v29 = vsel %vm18308_vm4, %v18307_v15, %v9833_v37  ;;  %v18309_v39 = vld [vmem:[#allocation43_spill] sm:$0xff]  ;;  %v14184_v25 = vpop.permute.xlu1 %10046  ;;  %v3014_v62 = vsel %vm2996_vm6, %v10013_v27, %v17306_v12  ;;  %vm18315_vm0 = vmmov %vm18308_vm4  ;;  %v18316_v15 = vld [vmem:[#allocation104_spill] sm:$0xff]  ;;  %8613 = vmatprep.subr.bf16.mxu0 %v8612_v51 }
 0x48c   :  { %v14171_v11 = vsel %vm18286_vm2, %v18305_v7, %v17305_v59  ;;  %v9848_v60 = vunpack.i.l.bf16 %v18309_v39  ;;  %8527 = vmatpush1.bf16.msra.mxu1 %v18312_v20  ;;  %v18314_v7 = vunpack.i.h.bf16 %v18313_v40  ;;  %v9853_v4 = vunpack.i.l.bf16 %v18316_v15  ;;  %vm18319_vm5 = vmmov %vm18315_vm0 }
 0x48d   :  { %v18317_v9 = vpack.c.bf16 %v13971_v54, %v13857_v14  ;;  %v18318_v47 = vunpack.i.h.bf16 %v18278_v18  ;;  %v17310_v59 = vunpack.i.h.bf16 %v18309_v39  ;;  %v8614_v43 = vpack.c.bf16 %v2864_v34, %v2854_v56  ;;  %vm18321_vm7 = vmmov %vm18315_vm0 }
 0x48e   :  { %v3633_v1 = vsel %vm18315_vm0, %v18314_v7, %v9828_v44  ;;  %v3004_v40 = vsel %vm2996_vm6, %v10008_v52, %v17307_v33  ;;  %v18320_v7 = vunpack.i.h.bf16 %v18277_v26  ;;  %v18322_v24 = vunpack.i.h.bf16 %v18174_v16  ;;  %v14224_v16 = vpop.permute.xlu0 %10051 }
 0x48f   :  { %8529 = vmatprep.subr.bf16.mxu1 %v18317_v9  ;;  %v3644_v20 = vsel %vm18319_vm5, %v9833_v37, %v18318_v47  ;;  %v17308_v54 = vunpack.i.l.bf16 %v14184_v25  ;;  %v8616_v51 = vpack.c.bf16 %v3014_v62, %v3004_v40  ;;  %v8538_v37 = vpack.c.bf16 %v14176_v29, %v3633_v1  ;;  %v18323_v9 = vld [vmem:[#allocation122_spill] sm:$0xff]  ;;  %8615 = vmatpush1.bf16.msra.mxu0 %v8614_v43  ;;  %v18327_v29 = vld [vmem:[#allocation45_spill] sm:$0xff] }
 0x490   :  { %v3634_v12 = vsel %vm18321_vm7, %v9828_v44, %v18320_v7  ;;  %v3013_v14 = vsel %vm2996_vm6, %v18322_v24, %v10013_v27  ;;  %v18324_v47 = vunpack.i.h.bf16 %v18323_v9  ;;  %vm18325_vm9 = vcmask 1006592   ;;  %v14226_v24 = vpop.permute.xlu1 %10056  ;;  %v18328_v1 = vld [vmem:[#allocation85_spill] sm:$0xff] }
 0x491   :  { %v17311_v34 = vunpack.i.h.bf16 %v14182_v50  ;;  %v10043_v33 = vunpack.i.l.bf16 %v14182_v50  ;;  %v18326_v44 = vpack.c.bf16 %v13989_v0, %v13732_v10  ;;  %v8536_v27 = vpack.c.bf16 %v3644_v20, %v3634_v12  ;;  %8617 = vmatprep.subr.bf16.mxu0 %v8616_v51  ;;  %vm18331_vm2 = vmmov %vm18325_vm9  ;;  %v18333_v20 = vld [vmem:[#allocation6_spill] sm:$0xff] }
 0x492   :  { %v14217_v56 = vsel %vm18325_vm9, %v18324_v47, %v9848_v60  ;;  %v17312_v62 = vunpack.i.h.bf16 %v18327_v29  ;;  %v18329_v40 = vunpack.i.h.bf16 %v18328_v1  ;;  %v17309_v9 = vunpack.i.l.bf16 %v14224_v16  ;;  %vm18332_vm4 = vmmov %vm18331_vm2 }
 0x493   :  { %8531 = vmatpush1.bf16.msra.mxu1 %v18326_v44  ;;  %v18330_v47 = vunpack.i.h.bf16 %v18316_v15  ;;  %v17313_v0 = vunpack.i.h.bf16 %v14136_v5  ;;  %v10038_v43 = vunpack.i.l.bf16 %v14136_v5  ;;  %v3782_v12 = vsel %vm18332_vm4, %v9848_v60, %v17310_v59  ;;  %vm18335_vm0 = vmmov %vm18331_vm2  ;;  %v18343_v60 = vld [vmem:[#allocation74_spill] sm:$0xff] }
 0x494   :  { %v3003_v7 = vsel %vm2996_vm6, %v18329_v40, %v10008_v52  ;;  %8533 = vmatprep.subr.bf16.mxu1 %v8532_v42  ;;  %v18334_v1 = vunpack.i.h.bf16 %v18333_v20  ;;  %v18336_v42 = vld [vmem:[#allocation44_spill] sm:$0xff]  ;;  %v18337_v51 = vunpack.i.h.bf16 %v13951_v63  ;;  %vm18338_vm5 = vcmask 15360   ;;  %v14265_v63 = vpop.permute.xlu1 %10066 }
 0x495   :  { %v3792_v10 = vsel %vm18331_vm2, %v9853_v4, %v18330_v47  ;;  %v8618_v44 = vpack.c.bf16 %v3013_v14, %v3003_v7  ;;  %v17314_v40 = vunpack.i.h.bf16 %v18336_v42  ;;  %v18340_v14 = vunpack.i.h.bf16 %v13953_v17  ;;  %vm18341_vm7 = vmmov %vm18338_vm5 }
 0x496   :  { %v3791_v52 = vsel %vm18335_vm0, %v18334_v1, %v9853_v4  ;;  %v14250_v47 = vsel %vm18338_vm5, %v18337_v51, %v17308_v54  ;;  %v18344_v4 = vpack.c.bf16 %v14054_v38, %v14049_v49  ;;  %v14263_v1 = vpop.permute.xlu0 %10061  ;;  %v8540_v51 = vpack.c.bf16 %v3792_v10, %v3782_v12  ;;  %v18346_v38 = vld [vmem:[#allocation110_spill] sm:$0xff] }
 0x497   :  { %18339 = vst [vmem:[#allocation116_spill] sm:$0xff] %v14250_v47  ;;  %v14257_v7 = vsel %vm18341_vm7, %v18340_v14, %v17309_v9  ;;  %8619 = vmatpush1.bf16.msra.mxu0 %v8618_v44  ;;  %v3202_v54 = vsel %vm50_vm3, %v10043_v33, %v17311_v34  ;;  %v18345_v14 = vld [vmem:[#allocation90_spill] sm:$0xff]  ;;  %v17315_v59 = vunpack.i.h.bf16 %v14263_v1  ;;  %v10063_v49 = vunpack.i.l.bf16 %v14263_v1  ;;  %v18347_v44 = vld [vmem:[#allocation97_spill] sm:$0xff] }
 0x498   :  { %18342 = vst [vmem:[#allocation61_spill] sm:$0xff] %v14257_v7  ;;  %8535 = vmatpush1.bf16.msra.mxu1 %v18344_v4  ;;  %v18348_v4 = vpack.c.bf16 %v18346_v38, %v18347_v44  ;;  %v18349_v10 = vunpack.i.l.bf16 %v18327_v29  ;;  %vm18350_vm9 = vcmask 998400   ;;  %v10058_v17 = vunpack.i.l.bf16 %v14226_v24 }
 0x499   :  { %8537 = vmatprep.subr.bf16.mxu1 %v8536_v27  ;;  %v3192_v27 = vsel %vm50_vm3, %v10038_v43, %v17313_v0  ;;  %v8542_v9 = vpack.c.bf16 %v3791_v52, %v14217_v56  ;;  %v18351_v20 = vunpack.i.h.bf16 %v18189_v2  ;;  %vm18354_vm2 = vmmov %vm18350_vm9  ;;  %v18355_v2 = vld [vmem:[#allocation94_spill] sm:$0xff]  ;;  %v18356_v52 = vld [vmem:[#allocation100_spill] sm:$0xff]  ;;  %v14309_v0 = vpop.permute.xlu1 %10076  ;;  %vm18358_vm4 = vcmask 1031168  }
 0x49a   :  { %8621 = vmatprep.subr.bf16.mxu0 %v18348_v4  ;;  %v3940_v12 = vsel %vm18350_vm9, %v18349_v10, %v17312_v62  ;;  %v14296_v4 = vld [vmem:[%s16922_s4] sm:$0xff]  ;;  %v8624_v10 = vpack.c.bf16 %v3202_v54, %v3192_v27  ;;  %v18353_v62 = vunpack.i.l.bf16 %v18336_v42  ;;  %v3350_v54 = vsel %vm18358_vm4, %v10063_v49, %v17315_v59  ;;  %vm18368_vm7 = vmmov %vm18358_vm4 }
 0x49b   :  { %v3201_v38 = vsel %vm50_vm3, %v18351_v20, %v10043_v33  ;;  %18352 = vst [vmem:[#allocation68_spill] sm:$0xff] %v14296_v4  ;;  %5847 = vmatmul.mubr.f32.vlgmr.msra.gmra.mrb[16].mxu1 %v14296_v4  ;;  %v18357_v33 = vpack.c.bf16 %v18355_v2, %v18356_v52  ;;  %v14307_v20 = vpop.permute.xlu0 %10071  ;;  %v18359_v27 = vunpack.i.h.bf16 %v18343_v60  ;;  %v18360_v34 = vunpack.i.l.bf16 %v18343_v60  ;;  %vm18370_vm9 = vmmov %vm18358_vm4 }
 0x49c   :  { %v3930_v56 = vsel %vm18354_vm2, %v18353_v62, %v17314_v40  ;;  %8539 = vmatpush1.bf16.msra.mxu1 %v8538_v37  ;;  %vm18361_vm0 = vcmask 990208   ;;  %v18362_v37 = vld [vmem:[#allocation101_spill] sm:$0xff]  ;;  %v18363_v2 = vunpack.i.h.bf16 %v18088_v57  ;;  %v18367_v47 = vunpack.i.h.bf16 %v18211_v45  ;;  %vm18380_vm2 = vmmov %vm18358_vm4 }
 0x49d   :  { %8623 = vmatpush1.bf16.msra.mxu0 %v18357_v33  ;;  %v8544_v44 = vpack.c.bf16 %v3940_v12, %v3930_v56  ;;  %v4078_v62 = vsel %vm18361_vm0, %v18360_v34, %v18359_v27  ;;  %8541 = vmatprep.subr.bf16.mxu1 %v8540_v51  ;;  %v17317_v33 = vunpack.i.l.bf16 %v14307_v20  ;;  %v18364_v12 = vunpack.i.h.bf16 %v18345_v14  ;;  %vm18366_vm5 = vmmov %vm18361_vm0  ;;  %v14339_v51 = vld [vmem:[%s16922_s4 + $0x28] sm:$0xff] }
 0x49e   :  { %v3191_v52 = vsel %vm50_vm3, %v18363_v2, %v10038_v43  ;;  %8625 = vmatprep.subr.bf16.mxu0 %v8624_v10  ;;  %v18365_v56 = vunpack.i.l.bf16 %v18345_v14  ;;  %v3349_v34 = vsel %vm18368_vm7, %v18367_v47, %v10063_v49  ;;  %v10078_v27 = vunpack.i.l.bf16 %v14309_v0  ;;  %18371 = vst [vmem:[#allocation105_spill] sm:$0xff] %v14339_v51  ;;  %5852 = vmatprep.mubr.f32.mxu1 %v14339_v51 }
 0x49f   :  { %v8626_v40 = vpack.c.bf16 %v3201_v38, %v3191_v52  ;;  %v18369_v57 = vunpack.i.h.bf16 %v14226_v24  ;;  %v18372_v10 = vunpack.i.l.bf16 %v14265_v63  ;;  %v18373_v45 = vunpack.i.h.bf16 %v13996_v53  ;;  %v18378_v53 = vld [vmem:[#allocation52_spill] sm:$0xff] }
 0x4a0   :  { %v4088_v59 = vsel %vm18366_vm5, %v18365_v56, %v18364_v12  ;;  %v18375_v49 = vunpack.i.h.bf16 %v14035_v36  ;;  %v17318_v2 = vunpack.i.h.bf16 %v14309_v0  ;;  %v14360_v12 = vld [vmem:[%s16922_s4 + $0x20] sm:$0xff]  ;;  %8543 = vmatpush1.bf16.msra.mxu1 %v8542_v9  ;;  %v14366_v36 = vpop.permute.xlu1 %10086  ;;  %v18381_v9 = vunpack.i.h.bf16 %v18362_v37 }
 0x4a1   :  { %v3340_v43 = vsel %vm18370_vm9, %v10058_v17, %v18369_v57  ;;  %v14347_v47 = vsel %vm2996_vm6, %v18373_v45, %v18372_v10  ;;  %18377 = vst [vmem:[#allocation150_spill] sm:$0xff] %v14360_v12  ;;  %5853 = vmatmul.mubr.f32.gmra.mrb[18].mxu1 %v14360_v12  ;;  %8627 = vmatpush1.bf16.msra.mxu0 %v8626_v40  ;;  %v14364_v57 = vpop.permute.xlu0 %10081  ;;  %v18382_v40 = vunpack.i.l.bf16 %v18362_v37  ;;  %vm18383_vm4 = vcmask 982016  }
 0x4a2   :  { %18374 = vst [vmem:[#allocation65_spill] sm:$0xff] %v14347_v47  ;;  %v14354_v38 = vsel %vm2996_vm6, %v18375_v49, %v17317_v33  ;;  %v8628_v52 = vpack.c.bf16 %v3350_v54, %v3340_v43  ;;  %v8548_v10 = vpack.c.bf16 %v4088_v59, %v4078_v62  ;;  %v18379_v54 = vunpack.i.h.bf16 %v18121_v19  ;;  %8545 = vmatprep.subr.bf16.mxu1 %v8544_v44 }
 0x4a3   :  { %18376 = vst [vmem:[#allocation72_spill] sm:$0xff] %v14354_v38  ;;  %v17319_v49 = vunpack.i.h.bf16 %v14364_v57  ;;  %v10083_v33 = vunpack.i.l.bf16 %v14364_v57  ;;  %v4236_v56 = vsel %vm18383_vm4, %v18382_v40, %v18381_v9  ;;  %v18384_v62 = vunpack.i.h.bf16 %v18246_v23 }
 0x4a4   :  { %v3339_v43 = vsel %vm18380_vm2, %v18379_v54, %v10058_v17  ;;  %8629 = vmatprep.subr.bf16.mxu0 %v8628_v52  ;;  %vm18385_vm0 = vcmask 1022976   ;;  %v10088_v17 = vunpack.i.l.bf16 %v14366_v36  ;;  %v14388_v54 = vld [vmem:[%s16922_s4 + $0x48] sm:$0xff]  ;;  %v18387_v52 = vunpack.i.h.bf16 %v18247_v61  ;;  %v14412_v40 = vpop.permute.xlu1 %10096  ;;  %vm18397_vm2 = vmmov %vm18383_vm4 }
 0x4a5   :  { %v3487_v19 = vsel %vm18385_vm0, %v18384_v62, %v10078_v27  ;;  %v8630_v44 = vpack.c.bf16 %v3349_v34, %v3339_v43  ;;  %18386 = vst [vmem:[#allocation121_spill] sm:$0xff] %v14388_v54  ;;  %5858 = vmatprep.mubr.f32.mxu1 %v14388_v54  ;;  %vm18388_vm5 = vmmov %vm18385_vm0  ;;  %v14404_v43 = vld [vmem:[%s16922_s4 + $0x40] sm:$0xff]  ;;  %v18392_v61 = vld [vmem:[#allocation115_spill] sm:$0xff]  ;;  %v14410_v45 = vpop.permute.xlu0 %10091  ;;  %v18395_v47 = vunpack.i.h.bf16 %v18378_v53  ;;  %v18396_v38 = vunpack.i.l.bf16 %v18378_v53 }
 0x4a6   :  { %v3497_v9 = vsel %vm18388_vm5, %v18387_v52, %v10083_v33  ;;  %vm18389_vm7 = vmmov %vm18385_vm0  ;;  %18391 = vst [vmem:[#allocation108_spill] sm:$0xff] %v14404_v43  ;;  %5859 = vmatmul.mubr.f32.gmra.mrb[20].mxu1 %v14404_v43  ;;  %v18393_v62 = vld [vmem:[#allocation47_spill] sm:$0xff]  ;;  %v10093_v59 = vunpack.i.l.bf16 %v14410_v45  ;;  %vm18400_vm4 = vcmask 1014784  }
 0x4a7   :  { %v3488_v23 = vsel %vm18389_vm7, %v10078_v27, %v17318_v2  ;;  %vm18390_vm9 = vmmov %vm18385_vm0  ;;  %v18394_v52 = vpack.c.bf16 %v18392_v61, %v18393_v62  ;;  %8631 = vmatpush1.bf16.msra.mxu0 %v8630_v44  ;;  %v8634_v2 = vpack.c.bf16 %v3497_v9, %v3487_v19  ;;  %v4226_v61 = vsel %vm18397_vm2, %v18396_v38, %v18395_v47  ;;  %v14425_v44 = vld [vmem:[%s16922_s4 + $0x68] sm:$0xff] }
 0x4a8   :  { %v3498_v34 = vsel %vm18390_vm9, %v10083_v33, %v17319_v49  ;;  %v17322_v49 = vunpack.i.h.bf16 %v14410_v45  ;;  %18398 = vst [vmem:[#allocation29_spill] sm:$0xff] %v14425_v44  ;;  %5864 = vmatprep.mubr.f32.mxu1 %v14425_v44  ;;  %v18402_v62 = vunpack.i.l.bf16 %v13613_v41  ;;  %vm18403_vm0 = vcmask 973824   ;;  %vm18405_vm5 = vmmov %vm18400_vm4 }
 0x4a9   :  { %8547 = vmatpush1.bf16.msra.mxu1 %v18394_v52  ;;  %v8632_v27 = vpack.c.bf16 %v3498_v34, %v3488_v23  ;;  %v8552_v23 = vpack.c.bf16 %v4236_v56, %v4226_v61  ;;  %v18401_v34 = vunpack.i.h.bf16 %v13613_v41  ;;  %v18404_v38 = vunpack.i.h.bf16 %v18278_v18  ;;  %vm18407_vm7 = vmmov %vm18400_vm4  ;;  %v18410_v18 = vld [vmem:[#allocation49_spill] sm:$0xff]  ;;  %v18411_v61 = vld [vmem:[#allocation51_spill] sm:$0xff] }
 0x4aa   :  { %8549 = vmatprep.subr.bf16.mxu1 %v8548_v10  ;;  %v18399_v10 = vunpack.i.h.bf16 %v18277_v26  ;;  %v18406_v19 = vunpack.i.h.bf16 %v14366_v36  ;;  %vm18408_vm9 = vmmov %vm18400_vm4  ;;  %v18414_v33 = vunpack.i.l.bf16 %v13551_v3 }
 0x4ab   :  { %8633 = vmatprep.subr.bf16.mxu0 %v8632_v27  ;;  %v4384_v47 = vsel %vm18403_vm0, %v18402_v62, %v18401_v34  ;;  %v3645_v52 = vsel %vm18405_vm5, %v18404_v38, %v10093_v59  ;;  %v3646_v56 = vsel %vm18408_vm9, %v10093_v59, %v17322_v49  ;;  %v14450_v27 = vld [vmem:[%s16922_s4 + $0x60] sm:$0xff]  ;;  %v14456_v34 = vpop.permute.xlu0 %10101  ;;  %v14458_v62 = vpop.permute.xlu1 %10106  ;;  %v17326_v59 = vunpack.i.h.bf16 %v13615_v58  ;;  %vm18415_vm2 = vmmov %vm18403_vm0 }
 0x4ac   :  { %v3635_v9 = vsel %vm18400_vm4, %v18399_v10, %v10088_v17  ;;  %v3636_v26 = vsel %vm18407_vm7, %v10088_v17, %v18406_v19  ;;  %18409 = vst [vmem:[#allocation148_spill] sm:$0xff] %v14450_v27  ;;  %5865 = vmatmul.mubr.f32.gmra.mrb[22].mxu1 %v14450_v27  ;;  %v18412_v10 = vpack.c.bf16 %v18410_v18, %v18411_v61  ;;  %v17324_v38 = vunpack.i.l.bf16 %v14456_v34 }
 0x4ad   :  { %8635 = vmatpush1.bf16.msra.mxu0 %v8634_v2  ;;  %v8636_v17 = vpack.c.bf16 %v3646_v56, %v3636_v26  ;;  %v8638_v19 = vpack.c.bf16 %v3645_v52, %v3635_v9  ;;  %v18413_v49 = vunpack.i.h.bf16 %v13551_v3  ;;  %v14470_v2 = vld [vmem:[%s16922_s4 + $0x18] sm:$0xff]  ;;  %v18417_v26 = vunpack.i.l.bf16 %v14412_v40 }
 0x4ae   :  { %8551 = vmatpush1.bf16.msra.mxu1 %v18412_v10  ;;  %18416 = vst [vmem:[#allocation69_spill] sm:$0xff] %v14470_v2  ;;  %8040 = vmatprep.mubr.msk.f32.mxu1 %vm5413_vm1, %v14470_v2  ;;  %v18418_v56 = vunpack.i.h.bf16 %v14136_v5  ;;  %vm18424_vm4 = vcmask 965632   ;;  %v18425_v10 = vld [vmem:[#allocation53_spill] sm:$0xff]  ;;  %vm18431_vm5 = vcmask 1006592   ;;  %vm18434_vm7 = vcmask 957440  }
 0x4af   :  { %8553 = vmatprep.subr.bf16.mxu1 %v8552_v23  ;;  %v4374_v7 = vsel %vm18415_vm2, %v18414_v33, %v18413_v49  ;;  %v10108_v23 = vunpack.i.l.bf16 %v14458_v62  ;;  %8637 = vmatprep.subr.bf16.mxu0 %v8636_v17  ;;  %v18420_v33 = vunpack.i.h.bf16 %v14182_v50  ;;  %v18426_v17 = vld [vmem:[#allocation112_spill] sm:$0xff]  ;;  %v14502_v50 = vpop.permute.xlu1 %10116  ;;  %vm18429_vm0 = vmmov %vm18424_vm4  ;;  %v18435_v61 = vunpack.i.h.bf16 %v18316_v15 }
 0x4b0   :  { %v8556_v52 = vpack.c.bf16 %v4384_v47, %v4374_v7  ;;  %v14481_v49 = vsel %vm50_vm3, %v18418_v56, %v18417_v26  ;;  %6025 = vmatmul.mubr.f32.vlgmr.msra.gmra.mrb[20].mxu0 %v14296_v4  ;;  %v18422_v7 = vunpack.i.h.bf16 %v13675_v6  ;;  %v18423_v47 = vunpack.i.l.bf16 %v13675_v6  ;;  %v14500_v56 = vpop.permute.xlu0 %10111  ;;  %vm18436_vm9 = vmmov %vm18431_vm5 }
 0x4b1   :  { %18419 = vst [vmem:[#allocation77_spill] sm:$0xff] %v14481_v49  ;;  %v14488_v18 = vsel %vm50_vm3, %v18420_v33, %v17324_v38  ;;  %v18427_v26 = vpack.c.bf16 %v18425_v10, %v18426_v17  ;;  %8639 = vmatpush1.bf16.msra.mxu0 %v8638_v19  ;;  %v10113_v9 = vunpack.i.l.bf16 %v14500_v56  ;;  %6030 = vmatprep.mubr.f32.mxu0 %v14339_v51  ;;  %v18430_v10 = vunpack.i.h.bf16 %v18309_v39  ;;  %vm18438_vm2 = vmmov %vm18431_vm5 }
 0x4b2   :  { %18421 = vst [vmem:[#allocation136_spill] sm:$0xff] %v14488_v18  ;;  %v4532_v5 = vsel %vm18424_vm4, %v18423_v47, %v18422_v7  ;;  %v18428_v7 = vunpack.i.l.bf16 %v13615_v58  ;;  %v18433_v33 = vunpack.i.l.bf16 %v13738_v28  ;;  %v18439_v39 = vunpack.i.h.bf16 %v14500_v56  ;;  %vm18440_vm4 = vmmov %vm18438_vm2 }
 0x4b3   :  { %8555 = vmatpush1.bf16.msra.mxu1 %v18427_v26  ;;  %v3783_v17 = vsel %vm18431_vm5, %v18430_v10, %v10108_v23  ;;  %v3793_v4 = vsel %vm18436_vm9, %v18435_v61, %v10113_v9  ;;  %v14540_v15 = vpop.permute.xlu1 %10126  ;;  %vm18449_vm5 = vcmask 1031168   ;;  %vm18456_vm9 = vcmask 949248  }
 0x4b4   :  { %8557 = vmatprep.subr.bf16.mxu1 %v8556_v52  ;;  %v4522_v19 = vsel %vm18429_vm0, %v18428_v7, %v17326_v59  ;;  %v18432_v52 = vunpack.i.h.bf16 %v13738_v28  ;;  %v18437_v59 = vunpack.i.h.bf16 %v14458_v62  ;;  %6031 = vmatmul.mubr.f32.gmra.mrb[22].mxu0 %v14360_v12  ;;  %v8642_v10 = vpack.c.bf16 %v3793_v4, %v3783_v17  ;;  %vm18445_vm0 = vmmov %vm18434_vm7 }
 0x4b5   :  { %v8560_v26 = vpack.c.bf16 %v4532_v5, %v4522_v19  ;;  %v3794_v5 = vsel %vm18440_vm4, %v10113_v9, %v18439_v39  ;;  %v18441_v19 = vpack.c.bf16 %v13666_v22, %v13659_v46  ;;  %6036 = vmatprep.mubr.f32.mxu0 %v14388_v54  ;;  %v18443_v9 = vunpack.i.h.bf16 %v13677_v32  ;;  %v18446_v22 = vld [vmem:[#allocation9_spill] sm:$0xff] }
 0x4b6   :  { %v4680_v38 = vsel %vm18434_vm7, %v18433_v33, %v18432_v52  ;;  %v3784_v47 = vsel %vm18438_vm2, %v10108_v23, %v18437_v59  ;;  %v14538_v33 = vpop.permute.xlu0 %10121  ;;  %v18442_v52 = vld [vmem:[#allocation124_spill] sm:$0xff]  ;;  %v18444_v39 = vunpack.i.l.bf16 %v13677_v32  ;;  %v10128_v7 = vunpack.i.l.bf16 %v14540_v15  ;;  %vm18452_vm7 = vmmov %vm18449_vm5 }
 0x4b7   :  { %8559 = vmatpush1.bf16.msra.mxu1 %v18441_v19  ;;  %v8640_v61 = vpack.c.bf16 %v3794_v5, %v3784_v47  ;;  %v17328_v23 = vunpack.i.l.bf16 %v14538_v33  ;;  %v9759_v19 = vunpack.i.h.bf16 %v18446_v22  ;;  %v18447_v4 = vunpack.i.l.bf16 %v14502_v50  ;;  %v14577_v54 = vpop.permute.xlu1 %10136  ;;  %vm18463_vm2 = vmmov %vm18456_vm9 }
 0x4b8   :  { %8561 = vmatprep.subr.bf16.mxu1 %v8560_v26  ;;  %v4670_v46 = vsel %vm18445_vm0, %v18444_v39, %v18443_v9  ;;  %v18448_v17 = vunpack.i.h.bf16 %v14226_v24  ;;  %v18451_v5 = vunpack.i.h.bf16 %v14263_v1  ;;  %v18457_v24 = vld [vmem:[#allocation19_spill] sm:$0xff]  ;;  %6037 = vmatmul.mubr.f32.gmra.mrb[24].mxu0 %v14404_v43  ;;  %v18465_v43 = vunpack.i.h.bf16 %v18336_v42 }
 0x4b9   :  { %8641 = vmatprep.subr.bf16.mxu0 %v8640_v61  ;;  %v8564_v47 = vpack.c.bf16 %v4680_v38, %v4670_v46  ;;  %v18454_v61 = vunpack.i.h.bf16 %v13791_v13  ;;  %v18455_v38 = vunpack.i.l.bf16 %v13791_v13  ;;  %v18458_v46 = vld [vmem:[#allocation25_spill] sm:$0xff]  ;;  %6042 = vmatprep.mubr.f32.mxu0 %v14425_v44  ;;  %vm18466_vm4 = vcmask 998400  }
 0x4ba   :  { %v14557_v26 = vsel %vm18449_vm5, %v18448_v17, %v18447_v4  ;;  %v14564_v59 = vsel %vm18452_vm7, %v18451_v5, %v17328_v23  ;;  %8643 = vmatpush1.bf16.msra.mxu0 %v8642_v10  ;;  %v18459_v4 = vpack.c.bf16 %v18457_v24, %v18458_v46  ;;  %v14575_v17 = vpop.permute.xlu0 %10131  ;;  %v18460_v10 = vld [vmem:[#allocation11_spill] sm:$0xff]  ;;  %v18462_v24 = vunpack.i.l.bf16 %v18442_v52  ;;  %vm18469_vm0 = vmmov %vm18466_vm4 }
 0x4bb   :  { %18450 = vst [vmem:[#allocation135_spill] sm:$0xff] %v14557_v26  ;;  %18453 = vst [vmem:[#allocation117_spill] sm:$0xff] %v14564_v59  ;;  %v4828_v39 = vsel %vm18456_vm9, %v18455_v38, %v18454_v61  ;;  %v9643_v5 = vunpack.i.l.bf16 %v18460_v10  ;;  %v10133_v61 = vunpack.i.l.bf16 %v14575_v17  ;;  %v18461_v38 = vunpack.i.h.bf16 %v18442_v52 }
 0x4bc   :  { %8563 = vmatpush1.bf16.msra.mxu1 %v18459_v4  ;;  %v18464_v4 = vld [vmem:[#allocation128_spill] sm:$0xff]  ;;  %v3931_v1 = vsel %vm18466_vm4, %v18465_v43, %v10128_v7  ;;  %v18468_v12 = vunpack.i.h.bf16 %v18327_v29  ;;  %vm18471_vm5 = vmmov %vm18469_vm0  ;;  %v18472_v44 = vunpack.i.h.bf16 %v14575_v17  ;;  %v18474_v43 = vld [vmem:[#allocation59_spill] sm:$0xff]  ;;  %6043 = vmatmul.mubr.f32.gmra.mrb[26].mxu0 %v14450_v27  ;;  %vm18483_vm9 = vcmask 1022976  }
 0x4bd   :  { %8565 = vmatprep.subr.bf16.mxu1 %v8564_v47  ;;  %v4818_v46 = vsel %vm18463_vm2, %v18462_v24, %v18461_v38  ;;  %v9764_v9 = vunpack.i.h.bf16 %v18464_v4  ;;  %v18467_v47 = vunpack.i.l.bf16 %v18446_v22  ;;  %v18470_v38 = vunpack.i.h.bf16 %v14540_v15  ;;  %vm18473_vm7 = vmmov %vm18469_vm0  ;;  %8044 = vmatprep.mubr.msk.f32.mxu0 %vm5413_vm1, %v14470_v2  ;;  %v18513_v27 = vld [vmem:[#allocation133_spill] sm:$0xff] }
 0x4be   :  { %v8568_v10 = vpack.c.bf16 %v4828_v39, %v4818_v46  ;;  %v3941_v51 = vsel %vm18469_vm0, %v18468_v12, %v10133_v61  ;;  %v3942_v42 = vsel %vm18473_vm7, %v10133_v61, %v18472_v44  ;;  %v18475_v39 = vld [vmem:[#allocation21_spill] sm:$0xff]  ;;  %v14611_v22 = vpop.permute.xlu0 %10141  ;;  %v18479_v44 = vld [vmem:[#allocation158_spill] sm:$0xff]  ;;  %vm18498_vm2 = vcmask 990208  }
 0x4bf   :  { %v1377_v23 = vsel %vm1357_vm12, %v18467_v47, %v9759_v19  ;;  %v3932_v24 = vsel %vm18471_vm5, %v10128_v7, %v18470_v38  ;;  %v18476_v46 = vpack.c.bf16 %v18474_v43, %v18475_v39  ;;  %v14613_v19 = vpop.permute.xlu1 %10146  ;;  %v8646_v12 = vpack.c.bf16 %v3941_v51, %v3931_v1  ;;  %v18477_v7 = vld [vmem:[#allocation87_spill] sm:$0xff]  ;;  %v18480_v43 = vld [vmem:[#allocation132_spill] sm:$0xff]  ;;  %vm18501_vm4 = vmmov %vm18498_vm2 }
 0x4c0   :  { %v8644_v29 = vpack.c.bf16 %v3942_v42, %v3932_v24  ;;  %v17334_v47 = vunpack.i.l.bf16 %v14611_v22  ;;  %v18478_v38 = vunpack.i.h.bf16 %v18477_v7  ;;  %v9648_v61 = vunpack.i.l.bf16 %v18479_v44  ;;  %vm18505_vm0 = vmmov %vm18498_vm2 }
 0x4c1   :  { %8567 = vmatpush1.bf16.msra.mxu1 %v18476_v46  ;;  %v9769_v39 = vunpack.i.h.bf16 %v18480_v43  ;;  %v10148_v46 = vunpack.i.l.bf16 %v14613_v19  ;;  %v18481_v1 = vunpack.i.l.bf16 %v14577_v54  ;;  %vm18516_vm5 = vcmask 1014784  }
 0x4c2   :  { %8569 = vmatprep.subr.bf16.mxu1 %v8568_v10  ;;  %v1367_v26 = vsel %vm1357_vm12, %v18478_v38, %v9643_v5  ;;  %8645 = vmatprep.subr.bf16.mxu0 %v8644_v29  ;;  %v18482_v10 = vunpack.i.h.bf16 %v14309_v0  ;;  %v18485_v5 = vunpack.i.h.bf16 %v14364_v57  ;;  %vm18486_vm12 = vmmov %vm18483_vm9  ;;  %v18488_v29 = vunpack.i.l.bf16 %v18464_v4  ;;  %v18490_v38 = vld [vmem:[#allocation66_spill] sm:$0xff]  ;;  %v14646_v44 = vpop.permute.xlu0 %10151 }
 0x4c3   :  { %v8672_v51 = vpack.c.bf16 %v1377_v23, %v1367_v26  ;;  %8647 = vmatpush1.bf16.msra.mxu0 %v8646_v12  ;;  %v18489_v26 = vld [vmem:[#allocation62_spill] sm:$0xff]  ;;  %v10153_v4 = vunpack.i.l.bf16 %v14646_v44  ;;  %v18499_v57 = vunpack.i.l.bf16 %v18480_v43  ;;  %v18504_v43 = vunpack.i.h.bf16 %v14646_v44 }
 0x4c4   :  { %v14630_v24 = vsel %vm18483_vm9, %v18482_v10, %v18481_v1  ;;  %v14637_v42 = vsel %vm18486_vm12, %v18485_v5, %v17334_v47  ;;  %v1526_v23 = vsel %vm1506_vm14, %v18488_v29, %v9764_v9  ;;  %v18491_v0 = vpack.c.bf16 %v18489_v26, %v18490_v38  ;;  %v14648_v1 = vpop.permute.xlu1 %10156  ;;  %v18493_v10 = vld [vmem:[#allocation12_spill] sm:$0xff]  ;;  %v18494_v47 = vld [vmem:[#allocation82_spill] sm:$0xff] }
 0x4c5   :  { %18484 = vst [vmem:[#allocation125_spill] sm:$0xff] %v14630_v24  ;;  %18487 = vst [vmem:[#allocation118_spill] sm:$0xff] %v14637_v42  ;;  %v9653_v5 = vunpack.i.l.bf16 %v18493_v10  ;;  %v18495_v9 = vunpack.i.h.bf16 %v18494_v47  ;;  %v18496_v26 = vld [vmem:[#allocation18_spill] sm:$0xff]  ;;  %v1675_v10 = vsel %vm1655_vm15, %v18499_v57, %v9769_v39  ;;  %v14672_v47 = vld [vmem:[%s16922_s4 + $0x10] sm:$0xff]  ;;  %v4090_v39 = vsel %vm18505_vm0, %v10153_v4, %v18504_v43 }
 0x4c6   :  { %8571 = vmatpush1.bf16.msra.mxu1 %v18491_v0  ;;  %18492 = vst [vmem:[#allocation152_spill] sm:$0xff] %v14648_v1  ;;  %v9774_v38 = vunpack.i.h.bf16 %v18496_v26  ;;  %v18497_v0 = vunpack.i.h.bf16 %v18343_v60  ;;  %v18502_v60 = vunpack.i.h.bf16 %v14613_v19  ;;  %v9779_v24 = vunpack.i.h.bf16 %v18513_v27 }
 0x4c7   :  { %8673 = vmatprep.subr.bf16.mxu1 %v8672_v51  ;;  %v1516_v29 = vsel %vm1506_vm14, %v18495_v9, %v9648_v61  ;;  %v18500_v51 = vunpack.i.h.bf16 %v18345_v14  ;;  %vm18503_vm14 = vmmov %vm18498_vm2  ;;  %v18506_v14 = vld [vmem:[#allocation8_spill] sm:$0xff]  ;;  %v14684_v9 = vpop.permute.xlu0 %10161  ;;  %v18514_v49 = vunpack.i.l.bf16 %v14648_v1  ;;  %vm18522_vm7 = vcmask 72704  }
 0x4c8   :  { %v4079_v7 = vsel %vm18498_vm2, %v18497_v0, %v10148_v46  ;;  %v8676_v2 = vpack.c.bf16 %v1526_v23, %v1516_v29  ;;  %v4080_v61 = vsel %vm18503_vm14, %v10148_v46, %v18502_v60  ;;  %v18507_v23 = vld [vmem:[#allocation7_spill] sm:$0xff]  ;;  %18509 = vst [vmem:[#allocation151_spill] sm:$0xff] %v14684_v9  ;;  %v14686_v29 = vpop.permute.xlu1 %10166  ;;  %v14691_v0 = vld [vmem:[%s16922_s4 + $0x38] sm:$0xff]  ;;  %vm18529_vm9 = vmmov %vm18522_vm7  ;;  %vm18532_vm12 = vcmask 982016  }
 0x4c9   :  { %v4089_v12 = vsel %vm18501_vm4, %v18500_v51, %v10153_v4  ;;  %5936 = vmatmul.mubr.f32.vlgmr.msra.gmra.mrb[16].mxu1 %v14672_v47  ;;  %v18508_v57 = vpack.c.bf16 %v18506_v14, %v18507_v23  ;;  %v8648_v46 = vpack.c.bf16 %v4090_v39, %v4080_v61  ;;  %v17341_v4 = vunpack.i.l.bf16 %v14684_v9  ;;  %v18510_v60 = vld [vmem:[#allocation127_spill] sm:$0xff]  ;;  %v18512_v23 = vld [vmem:[#allocation14_spill] sm:$0xff]  ;;  %v18523_v39 = vld [vmem:[#allocation113_spill] sm:$0xff] }
 0x4ca   :  { %8041 = vmatprep.mubr.msk.f32.mxu1 %vm5413_vm1, %v14691_v0  ;;  %v8650_v51 = vpack.c.bf16 %v4089_v12, %v4079_v7  ;;  %v18511_v43 = vunpack.i.h.bf16 %v18510_v60  ;;  %v10168_v42 = vunpack.i.l.bf16 %v14686_v29  ;;  %v18515_v61 = vunpack.i.h.bf16 %v14366_v36  ;;  %vm18536_vm4 = vmmov %vm18532_vm12 }
 0x4cb   :  { %8675 = vmatpush1.bf16.msra.mxu1 %v18508_v57  ;;  %v9658_v57 = vunpack.i.l.bf16 %v18512_v23  ;;  %8649 = vmatprep.subr.bf16.mxu0 %v8648_v46  ;;  %v18518_v7 = vunpack.i.h.bf16 %v14410_v45  ;;  %v18521_v36 = vunpack.i.l.bf16 %v18496_v26  ;;  %v18524_v46 = vld [vmem:[#allocation15_spill] sm:$0xff]  ;;  %v14729_v60 = vpop.permute.xlu0 %10171  ;;  %v18533_v26 = vunpack.i.l.bf16 %v18513_v27  ;;  %vm18539_vm14 = vmmov %vm18536_vm4 }
 0x4cc   :  { %8677 = vmatprep.subr.bf16.mxu1 %v8676_v2  ;;  %v1665_v14 = vsel %vm1655_vm15, %v18511_v43, %v9653_v5  ;;  %v14707_v2 = vsel %vm18516_vm5, %v18515_v61, %v18514_v49  ;;  %vm18519_vm15 = vmmov %vm18516_vm5  ;;  %8651 = vmatpush1.bf16.msra.mxu0 %v8650_v51  ;;  %v18525_v45 = vpack.c.bf16 %v18523_v39, %v18524_v46  ;;  %v14731_v43 = vpop.permute.xlu1 %10176  ;;  %v10173_v61 = vunpack.i.l.bf16 %v14729_v60  ;;  %v18530_v46 = vld [vmem:[#allocation103_spill] sm:$0xff] }
 0x4cd   :  { %v8680_v59 = vpack.c.bf16 %v1675_v10, %v1665_v14  ;;  %18517 = vst [vmem:[#allocation157_spill] sm:$0xff] %v14707_v2  ;;  %v14714_v5 = vsel %vm18519_vm15, %v18518_v7, %v17341_v4  ;;  %v14720_v10 = vld [vmem:[%s16922_s4 + $0x30] sm:$0xff]  ;;  %v1824_v49 = vsel %vm18522_vm7, %v18521_v36, %v9774_v38  ;;  %v14736_v14 = vld [vmem:[%s16922_s4 + $0x58] sm:$0xff]  ;;  %v18526_v38 = vld [vmem:[#allocation23_spill] sm:$0xff]  ;;  %v18531_v4 = vunpack.i.h.bf16 %v18378_v53 }
 0x4ce   :  { %18520 = vst [vmem:[#allocation119_spill] sm:$0xff] %v14714_v5  ;;  %5942 = vmatmul.mubr.f32.gmra.mrb[18].mxu1 %v14720_v10  ;;  %v9663_v51 = vunpack.i.l.bf16 %v18526_v38  ;;  %v18527_v7 = vld [vmem:[#allocation24_spill] sm:$0xff]  ;;  %vm18534_vm2 = vcmask 64512   ;;  %v18538_v53 = vunpack.i.h.bf16 %v14686_v29  ;;  %v18540_v27 = vunpack.i.h.bf16 %v14729_v60  ;;  %vm18541_vm0 = vmmov %vm18536_vm4  ;;  %v18549_v2 = vld [vmem:[#allocation114_spill] sm:$0xff] }
 0x4cf   :  { %8679 = vmatpush1.bf16.msra.mxu1 %v18525_v45  ;;  %8042 = vmatprep.mubr.msk.f32.mxu1 %vm5413_vm1, %v14736_v14  ;;  %v18528_v36 = vunpack.i.h.bf16 %v18527_v7  ;;  %v9784_v45 = vunpack.i.h.bf16 %v18530_v46  ;;  %v4227_v12 = vsel %vm18532_vm12, %v18531_v4, %v10168_v42  ;;  %v1973_v38 = vsel %vm18534_vm2, %v18533_v26, %v9779_v24  ;;  %v14774_v7 = vpop.permute.xlu0 %10181  ;;  %vm18547_vm5 = vmmov %vm18534_vm2 }
 0x4d0   :  { %8681 = vmatprep.subr.bf16.mxu1 %v8680_v59  ;;  %v18535_v59 = vunpack.i.h.bf16 %v18362_v37  ;;  %v4228_v4 = vsel %vm18539_vm14, %v10168_v42, %v18538_v53  ;;  %v4238_v24 = vsel %vm18541_vm0, %v10173_v61, %v18540_v27  ;;  %v18542_v37 = vld [vmem:[#allocation17_spill] sm:$0xff]  ;;  %v18545_v53 = vld [vmem:[#allocation120_spill] sm:$0xff]  ;;  %v9794_v5 = vunpack.i.h.bf16 %v18549_v2 }
 0x4d1   :  { %v1814_v39 = vsel %vm18529_vm9, %v18528_v36, %v9658_v57  ;;  %v14762_v57 = vld [vmem:[%s16922_s4 + $0x50] sm:$0xff]  ;;  %v14776_v36 = vpop.permute.xlu1 %10186  ;;  %v8652_v42 = vpack.c.bf16 %v4238_v24, %v4228_v4  ;;  %v18546_v27 = vunpack.i.h.bf16 %v18545_v53  ;;  %v18550_v9 = vunpack.i.l.bf16 %v14731_v43 }
 0x4d2   :  { %v8684_v1 = vpack.c.bf16 %v1824_v49, %v1814_v39  ;;  %v4237_v23 = vsel %vm18536_vm4, %v18535_v59, %v10173_v61  ;;  %18537 = vst [vmem:[#allocation109_spill] sm:$0xff] %v14762_v57  ;;  %5948 = vmatmul.mubr.f32.gmra.mrb[20].mxu1 %v14762_v57  ;;  %v18543_v49 = vld [vmem:[#allocation129_spill] sm:$0xff]  ;;  %v17351_v61 = vunpack.i.l.bf16 %v14774_v7  ;;  %v10188_v57 = vunpack.i.l.bf16 %v14776_v36  ;;  %v18559_v24 = vld [vmem:[#allocation32_spill] sm:$0xff] }
 0x4d3   :  { %v18544_v26 = vpack.c.bf16 %v18542_v37, %v18543_v49  ;;  %v14781_v39 = vld [vmem:[%s16922_s4 + $0x78] sm:$0xff]  ;;  %v8654_v59 = vpack.c.bf16 %v4237_v23, %v4227_v12  ;;  %v1963_v37 = vsel %vm18547_vm5, %v18546_v27, %v9663_v51  ;;  %v18548_v49 = vld [vmem:[#allocation31_spill] sm:$0xff]  ;;  %8653 = vmatprep.subr.bf16.mxu0 %v8652_v42  ;;  %v18551_v4 = vunpack.i.h.bf16 %v14458_v62  ;;  %v18560_v42 = vld [vmem:[#allocation102_spill] sm:$0xff]  ;;  %v14819_v53 = vpop.permute.xlu0 %10191 }
 0x4d4   :  { %8043 = vmatprep.mubr.msk.f32.mxu1 %vm5413_vm1, %v14781_v39  ;;  %v8688_v18 = vpack.c.bf16 %v1973_v38, %v1963_v37  ;;  %vm18552_vm15 = vcmask 1006592   ;;  %v18554_v12 = vunpack.i.h.bf16 %v14500_v56  ;;  %v14810_v38 = vld [vmem:[%s16922_s4 + $0x70] sm:$0xff]  ;;  %v18558_v62 = vunpack.i.l.bf16 %v18530_v46  ;;  %v10313_v37 = vld [vmem:[%s16922_s4 + $0x8] sm:$0xff] }
 0x4d5   :  { %8683 = vmatpush1.bf16.msra.mxu1 %v18544_v26  ;;  %v9668_v26 = vunpack.i.l.bf16 %v18548_v49  ;;  %vm18555_vm7 = vmmov %vm18552_vm15  ;;  %18557 = vst [vmem:[#allocation138_spill] sm:$0xff] %v14810_v38  ;;  %8655 = vmatpush1.bf16.msra.mxu0 %v8654_v59  ;;  %v18561_v56 = vpack.c.bf16 %v18559_v24, %v18560_v42  ;;  %v14821_v27 = vpop.permute.xlu1 %10196  ;;  %v18562_v49 = vld [vmem:[#allocation86_spill] sm:$0xff]  ;;  %v18565_v42 = vld [vmem:[#allocation64_spill] sm:$0xff]  ;;  %vm18567_vm9 = vcmask 973824   ;;  %v18568_v59 = vunpack.i.l.bf16 %v18549_v2 }
 0x4d6   :  { %8685 = vmatprep.subr.bf16.mxu1 %v8684_v1  ;;  %v14797_v1 = vsel %vm18552_vm15, %v18551_v4, %v18550_v9  ;;  %v14804_v51 = vsel %vm18555_vm7, %v18554_v12, %v17351_v61  ;;  %5954 = vmatmul.mubr.f32.gmra.mrb[22].mxu1 %v14810_v38  ;;  %v2122_v9 = vsel %vm2102_vm13, %v18558_v62, %v9784_v45  ;;  %v9673_v46 = vunpack.i.l.bf16 %v18562_v49  ;;  %v18563_v12 = vld [vmem:[#allocation35_spill] sm:$0xff]  ;;  %vm18570_vm12 = vmmov %vm18567_vm9 }
 0x4d7   :  { %18553 = vst [vmem:[#allocation126_spill] sm:$0xff] %v14797_v1  ;;  %18556 = vst [vmem:[#allocation139_spill] sm:$0xff] %v14804_v51  ;;  %6202 = vmatprep.mubr.f32.mxu1 %v10313_v37  ;;  %v10193_v4 = vunpack.i.l.bf16 %v14819_v53  ;;  %v18564_v62 = vunpack.i.h.bf16 %v18563_v12  ;;  %v18566_v61 = vunpack.i.h.bf16 %v13551_v3  ;;  %v2271_v49 = vsel %vm2251_vm11, %v18568_v59, %v9794_v5  ;;  %v14854_v2 = vpop.permute.xlu0 %10201  ;;  %v18578_v1 = vld [vmem:[#allocation38_spill] sm:$0xff] }
 0x4d8   :  { %v18571_v12 = vunpack.i.h.bf16 %v14776_v36  ;;  %vm18574_vm2 = vmmov %vm18567_vm9  ;;  %v18579_v51 = vunpack.i.h.bf16 %v18578_v1  ;;  %vm18583_vm4 = vcmask 998400   ;;  %v18584_v1 = vunpack.i.h.bf16 %v14575_v17 }
 0x4d9   :  { %8687 = vmatpush1.bf16.msra.mxu1 %v18561_v56  ;;  %v2112_v24 = vsel %vm2102_vm13, %v18564_v62, %v9668_v26  ;;  %v10004_v56 = vunpack.i.h.bf16 %v18565_v42  ;;  %v4375_v37 = vsel %vm18567_vm9, %v18566_v61, %v10188_v57  ;;  %vm18572_vm13 = vmmov %vm18567_vm9  ;;  %v18573_v62 = vunpack.i.h.bf16 %v14819_v53  ;;  %v18575_v61 = vld [vmem:[#allocation33_spill] sm:$0xff]  ;;  %v14856_v5 = vpop.permute.xlu1 %10206 }
 0x4da   :  { %8689 = vmatprep.subr.bf16.mxu1 %v8688_v18  ;;  %v8692_v23 = vpack.c.bf16 %v2122_v9, %v2112_v24  ;;  %v18569_v18 = vunpack.i.h.bf16 %v13613_v41  ;;  %v4376_v26 = vsel %vm18572_vm13, %v10188_v57, %v18571_v12  ;;  %v18576_v9 = vld [vmem:[#allocation22_spill] sm:$0xff]  ;;  %v2261_v57 = vsel %vm2251_vm11, %v18579_v51, %v9673_v46  ;;  %vm18585_vm11 = vmmov %vm18583_vm4 }
 0x4db   :  { %v4386_v3 = vsel %vm18574_vm2, %v10193_v4, %v18573_v62  ;;  %v18577_v24 = vpack.c.bf16 %v18575_v61, %v18576_v9  ;;  %v18580_v12 = vld [vmem:[#allocation34_spill] sm:$0xff]  ;;  %v10208_v62 = vunpack.i.l.bf16 %v14856_v5  ;;  %v8696_v61 = vpack.c.bf16 %v2271_v49, %v2261_v57  ;;  %v18587_v49 = vld [vmem:[#allocation88_spill] sm:$0xff] }
 0x4dc   :  { %v4385_v45 = vsel %vm18570_vm12, %v18569_v18, %v10193_v4  ;;  %v8656_v41 = vpack.c.bf16 %v4386_v3, %v4376_v26  ;;  %v17356_v18 = vunpack.i.l.bf16 %v14854_v2  ;;  %v9678_v38 = vunpack.i.l.bf16 %v18580_v12  ;;  %v18588_v3 = vld [vmem:[#allocation36_spill] sm:$0xff]  ;;  %v18590_v12 = vld [vmem:[#allocation130_spill] sm:$0xff] }
 0x4dd   :  { %8691 = vmatpush1.bf16.msra.mxu1 %v18577_v24  ;;  %v8658_v59 = vpack.c.bf16 %v4385_v45, %v4375_v37  ;;  %v10024_v4 = vunpack.i.h.bf16 %v14083_v48  ;;  %v18581_v9 = vunpack.i.l.bf16 %v14821_v27  ;;  %v18582_v26 = vunpack.i.h.bf16 %v14540_v15  ;;  %v14886_v24 = vpop.permute.xlu0 %10211 }
 0x4de   :  { %8693 = vmatprep.subr.bf16.mxu1 %v8692_v23  ;;  %8657 = vmatprep.subr.bf16.mxu0 %v8656_v41  ;;  %v14877_v51 = vsel %vm18585_vm11, %v18584_v1, %v17356_v18  ;;  %v17357_v46 = vunpack.i.h.bf16 %v14856_v5  ;;  %v18586_v45 = vunpack.i.l.bf16 %v18565_v42  ;;  %v18589_v15 = vpack.c.bf16 %v18587_v49, %v18588_v3  ;;  %v14888_v41 = vpop.permute.xlu1 %10216 }
 0x4df   :  { %v14870_v23 = vsel %vm18583_vm4, %v18582_v26, %v18581_v9  ;;  %8659 = vmatpush1.bf16.msra.mxu0 %v8658_v59  ;;  %v10019_v57 = vunpack.i.h.bf16 %v14037_v31  ;;  %v17358_v59 = vunpack.i.h.bf16 %v14886_v24  ;;  %v10213_v42 = vunpack.i.l.bf16 %v14886_v24 }
 0x4e0   :  { %v2420_v37 = vsel %vm2400_vm10, %v18586_v45, %v10004_v56  ;;  %v18591_v56 = vunpack.i.h.bf16 %v18590_v12  ;;  %v10034_v26 = vunpack.i.h.bf16 %v14134_v30  ;;  %v18592_v1 = vunpack.i.h.bf16 %v13615_v58  ;;  %v18599_v12 = vld [vmem:[#allocation84_spill] sm:$0xff] }
 0x4e1   :  { %8695 = vmatpush1.bf16.msra.mxu1 %v18589_v15  ;;  %vm18593_vm14 = vcmask 965632   ;;  %v18594_v3 = vunpack.i.l.bf16 %v14083_v48  ;;  %v10218_v18 = vunpack.i.l.bf16 %v14888_v41  ;;  %v14918_v48 = vpop.permute.xlu0 %10221  ;;  %vm18604_vm15 = vcmask 990208  }
 0x4e2   :  { %8697 = vmatprep.subr.bf16.mxu1 %v8696_v61  ;;  %v2410_v9 = vsel %vm2400_vm10, %v18591_v56, %v9678_v38  ;;  %v4523_v45 = vsel %vm18593_vm14, %v18592_v1, %v10208_v62  ;;  %v18595_v61 = vunpack.i.h.bf16 %v13675_v6  ;;  %vm18596_vm0 = vmmov %vm18593_vm14  ;;  %v10029_v1 = vunpack.i.h.bf16 %v14085_v55 }
 0x4e3   :  { %v8700_v49 = vpack.c.bf16 %v2420_v37, %v2410_v9  ;;  %v2569_v15 = vsel %vm2549_vm8, %v18594_v3, %v10024_v4  ;;  %vm18597_vm10 = vmmov %vm18596_vm0  ;;  %v18600_v37 = vld [vmem:[#allocation83_spill] sm:$0xff]  ;;  %v14920_v4 = vpop.permute.xlu1 %10226  ;;  %v10223_v3 = vunpack.i.l.bf16 %v14918_v48  ;;  %vm18615_vm12 = vcmask 957440  }
 0x4e4   :  { %v4533_v17 = vsel %vm18596_vm0, %v18595_v61, %v10213_v42  ;;  %v4524_v38 = vsel %vm18597_vm10, %v10208_v62, %v17357_v46  ;;  %vm18598_vm5 = vmmov %vm18596_vm0  ;;  %v18601_v56 = vpack.c.bf16 %v18599_v12, %v18600_v37  ;;  %v18602_v62 = vunpack.i.l.bf16 %v14037_v31 }
 0x4e5   :  { %v4534_v58 = vsel %vm18598_vm5, %v10213_v42, %v17358_v59  ;;  %v8662_v9 = vpack.c.bf16 %v4533_v17, %v4523_v45  ;;  %v10054_v42 = vunpack.i.h.bf16 %v14224_v16  ;;  %v10228_v12 = vunpack.i.l.bf16 %v14920_v4  ;;  %vm18606_vm7 = vmmov %vm18604_vm15 }
 0x4e6   :  { %8699 = vmatpush1.bf16.msra.mxu1 %v18601_v56  ;;  %v8660_v6 = vpack.c.bf16 %v4534_v58, %v4524_v38  ;;  %v2559_v61 = vsel %vm2549_vm8, %v18602_v62, %v10019_v57  ;;  %v18603_v38 = vunpack.i.h.bf16 %v14613_v19  ;;  %v18605_v45 = vunpack.i.h.bf16 %v14646_v44  ;;  %v18609_v58 = vld [vmem:[#allocation147_spill] sm:$0xff]  ;;  %v18610_v56 = vld [vmem:[#allocation57_spill] sm:$0xff]  ;;  %vm18619_vm2 = vmmov %vm18615_vm12 }
 0x4e7   :  { %8701 = vmatprep.subr.bf16.mxu1 %v8700_v49  ;;  %v8704_v37 = vpack.c.bf16 %v2569_v15, %v2559_v61  ;;  %v10229_v57 = vunpack.i.h.bf16 %v14920_v4  ;;  %v18607_v49 = vunpack.i.l.bf16 %v14134_v30  ;;  %vm18608_vm8 = vcmask 23552   ;;  %v14952_v62 = vpop.permute.xlu1 %10236  ;;  %vm18620_vm4 = vmmov %vm18619_vm2 }
 0x4e8   :  { %8661 = vmatprep.subr.bf16.mxu0 %v8660_v6  ;;  %v14934_v17 = vsel %vm18604_vm15, %v18603_v38, %v10218_v18  ;;  %v14941_v31 = vsel %vm18606_vm7, %v18605_v45, %v10223_v3  ;;  %v18611_v19 = vpack.c.bf16 %v18609_v58, %v18610_v56  ;;  %v14950_v6 = vpop.permute.xlu0 %10231  ;;  %v10049_v61 = vunpack.i.h.bf16 %v14184_v25  ;;  %vm18613_vm9 = vmmov %vm18608_vm8 }
 0x4e9   :  { %8663 = vmatpush1.bf16.msra.mxu0 %v8662_v9  ;;  %v2718_v15 = vsel %vm18608_vm8, %v18607_v49, %v10034_v26  ;;  %v10234_v9 = vunpack.i.h.bf16 %v14950_v6  ;;  %v10233_v30 = vunpack.i.l.bf16 %v14950_v6  ;;  %v18612_v26 = vunpack.i.l.bf16 %v14085_v55  ;;  %vm18621_vm11 = vmmov %vm18619_vm2 }
 0x4ea   :  { %8703 = vmatpush1.bf16.msra.mxu1 %v18611_v19  ;;  %v10074_v45 = vunpack.i.h.bf16 %v14307_v20  ;;  %v18614_v49 = vunpack.i.h.bf16 %v13677_v32  ;;  %v18616_v19 = vunpack.i.l.bf16 %v14224_v16  ;;  %vm18617_vm13 = vcmask 15360  }
 0x4eb   :  { %8705 = vmatprep.subr.bf16.mxu1 %v8704_v37  ;;  %v2708_v38 = vsel %vm18613_vm9, %v18612_v26, %v10029_v1  ;;  %v18618_v37 = vunpack.i.h.bf16 %v13738_v28  ;;  %v10238_v44 = vunpack.i.l.bf16 %v14952_v62  ;;  %v4672_v55 = vsel %vm18620_vm4, %v10228_v12, %v10229_v57  ;;  %vm18624_vm14 = vmmov %vm18617_vm13 }
 0x4ec   :  { %v4671_v58 = vsel %vm18615_vm12, %v18614_v49, %v10228_v12  ;;  %v8708_v56 = vpack.c.bf16 %v2718_v15, %v2708_v38  ;;  %v2867_v46 = vsel %vm18617_vm13, %v18616_v19, %v10054_v42  ;;  %v4682_v32 = vsel %vm18621_vm11, %v10233_v30, %v10234_v9  ;;  %v14982_v16 = vpop.permute.xlu0 %10241  ;;  %v14986_v38 = vpop.permute.xlu1 %10246 }
 0x4ed   :  { %v4681_v59 = vsel %vm18619_vm2, %v18618_v37, %v10233_v30  ;;  %v18622_v1 = vpack.c.bf16 %v14123_v21, %v14116_v8  ;;  %v8664_v42 = vpack.c.bf16 %v4682_v32, %v4672_v55  ;;  %v10069_v15 = vunpack.i.h.bf16 %v14265_v63 }
 0x4ee   :  { %v8666_v28 = vpack.c.bf16 %v4681_v59, %v4671_v58  ;;  %v10243_v26 = vunpack.i.l.bf16 %v14982_v16  ;;  %v18623_v12 = vunpack.i.l.bf16 %v14184_v25  ;;  %v10248_v30 = vunpack.i.l.bf16 %v14986_v38 }
 0x4ef   :  { %8707 = vmatpush1.bf16.msra.mxu1 %v18622_v1  ;;  %8665 = vmatprep.subr.bf16.mxu0 %v8664_v42  ;;  %v18625_v21 = vunpack.i.h.bf16 %v14686_v29  ;;  %vm18626_vm0 = vcmask 982016   ;;  %v18627_v58 = vunpack.i.h.bf16 %v14729_v60  ;;  %v10249_v25 = vunpack.i.h.bf16 %v14986_v38 }
 0x4f0   :  { %8709 = vmatprep.subr.bf16.mxu1 %v8708_v56  ;;  %v2857_v49 = vsel %vm18624_vm14, %v18623_v12, %v10049_v61  ;;  %vm18628_vm10 = vmmov %vm18626_vm0  ;;  %8667 = vmatpush1.bf16.msra.mxu0 %v8666_v28  ;;  %v18629_v61 = vunpack.i.l.bf16 %v14307_v20  ;;  %v18630_v29 = vpack.c.bf16 %v14171_v11, %v14164_v35  ;;  %v15013_v19 = vpop.permute.xlu0 %10251  ;;  %v15019_v32 = vpop.permute.xlu1 %10256  ;;  %v18631_v20 = vunpack.i.l.bf16 %v14265_v63 }
 0x4f1   :  { %v8712_v8 = vpack.c.bf16 %v2867_v46, %v2857_v49  ;;  %v14997_v59 = vsel %vm18626_vm0, %v18625_v21, %v10238_v44  ;;  %v15004_v56 = vsel %vm18628_vm10, %v18627_v58, %v10243_v26  ;;  %v10254_v60 = vunpack.i.h.bf16 %v15013_v19 }
 0x4f2   :  { %v3016_v46 = vsel %vm2996_vm6, %v18629_v61, %v10074_v45  ;;  %v8754_v37 = vpack.c.bf16 %v15004_v56, %v14997_v59  ;;  %v10253_v55 = vunpack.i.l.bf16 %v15013_v19  ;;  %v3006_v45 = vsel %vm2996_vm6, %v18631_v20, %v10069_v15  ;;  %v3066_v20 = vld [vmem:[#allocation3 + $0x50] sm:$0xff] }
 0x4f3   :  { %8711 = vmatpush1.bf16.msra.mxu1 %v18630_v29  ;;  %v18632_v1 = vunpack.i.h.bf16 %v18442_v52  ;;  %vm18633_vm5 = vcmask 949248   ;;  %v8716_v11 = vpack.c.bf16 %v3016_v46, %v3006_v45  ;;  %v18634_v42 = vunpack.i.h.bf16 %v13791_v13  ;;  %v18638_v52 = vld [vmem:[#allocation61_spill] sm:$0xff]  ;;  %v3076_v46 = vld [vmem:[#allocation3 + $0xb0] sm:$0xff] }
 0x4f4   :  { %8713 = vmatprep.subr.bf16.mxu1 %v8712_v8  ;;  %vm18635_vm15 = vmmov %vm18633_vm5  ;;  %v10258_v12 = vunpack.i.l.bf16 %v15019_v32  ;;  %v10104_v15 = vunpack.i.h.bf16 %v14456_v34  ;;  %v18639_v8 = vld [vmem:[#allocation116_spill] sm:$0xff]  ;;  %v15041_v58 = vpop.permute.xlu0 %10261  ;;  %vm18642_vm6 = vcmask 973824   ;;  %vm18651_vm12 = vcmask 1031168  }
 0x4f5   :  { %v4819_v35 = vsel %vm18633_vm5, %v18632_v1, %v10248_v30  ;;  %v4829_v28 = vsel %vm18635_vm15, %v18634_v42, %v10253_v55  ;;  %vm18636_vm7 = vmmov %vm18633_vm5  ;;  %v18640_v21 = vpack.c.bf16 %v18638_v52, %v18639_v8  ;;  %v10263_v29 = vunpack.i.l.bf16 %v15041_v58  ;;  %v3075_v42 = vld [vmem:[#allocation3 + $0xa8] sm:$0xff] }
 0x4f6   :  { %v4820_v49 = vsel %vm18636_vm7, %v10248_v30, %v10249_v25  ;;  %vm18637_vm8 = vmmov %vm18633_vm5  ;;  %v8670_v61 = vpack.c.bf16 %v4829_v28, %v4819_v35  ;;  %v10099_v30 = vunpack.i.h.bf16 %v14412_v40  ;;  %v18643_v1 = vunpack.i.h.bf16 %v14819_v53  ;;  %v3065_v53 = vld [vmem:[#allocation3 + $0x48] sm:$0xff] }
 0x4f7   :  { %v4830_v63 = vsel %vm18637_vm8, %v10253_v55, %v10254_v60  ;;  %8715 = vmatpush1.bf16.msra.mxu1 %v18640_v21  ;;  %v18641_v55 = vunpack.i.h.bf16 %v14776_v36  ;;  %vm18644_vm9 = vmmov %vm18642_vm6  ;;  %v10124_v28 = vunpack.i.h.bf16 %v14538_v33  ;;  %v18648_v36 = vunpack.i.l.bf16 %v14456_v34 }
 0x4f8   :  { %v8668_v13 = vpack.c.bf16 %v4830_v63, %v4820_v49  ;;  %8717 = vmatprep.subr.bf16.mxu1 %v8716_v11  ;;  %v15057_v35 = vsel %vm18644_vm9, %v18643_v1, %v10263_v29  ;;  %v8720_v11 = vpack.c.bf16 %v3076_v46, %v3066_v20  ;;  %v18645_v49 = vld [vmem:[#allocation72_spill] sm:$0xff]  ;;  %v18646_v63 = vld [vmem:[#allocation65_spill] sm:$0xff]  ;;  %v18649_v46 = vunpack.i.l.bf16 %v14412_v40  ;;  %vm18653_vm13 = vmmov %vm18651_vm12 }
 0x4f9   :  { %v15050_v45 = vsel %vm18642_vm6, %v18641_v55, %v10258_v12  ;;  %v18647_v52 = vpack.c.bf16 %v18645_v49, %v18646_v63  ;;  %v3204_v8 = vsel %vm50_vm3, %v18648_v36, %v10104_v15  ;;  %v10144_v34 = vunpack.i.h.bf16 %v14611_v22  ;;  %v18654_v49 = vld [vmem:[#allocation151_spill] sm:$0xff]  ;;  %v18656_v36 = vld [vmem:[#allocation77_spill] sm:$0xff] }
 0x4fa   :  { %8669 = vmatprep.subr.bf16.mxu0 %v8668_v13  ;;  %v8758_v21 = vpack.c.bf16 %v15057_v35, %v15050_v45  ;;  %v10119_v13 = vunpack.i.h.bf16 %v14502_v50  ;;  %v3194_v20 = vsel %vm50_vm3, %v18649_v46, %v10099_v30  ;;  %v18650_v15 = vunpack.i.l.bf16 %v14538_v33 }
 0x4fb   :  { %8671 = vmatpush1.bf16.msra.mxu0 %v8670_v61  ;;  %8719 = vmatpush1.bf16.msra.mxu1 %v18647_v52  ;;  %v8722_v61 = vpack.c.bf16 %v3075_v42, %v3065_v53  ;;  %v8724_v55 = vpack.c.bf16 %v3204_v8, %v3194_v20  ;;  %v18652_v40 = vunpack.i.l.bf16 %v14502_v50  ;;  %v10164_v63 = vunpack.i.h.bf16 %v18654_v49  ;;  %v18655_v52 = vld [vmem:[#allocation136_spill] sm:$0xff]  ;;  %v18661_v50 = vld [vmem:[#allocation109_spill] sm:$0xff] }
 0x4fc   :  { %8721 = vmatprep.subr.bf16.mxu1 %v8720_v11  ;;  %v3352_v1 = vsel %vm18651_vm12, %v18650_v15, %v10124_v28  ;;  %v10139_v11 = vunpack.i.h.bf16 %v14577_v54  ;;  %v18657_v33 = vpack.c.bf16 %v18655_v52, %v18656_v36  ;;  %v18658_v28 = vunpack.i.l.bf16 %v14611_v22  ;;  %v18660_v53 = vld [vmem:[#allocation152_spill] sm:$0xff]  ;;  %v18664_v15 = vld [vmem:[#allocation117_spill] sm:$0xff] }
 0x4fd   :  { %v3342_v30 = vsel %vm18653_vm13, %v18652_v40, %v10119_v13  ;;  %vm18659_vm2 = vcmask 1022976   ;;  %v18662_v13 = vunpack.i.l.bf16 %v14577_v54  ;;  %vm18668_vm11 = vcmask 1014784   ;;  %v18669_v54 = vld [vmem:[#allocation138_spill] sm:$0xff] }
 0x4fe   :  { %6114 = vmatmul.mubr.f32.vlgmr.msra.gmra.mrb[20].mxu0 %v14672_v47  ;;  %v8728_v42 = vpack.c.bf16 %v3352_v1, %v3342_v30  ;;  %v3500_v8 = vsel %vm18659_vm2, %v18658_v28, %v10144_v34  ;;  %vm18663_vm4 = vmmov %vm18659_vm2  ;;  %v18665_v1 = vld [vmem:[#allocation135_spill] sm:$0xff]  ;;  %v18667_v34 = vunpack.i.l.bf16 %v18654_v49  ;;  %v10179_v30 = vunpack.i.h.bf16 %v14731_v43  ;;  %v18673_v28 = vld [vmem:[#allocation125_spill] sm:$0xff] }
 0x4ff   :  { %8045 = vmatprep.mubr.msk.f32.mxu0 %vm5413_vm1, %v14691_v0  ;;  %8723 = vmatpush1.bf16.msra.mxu1 %v8722_v61  ;;  %v10159_v61 = vunpack.i.h.bf16 %v18660_v53  ;;  %v3490_v46 = vsel %vm18663_vm4, %v18662_v13, %v10139_v11  ;;  %v18666_v22 = vpack.c.bf16 %v18664_v15, %v18665_v1  ;;  %v18670_v11 = vunpack.i.l.bf16 %v18660_v53  ;;  %vm18671_vm14 = vmmov %vm18668_vm11  ;;  %v18680_v1 = vld [vmem:[#allocation119_spill] sm:$0xff] }
 0x500   :  { %8725 = vmatprep.subr.bf16.mxu1 %v8724_v55  ;;  %v8732_v20 = vpack.c.bf16 %v3500_v8, %v3490_v46  ;;  %v10184_v55 = vunpack.i.h.bf16 %v14774_v7  ;;  %v3648_v40 = vsel %vm18668_vm11, %v18667_v34, %v10164_v63  ;;  %v10204_v36 = vunpack.i.h.bf16 %v14854_v2 }
 0x501   :  { %v18675_v49 = vunpack.i.l.bf16 %v14774_v7  ;;  %vm18676_vm0 = vcmask 1006592   ;;  %v10199_v13 = vunpack.i.h.bf16 %v14821_v27  ;;  %v18677_v46 = vunpack.i.l.bf16 %v14731_v43 }
 0x502   :  { %6120 = vmatmul.mubr.f32.gmra.mrb[22].mxu0 %v14720_v10  ;;  %vm18678_vm10 = vmmov %vm18676_vm0  ;;  %v10224_v15 = vunpack.i.h.bf16 %v14918_v48  ;;  %v18683_v7 = vunpack.i.l.bf16 %v14854_v2  ;;  %vm18684_vm5 = vcmask 998400   ;;  %v10219_v43 = vunpack.i.h.bf16 %v14888_v41 }
 0x503   :  { %8046 = vmatprep.mubr.msk.f32.mxu0 %vm5413_vm1, %v14736_v14  ;;  %8727 = vmatpush1.bf16.msra.mxu1 %v18657_v33  ;;  %v18672_v33 = vld [vmem:[#allocation118_spill] sm:$0xff]  ;;  %v3796_v63 = vsel %vm18676_vm0, %v18675_v49, %v10184_v55  ;;  %v3786_v53 = vsel %vm18678_vm10, %v18677_v46, %v10179_v30  ;;  %v18686_v30 = vunpack.i.l.bf16 %v14821_v27  ;;  %vm18687_vm15 = vmmov %vm18684_vm5  ;;  %vm18692_vm7 = vcmask 990208   ;;  %v10267_v46 = vpop.permute.xlu1 %10266 }
 0x504   :  { %8729 = vmatprep.subr.bf16.mxu1 %v8728_v42  ;;  %v3638_v42 = vsel %vm18671_vm14, %v18670_v11, %v10159_v61  ;;  %v18674_v8 = vpack.c.bf16 %v18672_v33, %v18673_v28  ;;  %v8740_v61 = vpack.c.bf16 %v3796_v63, %v3786_v53  ;;  %v3944_v55 = vsel %vm18684_vm5, %v18683_v7, %v10204_v36  ;;  %v18689_v28 = vld [vmem:[#allocation139_spill] sm:$0xff]  ;;  %v18693_v36 = vld [vmem:[#allocation121_spill] sm:$0xff]  ;;  %v10272_v63 = vpop.permute.xlu0 %10271  ;;  %vm18694_vm8 = vmmov %vm18692_vm7 }
 0x505   :  { %v8736_v52 = vpack.c.bf16 %v3648_v40, %v3638_v42  ;;  %v18685_v40 = vld [vmem:[#allocation105_spill] sm:$0xff]  ;;  %v3934_v11 = vsel %vm18687_vm15, %v18686_v30, %v10199_v13  ;;  %v10244_v33 = vunpack.i.h.bf16 %v14982_v16  ;;  %v4092_v2 = vsel %vm18692_vm7, %v10223_v3, %v10224_v15 }
 0x506   :  { %6126 = vmatmul.mubr.f32.gmra.mrb[24].mxu0 %v18661_v50  ;;  %v8744_v42 = vpack.c.bf16 %v3944_v55, %v3934_v11  ;;  %v10239_v27 = vunpack.i.h.bf16 %v14952_v62  ;;  %v4082_v13 = vsel %vm18694_vm8, %v10218_v18, %v10219_v43  ;;  %v18696_v48 = vpack.c.bf16 %v14877_v51, %v14870_v23  ;;  %v18698_v15 = vld [vmem:[#allocation29_spill] sm:$0xff] }
 0x507   :  { %8047 = vmatprep.mubr.msk.f32.mxu0 %vm5413_vm1, %v14781_v39  ;;  %8731 = vmatpush1.bf16.msra.mxu1 %v18666_v22  ;;  %v18681_v22 = vld [vmem:[#allocation157_spill] sm:$0xff]  ;;  %v8748_v53 = vpack.c.bf16 %v4092_v2, %v4082_v13  ;;  %vm18697_vm6 = vcmask 982016   ;;  %v10259_v41 = vunpack.i.h.bf16 %v15019_v32  ;;  %v10274_v7 = vunpack.i.h.bf16 %v10272_v63  ;;  %v10277_v62 = vpop.permute.xlu1 %10276 }
 0x508   :  { %8733 = vmatprep.subr.bf16.mxu1 %v8732_v20  ;;  %v18679_v20 = vld [vmem:[#allocation68_spill] sm:$0xff]  ;;  %v18682_v34 = vpack.c.bf16 %v18680_v1, %v18681_v22  ;;  %v4240_v3 = vsel %vm18697_vm6, %v10243_v26, %v10244_v33  ;;  %vm18699_vm9 = vmmov %vm18697_vm6  ;;  %v10282_v1 = vpop.permute.xlu0 %10281  ;;  %v10273_v23 = vunpack.i.l.bf16 %v10272_v63  ;;  %v18701_v51 = vpack.c.bf16 %v14941_v31, %v14934_v17  ;;  %v18703_v26 = vld [vmem:[#allocation69_spill] sm:$0xff] }
 0x509   :  { %v4230_v18 = vsel %vm18699_vm9, %v10238_v44, %v10239_v27  ;;  %vm18702_vm12 = vcmask 973824   ;;  %v10269_v44 = vunpack.i.h.bf16 %v10267_v46  ;;  %v10268_v55 = vunpack.i.l.bf16 %v10267_v46 }
 0x50a   :  { %6132 = vmatmul.mubr.f32.gmra.mrb[26].mxu0 %v18669_v54  ;;  %v8752_v22 = vpack.c.bf16 %v4240_v3, %v4230_v18  ;;  %vm18704_vm13 = vmmov %vm18702_vm12  ;;  %v10284_v30 = vunpack.i.h.bf16 %v10282_v1  ;;  %v10283_v11 = vunpack.i.l.bf16 %v10282_v1  ;;  %vm18705_vm2 = vcmask 965632  }
 0x50b   :  { %8735 = vmatpush1.bf16.msra.mxu1 %v18674_v8  ;;  %v18690_v8 = vld [vmem:[#allocation126_spill] sm:$0xff]  ;;  %v4536_v17 = vsel %vm18705_vm2, %v10273_v23, %v10274_v7  ;;  %vm18706_vm4 = vmmov %vm18705_vm2  ;;  %vm18709_vm14 = vcmask 957440   ;;  %v18710_v56 = vunpack.i.h.bf16 %v14856_v5  ;;  %vm18714_vm15 = vcmask 949248  }
 0x50c   :  { %8737 = vmatprep.subr.bf16.mxu1 %v8736_v52  ;;  %v18688_v52 = vld [vmem:[#allocation150_spill] sm:$0xff]  ;;  %v18691_v49 = vpack.c.bf16 %v18689_v28, %v18690_v8  ;;  %v10292_v31 = vpop.permute.xlu0 %10291  ;;  %vm18708_vm11 = vmmov %vm18705_vm2  ;;  %v4684_v59 = vsel %vm18709_vm14, %v10283_v11, %v10284_v30 }
 0x50d   :  { %v10294_v28 = vunpack.i.h.bf16 %v10292_v31  ;;  %v10293_v8 = vunpack.i.l.bf16 %v10292_v31  ;;  %vm18711_vm0 = vmmov %vm18705_vm2 }
 0x50e   :  { %6203 = vmatmul.mubr.f32.vlgmr.msra.gmra.mrb[24].mxu1 %v18679_v20  ;;  %v18695_v20 = vld [vmem:[#allocation108_spill] sm:$0xff]  ;;  %vm18712_vm10 = vmmov %vm18709_vm14 }
 0x50f   :  { %8739 = vmatpush1.bf16.msra.mxu1 %v18682_v34  ;;  %6208 = vmatprep.mubr.f32.mxu1 %v18685_v40  ;;  %v18700_v34 = vld [vmem:[#allocation148_spill] sm:$0xff]  ;;  %v4378_v40 = vsel %vm18704_vm13, %v10258_v12, %v10259_v41  ;;  %v10287_v12 = vpop.permute.xlu1 %10286  ;;  %vm18713_vm5 = vmmov %vm18712_vm10  ;;  %v4832_v45 = vsel %vm18714_vm15, %v10293_v8, %v10294_v28 }
 0x510   :  { %8741 = vmatprep.subr.bf16.mxu1 %v8740_v61  ;;  %v10264_v61 = vunpack.i.h.bf16 %v15041_v58  ;;  %v10279_v58 = vunpack.i.h.bf16 %v10277_v62  ;;  %v10288_v2 = vunpack.i.l.bf16 %v10287_v12  ;;  %v4683_v63 = vsel %vm18713_vm5, %v10234_v9, %v10283_v11  ;;  %vm18715_vm7 = vmmov %vm18713_vm5 }
 0x511   :  { %vm18716_vm8 = vmmov %vm18714_vm15 }
 0x512   :  { %6209 = vmatmul.mubr.f32.gmra.mrb[26].mxu1 %v18688_v52  ;;  %v4388_v16 = vsel %vm18702_vm12, %v10263_v29, %v10264_v61  ;;  %v10278_v29 = vunpack.i.l.bf16 %v10277_v62  ;;  %v18707_v52 = vunpack.i.h.bf16 %v14886_v24  ;;  %vm18717_vm6 = vmmov %vm18716_vm8 }
 0x513   :  { %8743 = vmatpush1.bf16.msra.mxu1 %v18691_v49  ;;  %6214 = vmatprep.mubr.f32.mxu1 %v18693_v36  ;;  %v8756_v43 = vpack.c.bf16 %v4388_v16, %v4378_v40  ;;  %v10289_v49 = vunpack.i.h.bf16 %v10287_v12  ;;  %v4831_v13 = vsel %vm18717_vm6, %v10254_v60, %v10293_v8  ;;  %vm18718_vm9 = vmmov %vm18717_vm6  ;;  %v15213_v4 = vpop.permute.xlu1 %5395 }
 0x514   :  { %8745 = vmatprep.subr.bf16.mxu1 %v8744_v42  ;;  %v4526_v42 = vsel %vm18706_vm4, %v10268_v55, %v10269_v44  ;;  %v4535_v32 = vsel %vm18708_vm11, %v18707_v52, %v10273_v23  ;;  %v4674_v36 = vsel %vm18712_vm10, %v10278_v29, %v10279_v58  ;;  %v4673_v5 = vsel %vm18715_vm7, %v10229_v57, %v10278_v29  ;;  %v5581_v57 = vpop.f32.mrb[8].mxu1 }
 0x515   :  { %v8760_v33 = vpack.c.bf16 %v4536_v17, %v4526_v42  ;;  %v8764_v27 = vpack.c.bf16 %v4684_v59, %v4674_v36  ;;  %v8766_v35 = vpack.c.bf16 %v4683_v63, %v4673_v5  ;;  %v4821_v6 = vsel %vm18718_vm9, %v10249_v25, %v10288_v2 }
 0x516   :  { %6215 = vmatmul.mubr.f32.gmra.mrb[28].mxu1 %v18695_v20  ;;  %v8770_v9 = vpack.c.bf16 %v4831_v13, %v4821_v6  ;;  %v15216_v38 = vadd.f32 %v5581_v57, %v15213_v4 }
 0x517   :  { %8747 = vmatpush1.bf16.msra.mxu1 %v18696_v48  ;;  %6220 = vmatprep.mubr.f32.mxu1 %v18698_v15  ;;  %v15248_v41 = vpop.permute.xlu1 %5405 }
 0x518   :  { %8749 = vmatprep.subr.bf16.mxu1 %v8748_v53  ;;  %6356 = vrot.lane.b32.xlu1 %v15216_v38, %s10315_s30 }
 0x51a   :  { %6221 = vmatmul.mubr.f32.gmra.mrb[30].mxu1 %v18700_v34 }
 0x51b   :  { %8751 = vmatpush1.bf16.msra.mxu1 %v18701_v51  ;;  %8048 = vmatprep.mubr.msk.f32.mxu1 %vm5413_vm1, %v18703_v26 }
 0x51c   :  { %8753 = vmatprep.subr.bf16.mxu1 %v8752_v22 }
 0x51f   :  { %8755 = vmatpush1.bf16.msra.mxu1 %v8754_v37  ;;  %v4525_v37 = vsel %vm18711_vm0, %v18710_v56, %v10268_v55 }
 0x520   :  { %8757 = vmatprep.subr.bf16.mxu1 %v8756_v43  ;;  %v8762_v24 = vpack.c.bf16 %v4535_v32, %v4525_v37 }
 0x523   :  { %8759 = vmatpush1.bf16.msra.mxu1 %v8758_v21  ;;  %v4822_v21 = vsel %vm18716_vm8, %v10288_v2, %v10289_v49 }
 0x524   :  { %8761 = vmatprep.subr.bf16.mxu1 %v8760_v33  ;;  %v8768_v46 = vpack.c.bf16 %v4832_v45, %v4822_v21 }
 0x526   :  { %v5759_v20 = vpop.f32.mrb[12].mxu0 }
 0x527   :  { %8763 = vmatpush1.bf16.msra.mxu1 %v8762_v24  ;;  %v15239_v61 = vadd.f32 %v5759_v20, %v15213_v4  ;;  %v5761_v48 = vpop.f32.mrb[13].mxu0 }
 0x528   :  { %8765 = vmatprep.subr.bf16.mxu1 %v8764_v27  ;;  %v15242_v3 = vadd.f32 %v5761_v48, %v15213_v4 }
 0x52b   :  { %8767 = vmatpush1.bf16.msra.mxu1 %v8766_v35  ;;  %v5765_v15 = vpop.f32.mrb[14].mxu0 }
 0x52c   :  { %8769 = vmatprep.subr.bf16.mxu1 %v8768_v46  ;;  %v5767_v18 = vpop.f32.mrb[15].mxu0 }
 0x52f   :  { %8771 = vmatpush1.bf16.msra.mxu1 %v8770_v9 }
 0x530   :  { %v5771_v34 = vpop.f32.mrb[16].mxu0 }
 0x531   :  { %v5773_v23 = vpop.f32.mrb[17].mxu0  ;;  %v15283_v40 = vadd.f32 %v5771_v34, %v15248_v41 }
 0x532   :  { %6292 = vmatmul.mubr.f32.vlgmr.msra.gmra.mrb[24].mxu1 %v14672_v47  ;;  %v5583_v47 = vpop.f32.mrb[9].mxu1  ;;  %v15286_v43 = vadd.f32 %v5773_v23, %v15248_v41 }
 0x533   :  { %8049 = vmatprep.mubr.msk.f32.mxu1 %vm5413_vm1, %v14691_v0  ;;  %v15221_v0 = vpop.permute.xlu0 %5400 }
 0x534   :  { %v15254_v22 = vadd.f32 %v5767_v18, %v15221_v0  ;;  %v15276_v55 = vadd.f32 %v5765_v15, %v15221_v0 }
 0x536   :  { %6298 = vmatmul.mubr.f32.gmra.mrb[26].mxu1 %v14720_v10  ;;  %v5587_v10 = vpop.f32.mrb[10].mxu1 }
 0x537   :  { %8050 = vmatprep.mubr.msk.f32.mxu1 %vm5413_vm1, %v14736_v14  ;;  %v15224_v14 = vadd.f32 %v5583_v47, %v15213_v4  ;;  %v5589_v25 = vpop.f32.mrb[11].mxu1  ;;  %v15260_v7 = vpop.permute.xlu0 %5410 }
 0x538   :  { %v5593_v19 = vpop.f32.mrb[12].mxu1  ;;  %v15234_v60 = vadd.f32 %v5589_v25, %v15221_v0  ;;  %v5777_v26 = vpop.f32.mrb[18].mxu0 }
 0x539   :  { %6358 = vrot.lane.b32.xlu1 %v15224_v14, %s10315_s30  ;;  %v15251_v1 = vadd.f32 %v5593_v19, %v15248_v41  ;;  %v5779_v62 = vpop.f32.mrb[19].mxu0  ;;  %v15293_v30 = vadd.f32 %v5777_v26, %v15260_v7 }
 0x53a   :  { %6304 = vmatmul.mubr.f32.gmra.mrb[28].mxu1 %v18661_v50  ;;  %v5595_v50 = vpop.f32.mrb[13].mxu1  ;;  %v15296_v11 = vadd.f32 %v5779_v62, %v15260_v7 }
 0x53b   :  { %8051 = vmatprep.mubr.msk.f32.mxu1 %vm5413_vm1, %v14781_v39  ;;  %v15227_v39 = vadd.f32 %v5587_v10, %v15221_v0  ;;  %v15263_v51 = vadd.f32 %v5595_v50, %v15248_v41  ;;  %vm18719_vm1 = vcmask 1031168  }
 0x53c   :  { %vm18720_vm12 = vmmov %vm18719_vm1 }
 0x53d   :  { %6376 = vrot.lane.b32.xlu0 %v15227_v39, %s10315_s30  ;;  %6362 = vrot.lane.b32.xlu1 %v15242_v3, %s10315_s30  ;;  %vm18721_vm13 = vmmov %vm18719_vm1 }
 0x53e   :  { %6310 = vmatmul.mubr.f32.gmra.mrb[30].mxu1 %v18669_v54  ;;  %v5599_v54 = vpop.f32.mrb[14].mxu1  ;;  %vm18722_vm2 = vmmov %vm18719_vm1 }
 0x53f   :  { %v5601_v53 = vpop.f32.mrb[15].mxu1  ;;  %v15266_v16 = vadd.f32 %v5599_v54, %v15260_v7  ;;  %vm18723_vm4 = vmmov %vm18719_vm1 }
 0x540   :  { %v15273_v44 = vadd.f32 %v5601_v53, %v15260_v7  ;;  %vm18724_vm11 = vmmov %vm18719_vm1 }
 0x541   :  { %6378 = vrot.lane.b32.xlu0 %v15234_v60, %s10315_s30  ;;  %6396 = vrot.lane.b32.xlu1 %v15251_v1, %s10315_s30  ;;  %vm18725_vm14 = vmmov %vm18719_vm1 }
 0x542   :  { %vm18726_vm0 = vmmov %vm18719_vm1 }
 0x543   :  { %vm18727_vm10 = vmmov %vm18726_vm0 }
 0x544   :  { %vm18728_vm5 = vmmov %vm18726_vm0 }
 0x545   :  { %6360 = vrot.lane.b32.xlu0 %v15239_v61, %s10315_s30  ;;  %6398 = vrot.lane.b32.xlu1 %v15263_v51, %s10315_s30  ;;  %vm18729_vm15 = vmmov %vm18726_vm0 }
 0x546   :  { %vm18731_vm7 = vmmov %vm18726_vm0 }
 0x547   :  { %vm18732_vm8 = vmmov %vm18726_vm0 }
 0x548   :  { %vm18733_vm6 = vmmov %vm18726_vm0 }
 0x549   :  { %6382 = vrot.lane.b32.xlu0 %v15254_v22, %s10315_s30  ;;  %6380 = vrot.lane.b32.xlu1 %v15276_v55, %s10315_s30  ;;  %vm18734_vm9 = vmmov %vm18726_vm0 }
 0x54d   :  { %6416 = vrot.lane.b32.xlu0 %v15266_v16, %s10315_s30  ;;  %6402 = vrot.lane.b32.xlu1 %v15286_v43, %s10315_s30 }
 0x551   :  { %6418 = vrot.lane.b32.xlu0 %v15273_v44, %s10315_s30  ;;  %6420 = vrot.lane.b32.xlu1 %v15293_v30, %s10315_s30 }
 0x555   :  { %6400 = vrot.lane.b32.xlu0 %v15283_v40, %s10315_s30 }
 0x559   :  { %6422 = vrot.lane.b32.xlu0 %v15296_v11, %s10315_s30 }
 0x58a   :  { %v6357_v56 = vpop.permute.xlu1 %6356 }
 0x59c   :  { %v5937_v17 = vpop.f32.mrb[16].mxu1 }
 0x59d   :  { %v15303_v31 = vadd.f32 %v5937_v17, %v15213_v4  ;;  %v5939_v58 = vpop.f32.mrb[17].mxu1 }
 0x59e   :  { %v15306_v29 = vadd.f32 %v5939_v58, %v15213_v4 }
 0x59f   :  { %6364 = vrot.lane.b32.xlu0 %v15303_v31, %s10315_s30 }
 0x5a0   :  { %6366 = vrot.lane.b32.xlu1 %v15306_v29, %s10315_s30 }
 0x5a1   :  { %v5943_v42 = vpop.f32.mrb[18].mxu1 }
 0x5a2   :  { %v15313_v52 = vadd.f32 %v5943_v42, %v15221_v0  ;;  %v5945_v32 = vpop.f32.mrb[19].mxu1 }
 0x5a3   :  { %v15316_v12 = vadd.f32 %v5945_v32, %v15221_v0 }
 0x5a4   :  { %6384 = vrot.lane.b32.xlu1 %v15313_v52, %s10315_s30 }
 0x5a5   :  { %v5949_v33 = vpop.f32.mrb[20].mxu1  ;;  %6386 = vrot.lane.b32.xlu0 %v15316_v12, %s10315_s30 }
 0x5a6   :  { %v5951_v28 = vpop.f32.mrb[21].mxu1  ;;  %v15335_v21 = vadd.f32 %v5949_v33, %v15248_v41 }
 0x5a7   :  { %v15338_v46 = vadd.f32 %v5951_v28, %v15248_v41 }
 0x5a9   :  { %v5955_v8 = vpop.f32.mrb[22].mxu1 }
 0x5aa   :  { %v5957_v59 = vpop.f32.mrb[23].mxu1  ;;  %v15360_v53 = vadd.f32 %v5955_v8, %v15260_v7 }
 0x5ab   :  { %v6359_v49 = vpop.permute.xlu1 %6358  ;;  %v15357_v50 = vadd.f32 %v5957_v59, %v15260_v7 }
 0x5ac   :  { %v6436_v18 = vsel %vm50_vm3, %v6357_v56, %v6359_v49 }
 0x5ad   :  { %v15378_v26 = vmax.f32 %v15216_v38, %v6436_v18 }
 0x5af   :  { %v6377_v37 = vpop.permute.xlu0 %6376  ;;  %v15325_v27 = vpop.permute.xlu1 %6362 }
 0x5b3   :  { %v6379_v2 = vpop.permute.xlu0 %6378  ;;  %v6397_v6 = vpop.permute.xlu1 %6396 }
 0x5b4   :  { %v6445_v32 = vsel %vm50_vm3, %v6377_v37, %v6379_v2 }
 0x5b5   :  { %v15403_v59 = vmax.f32 %v15227_v39, %v6445_v32 }
 0x5b7   :  { %v6361_v5 = vpop.permute.xlu0 %6360  ;;  %v6399_v20 = vpop.permute.xlu1 %6398 }
 0x5b8   :  { %v6437_v58 = vsel %vm50_vm3, %v6359_v49, %v6361_v5  ;;  %v6438_v56 = vsel %vm50_vm3, %v6361_v5, %v15325_v27  ;;  %v6454_v39 = vsel %vm50_vm3, %v6397_v6, %v6399_v20 }
 0x5b9   :  { %v15393_v38 = vmax.f32 %v15224_v14, %v6437_v58 }
 0x5bb   :  { %v15347_v10 = vpop.permute.xlu0 %6382  ;;  %v6381_v23 = vpop.permute.xlu1 %6380 }
 0x5bc   :  { %v6446_v28 = vsel %vm50_vm3, %v6379_v2, %v6381_v23  ;;  %v15416_v2 = vmax.f32 %v15239_v61, %v6438_v56  ;;  %v6447_v61 = vsel %vm50_vm3, %v6381_v23, %v15347_v10 }
 0x5bd   :  { %v15408_v14 = vmax.f32 %v15234_v60, %v6446_v28 }
 0x5bf   :  { %v6417_v48 = vpop.permute.xlu0 %6416  ;;  %v15395_v33 = vpop.permute.xlu1 %6402 }
 0x5c3   :  { %v6419_v62 = vpop.permute.xlu0 %6418  ;;  %v6421_v49 = vpop.permute.xlu1 %6420 }
 0x5c4   :  { %v6464_v60 = vsel %vm50_vm3, %v6419_v62, %v6421_v49 }
 0x5c5   :  { %v15433_v5 = vmax.f32 %v15273_v44, %v6464_v60 }
 0x5c7   :  { %v6401_v8 = vpop.permute.xlu0 %6400 }
 0x5c8   :  { %v6455_v37 = vsel %vm50_vm3, %v6399_v20, %v6401_v8  ;;  %v6456_v44 = vsel %vm50_vm3, %v6401_v8, %v15395_v33 }
 0x5c9   :  { %v15455_v6 = vmax.f32 %v15283_v40, %v6456_v44 }
 0x5d1   :  { %v6115_v24 = vpop.f32.mrb[20].mxu0 }
 0x5d2   :  { %v15323_v36 = vadd.f32 %v6115_v24, %v15213_v4  ;;  %v6117_v63 = vpop.f32.mrb[21].mxu0  ;;  %v15420_v24 = vmax.f32 %v15263_v51, %v6455_v37  ;;  %v15440_v51 = vmax.f32 %v15276_v55, %v6447_v61 }
 0x5d3   :  { %v15328_v45 = vadd.f32 %v6117_v63, %v15213_v4  ;;  %v15428_v63 = vmax.f32 %v15251_v1, %v6454_v39 }
 0x5d4   :  { %6368 = vrot.lane.b32.xlu0 %v15323_v36, %s10315_s30 }
 0x5d5   :  { %v6121_v35 = vpop.f32.mrb[22].mxu0  ;;  %6370 = vrot.lane.b32.xlu1 %v15328_v45, %s10315_s30 }
 0x5d6   :  { %v6123_v13 = vpop.f32.mrb[23].mxu0  ;;  %v15350_v25 = vadd.f32 %v6121_v35, %v15221_v0  ;;  %v6463_v35 = vsel %vm50_vm3, %v6417_v48, %v6419_v62 }
 0x5d7   :  { %v15345_v57 = vadd.f32 %v6123_v13, %v15221_v0  ;;  %v15446_v1 = vmax.f32 %v15266_v16, %v6463_v35  ;;  %v15450_v13 = vpop.permute.xlu0 %6422 }
 0x5d8   :  { %6404 = vrot.lane.b32.xlu0 %v15335_v21, %s10315_s30  ;;  %v6465_v55 = vsel %vm50_vm3, %v6421_v49, %v15450_v13 }
 0x5d9   :  { %v6127_v9 = vpop.f32.mrb[24].mxu0  ;;  %6406 = vrot.lane.b32.xlu1 %v15338_v46, %s10315_s30  ;;  %v15462_v16 = vmax.f32 %v15293_v30, %v6465_v55 }
 0x5da   :  { %v6129_v47 = vpop.f32.mrb[25].mxu0  ;;  %v15367_v15 = vadd.f32 %v6127_v9, %v15248_v41 }
 0x5db   :  { %v15371_v34 = vadd.f32 %v6129_v47, %v15248_v41 }
 0x5dc   :  { %6390 = vrot.lane.b32.xlu0 %v15345_v57, %s10315_s30 }
 0x5dd   :  { %v6133_v19 = vpop.f32.mrb[26].mxu0  ;;  %6388 = vrot.lane.b32.xlu1 %v15350_v25, %s10315_s30 }
 0x5de   :  { %v6135_v54 = vpop.f32.mrb[27].mxu0  ;;  %v15381_v17 = vadd.f32 %v6133_v19, %v15260_v7 }
 0x5df   :  { %v15389_v42 = vadd.f32 %v6135_v54, %v15260_v7 }
 0x5e0   :  { %6426 = vrot.lane.b32.xlu0 %v15357_v50, %s10315_s30 }
 0x5e1   :  { %6424 = vrot.lane.b32.xlu1 %v15360_v53, %s10315_s30 }
 0x5e4   :  { %6408 = vrot.lane.b32.xlu0 %v15367_v15, %s10315_s30 }
 0x5e5   :  { %6410 = vrot.lane.b32.xlu1 %v15371_v34, %s10315_s30 }
 0x5e8   :  { %6592 = vrot.lane.b32.xlu0 %v15378_v26, %s10314_s29 }
 0x5e9   :  { %6428 = vrot.lane.b32.xlu1 %v15381_v17, %s10315_s30 }
 0x5ec   :  { %6430 = vrot.lane.b32.xlu0 %v15389_v42, %s10315_s30 }
 0x5ed   :  { %6594 = vrot.lane.b32.xlu1 %v15393_v38, %s10314_s29 }
 0x5f0   :  { %6612 = vrot.lane.b32.xlu0 %v15403_v59, %s10314_s29 }
 0x5f1   :  { %6614 = vrot.lane.b32.xlu1 %v15408_v14, %s10314_s29 }
 0x5f4   :  { %6596 = vrot.lane.b32.xlu0 %v15416_v2, %s10314_s29 }
 0x5f5   :  { %6634 = vrot.lane.b32.xlu1 %v15420_v24, %s10314_s29 }
 0x5f8   :  { %6632 = vrot.lane.b32.xlu0 %v15428_v63, %s10314_s29 }
 0x5f9   :  { %6654 = vrot.lane.b32.xlu1 %v15433_v5, %s10314_s29 }
 0x5fc   :  { %6616 = vrot.lane.b32.xlu0 %v15440_v51, %s10314_s29 }
 0x600   :  { %6652 = vrot.lane.b32.xlu0 %v15446_v1, %s10314_s29 }
 0x604   :  { %6636 = vrot.lane.b32.xlu0 %v15455_v6, %s10314_s29 }
 0x605   :  { %v6293_v9 = vpop.f32.mrb[24].mxu1 }
 0x606   :  { %v6295_v47 = vpop.f32.mrb[25].mxu1  ;;  %v15470_v40 = vadd.f32 %v6293_v9, %v15213_v4 }
 0x607   :  { %v15465_v19 = vadd.f32 %v6295_v47, %v15213_v4 }
 0x608   :  { %6656 = vrot.lane.b32.xlu0 %v15462_v16, %s10314_s29 }
 0x609   :  { %v6299_v54 = vpop.f32.mrb[26].mxu1  ;;  %6374 = vrot.lane.b32.xlu1 %v15465_v19, %s10315_s30 }
 0x60a   :  { %v15475_v20 = vadd.f32 %v6299_v54, %v15221_v0  ;;  %v6301_v30 = vpop.f32.mrb[27].mxu1 }
 0x60b   :  { %v15480_v48 = vadd.f32 %v6301_v30, %v15221_v0 }
 0x60c   :  { %6372 = vrot.lane.b32.xlu0 %v15470_v40, %s10315_s30 }
 0x60d   :  { %v6305_v18 = vpop.f32.mrb[28].mxu1  ;;  %6392 = vrot.lane.b32.xlu1 %v15475_v20, %s10315_s30 }
 0x60e   :  { %v6307_v4 = vpop.f32.mrb[29].mxu1  ;;  %v15490_v62 = vadd.f32 %v6305_v18, %v15248_v41 }
 0x60f   :  { %v15485_v23 = vadd.f32 %v6307_v4, %v15248_v41 }
 0x610   :  { %6394 = vrot.lane.b32.xlu0 %v15480_v48, %s10315_s30 }
 0x611   :  { %v6311_v58 = vpop.f32.mrb[30].mxu1  ;;  %6414 = vrot.lane.b32.xlu1 %v15485_v23, %s10315_s30  ;;  %v6365_v8 = vpop.permute.xlu0 %6364 }
 0x612   :  { %v15495_v0 = vadd.f32 %v6311_v58, %v15260_v7  ;;  %v6313_v32 = vpop.f32.mrb[31].mxu1  ;;  %v6439_v41 = vsel %vm50_vm3, %v15325_v27, %v6365_v8  ;;  %v6367_v56 = vpop.permute.xlu1 %6366 }
 0x613   :  { %v15500_v28 = vadd.f32 %v6313_v32, %v15260_v7  ;;  %v15509_v37 = vmax.f32 %v15242_v3, %v6439_v41  ;;  %v6440_v49 = vsel %vm50_vm3, %v6365_v8, %v6367_v56 }
 0x614   :  { %6412 = vrot.lane.b32.xlu0 %v15490_v62, %s10315_s30  ;;  %v15513_v39 = vmax.f32 %v15303_v31, %v6440_v49 }
 0x615   :  { %6432 = vrot.lane.b32.xlu1 %v15495_v0, %s10315_s30 }
 0x616   :  { %v6385_v60 = vpop.permute.xlu1 %6384 }
 0x617   :  { %v6387_v7 = vpop.permute.xlu0 %6386  ;;  %v6448_v27 = vsel %vm50_vm3, %v15347_v10, %v6385_v60 }
 0x618   :  { %6434 = vrot.lane.b32.xlu0 %v15500_v28, %s10315_s30  ;;  %v6449_v61 = vsel %vm50_vm3, %v6385_v60, %v6387_v7  ;;  %v15523_v3 = vmax.f32 %v15254_v22, %v6448_v27 }
 0x619   :  { %6598 = vrot.lane.b32.xlu1 %v15509_v37, %s10314_s29  ;;  %v15526_v35 = vmax.f32 %v15313_v52, %v6449_v61 }
 0x61c   :  { %6600 = vrot.lane.b32.xlu0 %v15513_v39, %s10314_s29 }
 0x61d   :  { %6618 = vrot.lane.b32.xlu1 %v15523_v3, %s10314_s29 }
 0x620   :  { %6620 = vrot.lane.b32.xlu0 %v15526_v35, %s10314_s29 }
 0x646   :  { %v6369_v31 = vpop.permute.xlu0 %6368 }
 0x647   :  { %v6441_v44 = vsel %vm50_vm3, %v6367_v56, %v6369_v31  ;;  %v15533_v55 = vpop.permute.xlu1 %6370 }
 0x648   :  { %v15536_v10 = vmax.f32 %v15306_v29, %v6441_v44  ;;  %v6442_v30 = vsel %vm50_vm3, %v6369_v31, %v15533_v55 }
 0x64a   :  { %v6405_v9 = vpop.permute.xlu0 %6404  ;;  %6602 = vrot.lane.b32.xlu1 %v15536_v10, %s10314_s29 }
 0x64b   :  { %v6457_v22 = vsel %vm50_vm3, %v15395_v33, %v6405_v9  ;;  %v6407_v52 = vpop.permute.xlu1 %6406 }
 0x64c   :  { %v15543_v47 = vmax.f32 %v15286_v43, %v6457_v22  ;;  %v6458_v54 = vsel %vm50_vm3, %v6405_v9, %v6407_v52  ;;  %v15558_v43 = vmax.f32 %v15323_v36, %v6442_v30 }
 0x64d   :  { %v15549_v18 = vmax.f32 %v15335_v21, %v6458_v54 }
 0x64e   :  { %v15551_v29 = vpop.permute.xlu0 %6390  ;;  %6638 = vrot.lane.b32.xlu1 %v15543_v47, %s10314_s29 }
 0x64f   :  { %6640 = vrot.lane.b32.xlu0 %v15549_v18, %s10314_s29  ;;  %v6389_v33 = vpop.permute.xlu1 %6388 }
 0x650   :  { %v6450_v4 = vsel %vm50_vm3, %v6387_v7, %v6389_v33  ;;  %v6451_v7 = vsel %vm50_vm3, %v6389_v33, %v15551_v29 }
 0x651   :  { %v15564_v32 = vmax.f32 %v15316_v12, %v6450_v4 }
 0x652   :  { %v6427_v58 = vpop.permute.xlu0 %6426  ;;  %6604 = vrot.lane.b32.xlu1 %v15558_v43, %s10314_s29 }
 0x653   :  { %v6425_v21 = vpop.permute.xlu1 %6424 }
 0x654   :  { %v6467_v8 = vsel %vm50_vm3, %v6425_v21, %v6427_v58  ;;  %v6466_v41 = vsel %vm50_vm3, %v15450_v13, %v6425_v21  ;;  %v15586_v13 = vmax.f32 %v15350_v25, %v6451_v7 }
 0x655   :  { %v15570_v56 = vmax.f32 %v15360_v53, %v6467_v8  ;;  %v15579_v12 = vmax.f32 %v15296_v11, %v6466_v41 }
 0x656   :  { %v6409_v36 = vpop.permute.xlu0 %6408  ;;  %6622 = vrot.lane.b32.xlu1 %v15564_v32, %s10314_s29 }
 0x657   :  { %6660 = vrot.lane.b32.xlu0 %v15570_v56, %s10314_s29  ;;  %v15576_v49 = vpop.permute.xlu1 %6410  ;;  %v6459_v27 = vsel %vm50_vm3, %v6407_v52, %v6409_v36 }
 0x658   :  { %v15594_v31 = vmax.f32 %v15338_v46, %v6459_v27  ;;  %v6460_v44 = vsel %vm50_vm3, %v6409_v36, %v15576_v49 }
 0x659   :  { %v15601_v22 = vmax.f32 %v15367_v15, %v6460_v44 }
 0x65a   :  { %v6593_v60 = vpop.permute.xlu0 %6592  ;;  %6658 = vrot.lane.b32.xlu1 %v15579_v12, %s10314_s29 }
 0x65b   :  { %v6429_v53 = vpop.permute.xlu1 %6428 }
 0x65c   :  { %v6468_v54 = vsel %vm50_vm3, %v6427_v58, %v6429_v53 }
 0x65d   :  { %v15615_v33 = vmax.f32 %v15357_v50, %v6468_v54 }
 0x65e   :  { %v15589_v61 = vpop.permute.xlu0 %6430  ;;  %6624 = vrot.lane.b32.xlu1 %v15586_v13, %s10314_s29 }
 0x65f   :  { %v6595_v11 = vpop.permute.xlu1 %6594  ;;  %v6469_v15 = vsel %vm50_vm3, %v6429_v53, %v15589_v61 }
 0x660   :  { %v6672_v21 = vsel %vm18720_vm12, %v6593_v60, %v6595_v11  ;;  %vm18736_vm12 = vmmov %vm18726_vm0 }
 0x661   :  { %v15632_v41 = vmax.f32 %v15378_v26, %v6672_v21 }
 0x662   :  { %v6613_v9 = vpop.permute.xlu0 %6612  ;;  %6642 = vrot.lane.b32.xlu1 %v15594_v31, %s10314_s29 }
 0x663   :  { %v6615_v25 = vpop.permute.xlu1 %6614 }
 0x664   :  { %v6681_v52 = vsel %vm18719_vm1, %v6613_v9, %v6615_v25  ;;  %vm18735_vm1 = vmmov %vm18726_vm0 }
 0x665   :  { %v15606_v30 = vmax.f32 %v15403_v59, %v6681_v52  ;;  %v15622_v59 = vmax.f32 %v15381_v17, %v6469_v15 }
 0x666   :  { %v15608_v46 = vpop.permute.xlu0 %6596  ;;  %6644 = vrot.lane.b32.xlu1 %v15601_v22, %s10314_s29 }
 0x667   :  { %6848 = vrot.lane.b32.xlu0 %v15606_v30, %s17368_s1  ;;  %v6635_v58 = vpop.permute.xlu1 %6634  ;;  %v6673_v17 = vsel %vm18722_vm2, %v6595_v11, %v15608_v46  ;;  %vm18738_vm2 = vmmov %vm18726_vm0 }
 0x668   :  { %v15645_v27 = vmax.f32 %v15393_v38, %v6673_v17 }
 0x66a   :  { %v6633_v4 = vpop.permute.xlu0 %6632  ;;  %6662 = vrot.lane.b32.xlu1 %v15615_v33, %s10314_s29 }
 0x66b   :  { %v6655_v7 = vpop.permute.xlu1 %6654 }
 0x66e   :  { %v15625_v8 = vpop.permute.xlu0 %6616  ;;  %6664 = vrot.lane.b32.xlu1 %v15622_v59, %s10314_s29 }
 0x66f   :  { %v6682_v50 = vsel %vm18721_vm13, %v6615_v25, %v15625_v8  ;;  %vm18737_vm13 = vmmov %vm18726_vm0 }
 0x670   :  { %v15635_v36 = vmax.f32 %v15408_v14, %v6682_v50  ;;  %v6690_v14 = vsel %vm18724_vm11, %v6633_v4, %v6635_v58  ;;  %vm18740_vm11 = vmmov %vm18726_vm0 }
 0x671   :  { %v15658_v11 = vmax.f32 %v15428_v63, %v6690_v14 }
 0x672   :  { %v6653_v53 = vpop.permute.xlu0 %6652  ;;  %6828 = vrot.lane.b32.xlu1 %v15632_v41, %s17368_s1  ;;  %6850 = vrot.lane.b32.xlu0 %v15635_v36, %s17368_s1 }
 0x673   :  { %v6699_v60 = vsel %vm18723_vm4, %v6653_v53, %v6655_v7  ;;  %vm18739_vm4 = vmmov %vm18726_vm0 }
 0x674   :  { %v15648_v26 = vmax.f32 %v15446_v1, %v6699_v60 }
 0x676   :  { %v15651_v44 = vpop.permute.xlu0 %6636  ;;  %6830 = vrot.lane.b32.xlu1 %v15645_v27, %s17368_s1  ;;  %6888 = vrot.lane.b32.xlu0 %v15648_v26, %s17368_s1 }
 0x677   :  { %v6691_v38 = vsel %vm18725_vm14, %v6635_v58, %v15651_v44  ;;  %vm18741_vm14 = vmmov %vm18726_vm0 }
 0x678   :  { %v15669_v25 = vmax.f32 %v15420_v24, %v6691_v38 }
 0x67a   :  { %v15662_v9 = vpop.permute.xlu0 %6656  ;;  %6868 = vrot.lane.b32.xlu1 %v15658_v11, %s17368_s1 }
 0x67b   :  { %v6700_v1 = vsel %vm18726_vm0, %v6655_v7, %v15662_v9  ;;  %v6375_v54 = vpop.permute.xlu1 %6374 }
 0x67c   :  { %v15672_v52 = vmax.f32 %v15433_v5, %v6700_v1 }
 0x67e   :  { %v6373_v63 = vpop.permute.xlu0 %6372  ;;  %6870 = vrot.lane.b32.xlu1 %v15669_v25, %s17368_s1  ;;  %6890 = vrot.lane.b32.xlu0 %v15672_v52, %s17368_s1 }
 0x67f   :  { %v6443_v15 = vsel %vm50_vm3, %v15533_v55, %v6373_v63  ;;  %v6444_v4 = vsel %vm50_vm3, %v6373_v63, %v6375_v54  ;;  %v6393_v5 = vpop.permute.xlu1 %6392  ;;  %v15693_v55 = vmax.f32 %v15465_v19, %v6375_v54 }
 0x680   :  { %v15682_v58 = vmax.f32 %v15328_v45, %v6443_v15  ;;  %v15685_v24 = vmax.f32 %v15470_v40, %v6444_v4  ;;  %v6452_v40 = vsel %vm50_vm3, %v15551_v29, %v6393_v5 }
 0x681   :  { %v15706_v60 = vmax.f32 %v15345_v57, %v6452_v40 }
 0x682   :  { %v6395_v21 = vpop.permute.xlu0 %6394  ;;  %6606 = vrot.lane.b32.xlu0 %v15682_v58, %s10314_s29  ;;  %6608 = vrot.lane.b32.xlu1 %v15685_v24, %s10314_s29 }
 0x683   :  { %v6453_v50 = vsel %vm50_vm3, %v6393_v5, %v6395_v21  ;;  %v6415_v45 = vpop.permute.xlu1 %6414  ;;  %v15717_v38 = vmax.f32 %v15480_v48, %v6395_v21 }
 0x684   :  { %v15696_v17 = vmax.f32 %v15475_v20, %v6453_v50  ;;  %v15742_v4 = vmax.f32 %v15485_v23, %v6415_v45 }
 0x686   :  { %v6413_v7 = vpop.permute.xlu0 %6412  ;;  %6610 = vrot.lane.b32.xlu0 %v15693_v55, %s10314_s29  ;;  %6628 = vrot.lane.b32.xlu1 %v15696_v17, %s10314_s29 }
 0x687   :  { %v6462_v53 = vsel %vm50_vm3, %v6413_v7, %v6415_v45  ;;  %v6433_v20 = vpop.permute.xlu1 %6432  ;;  %v6461_v57 = vsel %vm50_vm3, %v15576_v49, %v6413_v7 }
 0x688   :  { %v15709_v19 = vmax.f32 %v15490_v62, %v6462_v53  ;;  %v15730_v15 = vmax.f32 %v15371_v34, %v6461_v57  ;;  %v6470_v34 = vsel %vm50_vm3, %v15589_v61, %v6433_v20 }
 0x68a   :  { %v6435_v14 = vpop.permute.xlu0 %6434  ;;  %6626 = vrot.lane.b32.xlu0 %v15706_v60, %s10314_s29  ;;  %6648 = vrot.lane.b32.xlu1 %v15709_v19, %s10314_s29 }
 0x68b   :  { %v6471_v29 = vsel %vm50_vm3, %v6433_v20, %v6435_v14  ;;  %v6599_v62 = vpop.permute.xlu1 %6598  ;;  %v15759_v23 = vmax.f32 %v15500_v28, %v6435_v14  ;;  %vm18730_vm3 = vmmov %vm18726_vm0 }
 0x68c   :  { %v15720_v1 = vmax.f32 %v15495_v0, %v6471_v29 }
 0x68e   :  { %v6601_v54 = vpop.permute.xlu0 %6600  ;;  %6630 = vrot.lane.b32.xlu0 %v15717_v38, %s10314_s29  ;;  %6668 = vrot.lane.b32.xlu1 %v15720_v1, %s10314_s29 }
 0x68f   :  { %v6675_v63 = vsel %vm18727_vm10, %v6599_v62, %v6601_v54  ;;  %v6619_v0 = vpop.permute.xlu1 %6618  ;;  %vm18742_vm10 = vcmask 1014784  }
 0x690   :  { %v15733_v48 = vmax.f32 %v15509_v37, %v6675_v63  ;;  %v6683_v49 = vsel %vm18728_vm5, %v15625_v8, %v6619_v0  ;;  %v15754_v37 = vmax.f32 %v15389_v42, %v6470_v34  ;;  %vm18743_vm5 = vmmov %vm18726_vm0 }
 0x691   :  { %v15745_v5 = vmax.f32 %v15440_v51, %v6683_v49  ;;  %v6674_v51 = vsel %vm18729_vm15, %v15608_v46, %v6599_v62  ;;  %vm18744_vm15 = vmmov %vm18726_vm0 }
 0x692   :  { %6646 = vrot.lane.b32.xlu0 %v15730_v15, %s10314_s29  ;;  %6834 = vrot.lane.b32.xlu1 %v15733_v48, %s17368_s1  ;;  %v6621_v8 = vpop.permute.xlu0 %6620  ;;  %v15766_v61 = vmax.f32 %v15416_v2, %v6674_v51 }
 0x693   :  { %v6684_v21 = vsel %vm18730_vm3, %v6619_v0, %v6621_v8  ;;  %vm18745_vm3 = vmmov %vm18726_vm0 }
 0x694   :  { %v15772_v42 = vmax.f32 %v15523_v3, %v6684_v21 }
 0x696   :  { %6650 = vrot.lane.b32.xlu0 %v15742_v4, %s10314_s29  ;;  %6852 = vrot.lane.b32.xlu1 %v15745_v5, %s17368_s1 }
 0x69a   :  { %6666 = vrot.lane.b32.xlu0 %v15754_v37, %s10314_s29 }
 0x69e   :  { %6670 = vrot.lane.b32.xlu0 %v15759_v23, %s10314_s29 }
 0x6a2   :  { %6832 = vrot.lane.b32.xlu0 %v15766_v61, %s17368_s1 }
 0x6a6   :  { %6854 = vrot.lane.b32.xlu0 %v15772_v42, %s17368_s1 }
 0x6bc   :  { %v6603_v28 = vpop.permute.xlu1 %6602 }
 0x6bd   :  { %v6676_v46 = vsel %vm18731_vm7, %v6601_v54, %v6603_v28  ;;  %vm18746_vm7 = vmmov %vm18726_vm0 }
 0x6be   :  { %v15778_v50 = vmax.f32 %v15513_v39, %v6676_v46 }
 0x6c0   :  { %6836 = vrot.lane.b32.xlu0 %v15778_v50, %s17368_s1  ;;  %v6639_v2 = vpop.permute.xlu1 %6638 }
 0x6c1   :  { %v6692_v45 = vsel %vm18732_vm8, %v15651_v44, %v6639_v2  ;;  %v6641_v3 = vpop.permute.xlu0 %6640  ;;  %vm18747_vm8 = vmmov %vm18726_vm0 }
 0x6c2   :  { %v15785_v40 = vmax.f32 %v15455_v6, %v6692_v45  ;;  %v6693_v20 = vsel %vm18734_vm9, %v6639_v2, %v6641_v3  ;;  %vm18749_vm9 = vmmov %vm18726_vm0 }
 0x6c3   :  { %v15797_v44 = vmax.f32 %v15543_v47, %v6693_v20 }
 0x6c4   :  { %6872 = vrot.lane.b32.xlu0 %v15785_v40, %s17368_s1  ;;  %v6605_v7 = vpop.permute.xlu1 %6604 }
 0x6c5   :  { %v6677_v53 = vsel %vm18733_vm6, %v6603_v28, %v6605_v7  ;;  %vm18748_vm6 = vmmov %vm18726_vm0 }
 0x6c6   :  { %v15791_v39 = vmax.f32 %v15536_v10, %v6677_v53 }
 0x6c8   :  { %6838 = vrot.lane.b32.xlu1 %v15791_v39, %s17368_s1  ;;  %v6623_v14 = vpop.permute.xlu1 %6622 }
 0x6c9   :  { %v6685_v6 = vsel %vm18735_vm1, %v6621_v8, %v6623_v14  ;;  %v6661_v47 = vpop.permute.xlu0 %6660  ;;  %vm18750_vm1 = vmmov %vm18726_vm0 }
 0x6ca   :  { %v15803_v57 = vmax.f32 %v15526_v35, %v6685_v6 }
 0x6cc   :  { %6874 = vrot.lane.b32.xlu1 %v15797_v44, %s17368_s1  ;;  %v6659_v29 = vpop.permute.xlu1 %6658 }
 0x6cd   :  { %v6701_v10 = vsel %vm18736_vm12, %v15662_v9, %v6659_v29  ;;  %v6702_v49 = vsel %vm18738_vm2, %v6659_v29, %v6661_v47  ;;  %vm18751_vm12 = vmmov %vm18726_vm0 }
 0x6ce   :  { %v15811_v63 = vmax.f32 %v15462_v16, %v6701_v10  ;;  %v15822_v9 = vmax.f32 %v15579_v12, %v6702_v49  ;;  %vm18753_vm2 = vmmov %vm18726_vm0 }
 0x6d0   :  { %6856 = vrot.lane.b32.xlu1 %v15803_v57, %s17368_s1  ;;  %v6625_v62 = vpop.permute.xlu1 %6624 }
 0x6d1   :  { %v6686_v54 = vsel %vm18737_vm13, %v6623_v14, %v6625_v62  ;;  %vm18752_vm13 = vmmov %vm18726_vm0 }
 0x6d2   :  { %v15814_v0 = vmax.f32 %v15564_v32, %v6686_v54 }
 0x6d4   :  { %6892 = vrot.lane.b32.xlu1 %v15811_v63, %s17368_s1  ;;  %6858 = vrot.lane.b32.xlu0 %v15814_v0, %s17368_s1  ;;  %v6643_v35 = vpop.permute.xlu1 %6642 }
 0x6d5   :  { %v6694_v34 = vsel %vm18739_vm4, %v6641_v3, %v6643_v35  ;;  %vm18754_vm4 = vmmov %vm18726_vm0 }
 0x6d6   :  { %v15829_v51 = vmax.f32 %v15549_v18, %v6694_v34 }
 0x6d8   :  { %6894 = vrot.lane.b32.xlu0 %v15822_v9, %s17368_s1  ;;  %v6645_v16 = vpop.permute.xlu1 %6644 }
 0x6d9   :  { %v6695_v32 = vsel %vm18740_vm11, %v6643_v35, %v6645_v16  ;;  %vm18755_vm11 = vmmov %vm18742_vm10 }
 0x6da   :  { %v15832_v8 = vmax.f32 %v15594_v31, %v6695_v32  ;;  %v15845_v31 = vpop.permute.xlu0 %6848 }
 0x6dc   :  { %6876 = vrot.lane.b32.xlu0 %v15829_v51, %s17368_s1  ;;  %6878 = vrot.lane.b32.xlu1 %v15832_v8, %s17368_s1  ;;  %v6663_v12 = vpop.permute.xlu1 %6662 }
 0x6dd   :  { %v6703_v21 = vsel %vm18741_vm14, %v6661_v47, %v6663_v12  ;;  %vm18756_vm14 = vmmov %vm18742_vm10 }
 0x6de   :  { %v15840_v28 = vmax.f32 %v15570_v56, %v6703_v21 }
 0x6e0   :  { %6896 = vrot.lane.b32.xlu1 %v15840_v28, %s17368_s1  ;;  %v6665_v18 = vpop.permute.xlu1 %6664 }
 0x6e1   :  { %v6704_v46 = vsel %vm18726_vm0, %v6663_v12, %v6665_v18  ;;  %vm18757_vm0 = vmmov %vm18742_vm10 }
 0x6e2   :  { %v15848_v2 = vmax.f32 %v15615_v33, %v6704_v46 }
 0x6e4   :  { %6898 = vrot.lane.b32.xlu0 %v15848_v2, %s17368_s1  ;;  %v6829_v45 = vpop.permute.xlu1 %6828  ;;  %v15852_v3 = vpop.permute.xlu0 %6850 }
 0x6e8   :  { %v15854_v53 = vpop.permute.xlu1 %6830  ;;  %v15861_v14 = vpop.permute.xlu0 %6888 }
 0x6e9   :  { %v6908_v56 = vsel %vm18742_vm10, %v6829_v45, %v15854_v53  ;;  %vm18758_vm10 = vmmov %vm18757_vm0 }
 0x6ea   :  { %v15859_v20 = vmax.f32 %v15632_v41, %v6908_v56 }
 0x6ec   :  { %7064 = vrot.lane.b32.xlu0 %v15859_v20, %s10321_s15  ;;  %v15865_v33 = vpop.permute.xlu1 %6868 }
 0x6f0   :  { %v15867_v6 = vpop.permute.xlu0 %6890  ;;  %v15869_v29 = vpop.permute.xlu1 %6870 }
 0x6f4   :  { %v6607_v10 = vpop.permute.xlu0 %6606  ;;  %v6609_v49 = vpop.permute.xlu1 %6608 }
 0x6f5   :  { %v6678_v54 = vsel %vm18743_vm5, %v6605_v7, %v6607_v10  ;;  %v6679_v32 = vsel %vm18745_vm3, %v6607_v10, %v6609_v49  ;;  %vm18759_vm5 = vmmov %vm18757_vm0 }
 0x6f6   :  { %v15873_v47 = vmax.f32 %v15558_v43, %v6678_v54  ;;  %v15890_v7 = vmax.f32 %v15682_v58, %v6679_v32  ;;  %vm18761_vm3 = vmmov %vm18757_vm0 }
 0x6f8   :  { %v6611_v41 = vpop.permute.xlu0 %6610  ;;  %6840 = vrot.lane.b32.xlu1 %v15873_v47, %s17368_s1  ;;  %v6629_v46 = vpop.permute.xlu1 %6628 }
 0x6f9   :  { %v6680_v35 = vsel %vm18744_vm15, %v6609_v49, %v6611_v41  ;;  %v15879_v34 = vmax.f32 %v15693_v55, %v6611_v41  ;;  %vm18760_vm15 = vmmov %vm18757_vm0 }
 0x6fa   :  { %v15883_v12 = vmax.f32 %v15685_v24, %v6680_v35 }
 0x6fb   :  { %6846 = vrot.lane.b32.xlu0 %v15879_v34, %s17368_s1 }
 0x6fc   :  { %v6627_v43 = vpop.permute.xlu0 %6626  ;;  %6844 = vrot.lane.b32.xlu1 %v15883_v12, %s17368_s1  ;;  %v6649_v54 = vpop.permute.xlu1 %6648 }
 0x6fd   :  { %v6687_v21 = vsel %vm18746_vm7, %v6625_v62, %v6627_v43  ;;  %v6688_v56 = vsel %vm18747_vm8, %v6627_v43, %v6629_v46  ;;  %vm18762_vm7 = vmmov %vm18757_vm0 }
 0x6fe   :  { %v15896_v24 = vmax.f32 %v15586_v13, %v6687_v21  ;;  %v15908_v62 = vmax.f32 %v15706_v60, %v6688_v56  ;;  %vm18763_vm8 = vmmov %vm18757_vm0 }
 0x6ff   :  { %6842 = vrot.lane.b32.xlu0 %v15890_v7, %s17368_s1 }
 0x700   :  { %v6631_v55 = vpop.permute.xlu0 %6630  ;;  %v6669_v32 = vpop.permute.xlu1 %6668 }
 0x701   :  { %v15899_v45 = vmax.f32 %v15717_v38, %v6631_v55  ;;  %v6689_v10 = vsel %vm18748_vm6, %v6629_v46, %v6631_v55  ;;  %vm18764_vm6 = vmmov %vm18757_vm0 }
 0x702   :  { %v15911_v13 = vmax.f32 %v15696_v17, %v6689_v10 }
 0x703   :  { %6866 = vrot.lane.b32.xlu1 %v15899_v45, %s17368_s1  ;;  %6860 = vrot.lane.b32.xlu0 %v15896_v24, %s17368_s1 }
 0x704   :  { %v6647_v58 = vpop.permute.xlu0 %6646  ;;  %v6835_v46 = vpop.permute.xlu1 %6834 }
 0x705   :  { %v6696_v38 = vsel %vm18749_vm9, %v6645_v16, %v6647_v58  ;;  %v6697_v60 = vsel %vm18750_vm1, %v6647_v58, %v6649_v54  ;;  %vm18765_vm9 = vmmov %vm18757_vm0 }
 0x706   :  { %v15919_v41 = vmax.f32 %v15601_v22, %v6696_v38  ;;  %v15931_v43 = vmax.f32 %v15730_v15, %v6697_v60  ;;  %vm18766_vm1 = vmmov %vm18757_vm0 }
 0x707   :  { %6864 = vrot.lane.b32.xlu0 %v15911_v13, %s17368_s1  ;;  %6862 = vrot.lane.b32.xlu1 %v15908_v62, %s17368_s1 }
 0x708   :  { %v6651_v49 = vpop.permute.xlu0 %6650 }
 0x709   :  { %v15922_v35 = vmax.f32 %v15742_v4, %v6651_v49  ;;  %v6698_v17 = vsel %vm18751_vm12, %v6649_v54, %v6651_v49  ;;  %v6853_v54 = vpop.permute.xlu1 %6852  ;;  %vm18767_vm12 = vmmov %vm18757_vm0 }
 0x70a   :  { %v15934_v22 = vmax.f32 %v15709_v19, %v6698_v17 }
 0x70b   :  { %6886 = vrot.lane.b32.xlu0 %v15922_v35, %s17368_s1  ;;  %6880 = vrot.lane.b32.xlu1 %v15919_v41, %s17368_s1 }
 0x70c   :  { %v6667_v16 = vpop.permute.xlu0 %6666 }
 0x70d   :  { %v6705_v4 = vsel %vm18752_vm13, %v6665_v18, %v6667_v16  ;;  %v6706_v15 = vsel %vm18753_vm2, %v6667_v16, %v6669_v32  ;;  %vm18768_vm13 = vmmov %vm18757_vm0 }
 0x70e   :  { %v15942_v55 = vmax.f32 %v15622_v59, %v6705_v4  ;;  %v15954_v10 = vmax.f32 %v15754_v37, %v6706_v15  ;;  %vm18769_vm2 = vmmov %vm18757_vm0 }
 0x70f   :  { %6884 = vrot.lane.b32.xlu1 %v15934_v22, %s17368_s1  ;;  %6882 = vrot.lane.b32.xlu0 %v15931_v43, %s17368_s1 }
 0x710   :  { %v6671_v21 = vpop.permute.xlu0 %6670 }
 0x711   :  { %v15945_v56 = vmax.f32 %v15759_v23, %v6671_v21  ;;  %v6707_v19 = vsel %vm18754_vm4, %v6669_v32, %v6671_v21  ;;  %v6917_v23 = vsel %vm18755_vm11, %v15845_v31, %v15852_v3  ;;  %v6926_v31 = vsel %vm18757_vm0, %v15865_v33, %v15869_v29  ;;  %vm18770_vm4 = vmmov %vm18757_vm0 }
 0x712   :  { %v15957_v59 = vmax.f32 %v15720_v1, %v6707_v19  ;;  %v15969_v37 = vmax.f32 %v15606_v30, %v6917_v23  ;;  %v15984_v38 = vmax.f32 %v15658_v11, %v6926_v31  ;;  %vm18771_vm11 = vmmov %vm18757_vm0 }
 0x713   :  { %6906 = vrot.lane.b32.xlu1 %v15945_v56, %s17368_s1  ;;  %6900 = vrot.lane.b32.xlu0 %v15942_v55, %s17368_s1 }
 0x714   :  { %v6833_v18 = vpop.permute.xlu0 %6832 }
 0x715   :  { %v6909_v58 = vsel %vm18756_vm14, %v15854_v53, %v6833_v18  ;;  %v6918_v53 = vsel %vm18758_vm10, %v15852_v3, %v6853_v54  ;;  %v6910_v33 = vsel %vm18760_vm15, %v6833_v18, %v6835_v46  ;;  %vm18772_vm14 = vmmov %vm18757_vm0 }
 0x716   :  { %v15972_v1 = vmax.f32 %v15645_v27, %v6909_v58  ;;  %v15987_v30 = vmax.f32 %v15635_v36, %v6918_v53  ;;  %v6935_v27 = vsel %vm18759_vm5, %v15861_v14, %v15867_v6  ;;  %v16003_v36 = vmax.f32 %v15766_v61, %v6910_v33  ;;  %vm18773_vm10 = vmmov %vm18757_vm0 }
 0x717   :  { %6904 = vrot.lane.b32.xlu0 %v15957_v59, %s17368_s1  ;;  %6902 = vrot.lane.b32.xlu1 %v15954_v10, %s17368_s1  ;;  %v15997_v3 = vmax.f32 %v15648_v26, %v6935_v27  ;;  %vm18774_vm5 = vmmov %vm18757_vm0 }
 0x718   :  { %v6855_v11 = vpop.permute.xlu0 %6854  ;;  %vm18775_vm15 = vmmov %vm18757_vm0 }
 0x719   :  { %v6919_v14 = vsel %vm18761_vm3, %v6853_v54, %v6855_v11  ;;  %vm18776_vm3 = vmmov %vm18757_vm0 }
 0x71a   :  { %v16009_v49 = vmax.f32 %v15745_v5, %v6919_v14 }
 0x71b   :  { %7084 = vrot.lane.b32.xlu0 %v15969_v37, %s10321_s15  ;;  %7066 = vrot.lane.b32.xlu1 %v15972_v1, %s10321_s15 }
 0x71f   :  { %7104 = vrot.lane.b32.xlu0 %v15984_v38, %s10321_s15  ;;  %7086 = vrot.lane.b32.xlu1 %v15987_v30, %s10321_s15 }
 0x723   :  { %7124 = vrot.lane.b32.xlu0 %v15997_v3, %s10321_s15 }
 0x727   :  { %7068 = vrot.lane.b32.xlu0 %v16003_v36, %s10321_s15 }
 0x72b   :  { %7088 = vrot.lane.b32.xlu0 %v16009_v49, %s10321_s15 }
 0x732   :  { %v16013_v26 = vpop.permute.xlu0 %6836 }
 0x733   :  { %v6911_v60 = vsel %vm18762_vm7, %v6835_v46, %v16013_v26  ;;  %vm18777_vm7 = vmmov %vm18757_vm0 }
 0x734   :  { %v16018_v17 = vmax.f32 %v15733_v48, %v6911_v60 }
 0x736   :  { %v6873_v61 = vpop.permute.xlu0 %6872  ;;  %7070 = vrot.lane.b32.xlu1 %v16018_v17, %s10321_s15 }
 0x737   :  { %v6927_v32 = vsel %vm18763_vm8, %v15869_v29, %v6873_v61  ;;  %vm18778_vm8 = vmmov %vm18757_vm0 }
 0x738   :  { %v16025_v5 = vmax.f32 %v15669_v25, %v6927_v32 }
 0x73a   :  { %7106 = vrot.lane.b32.xlu1 %v16025_v5, %s10321_s15  ;;  %v16029_v16 = vpop.permute.xlu1 %6838 }
 0x73e   :  { %v6875_v4 = vpop.permute.xlu1 %6874 }
 0x73f   :  { %v6928_v21 = vsel %vm18764_vm6, %v6873_v61, %v6875_v4  ;;  %vm18779_vm6 = vmmov %vm18757_vm0 }
 0x740   :  { %v16033_v48 = vmax.f32 %v15785_v40, %v6928_v21 }
 0x742   :  { %7108 = vrot.lane.b32.xlu0 %v16033_v48, %s10321_s15  ;;  %v16037_v46 = vpop.permute.xlu1 %6856 }
 0x743   :  { %v6920_v25 = vsel %vm18765_vm9, %v6855_v11, %v16037_v46  ;;  %vm18780_vm9 = vmmov %vm18757_vm0 }
 0x744   :  { %v16042_v29 = vmax.f32 %v15772_v42, %v6920_v25 }
 0x746   :  { %v16044_v15 = vpop.permute.xlu0 %6858  ;;  %7090 = vrot.lane.b32.xlu1 %v16042_v29, %s10321_s15  ;;  %v6893_v19 = vpop.permute.xlu1 %6892 }
 0x747   :  { %v6936_v40 = vsel %vm18766_vm1, %v15867_v6, %v6893_v19  ;;  %vm18781_vm1 = vmmov %vm18757_vm0 }
 0x748   :  { %v16051_v18 = vmax.f32 %v15672_v52, %v6936_v40 }
 0x74a   :  { %v6895_v23 = vpop.permute.xlu0 %6894  ;;  %7126 = vrot.lane.b32.xlu1 %v16051_v18, %s10321_s15 }
 0x74b   :  { %v6937_v58 = vsel %vm18767_vm12, %v6893_v19, %v6895_v23  ;;  %vm18783_vm12 = vmmov %vm18757_vm0 }
 0x74c   :  { %v16057_v42 = vmax.f32 %v15811_v63, %v6937_v58 }
 0x74e   :  { %v16059_v54 = vpop.permute.xlu0 %6876  ;;  %7128 = vrot.lane.b32.xlu0 %v16057_v42, %s10321_s15  ;;  %v16063_v31 = vpop.permute.xlu1 %6878 }
 0x74f   :  { %v6929_v52 = vsel %vm18768_vm13, %v6875_v4, %v16059_v54  ;;  %vm18784_vm13 = vmmov %vm18757_vm0 }
 0x750   :  { %v16068_v6 = vmax.f32 %v15797_v44, %v6929_v52 }
 0x752   :  { %7110 = vrot.lane.b32.xlu1 %v16068_v6, %s10321_s15  ;;  %v16072_v53 = vpop.permute.xlu1 %6896 }
 0x753   :  { %v6938_v63 = vsel %vm18769_vm2, %v6895_v23, %v16072_v53  ;;  %vm18785_vm2 = vmmov %vm18757_vm0 }
 0x754   :  { %v16077_v27 = vmax.f32 %v15822_v9, %v6938_v63 }
 0x756   :  { %7130 = vrot.lane.b32.xlu1 %v16077_v27, %s10321_s15  ;;  %v16081_v33 = vpop.permute.xlu0 %6898 }
 0x75e   :  { %v16083_v11 = vpop.permute.xlu0 %7064 }
 0x76a   :  { %v6841_v44 = vpop.permute.xlu1 %6840 }
 0x76b   :  { %v6913_v14 = vsel %vm18770_vm4, %v16029_v16, %v6841_v44  ;;  %vm18786_vm4 = vmmov %vm18757_vm0 }
 0x76c   :  { %v16088_v60 = vmax.f32 %v15791_v39, %v6913_v14 }
 0x76d   :  { %v16090_v61 = vpop.permute.xlu0 %6846 }
 0x76e   :  { %7074 = vrot.lane.b32.xlu0 %v16088_v60, %s10321_s15  ;;  %v6845_v9 = vpop.permute.xlu1 %6844 }
 0x76f   :  { %v6916_v39 = vsel %vm18757_vm0, %v6845_v9, %v16090_v61 }
 0x771   :  { %v6843_v32 = vpop.permute.xlu0 %6842 }
 0x772   :  { %v6914_v4 = vsel %vm18771_vm11, %v6841_v44, %v6843_v32  ;;  %v6915_v21 = vsel %vm18772_vm14, %v6843_v32, %v6845_v9  ;;  %vm18787_vm11 = vmmov %vm18757_vm0 }
 0x773   :  { %v16097_v25 = vmax.f32 %v15873_v47, %v6914_v4  ;;  %v16100_v19 = vmax.f32 %v15890_v7, %v6915_v21  ;;  %v16113_v47 = vmax.f32 %v15883_v12, %v6916_v39  ;;  %vm18788_vm14 = vmmov %vm18757_vm0 }
 0x775   :  { %v6861_v40 = vpop.permute.xlu0 %6860  ;;  %7076 = vrot.lane.b32.xlu1 %v16097_v25, %s10321_s15  ;;  %7078 = vrot.lane.b32.xlu0 %v16100_v19, %s10321_s15  ;;  %v16108_v23 = vpop.permute.xlu1 %6866 }
 0x776   :  { %v6922_v58 = vsel %vm18773_vm10, %v16044_v15, %v6861_v40  ;;  %vm18789_vm10 = vcmask 982016  }
 0x777   :  { %v16116_v7 = vmax.f32 %v15814_v0, %v6922_v58 }
 0x779   :  { %v6865_v52 = vpop.permute.xlu0 %6864  ;;  %7080 = vrot.lane.b32.xlu1 %v16113_v47, %s10321_s15  ;;  %7094 = vrot.lane.b32.xlu0 %v16116_v7, %s10321_s15  ;;  %v6863_v63 = vpop.permute.xlu1 %6862 }
 0x77a   :  { %v6923_v44 = vsel %vm18774_vm5, %v6861_v40, %v6863_v63  ;;  %v6924_v14 = vsel %vm18775_vm15, %v6863_v63, %v6865_v52  ;;  %v6925_v0 = vsel %vm18776_vm3, %v6865_v52, %v16108_v23  ;;  %vm18790_vm5 = vmmov %vm18789_vm10 }
 0x77b   :  { %v16125_v9 = vmax.f32 %v15896_v24, %v6923_v44  ;;  %v16128_v12 = vmax.f32 %v15908_v62, %v6924_v14  ;;  %v16141_v24 = vmax.f32 %v15911_v13, %v6925_v0  ;;  %v7594_v44 = vld [vmem:[%s16924_s6 + $0x88] sm:$0xff]  ;;  %vm18791_vm15 = vmmov %vm18790_vm5 }
 0x77c   :  { %vm18792_vm3 = vmmov %vm18790_vm5 }
 0x77d   :  { %v16132_v32 = vpop.permute.xlu0 %6886  ;;  %7098 = vrot.lane.b32.xlu0 %v16128_v12, %s10321_s15  ;;  %7096 = vrot.lane.b32.xlu1 %v16125_v9, %s10321_s15  ;;  %v6881_v4 = vpop.permute.xlu1 %6880 }
 0x77e   :  { %v6931_v21 = vsel %vm18777_vm7, %v16063_v31, %v6881_v4  ;;  %vm18793_vm7 = vmmov %vm18792_vm3 }
 0x77f   :  { %v16144_v62 = vmax.f32 %v15832_v8, %v6931_v21  ;;  %v7593_v8 = vld [vmem:[%s16924_s6 + $0x80] sm:$0xff] }
 0x780   :  { %v8772_v0 = vpack.c.bf16 %v7594_v44, %v7593_v8  ;;  %v7595_v8 = vld [vmem:[%s16924_s6 + $0x90] sm:$0xff]  ;;  %v7596_v44 = vld [vmem:[%s16924_s6 + $0x98] sm:$0xff] }
 0x781   :  { %v6883_v39 = vpop.permute.xlu0 %6882  ;;  %7100 = vrot.lane.b32.xlu1 %v16141_v24, %s10321_s15  ;;  %7114 = vrot.lane.b32.xlu0 %v16144_v62, %s10321_s15  ;;  %v6885_v40 = vpop.permute.xlu1 %6884 }
 0x782   :  { %v6932_v58 = vsel %vm18778_vm8, %v6881_v4, %v6883_v39  ;;  %v6933_v52 = vsel %vm18779_vm6, %v6883_v39, %v6885_v40  ;;  %v6934_v14 = vsel %vm18780_vm9, %v6885_v40, %v16132_v32  ;;  %8773 = vmatprep.subr.bf16.mxu0 %v8772_v0  ;;  %v7579_v0 = vld [vmem:[%s16924_s6 + $0x10] sm:$0xff]  ;;  %vm18794_vm8 = vmmov %vm18792_vm3 }
 0x783   :  { %v16153_v63 = vmax.f32 %v15919_v41, %v6932_v58  ;;  %v16156_v13 = vmax.f32 %v15931_v43, %v6933_v52  ;;  %v7577_v41 = vld [vmem:[%s16924_s6] sm:$0xff]  ;;  %v7578_v43 = vld [vmem:[%s16924_s6 + $0x8] sm:$0xff]  ;;  %v16181_v58 = vmax.f32 %v15934_v22, %v6934_v14  ;;  %v7580_v22 = vld [vmem:[%s16924_s6 + $0x18] sm:$0xff] }
 0x784   :  { %v8774_v39 = vpack.c.bf16 %v7578_v43, %v7577_v41  ;;  %v8776_v41 = vpack.c.bf16 %v7596_v44, %v7595_v8  ;;  %v8778_v43 = vpack.c.bf16 %v7580_v22, %v7579_v0  ;;  %v7598_v0 = vld [vmem:[%s16924_s6 + $0xa8] sm:$0xff]  ;;  %vm18795_vm6 = vmmov %vm18792_vm3 }
 0x785   :  { %v6901_v4 = vpop.permute.xlu0 %6900  ;;  %7116 = vrot.lane.b32.xlu1 %v16153_v63, %s10321_s15  ;;  %7118 = vrot.lane.b32.xlu0 %v16156_v13, %s10321_s15  ;;  %v16176_v21 = vpop.permute.xlu1 %6906  ;;  %18782 = vst [vmem:[#allocation134_spill] sm:$0xff] %v16181_v58  ;;  %v7582_v22 = vld [vmem:[%s16924_s6 + $0x28] sm:$0xff]  ;;  %vm18796_vm9 = vmmov %vm18792_vm3 }
 0x786   :  { %v6940_v40 = vsel %vm18781_vm1, %v16081_v33, %v6901_v4  ;;  %8775 = vmatpush3.bf16.msra.mxu0 %v8774_v39  ;;  %vm18797_vm1 = vmmov %vm18792_vm3 }
 0x787   :  { %v16184_v52 = vmax.f32 %v15848_v2, %v6940_v40  ;;  %8777 = vmatprep.subr.bf16.mxu0 %v8776_v41 }
 0x789   :  { %v6905_v2 = vpop.permute.xlu0 %6904  ;;  %7120 = vrot.lane.b32.xlu1 %v16181_v58, %s10321_s15  ;;  %7134 = vrot.lane.b32.xlu0 %v16184_v52, %s10321_s15  ;;  %v6903_v14 = vpop.permute.xlu1 %6902  ;;  %v7597_v58 = vld [vmem:[%s16924_s6 + $0xa0] sm:$0xff] }
 0x78a   :  { %v6941_v39 = vsel %vm18783_vm12, %v6901_v4, %v6903_v14  ;;  %v6942_v40 = vsel %vm18784_vm13, %v6903_v14, %v6905_v2  ;;  %8779 = vmatpush3.bf16.msra.mxu0 %v8778_v43  ;;  %v6921_v4 = vsel %vm18785_vm2, %v16037_v46, %v16044_v15  ;;  %v8780_v41 = vpack.c.bf16 %v7598_v0, %v7597_v58  ;;  %v7600_v43 = vld [vmem:[%s16924_s6 + $0xb8] sm:$0xff]  ;;  %vm18798_vm12 = vmmov %vm18797_vm1 }
 0x78b   :  { %v16205_v8 = vmax.f32 %v15942_v55, %v6941_v39  ;;  %v16208_v44 = vmax.f32 %v15954_v10, %v6942_v40  ;;  %v6943_v55 = vsel %vm18786_vm4, %v6905_v2, %v16176_v21  ;;  %v7581_v10 = vld [vmem:[%s16924_s6 + $0x20] sm:$0xff]  ;;  %v16232_v15 = vmax.f32 %v15803_v57, %v6921_v4  ;;  %v7599_v2 = vld [vmem:[%s16924_s6 + $0xb0] sm:$0xff]  ;;  %v7584_v0 = vld [vmem:[%s16924_s6 + $0x38] sm:$0xff] }
 0x78c   :  { %v8782_v46 = vpack.c.bf16 %v7582_v22, %v7581_v10  ;;  %8781 = vmatprep.subr.bf16.mxu0 %v8780_v41  ;;  %v16235_v58 = vmax.f32 %v15957_v59, %v6943_v55  ;;  %v6912_v39 = vsel %vm18787_vm11, %v16013_v26, %v16029_v16  ;;  %v6939_v57 = vsel %vm18788_vm14, %v16072_v53, %v16081_v33  ;;  %v7583_v59 = vld [vmem:[%s16924_s6 + $0x30] sm:$0xff]  ;;  %v7601_v55 = vld [vmem:[%s16924_s6 + $0xc0] sm:$0xff]  ;;  %v7602_v41 = vld [vmem:[%s16924_s6 + $0xc8] sm:$0xff] }
 0x78d   :  { %v7085_v14 = vpop.permute.xlu0 %7084  ;;  %7138 = vrot.lane.b32.xlu0 %v16208_v44, %s10321_s15  ;;  %7136 = vrot.lane.b32.xlu1 %v16205_v8, %s10321_s15  ;;  %v8784_v40 = vpack.c.bf16 %v7600_v43, %v7599_v2  ;;  %v8786_v26 = vpack.c.bf16 %v7584_v0, %v7583_v59  ;;  %v16262_v16 = vmax.f32 %v15778_v50, %v6912_v39  ;;  %v7067_v33 = vpop.permute.xlu1 %7066  ;;  %v7585_v50 = vld [vmem:[%s16924_s6 + $0x40] sm:$0xff]  ;;  %v7603_v43 = vld [vmem:[%s16924_s6 + $0xd0] sm:$0xff]  ;;  %vm18799_vm13 = vmmov %vm18797_vm1 }
 0x78e   :  { %8783 = vmatpush3.bf16.msra.mxu0 %v8782_v46  ;;  %v16265_v53 = vmax.f32 %v15840_v28, %v6939_v57  ;;  %v6930_v10 = vsel %vm18757_vm0, %v16059_v54, %v16063_v31  ;;  %v8788_v22 = vpack.c.bf16 %v7602_v41, %v7601_v55  ;;  %v7586_v28 = vld [vmem:[%s16924_s6 + $0x48] sm:$0xff]  ;;  %v16293_v31 = vmax.f32 %v15899_v45, %v16108_v23  ;;  %v7604_v39 = vld [vmem:[%s16924_s6 + $0xd8] sm:$0xff]  ;;  %v7605_v55 = vld [vmem:[%s16924_s6 + $0xe0] sm:$0xff] }
 0x78f   :  { %8785 = vmatprep.subr.bf16.mxu0 %v8784_v40  ;;  %v8790_v2 = vpack.c.bf16 %v7586_v28, %v7585_v50  ;;  %v16289_v54 = vmax.f32 %v15829_v51, %v6930_v10  ;;  %v8792_v57 = vpack.c.bf16 %v7604_v39, %v7603_v43  ;;  %v7587_v40 = vld [vmem:[%s16924_s6 + $0x50] sm:$0xff]  ;;  %v7588_v51 = vld [vmem:[%s16924_s6 + $0x58] sm:$0xff]  ;;  %v16313_v0 = vmax.f32 %v15879_v34, %v16090_v61  ;;  %v7606_v41 = vld [vmem:[%s16924_s6 + $0xe8] sm:$0xff] }
 0x790   :  { %v8794_v59 = vpack.c.bf16 %v7588_v51, %v7587_v40  ;;  %v7589_v34 = vld [vmem:[%s16924_s6 + $0x60] sm:$0xff]  ;;  %v7607_v28 = vld [vmem:[%s16924_s6 + $0xf0] sm:$0xff]  ;;  %v7144_v43 = vsel %vm18790_vm5, %v16083_v11, %v7067_v33  ;;  %vm18800_vm2 = vmmov %vm18797_vm1 }
 0x791   :  { %v16255_v4 = vpop.permute.xlu0 %7104  ;;  %7092 = vrot.lane.b32.xlu0 %v16232_v15, %s10321_s15  ;;  %7140 = vrot.lane.b32.xlu1 %v16235_v58, %s10321_s15  ;;  %v7087_v45 = vpop.permute.xlu1 %7086  ;;  %v16363_v11 = vmax.f32 %v15859_v20, %v7144_v43  ;;  %v7625_v43 = vld [vmem:[%s16924_s6 + $0x180] sm:$0xff]  ;;  %vm18801_vm4 = vmmov %vm18797_vm1 }
 0x792   :  { %8787 = vmatpush3.bf16.msra.mxu0 %v8786_v26  ;;  %v16317_v26 = vmax.f32 %v15945_v56, %v16176_v21  ;;  %v7153_v10 = vsel %vm18789_vm10, %v7085_v14, %v7087_v45  ;;  %v7590_v56 = vld [vmem:[%s16924_s6 + $0x68] sm:$0xff]  ;;  %v16338_v14 = vmax.f32 %v15922_v35, %v16132_v32  ;;  %v7591_v35 = vld [vmem:[%s16924_s6 + $0x70] sm:$0xff]  ;;  %vm18802_vm11 = vmmov %vm18797_vm1 }
 0x793   :  { %8789 = vmatprep.subr.bf16.mxu0 %v8788_v22  ;;  %v8796_v22 = vpack.c.bf16 %v7606_v41, %v7605_v55  ;;  %v8798_v21 = vpack.c.bf16 %v7590_v56, %v7589_v34  ;;  %v16341_v50 = vmax.f32 %v15969_v37, %v7153_v10  ;;  %v7592_v37 = vld [vmem:[%s16924_s6 + $0x78] sm:$0xff]  ;;  %vm18803_vm14 = vmmov %vm18797_vm1 }
 0x794   :  { %v8802_v32 = vpack.c.bf16 %v7592_v37, %v7591_v35  ;;  %vm18804_vm0 = vmmov %vm18797_vm1 }
 0x795   :  { %v16282_v46 = vpop.permute.xlu0 %7124  ;;  %7132 = vrot.lane.b32.xlu0 %v16265_v53, %s10321_s15  ;;  %7072 = vrot.lane.b32.xlu1 %v16262_v16, %s10321_s15  ;;  %vm18805_vm10 = vmmov %vm18804_vm0 }
 0x796   :  { %8791 = vmatpush3.bf16.msra.mxu0 %v8790_v2  ;;  %v7608_v2 = vld [vmem:[%s16924_s6 + $0xf8] sm:$0xff]  ;;  %vm18806_vm5 = vmmov %vm18804_vm0 }
 0x797   :  { %8793 = vmatprep.subr.bf16.mxu0 %v8792_v57  ;;  %v8800_v57 = vpack.c.bf16 %v7608_v2, %v7607_v28 }
 0x799   :  { %v7069_v23 = vpop.permute.xlu0 %7068  ;;  %7102 = vrot.lane.b32.xlu0 %v16293_v31, %s10321_s15  ;;  %7112 = vrot.lane.b32.xlu1 %v16289_v54, %s10321_s15 }
 0x79a   :  { %8795 = vmatpush3.bf16.msra.mxu0 %v8794_v59  ;;  %v7145_v51 = vsel %vm18792_vm3, %v7067_v33, %v7069_v23  ;;  %vm18808_vm3 = vmmov %vm18804_vm0 }
 0x79b   :  { %8797 = vmatprep.subr.bf16.mxu0 %v8796_v22 }
 0x79d   :  { %v7089_v61 = vpop.permute.xlu0 %7088  ;;  %7142 = vrot.lane.b32.xlu0 %v16317_v26, %s10321_s15  ;;  %7082 = vrot.lane.b32.xlu1 %v16313_v0, %s10321_s15 }
 0x79e   :  { %8799 = vmatpush3.bf16.msra.mxu0 %v8798_v21  ;;  %v7154_v39 = vsel %vm18791_vm15, %v7087_v45, %v7089_v61  ;;  %v16374_v45 = vmax.f32 %v15972_v1, %v7145_v51  ;;  %vm18807_vm15 = vmmov %vm18804_vm0 }
 0x79f   :  { %8801 = vmatprep.subr.bf16.mxu0 %v8800_v57  ;;  %v16366_v40 = vmax.f32 %v15987_v30, %v7154_v39 }
 0x7a1   :  { %7122 = vrot.lane.b32.xlu1 %v16338_v14, %s10321_s15  ;;  %7320 = vrot.lane.b32.xlu0 %v16341_v50, %s10322_s16 }
 0x7a2   :  { %8803 = vmatpush3.bf16.msra.mxu0 %v8802_v32 }
 0x7a5   :  { %7300 = vrot.lane.b32.xlu1 %v16363_v11, %s10322_s16  ;;  %7322 = vrot.lane.b32.xlu0 %v16366_v40, %s10322_s16 }
 0x7a8   :  { %v16376_v59 = vpop.permute.xlu1 %7070 }
 0x7a9   :  { %v7146_v20 = vsel %vm18793_vm7, %v7069_v23, %v16376_v59  ;;  %7302 = vrot.lane.b32.xlu1 %v16374_v45, %s10322_s16  ;;  %vm18809_vm7 = vmmov %vm18804_vm0 }
 0x7aa   :  { %v16383_v30 = vmax.f32 %v16003_v36, %v7146_v20 }
 0x7ac   :  { %7304 = vrot.lane.b32.xlu0 %v16383_v30, %s10322_s16  ;;  %v7107_v33 = vpop.permute.xlu1 %7106 }
 0x7ad   :  { %v7162_v55 = vsel %vm18794_vm8, %v16255_v4, %v7107_v33  ;;  %vm18810_vm8 = vmmov %vm18804_vm0 }
 0x7ae   :  { %v16390_v1 = vmax.f32 %v15984_v38, %v7162_v55 }
 0x7b0   :  { %7340 = vrot.lane.b32.xlu1 %v16390_v1, %s10322_s16 }
 0x7b4   :  { %v7109_v23 = vpop.permute.xlu0 %7108 }
 0x7b5   :  { %v7163_v41 = vsel %vm18795_vm6, %v7107_v33, %v7109_v23  ;;  %vm18811_vm6 = vmmov %vm18804_vm0 }
 0x7b6   :  { %v16396_v10 = vmax.f32 %v16025_v5, %v7163_v41 }
 0x7b8   :  { %7342 = vrot.lane.b32.xlu1 %v16396_v10, %s10322_s16  ;;  %v16400_v36 = vpop.permute.xlu1 %7090 }
 0x7b9   :  { %v7155_v4 = vsel %vm18796_vm9, %v7089_v61, %v16400_v36  ;;  %vm18812_vm9 = vmmov %vm18804_vm0 }
 0x7ba   :  { %v16405_v38 = vmax.f32 %v16009_v49, %v7155_v4 }
 0x7bc   :  { %7324 = vrot.lane.b32.xlu1 %v16405_v38, %s10322_s16  ;;  %v7127_v22 = vpop.permute.xlu1 %7126 }
 0x7bd   :  { %v7171_v34 = vsel %vm18797_vm1, %v16282_v46, %v7127_v22  ;;  %vm18813_vm1 = vmmov %vm18804_vm0 }
 0x7be   :  { %v16412_v5 = vmax.f32 %v15997_v3, %v7171_v34 }
 0x7c0   :  { %v7129_v56 = vpop.permute.xlu0 %7128  ;;  %7360 = vrot.lane.b32.xlu0 %v16412_v5, %s10322_s16 }
 0x7c1   :  { %v7172_v21 = vsel %vm18798_vm12, %v7127_v22, %v7129_v56  ;;  %vm18814_vm12 = vmmov %vm18804_vm0 }
 0x7c2   :  { %v16418_v61 = vmax.f32 %v16051_v18, %v7172_v21 }
 0x7c4   :  { %7362 = vrot.lane.b32.xlu0 %v16418_v61, %s10322_s16  ;;  %v16422_v49 = vpop.permute.xlu1 %7110 }
 0x7c5   :  { %v7164_v46 = vsel %vm18799_vm13, %v7109_v23, %v16422_v49  ;;  %vm18815_vm13 = vmmov %vm18804_vm0 }
 0x7c6   :  { %v16427_v3 = vmax.f32 %v16033_v48, %v7164_v46  ;;  %v7626_v48 = vld [vmem:[%s16924_s6 + $0x188] sm:$0xff] }
 0x7c7   :  { %v8804_v57 = vpack.c.bf16 %v7626_v48, %v7625_v43 }
 0x7c8   :  { %7344 = vrot.lane.b32.xlu0 %v16427_v3, %s10322_s16  ;;  %v16431_v28 = vpop.permute.xlu1 %7130 }
 0x7c9   :  { %v7173_v18 = vsel %vm18800_vm2, %v7129_v56, %v16431_v28  ;;  %8805 = vmatprep.subr.bf16.mxu0 %v8804_v57  ;;  %vm18816_vm2 = vmmov %vm18804_vm0 }
 0x7ca   :  { %v16436_v2 = vmax.f32 %v16057_v42, %v7173_v18 }
 0x7cc   :  { %7364 = vrot.lane.b32.xlu1 %v16436_v2, %s10322_s16 }
 0x7e0   :  { %v7075_v39 = vpop.permute.xlu0 %7074 }
 0x7e7   :  { %v7079_v35 = vpop.permute.xlu0 %7078  ;;  %v7077_v37 = vpop.permute.xlu1 %7076 }
 0x7e8   :  { %v7150_v32 = vsel %vm18801_vm4, %v7077_v37, %v7079_v35  ;;  %v7149_v51 = vsel %vm18802_vm11, %v7075_v39, %v7077_v37  ;;  %vm18817_vm4 = vmmov %vm18804_vm0 }
 0x7e9   :  { %v16448_v42 = vmax.f32 %v16097_v25, %v7150_v32  ;;  %v16458_v23 = vmax.f32 %v16088_v60, %v7149_v51  ;;  %vm18818_vm11 = vmmov %vm18804_vm0 }
 0x7eb   :  { %v7095_v20 = vpop.permute.xlu0 %7094  ;;  %7312 = vrot.lane.b32.xlu1 %v16448_v42, %s10322_s16  ;;  %v16453_v33 = vpop.permute.xlu1 %7080 }
 0x7ec   :  { %v7151_v55 = vsel %vm18803_vm14, %v7079_v35, %v16453_v33  ;;  %vm18819_vm14 = vmmov %vm18804_vm0 }
 0x7ed   :  { %v16461_v41 = vmax.f32 %v16100_v19, %v7151_v55 }
 0x7ef   :  { %v7099_v4 = vpop.permute.xlu0 %7098  ;;  %7310 = vrot.lane.b32.xlu1 %v16458_v23, %s10322_s16  ;;  %7314 = vrot.lane.b32.xlu0 %v16461_v41, %s10322_s16  ;;  %v7097_v25 = vpop.permute.xlu1 %7096 }
 0x7f0   :  { %v7159_v22 = vsel %vm18804_vm0, %v7097_v25, %v7099_v4  ;;  %v7158_v56 = vsel %vm18805_vm10, %v7095_v20, %v7097_v25  ;;  %vm18820_vm10 = vmmov %vm18804_vm0 }
 0x7f1   :  { %v16469_v34 = vmax.f32 %v16125_v9, %v7159_v22  ;;  %v16479_v46 = vmax.f32 %v16116_v7, %v7158_v56 }
 0x7f3   :  { %v7115_v60 = vpop.permute.xlu0 %7114  ;;  %7332 = vrot.lane.b32.xlu0 %v16469_v34, %s10322_s16  ;;  %v16474_v19 = vpop.permute.xlu1 %7100 }
 0x7f4   :  { %v7160_v21 = vsel %vm18806_vm5, %v7099_v4, %v16474_v19  ;;  %vm18821_vm5 = vcmask 973824  }
 0x7f5   :  { %v16482_v18 = vmax.f32 %v16128_v12, %v7160_v21 }
 0x7f7   :  { %v7119_v43 = vpop.permute.xlu0 %7118  ;;  %7330 = vrot.lane.b32.xlu0 %v16479_v46, %s10322_s16  ;;  %7334 = vrot.lane.b32.xlu1 %v16482_v18, %s10322_s16  ;;  %v7117_v9 = vpop.permute.xlu1 %7116 }
 0x7f8   :  { %v7168_v48 = vsel %vm18807_vm15, %v7117_v9, %v7119_v43  ;;  %v7167_v35 = vsel %vm18808_vm3, %v7115_v60, %v7117_v9  ;;  %vm18822_vm15 = vmmov %vm18804_vm0 }
 0x7f9   :  { %v16490_v57 = vmax.f32 %v16153_v63, %v7168_v48  ;;  %v16500_v32 = vmax.f32 %v16144_v62, %v7167_v35  ;;  %vm18823_vm3 = vmmov %vm18821_vm5 }
 0x7fb   :  { %v7135_v7 = vpop.permute.xlu0 %7134  ;;  %7352 = vrot.lane.b32.xlu1 %v16490_v57, %s10322_s16  ;;  %v16495_v12 = vpop.permute.xlu1 %7120 }
 0x7fc   :  { %v7169_v37 = vsel %vm18809_vm7, %v7119_v43, %v16495_v12  ;;  %vm18824_vm7 = vmmov %vm18804_vm0 }
 0x7fd   :  { %v16503_v51 = vmax.f32 %v16156_v13, %v7169_v37 }
 0x7ff   :  { %v7139_v55 = vpop.permute.xlu0 %7138  ;;  %7350 = vrot.lane.b32.xlu1 %v16500_v32, %s10322_s16  ;;  %7354 = vrot.lane.b32.xlu0 %v16503_v51, %s10322_s16  ;;  %v7137_v63 = vpop.permute.xlu1 %7136 }
 0x800   :  { %v7177_v4 = vsel %vm18810_vm8, %v7137_v63, %v7139_v55  ;;  %v7176_v22 = vsel %vm18811_vm6, %v7135_v7, %v7137_v63  ;;  %vm18825_vm8 = vmmov %vm18823_vm3 }
 0x801   :  { %v16511_v25 = vmax.f32 %v16205_v8, %v7177_v4  ;;  %v16521_v21 = vmax.f32 %v16184_v52, %v7176_v22  ;;  %vm18827_vm6 = vmmov %vm18804_vm0 }
 0x803   :  { %v7093_v62 = vpop.permute.xlu0 %7092  ;;  %7372 = vrot.lane.b32.xlu0 %v16511_v25, %s10322_s16  ;;  %v16516_v13 = vpop.permute.xlu1 %7140 }
 0x804   :  { %v7178_v56 = vsel %vm18812_vm9, %v7139_v55, %v16516_v13  ;;  %v7157_v55 = vsel %vm18816_vm2, %v7093_v62, %v7095_v20  ;;  %vm18828_vm9 = vmmov %vm18823_vm3 }
 0x805   :  { %v16524_v43 = vmax.f32 %v16208_v44, %v7178_v56  ;;  %v7156_v44 = vsel %vm18815_vm13, %v16400_v36, %v7093_v62 }
 0x807   :  { %v7133_v9 = vpop.permute.xlu0 %7132  ;;  %7370 = vrot.lane.b32.xlu0 %v16521_v21, %s10322_s16  ;;  %7374 = vrot.lane.b32.xlu1 %v16524_v43, %s10322_s16  ;;  %v7073_v8 = vpop.permute.xlu1 %7072 }
 0x808   :  { %v7147_v48 = vsel %vm18813_vm1, %v16376_v59, %v7073_v8  ;;  %v7148_v35 = vsel %vm18814_vm12, %v7073_v8, %v7075_v39  ;;  %v16547_v39 = vmax.f32 %v16042_v29, %v7156_v44  ;;  %vm18829_vm1 = vmmov %vm18823_vm3 }
 0x809   :  { %v16534_v37 = vmax.f32 %v16018_v17, %v7147_v48  ;;  %v16537_v52 = vmax.f32 %v16262_v16, %v7148_v35  ;;  %v16550_v17 = vmax.f32 %v16232_v15, %v7157_v55  ;;  %v7174_v15 = vsel %vm18819_vm14, %v16431_v28, %v7133_v9  ;;  %vm18830_vm12 = vmmov %vm18829_vm1 }
 0x80a   :  { %v16573_v56 = vmax.f32 %v16077_v27, %v7174_v15  ;;  %vm18831_vm13 = vmmov %vm18829_vm1 }
 0x80b   :  { %v7103_v63 = vpop.permute.xlu0 %7102  ;;  %7308 = vrot.lane.b32.xlu0 %v16537_v52, %s10322_s16  ;;  %7306 = vrot.lane.b32.xlu1 %v16534_v37, %s10322_s16  ;;  %v7113_v59 = vpop.permute.xlu1 %7112  ;;  %vm18832_vm2 = vmmov %vm18829_vm1 }
 0x80c   :  { %v7165_v16 = vsel %vm18817_vm4, %v16422_v49, %v7113_v59  ;;  %v7166_v36 = vsel %vm18818_vm11, %v7113_v59, %v7115_v60  ;;  %v7175_v49 = vsel %vm18804_vm0, %v7133_v9, %v7135_v7  ;;  %v7161_v8 = vsel %vm18822_vm15, %v16474_v19, %v7103_v63  ;;  %v7609_v59 = vld [vmem:[%s16924_s6 + $0x100] sm:$0xff]  ;;  %vm18833_vm4 = vmmov %vm18829_vm1 }
 0x80d   :  { %v16560_v22 = vmax.f32 %v16068_v6, %v7165_v16  ;;  %v16563_v29 = vmax.f32 %v16289_v54, %v7166_v36  ;;  %v16576_v6 = vmax.f32 %v16265_v53, %v7175_v49  ;;  %v7610_v16 = vld [vmem:[%s16924_s6 + $0x108] sm:$0xff]  ;;  %vm18834_vm11 = vmmov %vm18829_vm1 }
 0x80e   :  { %v8806_v15 = vpack.c.bf16 %v7610_v16, %v7609_v59  ;;  %v7614_v59 = vld [vmem:[%s16924_s6 + $0x128] sm:$0xff]  ;;  %vm18835_vm14 = vmmov %vm18829_vm1 }
 0x80f   :  { %v7143_v20 = vpop.permute.xlu0 %7142  ;;  %7328 = vrot.lane.b32.xlu0 %v16550_v17, %s10322_s16  ;;  %7326 = vrot.lane.b32.xlu1 %v16547_v39, %s10322_s16  ;;  %v7083_v4 = vpop.permute.xlu1 %7082  ;;  %vm18836_vm0 = vmmov %vm18829_vm1 }
 0x810   :  { %v7152_v54 = vsel %vm18820_vm10, %v16453_v33, %v7083_v4  ;;  %v16594_v53 = vmax.f32 %v16313_v0, %v7083_v4  ;;  %v16609_v0 = vmax.f32 %v16293_v31, %v7103_v63  ;;  %v7627_v31 = vld [vmem:[%s16924_s6 + $0x190] sm:$0xff]  ;;  %v18826_v63 = vld [vmem:[#allocation134_spill] sm:$0xff]  ;;  %v7179_v49 = vsel %vm18827_vm6, %v16516_v13, %v7143_v20  ;;  %v7630_v13 = vld [vmem:[%s16924_s6 + $0x1a8] sm:$0xff] }
 0x811   :  { %v16591_v27 = vmax.f32 %v16113_v47, %v7152_v54  ;;  %v16606_v47 = vmax.f32 %v16141_v24, %v7161_v8  ;;  %v7611_v54 = vld [vmem:[%s16924_s6 + $0x110] sm:$0xff]  ;;  %vm18837_vm10 = vmmov %vm18836_vm0 }
 0x812   :  { %vm18839_vm15 = vmmov %vm18836_vm0 }
 0x813   :  { %v7321_v60 = vpop.permute.xlu0 %7320  ;;  %7348 = vrot.lane.b32.xlu0 %v16563_v29, %s10322_s16  ;;  %7346 = vrot.lane.b32.xlu1 %v16560_v22, %s10322_s16  ;;  %v7123_v62 = vpop.permute.xlu1 %7122  ;;  %vm18842_vm6 = vmmov %vm18836_vm0 }
 0x814   :  { %v7170_v19 = vsel %vm18824_vm7, %v16495_v12, %v7123_v62  ;;  %v16639_v4 = vmax.f32 %v16338_v14, %v7123_v62  ;;  %v7629_v14 = vld [vmem:[%s16924_s6 + $0x1a0] sm:$0xff]  ;;  %v16660_v62 = vmax.f32 %v16235_v58, %v7179_v49  ;;  %v7631_v58 = vld [vmem:[%s16924_s6 + $0x1b0] sm:$0xff]  ;;  %vm7500_vm7 = vcmask 498688  }
 0x815   :  { %v16636_v36 = vmax.f32 %v18826_v63, %v7170_v19  ;;  %v7613_v19 = vld [vmem:[%s16924_s6 + $0x120] sm:$0xff]  ;;  %v7634_v63 = vld [vmem:[%s16924_s6 + $0x1c8] sm:$0xff] }
 0x817   :  { %v16580_v28 = vpop.permute.xlu0 %7322  ;;  %7368 = vrot.lane.b32.xlu0 %v16576_v6, %s10322_s16  ;;  %7366 = vrot.lane.b32.xlu1 %v16573_v56, %s10322_s16  ;;  %v7301_v7 = vpop.permute.xlu1 %7300 }
 0x818   :  { %v16588_v9 = vsel %vm18821_vm5, %v7321_v60, %v16580_v28  ;;  %vm18838_vm5 = vmmov %vm18836_vm0 }
 0x819   :  { %v7466_v33 = vmax.f32 %v16341_v50, %v16588_v9  ;;  %v7622_v50 = vld [vmem:[%s16924_s6 + $0x168] sm:$0xff] }
 0x81b   :  { %7318 = vrot.lane.b32.xlu0 %v16594_v53, %s10322_s16  ;;  %7316 = vrot.lane.b32.xlu1 %v16591_v27, %s10322_s16  ;;  %v7303_v48 = vpop.permute.xlu1 %7302 }
 0x81c   :  { %v7380_v35 = vsel %vm18823_vm3, %v7301_v7, %v7303_v48  ;;  %v16663_v7 = vmax.f32 %v16317_v26, %v7143_v20  ;;  %v7632_v26 = vld [vmem:[%s16924_s6 + $0x1b8] sm:$0xff]  ;;  %v8814_v20 = vpack.c.bf16 %v7614_v59, %v7613_v19  ;;  %vm18840_vm3 = vmmov %vm18836_vm0 }
 0x81d   :  { %v7456_v44 = vmax.f32 %v16363_v11, %v7380_v35  ;;  %v7628_v11 = vld [vmem:[%s16924_s6 + $0x198] sm:$0xff]  ;;  %v8812_v35 = vpack.c.bf16 %v7630_v13, %v7629_v14  ;;  %v8816_v16 = vpack.c.bf16 %v7632_v26, %v7631_v58  ;;  %v7618_v14 = vld [vmem:[%s16924_s6 + $0x148] sm:$0xff] }
 0x81e   :  { %v16614_v55 = vpop.permute.xlu0 %7304  ;;  %v8808_v60 = vpack.c.bf16 %v7628_v11, %v7627_v31  ;;  %v7616_v31 = vld [vmem:[%s16924_s6 + $0x138] sm:$0xff]  ;;  %v7638_v26 = vld [vmem:[%s16924_s6 + $0x1e8] sm:$0xff] }
 0x81f   :  { %v7381_v24 = vsel %vm18825_vm8, %v7303_v48, %v16614_v55  ;;  %7338 = vrot.lane.b32.xlu0 %v16609_v0, %s10322_s16  ;;  %7336 = vrot.lane.b32.xlu1 %v16606_v47, %s10322_s16  ;;  %v7620_v58 = vld [vmem:[%s16924_s6 + $0x158] sm:$0xff]  ;;  %vm18841_vm8 = vmmov %vm18836_vm0 }
 0x820   :  { %v7457_v12 = vmax.f32 %v16374_v45, %v7381_v24  ;;  %v7612_v45 = vld [vmem:[%s16924_s6 + $0x118] sm:$0xff]  ;;  %v7615_v24 = vld [vmem:[%s16924_s6 + $0x130] sm:$0xff] }
 0x821   :  { %v8810_v8 = vpack.c.bf16 %v7612_v45, %v7611_v54  ;;  %v8818_v49 = vpack.c.bf16 %v7616_v31, %v7615_v24  ;;  %v7617_v45 = vld [vmem:[%s16924_s6 + $0x140] sm:$0xff] }
 0x822   :  { %7748 = vmatprep.mubr.f32.mxu0 %v7457_v12  ;;  %v7341_v48 = vpop.permute.xlu1 %7340  ;;  %v7633_v12 = vld [vmem:[%s16924_s6 + $0x1c0] sm:$0xff] }
 0x823   :  { %7358 = vrot.lane.b32.xlu0 %v16639_v4, %s10322_s16  ;;  %7356 = vrot.lane.b32.xlu1 %v16636_v36, %s10322_s16  ;;  %v8820_v54 = vpack.c.bf16 %v7634_v63, %v7633_v12  ;;  %v7621_v31 = vld [vmem:[%s16924_s6 + $0x160] sm:$0xff] }
 0x824   :  { %7749 = vmatmul.mubr.f32.vlgmr.msra.gmra.mrb[28].mxu0 %v7456_v44  ;;  %v8830_v63 = vpack.c.bf16 %v7622_v50, %v7621_v31 }
 0x825   :  { %8807 = vmatpush3.bf16.msra.mxu0 %v8806_v15 }
 0x826   :  { %8809 = vmatprep.subr.bf16.mxu0 %v8808_v60 }
 0x827   :  { %7378 = vrot.lane.b32.xlu0 %v16663_v7, %s10322_s16  ;;  %7376 = vrot.lane.b32.xlu1 %v16660_v62, %s10322_s16 }
 0x829   :  { %8811 = vmatpush3.bf16.msra.mxu0 %v8810_v8  ;;  %v7636_v8 = vld [vmem:[%s16924_s6 + $0x1d8] sm:$0xff] }
 0x82a   :  { %v7343_v44 = vpop.permute.xlu1 %7342  ;;  %8813 = vmatprep.subr.bf16.mxu0 %v8812_v35  ;;  %v8822_v35 = vpack.c.bf16 %v7618_v14, %v7617_v45  ;;  %v7623_v45 = vld [vmem:[%s16924_s6 + $0x170] sm:$0xff]  ;;  %v7624_v14 = vld [vmem:[%s16924_s6 + $0x178] sm:$0xff] }
 0x82b   :  { %v7398_v11 = vsel %vm18828_vm9, %v7341_v48, %v7343_v44  ;;  %vm18843_vm9 = vmmov %vm18836_vm0 }
 0x82c   :  { %v7476_v15 = vmax.f32 %v16390_v1, %v7398_v11  ;;  %v7635_v1 = vld [vmem:[%s16924_s6 + $0x1d0] sm:$0xff]  ;;  %v7640_v11 = vld [vmem:[%s16924_s6 + $0x1f8] sm:$0xff] }
 0x82d   :  { %8815 = vmatpush3.bf16.msra.mxu0 %v8814_v20  ;;  %v8824_v59 = vpack.c.bf16 %v7636_v8, %v7635_v1  ;;  %v7642_v1 = vld [vmem:[%s16924_s6 + $0x208] sm:$0xff] }
 0x82e   :  { %v16695_v60 = vpop.permute.xlu1 %7324  ;;  %8817 = vmatprep.subr.bf16.mxu0 %v8816_v16 }
 0x82f   :  { %v7390_v13 = vsel %vm18829_vm1, %v16580_v28, %v16695_v60  ;;  %v7619_v28 = vld [vmem:[%s16924_s6 + $0x150] sm:$0xff]  ;;  %vm18844_vm1 = vmmov %vm18836_vm0 }
 0x830   :  { %v7467_v48 = vmax.f32 %v16366_v40, %v7390_v13  ;;  %v7637_v40 = vld [vmem:[%s16924_s6 + $0x1e0] sm:$0xff]  ;;  %v8826_v20 = vpack.c.bf16 %v7620_v58, %v7619_v28 }
 0x831   :  { %8819 = vmatpush3.bf16.msra.mxu0 %v8818_v49  ;;  %v8828_v24 = vpack.c.bf16 %v7638_v26, %v7637_v40 }
 0x832   :  { %v7361_v19 = vpop.permute.xlu0 %7360  ;;  %7753 = vmatprep.mubr.f32.mxu0 %v7467_v48  ;;  %8821 = vmatprep.subr.bf16.mxu0 %v8820_v54  ;;  %v8834_v48 = vpack.c.bf16 %v7624_v14, %v7623_v45 }
 0x833   :  { %7754 = vmatmul.mubr.f32.gmra.mrb[30].mxu0 %v7466_v33  ;;  %v7639_v33 = vld [vmem:[%s16924_s6 + $0x1f0] sm:$0xff] }
 0x834   :  { %v8832_v54 = vpack.c.bf16 %v7640_v11, %v7639_v33 }
 0x835   :  { %8823 = vmatpush3.bf16.msra.mxu0 %v8822_v35 }
 0x836   :  { %v7363_v16 = vpop.permute.xlu0 %7362  ;;  %8825 = vmatprep.subr.bf16.mxu0 %v8824_v59 }
 0x837   :  { %v7407_v9 = vsel %vm18830_vm12, %v7361_v19, %v7363_v16  ;;  %vm18845_vm12 = vmmov %vm18836_vm0 }
 0x838   :  { %v7486_v12 = vmax.f32 %v16412_v5, %v7407_v9  ;;  %v7641_v5 = vld [vmem:[%s16924_s6 + $0x200] sm:$0xff] }
 0x839   :  { %8827 = vmatpush3.bf16.msra.mxu0 %v8826_v20  ;;  %v16761_v19 = vpack.c.bf16 %v7642_v1, %v7641_v5 }
 0x83a   :  { %v16742_v49 = vpop.permute.xlu0 %7344  ;;  %8829 = vmatprep.subr.bf16.mxu0 %v8828_v24 }
 0x83b   :  { %v7399_v13 = vsel %vm18831_vm13, %v7343_v44, %v16742_v49  ;;  %vm18846_vm13 = vmmov %vm18836_vm0 }
 0x83c   :  { %v7477_v8 = vmax.f32 %v16396_v10, %v7399_v13 }
 0x83d   :  { %8831 = vmatpush3.bf16.msra.mxu0 %v8830_v63 }
 0x83e   :  { %v16759_v35 = vpop.permute.xlu1 %7364  ;;  %7758 = vmatprep.mubr.f32.mxu0 %v7477_v8  ;;  %8833 = vmatprep.subr.bf16.mxu0 %v8832_v54 }
 0x83f   :  { %v7408_v44 = vsel %vm18832_vm2, %v7363_v16, %v16759_v35  ;;  %7759 = vmatmul.mubr.f32.gmra.mrb[32].mxu0 %v7476_v15  ;;  %vm18847_vm2 = vmmov %vm18836_vm0 }
 0x840   :  { %v7487_v59 = vmax.f32 %v16418_v61, %v7408_v44 }
 0x841   :  { %8835 = vmatpush3.bf16.msra.mxu0 %v8834_v48 }
 0x842   :  { %7763 = vmatprep.mubr.f32.mxu0 %v7487_v59  ;;  %8837 = vmatprep.subr.bf16.mxu0 %v16761_v19 }
 0x843   :  { %7764 = vmatmul.mubr.f32.gmra.mrb[34].mxu0 %v7486_v12 }
 0x85d   :  { %v7313_v10 = vpop.permute.xlu1 %7312 }
 0x861   :  { %v16767_v28 = vpop.permute.xlu0 %7314  ;;  %v7311_v58 = vpop.permute.xlu1 %7310 }
 0x862   :  { %v7386_v40 = vsel %vm18833_vm4, %v7313_v10, %v16767_v28  ;;  %v7385_v26 = vsel %vm18834_vm11, %v7311_v58, %v7313_v10  ;;  %vm18848_vm4 = vmmov %vm18836_vm0 }
 0x863   :  { %v7462_v20 = vmax.f32 %v16448_v42, %v7386_v40  ;;  %v7461_v15 = vmax.f32 %v16458_v23, %v7385_v26  ;;  %vm18849_vm11 = vmmov %vm18836_vm0 }
 0x865   :  { %v7333_v16 = vpop.permute.xlu0 %7332  ;;  %7768 = vmatprep.mubr.f32.mxu0 %v7462_v20 }
 0x866   :  { %7769 = vmatmul.mubr.f32.gmra.mrb[36].mxu0 %v7461_v15 }
 0x869   :  { %v7331_v61 = vpop.permute.xlu0 %7330  ;;  %v16774_v24 = vpop.permute.xlu1 %7334 }
 0x86a   :  { %v7394_v31 = vsel %vm18835_vm14, %v7331_v61, %v7333_v16  ;;  %v7395_v50 = vsel %vm18836_vm0, %v7333_v16, %v16774_v24  ;;  %vm7680_vm14 = vcmask 1044480   ;;  %vm18850_vm0 = vmmov 1  }
 0x86b   :  { %v7471_v9 = vmax.f32 %v16479_v46, %v7394_v31  ;;  %v7472_v33 = vmax.f32 %v16469_v34, %v7395_v50 }
 0x86d   :  { %v7353_v11 = vpop.permute.xlu1 %7352  ;;  %7773 = vmatprep.mubr.f32.mxu0 %v7472_v33 }
 0x86e   :  { %7774 = vmatmul.mubr.f32.gmra.mrb[38].mxu0 %v7471_v9 }
 0x871   :  { %v16781_v42 = vpop.permute.xlu0 %7354  ;;  %v7351_v23 = vpop.permute.xlu1 %7350 }
 0x872   :  { %v7404_v12 = vsel %vm18837_vm10, %v7353_v11, %v16781_v42  ;;  %v7403_v63 = vsel %vm18838_vm5, %v7351_v23, %v7353_v11  ;;  %vm16839_vm10 = vmpackc.low %vm7680_vm14, %vm18850_vm0 }
 0x873   :  { %v7482_v54 = vmax.f32 %v16490_v57, %v7404_v12  ;;  %v7481_v45 = vmax.f32 %v16500_v32, %v7403_v63  ;;  %v7643_v57 = vld [vmem:[%s16924_s6 + $0x210] sm:$0xff]  ;;  %v7644_v32 = vld [vmem:[%s16924_s6 + $0x218] sm:$0xff]  ;;  %vm18853_vm5 = vmmov %vm18844_vm1 }
 0x874   :  { %v8840_v20 = vpack.c.bf16 %v7644_v32, %v7643_v57 }
 0x875   :  { %v7373_v14 = vpop.permute.xlu0 %7372  ;;  %7778 = vmatprep.mubr.f32.mxu0 %v7482_v54 }
 0x876   :  { %7779 = vmatmul.mubr.f32.gmra.mrb[40].mxu0 %v7481_v45 }
 0x879   :  { %v7371_v46 = vpop.permute.xlu0 %7370  ;;  %v16788_v34 = vpop.permute.xlu1 %7374 }
 0x87a   :  { %v7412_v13 = vsel %vm18839_vm15, %v7371_v46, %v7373_v14  ;;  %v7413_v5 = vsel %vm18840_vm3, %v7373_v14, %v16788_v34  ;;  %vm18854_vm15 = vmmov %vm18844_vm1 }
 0x87b   :  { %v7491_v1 = vmax.f32 %v16521_v21, %v7412_v13  ;;  %v7492_v8 = vmax.f32 %v16511_v25, %v7413_v5  ;;  %vm18855_vm3 = vmmov %vm18844_vm1 }
 0x87d   :  { %v7309_v48 = vpop.permute.xlu0 %7308  ;;  %v7307_v44 = vpop.permute.xlu1 %7306  ;;  %7783 = vmatprep.mubr.f32.mxu0 %v7492_v8 }
 0x87e   :  { %v7384_v59 = vsel %vm18841_vm8, %v7309_v48, %v7311_v58  ;;  %v7382_v10 = vsel %vm18842_vm6, %v16614_v55, %v7307_v44  ;;  %v7383_v21 = vsel %vm18843_vm9, %v7307_v44, %v7309_v48  ;;  %7784 = vmatmul.mubr.f32.gmra.mrb[42].mxu0 %v7491_v1  ;;  %v7645_v58 = vld [vmem:[%s16924_s6 + $0x220] sm:$0xff]  ;;  %v7646_v55 = vld [vmem:[%s16924_s6 + $0x228] sm:$0xff]  ;;  %vm18856_vm8 = vmmov %vm18844_vm1 }
 0x87f   :  { %v7460_v25 = vmax.f32 %v16537_v52, %v7384_v59  ;;  %v7458_v40 = vmax.f32 %v16383_v30, %v7382_v10  ;;  %v7459_v26 = vmax.f32 %v16534_v37, %v7383_v21  ;;  %v8844_v33 = vpack.c.bf16 %v7646_v55, %v7645_v58  ;;  %vm18857_vm6 = vmmov %vm18844_vm1 }
 0x880   :  { %vm18858_vm9 = vmmov %vm18844_vm1 }
 0x881   :  { %7501 = vst.msk [vmem:[#allocation5 + $0x20] sm:$0xff] %vm7500_vm7, %v7460_v25  ;;  %v7329_v15 = vpop.permute.xlu0 %7328  ;;  %v7327_v16 = vpop.permute.xlu1 %7326  ;;  %7853 = vmatprep.mubr.f32.mxu0 %v7459_v26 }
 0x882   :  { %v7393_v52 = vsel %vm18844_vm1, %v7329_v15, %v7331_v61  ;;  %v7391_v30 = vsel %vm18845_vm12, %v16695_v60, %v7327_v16  ;;  %v7392_v37 = vsel %vm18846_vm13, %v7327_v16, %v7329_v15  ;;  %7854 = vmatmul.mubr.f32.vlgmr.msra.gmra.mrb[44].mxu0 %v7458_v40  ;;  %v7647_v60 = vld [vmem:[%s16924_s6 + $0x230] sm:$0xff]  ;;  %vm18859_vm12 = vmmov %vm18844_vm1 }
 0x883   :  { %v7470_v31 = vmax.f32 %v16550_v17, %v7393_v52  ;;  %v7468_v50 = vmax.f32 %v16405_v38, %v7391_v30  ;;  %v7469_v9 = vmax.f32 %v16547_v39, %v7392_v37  ;;  %8839 = vmatpush3.bf16.msra.mxu0 %v16761_v19  ;;  %v7648_v17 = vld [vmem:[%s16924_s6 + $0x238] sm:$0x1f]  ;;  %vm18860_vm13 = vmmov %vm18844_vm1 }
 0x884   :  { %8841 = vmatprep.subr.bf16.mxu0 %v8840_v20  ;;  %v8848_v45 = vpack.c.bf16 %v7648_v17, %v7647_v60 }
 0x885   :  { %7506 = vst.msk [vmem:[#allocation5 + $0x48] sm:$0xff] %vm7500_vm7, %v7470_v31  ;;  %v7349_v11 = vpop.permute.xlu0 %7348  ;;  %v7347_v61 = vpop.permute.xlu1 %7346  ;;  %7858 = vmatprep.mubr.f32.mxu0 %v7469_v9 }
 0x886   :  { %v7402_v38 = vsel %vm18847_vm2, %v7349_v11, %v7351_v23  ;;  %v7400_v39 = vsel %vm18848_vm4, %v16742_v49, %v7347_v61  ;;  %v7401_v19 = vsel %vm18849_vm11, %v7347_v61, %v7349_v11  ;;  %7859 = vmatmul.mubr.f32.gmra.mrb[46].mxu0 %v7468_v50  ;;  %vm18861_vm2 = vmmov %vm18844_vm1 }
 0x887   :  { %v7480_v12 = vmax.f32 %v16563_v29, %v7402_v38  ;;  %v7478_v63 = vmax.f32 %v16427_v3, %v7400_v39  ;;  %v7479_v54 = vmax.f32 %v16560_v22, %v7401_v19  ;;  %8843 = vmatpush3.bf16.msra.mxu0 %v8840_v20  ;;  %vm18862_vm4 = vmmov %vm18844_vm1 }
 0x888   :  { %8845 = vmatprep.subr.bf16.mxu0 %v8844_v33 }
 0x889   :  { %7511 = vst.msk [vmem:[#allocation5 + $0x70] sm:$0xff] %vm7500_vm7, %v7480_v12  ;;  %v7369_v14 = vpop.permute.xlu0 %7368  ;;  %v7367_v23 = vpop.permute.xlu1 %7366  ;;  %7863 = vmatprep.mubr.f32.mxu0 %v7479_v54 }
 0x88a   :  { %v7411_v13 = vsel %vm18853_vm5, %v7369_v14, %v7371_v46  ;;  %v7409_v3 = vsel %vm18854_vm15, %v16759_v35, %v7367_v23  ;;  %v7410_v22 = vsel %vm18855_vm3, %v7367_v23, %v7369_v14  ;;  %7864 = vmatmul.mubr.f32.gmra.mrb[48].mxu0 %v7478_v63 }
 0x88b   :  { %v7490_v29 = vmax.f32 %v16576_v6, %v7411_v13  ;;  %v7488_v5 = vmax.f32 %v16436_v2, %v7409_v3  ;;  %v7489_v1 = vmax.f32 %v16573_v56, %v7410_v22  ;;  %8847 = vmatpush3.bf16.msra.mxu0 %v8844_v33  ;;  %v8052_v22 = vld [vmem:[%s16925_s7] ss:$0 sm:$0xff] }
 0x88c   :  { %8850 = vmatprep.subr.msk.bf16.mxu0 %vm16839_vm10, %v8848_v45 }
 0x88d   :  { %7516 = vst.msk [vmem:[#allocation5 + $0x98] sm:$0xff] %vm7500_vm7, %v7490_v29  ;;  %v7319_v8 = vpop.permute.xlu0 %7318  ;;  %v7317_v46 = vpop.permute.xlu1 %7316  ;;  %7868 = vmatprep.mubr.f32.mxu0 %v7489_v1 }
 0x88e   :  { %v7465_v35 = vmax.f32 %v16594_v53, %v7319_v8  ;;  %v7387_v48 = vsel %vm18856_vm8, %v16767_v28, %v7317_v46  ;;  %v7388_v6 = vsel %vm18857_vm6, %v7317_v46, %v7319_v8  ;;  %7869 = vmatmul.mubr.f32.gmra.mrb[50].mxu0 %v7488_v5 }
 0x88f   :  { %v7463_v2 = vmax.f32 %v16461_v41, %v7387_v48  ;;  %v7464_v56 = vmax.f32 %v16591_v27, %v7388_v6  ;;  %8853 = vmatpush3.bf16.msk.msra.mxu0 %vm16839_vm10, %v8848_v45 }
 0x890   :  { %7521 = vst.msk [vmem:[#allocation5 + $0xc0] sm:$0xff] %vm7500_vm7, %v7465_v35 }
 0x891   :  { %v7339_v44 = vpop.permute.xlu0 %7338  ;;  %v7337_v57 = vpop.permute.xlu1 %7336  ;;  %7873 = vmatprep.mubr.f32.mxu0 %v7464_v56 }
 0x892   :  { %v7475_v53 = vmax.f32 %v16609_v0, %v7339_v44  ;;  %v7396_v28 = vsel %vm18858_vm9, %v16774_v24, %v7337_v57  ;;  %v7397_v32 = vsel %vm18844_vm1, %v7337_v57, %v7339_v44  ;;  %7874 = vmatmul.mubr.f32.gmra.mrb[52].mxu0 %v7463_v2 }
 0x893   :  { %v7473_v41 = vmax.f32 %v16482_v18, %v7396_v28  ;;  %v7474_v27 = vmax.f32 %v16606_v47, %v7397_v32 }
 0x894   :  { %7526 = vst.msk [vmem:[#allocation5 + $0xe8] sm:$0xff] %vm7500_vm7, %v7475_v53 }
 0x895   :  { %v7359_v59 = vpop.permute.xlu0 %7358  ;;  %v7357_v10 = vpop.permute.xlu1 %7356  ;;  %7878 = vmatprep.mubr.f32.mxu0 %v7474_v27 }
 0x896   :  { %v7485_v21 = vmax.f32 %v16639_v4, %v7359_v59  ;;  %v7405_v0 = vsel %vm18859_vm12, %v16781_v42, %v7357_v10  ;;  %v7406_v25 = vsel %vm18860_vm13, %v7357_v10, %v7359_v59  ;;  %7879 = vmatmul.mubr.f32.gmra.mrb[54].mxu0 %v7473_v41 }
 0x897   :  { %v7483_v24 = vmax.f32 %v16503_v51, %v7405_v0  ;;  %v7484_v40 = vmax.f32 %v16636_v36, %v7406_v25  ;;  %v7541_v51 = vld [vmem:[#allocation5 + $0x20] sm:$0xff]  ;;  %v7546_v36 = vld [vmem:[#allocation5 + $0x48] sm:$0xff] }
 0x898   :  { %7531 = vst.msk [vmem:[#allocation5 + $0x110] sm:$0xff] %vm7500_vm7, %v7485_v21  ;;  %v7561_v16 = vld [vmem:[#allocation5 + $0xc0] sm:$0xff] }
 0x899   :  { %v7379_v18 = vpop.permute.xlu0 %7378  ;;  %v7377_v47 = vpop.permute.xlu1 %7376  ;;  %7883 = vmatprep.mubr.f32.mxu0 %v7484_v40 }
 0x89a   :  { %v7495_v26 = vmax.f32 %v16663_v7, %v7379_v18  ;;  %v7414_v4 = vsel %vm18861_vm2, %v16788_v34, %v7377_v47  ;;  %v7415_v20 = vsel %vm18862_vm4, %v7377_v47, %v7379_v18  ;;  %7884 = vmatmul.mubr.f32.gmra.mrb[56].mxu0 %v7483_v24  ;;  %v7551_v7 = vld [vmem:[#allocation5 + $0x70] sm:$0xff]  ;;  %v7556_v34 = vld [vmem:[#allocation5 + $0x98] sm:$0xff] }
 0x89b   :  { %v7493_v42 = vmax.f32 %v16524_v43, %v7414_v4  ;;  %v7494_v15 = vmax.f32 %v16660_v62, %v7415_v20  ;;  %v7566_v43 = vld [vmem:[#allocation5 + $0xe8] sm:$0xff] }
 0x89c   :  { %7536 = vst.msk [vmem:[#allocation5 + $0x138] sm:$0xff] %vm7500_vm7, %v7495_v26 }
 0x89d   :  { %7888 = vmatprep.mubr.f32.mxu0 %v7494_v15 }
 0x89e   :  { %7889 = vmatmul.mubr.f32.gmra.mrb[58].mxu0 %v7493_v42 }
 0x89f   :  { %8210 = vmatprep.mubr.msk.f32.mxu0 %vm7500_vm7, %v7541_v51  ;;  %v7571_v62 = vld [vmem:[#allocation5 + $0x110] sm:$0xff] }
 0x8a2   :  { %8211 = vmatmul.mubr.msk.f32.vlgmr.msra.gmra.mrb[60].mxu0 %vm7500_vm7, %v7546_v36 }
 0x8a3   :  { %8213 = vmatprep.mubr.msk.f32.mxu0 %vm7500_vm7, %v7551_v7  ;;  %v7576_v58 = vld [vmem:[#allocation5 + $0x138] sm:$0xff] }
 0x8a6   :  { %8214 = vmatmul.mubr.msk.f32.gmra.mrb[62].mxu0 %vm7500_vm7, %v7556_v34 }
 0x8a7   :  { %8216 = vmatprep.mubr.msk.f32.mxu0 %vm7500_vm7, %v7561_v16 }
 0x8aa   :  { %8217 = vmatmul.mubr.msk.f32.gmra.mrb[64].mxu0 %vm7500_vm7, %v7566_v43 }
 0x8ab   :  { %8219 = vmatprep.mubr.msk.f32.mxu0 %vm7500_vm7, %v7571_v62 }
 0x8ae   :  { %8220 = vmatmul.mubr.msk.f32.gmra.mrb[66].mxu0 %vm7500_vm7, %v7576_v58 }
 0x8f7   :  { %v8098_v55 = vpop.f32.mrb[28].mxu0 }
 0x8f8   :  { %v8099_v52 = vpop.f32.mrb[29].mxu0 }
 0x8f9   :  { %v8100_v30 = vadd.f32 %v8099_v52, %v8098_v55 }
 0x8fb   :  { %v7751_v1 = vadd.f32 %v8100_v30, %v8052_v22 }
 0x906   :  { %v8101_v37 = vpop.f32.mrb[30].mxu0 }
 0x907   :  { %v8102_v31 = vpop.f32.mrb[31].mxu0 }
 0x908   :  { %v8103_v50 = vadd.f32 %v8102_v31, %v8101_v37 }
 0x90a   :  { %v7756_v6 = vadd.f32 %v8103_v50, %v8052_v22 }
 0x912   :  { %v8104_v9 = vpop.f32.mrb[32].mxu0 }
 0x913   :  { %v8105_v33 = vpop.f32.mrb[33].mxu0 }
 0x914   :  { %v8106_v11 = vadd.f32 %v8105_v33, %v8104_v9 }
 0x916   :  { %v8107_v61 = vpop.f32.mrb[34].mxu0  ;;  %v7761_v53 = vadd.f32 %v8106_v11, %v8052_v22 }
 0x917   :  { %v8108_v60 = vpop.f32.mrb[35].mxu0 }
 0x918   :  { %v8109_v17 = vadd.f32 %v8108_v60, %v8107_v61 }
 0x91a   :  { %v7766_v59 = vadd.f32 %v8109_v17, %v8052_v22 }
 0x939   :  { %v8110_v38 = vpop.f32.mrb[36].mxu0 }
 0x93a   :  { %v8111_v39 = vpop.f32.mrb[37].mxu0 }
 0x93b   :  { %v8112_v19 = vadd.f32 %v8111_v39, %v8110_v38 }
 0x93d   :  { %v7771_v24 = vadd.f32 %v8112_v19, %v8052_v22 }
 0x941   :  { %v8113_v12 = vpop.f32.mrb[38].mxu0 }
 0x942   :  { %v8114_v63 = vpop.f32.mrb[39].mxu0 }
 0x943   :  { %v8115_v54 = vadd.f32 %v8114_v63, %v8113_v12 }
 0x945   :  { %v7776_v4 = vadd.f32 %v8115_v54, %v8052_v22 }
 0x949   :  { %v8116_v45 = vpop.f32.mrb[40].mxu0 }
 0x94a   :  { %v8117_v14 = vpop.f32.mrb[41].mxu0 }
 0x94b   :  { %v8118_v23 = vadd.f32 %v8117_v14, %v8116_v45 }
 0x94d   :  { %v7781_v36 = vadd.f32 %v8118_v23, %v8052_v22 }
 0x951   :  { %v8119_v49 = vpop.f32.mrb[42].mxu0 }
 0x952   :  { %v8120_v13 = vpop.f32.mrb[43].mxu0 }
 0x953   :  { %v8121_v3 = vadd.f32 %v8120_v13, %v8119_v49 }
 0x955   :  { %v8154_v29 = vpop.f32.mrb[44].mxu0  ;;  %v7786_v62 = vadd.f32 %v8121_v3, %v8052_v22 }
 0x956   :  { %v8155_v5 = vpop.f32.mrb[45].mxu0 }
 0x957   :  { %v8156_v8 = vadd.f32 %v8155_v5, %v8154_v29 }
 0x959   :  { %v8157_v46 = vpop.f32.mrb[46].mxu0  ;;  %v7856_v35 = vadd.f32 %v8156_v8, %v7751_v1 }
 0x95a   :  { %v8158_v48 = vpop.f32.mrb[47].mxu0 }
 0x95b   :  { %v8159_v2 = vadd.f32 %v8158_v48, %v8157_v46 }
 0x95d   :  { %v8160_v56 = vpop.f32.mrb[48].mxu0  ;;  %v7861_v44 = vadd.f32 %v8159_v2, %v7756_v6 }
 0x95e   :  { %v8161_v57 = vpop.f32.mrb[49].mxu0 }
 0x95f   :  { %v8162_v28 = vadd.f32 %v8161_v57, %v8160_v56 }
 0x961   :  { %v8163_v32 = vpop.f32.mrb[50].mxu0  ;;  %v7866_v41 = vadd.f32 %v8162_v28, %v7761_v53 }
 0x962   :  { %v8164_v27 = vpop.f32.mrb[51].mxu0 }
 0x963   :  { %v8165_v10 = vadd.f32 %v8164_v27, %v8163_v32 }
 0x965   :  { %v8166_v21 = vpop.f32.mrb[52].mxu0  ;;  %v7871_v0 = vadd.f32 %v8165_v10, %v7766_v59 }
 0x966   :  { %v8167_v25 = vpop.f32.mrb[53].mxu0 }
 0x967   :  { %v8168_v40 = vadd.f32 %v8167_v25, %v8166_v21 }
 0x969   :  { %v8169_v18 = vpop.f32.mrb[54].mxu0  ;;  %v7876_v47 = vadd.f32 %v8168_v40, %v7771_v24 }
 0x96a   :  { %v8170_v26 = vpop.f32.mrb[55].mxu0 }
 0x96b   :  { %v8171_v20 = vadd.f32 %v8170_v26, %v8169_v18 }
 0x96d   :  { %v8172_v42 = vpop.f32.mrb[56].mxu0  ;;  %v7881_v15 = vadd.f32 %v8171_v20, %v7776_v4 }
 0x96e   :  { %v8173_v51 = vpop.f32.mrb[57].mxu0 }
 0x96f   :  { %v8174_v7 = vadd.f32 %v8173_v51, %v8172_v42 }
 0x971   :  { %v8175_v34 = vpop.f32.mrb[58].mxu0  ;;  %v7886_v16 = vadd.f32 %v8174_v7, %v7781_v36 }
 0x972   :  { %v8176_v43 = vpop.f32.mrb[59].mxu0 }
 0x973   :  { %v8177_v58 = vadd.f32 %v8176_v43, %v8175_v34 }
 0x975   :  { %v8212_v55 = vpop.f32.mrb[60].mxu0  ;;  %v7891_v52 = vadd.f32 %v8177_v58, %v7786_v62 }
 0x976   :  { %v7966_v30 = vadd.f32 %v8212_v55, %v7861_v44  ;;  %v7960_v37 = vpop.f32.mrb[61].mxu0 }
 0x977   :  { %v7961_v31 = vadd.f32 %v7960_v37, %v7856_v35 }
 0x978   :  { %8000 = vst [vmem:[%s16926_s8 + $0x8] sm:$0xff] %v7966_v30 }
 0x979   :  { %7999 = vst [vmem:[%s16926_s8] sm:$0xff] %v7961_v31  ;;  %v8215_v50 = vpop.f32.mrb[62].mxu0 }
 0x97a   :  { %v7976_v9 = vadd.f32 %v8215_v50, %v7871_v0  ;;  %v7970_v33 = vpop.f32.mrb[63].mxu0 }
 0x97b   :  { %v7971_v11 = vadd.f32 %v7970_v33, %v7866_v41 }
 0x97c   :  { %8002 = vst [vmem:[%s16926_s8 + $0x18] sm:$0xff] %v7976_v9 }
 0x97d   :  { %8001 = vst [vmem:[%s16926_s8 + $0x10] sm:$0xff] %v7971_v11  ;;  %v8218_v61 = vpop.f32.mrb[64].mxu0 }
 0x97e   :  { %v7986_v60 = vadd.f32 %v8218_v61, %v7881_v15  ;;  %v7980_v17 = vpop.f32.mrb[65].mxu0 }
 0x97f   :  { %v7981_v38 = vadd.f32 %v7980_v17, %v7876_v47 }
 0x980   :  { %8063 = vst [vmem:[%s16926_s8 + $0x28] sm:$0xff] %v7986_v60 }
 0x981   :  { %8062 = vst [vmem:[%s16926_s8 + $0x20] sm:$0xff] %v7981_v38  ;;  %v8221_v39 = vpop.f32.mrb[66].mxu0 }
 0x982   :  { %v7996_v19 = vadd.f32 %v8221_v39, %v7891_v52  ;;  %v7990_v12 = vpop.f32.mrb[67].mxu0 }
 0x983   :  { %v7991_v63 = vadd.f32 %v7990_v12, %v7886_v16 }
 0x984   :  { %8065 = vst [vmem:[%s16926_s8 + $0x38] sm:$0xff] %v7996_v19 }
 0x985   :  { %8064 = vst [vmem:[%s16926_s8 + $0x30] sm:$0xff] %v7991_v63 }

</bundles_post_ra>
